<compile_context>
chip_gen: v6e
topology: v6e:2x2x1
jax: 0.10.0
libtpu: 0.0.40
codegen_flags: <defaults>
</compile_context>

<pallas_src>
import functools
import math
from types import SimpleNamespace

import jax
import jax.numpy as jnp
from jax.experimental import pallas as pl
from jax.experimental.pallas import tpu as pltpu


# ------------------------------ small helpers ------------------------------ #

def _round_up(x, m):
    return (x + m - 1) // m * m


def _pick_rows(h, wp, target_lanes=16384):
    """Largest divisor R of `h` with R*wp <= target_lanes (R >= 1)."""
    r = max(1, min(h, max(1, target_lanes // wp)))
    while h % r:
        r -= 1
    return r


def _vmem_limit_bytes(step_bytes):
    """Always set a scoped-VMEM limit from the per-step footprint (v5e default
    is only 16 MiB) and cap it at ~75% of physical VMEM (64 MiB on v7x)."""
    cap = 48 * 1024 * 1024
    try:
        vc = getattr(pltpu.get_tpu_info(), "vmem_capacity_bytes", None)
        if vc:
            cap = int(0.75 * int(vc))
    except Exception:
        pass
    return int(min(max(int(1.5 * step_bytes), 32 * 1024 * 1024), cap))


def _compiler_params(step_bytes):
    # batch and row-strip steps are independent -> both parallel (megacore).
    return pltpu.CompilerParams(
        dimension_semantics=("parallel", "parallel"),
        vmem_limit_bytes=_vmem_limit_bytes(step_bytes))


# --------------------------- row-strip halo tiling --------------------------- #

def _tile_halo(x_bchw, rows):
    """(B,C,H,W) -> ((B, nt, C, Lin) bf16 tiles, geometry).

    One tile = `rows`+2 rows of the 1px zero-padded image (2 halo rows
    duplicated from the next strip), flattened row-major to one lane-dense
    axis and right-padded so every 3x3 tap window [s, s+Lt) stays in bounds.
    """
    B, C, H, W = x_bchw.shape
    Hp, Wp = H + 2, W + 2
    nt = H // rows
    lt = rows * Wp
    lin = _round_up((rows + 2) * Wp + 2, 128)
    xp = jnp.pad(x_bchw, ((0, 0), (0, 0), (1, 1), (1, 1)))        # (B,C,Hp,Wp)
    ridx = jnp.arange(nt)[:, None] * rows + jnp.arange(rows + 2)[None, :]
    tiles = xp[:, :, ridx, :]                                     # (B,C,nt,R+2,Wp)
    tiles = jnp.moveaxis(tiles, 2, 1).reshape(B, nt, C, (rows + 2) * Wp)
    tiles = jnp.pad(tiles, ((0, 0), (0, 0), (0, 0), (0, lin - (rows + 2) * Wp)))
    taps = tuple(dy * Wp + dx for dy in range(3) for dx in range(3))
    geom = dict(H=H, W=W, Wp=Wp, rows=rows, nt=nt, lt=lt, lin=lin, taps=taps)
    return tiles.astype(jnp.bfloat16), geom


def _untile(y, geom):
    """(B, nt, C, rows*Wp) -> (B, C, H, W): drop the 2 junk columns per row."""
    B, nt, C, _ = y.shape
    y = y.reshape(B, nt, C, geom["rows"], geom["Wp"])
    y = jnp.moveaxis(y, 1, 2).reshape(B, C, geom["H"], geom["Wp"])
    return y[:, :, :, : geom["W"]]


# -------------------------------- kernels ----------------------------------- #

def _conv3x3_kernel(x_ref, w_ref, b_ref, o_ref, *, taps, lt, relu):
    """Fused 3x3 SAME conv on one row strip (single wide-K MXU dot).

    x_ref: (1,1,Cin,Lin) bf16   w_ref: (Cout, 9*Cin) bf16   b_ref: (Cout,1) f32
    o_ref: (1,1,Cout,Lt)
    """
    x = x_ref[0, 0]                                          # (Cin, Lin) bf16
    # Fold the 9 taps into the contraction dim: K = 9*Cin, one dot, no per-tap
    # f32 accumulator read-modify-write.
    slab = jnp.concatenate([x[:, s:s + lt] for s in taps], axis=0)
    acc = jnp.dot(w_ref[...], slab, preferred_element_type=jnp.float32)
    acc = acc + b_ref[...]                                   # bias once
    if relu:
        acc = jnp.maximum(acc, 0.0)
    o_ref[0, 0] = acc.astype(o_ref.dtype)


def _head_kernel(h1_ref, u2_ref, w3_ref, b3_ref, w4_ref, b4_ref, o_ref, *,
                 taps, lt, est_opacity, inverse, inv_scale, out_scale,
                 out_shift):
    """Skip-conv (3x3 over implicit [h1, u2] concat) + ReLU + 1x1 projection
    + sigmoid + depth-range epilogue, one pass per row strip.

    h1_ref: (1,1,c1,Lin) bf16    u2_ref: (1,1,c2,Lin) bf16
    w3_ref: (cmid, 9*(c1+c2)) bf16   b3_ref: (cmid,1) f32
    w4_ref: (n_out, cmid) bf16       b4_ref: (n_out,1) f32
    o_ref : (1,1,n_rows,Lt) f32
    """
    x = jnp.concatenate([h1_ref[0, 0], u2_ref[0, 0]], axis=0)   # (c1+c2, Lin)
    slab = jnp.concatenate([x[:, s:s + lt] for s in taps], axis=0)
    h3 = jnp.dot(w3_ref[...], slab, preferred_element_type=jnp.float32)
    h3 = jnp.maximum(h3 + b3_ref[...], 0.0).astype(jnp.bfloat16)  # (cmid, Lt)
    z = jnp.dot(w4_ref[...], h3,
                preferred_element_type=jnp.float32) + b4_ref[...]  # (n_out, Lt)
    # sigmoid with the divide on the EUP (separate bundle slot)
    act = pl.reciprocal(1.0 + jnp.exp(-z), approx=True)
    depth = act[0:1]                                             # (1, Lt)
    if inverse:
        refine = depth * inv_scale
        pts = pl.reciprocal(jnp.maximum(refine, 0.001), approx=True)
    else:
        pts = depth * out_scale + out_shift
        refine = pts
    # direct per-row stores (no concat temp)
    o_ref[0, 0, 0:1] = pts
    o_ref[0, 0, 1:2] = refine
    if est_opacity:
        o_ref[0, 0, 2:3] = act[1:2]


# ------------------------------ conv wrappers ------------------------------- #

def conv3x3(x_bchw, w9, b, *, relu, out_dtype=jnp.bfloat16, target_lanes=16384):
    """3x3 SAME conv, NCHW in/out.  grid = (batch, row_strip)."""
    B, cin, H, W = x_bchw.shape
    cout = w9.shape[1]
    cin_p = _round_up(cin, 8)               # keep slab concat sublane-aligned
    if cin_p != cin:
        x_bchw = jnp.pad(x_bchw, ((0, 0), (0, cin_p - cin), (0, 0), (0, 0)))
        w9 = jnp.pad(w9, ((0, 0), (0, 0), (0, cin_p - cin)))
    rows = _pick_rows(H, W + 2, target_lanes)
    xt, g = _tile_halo(x_bchw, rows)
    nt, lt, lin, taps = g["nt"], g["lt"], g["lin"], g["taps"]
    wk = (jnp.transpose(w9, (1, 0, 2)).reshape(cout, 9 * cin_p)
          .astype(jnp.bfloat16))
    bk = b.reshape(cout, 1).astype(jnp.float32)
    step = (2 * cin_p * lin * 2            # double-buffered input blocks
            + cin_p * lin * 2              # working copy
            + 9 * cin_p * lt * 2           # K-folded slab
            + cout * lt * 4                # f32 accumulator / epilogue
            + 2 * cout * lt * jnp.dtype(out_dtype).itemsize)
    out = pl.pallas_call(
        functools.partial(_conv3x3_kernel, taps=taps, lt=lt, relu=relu),
        out_shape=jax.ShapeDtypeStruct((B, nt, cout, lt), out_dtype),
        grid=(B, nt),
        in_specs=[
            pl.BlockSpec((1, 1, cin_p, lin), lambda bi, ti: (bi, ti, 0, 0)),
            pl.BlockSpec((cout, 9 * cin_p), lambda bi, ti: (0, 0)),
            pl.BlockSpec((cout, 1), lambda bi, ti: (0, 0)),
        ],
        out_specs=pl.BlockSpec((1, 1, cout, lt), lambda bi, ti: (bi, ti, 0, 0)),
        compiler_params=_compiler_params(step),
    )(xt, wk, bk)
    return _untile(out, g)


def fused_head(h1_bchw, u2_bchw, params, opt, target_lanes=16384):
    """Fused: conv3x3([h1, u2]) -> ReLU -> 1x1 -> sigmoid -> depth epilogue."""
    B, c1, H, W = h1_bchw.shape
    c2 = u2_bchw.shape[1]
    rows = _pick_rows(H, W + 2, target_lanes)
    h1t, g = _tile_halo(h1_bchw, rows)
    u2t, _ = _tile_halo(u2_bchw, rows)
    nt, lt, lin, taps = g["nt"], g["lt"], g["lin"], g["taps"]

    w3h, w3u = params["w3h"], params["w3u"]                 # (9, cmid, c1/c2)
    cmid = w3h.shape[1]
    w3 = jnp.concatenate([w3h, w3u], axis=2)                # (9, cmid, c1+c2)
    w3 = (jnp.transpose(w3, (1, 0, 2)).reshape(cmid, 9 * (c1 + c2))
          .astype(jnp.bfloat16))
    b3 = params["b3"].reshape(cmid, 1).astype(jnp.float32)
    w4 = params["w4"].astype(jnp.bfloat16)                  # (n_out, cmid)
    b4 = params["b4"].reshape(-1, 1).astype(jnp.float32)
    n_out = w4.shape[0]
    n_rows = 3 if opt.est_opacity else 2
    inv_scale = (1.0 / opt.min_z) if opt.normalize_depth else 1.0

    step = (2 * (c1 + c2) * lin * 2        # double-buffered input blocks
            + (c1 + c2) * lin * 2          # concat working copy
            + 9 * (c1 + c2) * lt * 2       # K-folded slab
            + cmid * lt * 6                # h3 f32 + bf16
            + (n_out + n_rows) * lt * 4    # z/act/pts temps
            + 2 * n_rows * lt * 4)         # double-buffered output blocks

    out = pl.pallas_call(
        functools.partial(
            _head_kernel, taps=taps, lt=lt,
            est_opacity=bool(opt.est_opacity),
            inverse=bool(opt.inverse_depth_com),
            inv_scale=float(inv_scale),
            out_scale=float(opt.max_z - opt.min_z),
            out_shift=float(opt.min_z)),
        out_shape=jax.ShapeDtypeStruct((B, nt, n_rows, lt), jnp.float32),
        grid=(B, nt),
        in_specs=[
            pl.BlockSpec((1, 1, c1, lin), lambda bi, ti: (bi, ti, 0, 0)),
            pl.BlockSpec((1, 1, c2, lin), lambda bi, ti: (bi, ti, 0, 0)),
            pl.BlockSpec((cmid, 9 * (c1 + c2)), lambda bi, ti: (0, 0)),
            pl.BlockSpec((cmid, 1), lambda bi, ti: (0, 0)),
            pl.BlockSpec((n_out, cmid), lambda bi, ti: (0, 0)),
            pl.BlockSpec((n_out, 1), lambda bi, ti: (0, 0)),
        ],
        out_specs=pl.BlockSpec((1, 1, n_rows, lt),
                               lambda bi, ti: (bi, ti, 0, 0)),
        compiler_params=_compiler_params(step),
    )(h1t, u2t, w3, b3, w4, b4)
    return _untile(out, g)                 # (B, n_rows, H, W) f32


# ---------------------------- U-Net stand-in glue ---------------------------- #

def avgpool2(x_bchw):
    B, C, H, W = x_bchw.shape
    y = (x_bchw.astype(jnp.float32)
         .reshape(B, C, H // 2, 2, W // 2, 2).mean(axis=(3, 5)))
    return y.astype(jnp.bfloat16)


def upsample2(x_bchw):
    return jnp.repeat(jnp.repeat(x_bchw, 2, axis=2), 2, axis=3)


def init_params(key, channels_in, channels_out, c1=8, c2=16):
    ks = jax.random.split(key, 9)

    def conv_w(k, cout, cin, fan_in):
        return (jax.random.normal(k, (9, cout, cin), jnp.float32)
                / jnp.sqrt(jnp.float32(fan_in)))

    def bvec(k, n):
        return 0.01 * jax.random.normal(k, (n,), jnp.float32)

    return {
        "w1": conv_w(ks[0], c1, channels_in, 9 * channels_in),
        "b1": bvec(ks[1], c1),
        "w2": conv_w(ks[2], c2, c1, 9 * c1),
        "b2": bvec(ks[3], c2),
        # conv3 acts on the implicit (h1, upsampled-h2) concat; stored as two
        # slabs so the fused head accumulates both sources without HBM concat.
        "w3h": conv_w(ks[4], c1, c1, 9 * (c1 + c2)),
        "w3u": conv_w(ks[5], c1, c2, 9 * (c1 + c2)),
        "b3": bvec(ks[6], c1),
        "w4": (jax.random.normal(ks[7], (channels_out, c1), jnp.float32)
               / jnp.sqrt(jnp.float32(c1))),
        "b4": bvec(ks[8], channels_out),
    }


# ------------------------------ Depth_Regressor ------------------------------ #

def depth_regressor_forward(params, depth_input, opt):
    """Mirrors Depth_Regressor.forward (NCHW input)."""
    B, C, H, W = depth_input.shape
    pad = {"Unet": 256, "Unet64": 64, "Unet128": 128}[opt.regressor_model]

    if H % pad == 0 and W % pad == 0:
        x = depth_input
    else:
        padding_H = math.ceil(H / pad) * pad
        padding_W = math.ceil(W / pad) * pad
        padding = max(padding_H, padding_W)
        # F.pad(..., (0, padding-W, 0, padding-H)) == right/bottom zero pad
        x = jnp.pad(depth_input,
                    ((0, 0), (0, 0), (0, padding - H), (0, padding - W)))

    # ----- stand-in 2-level U-Net body (NCHW, bf16 intermediates) -----
    h1 = conv3x3(x, params["w1"], params["b1"], relu=True)     # (B,c1,HP,WP)
    p1 = avgpool2(h1)                                          # (B,c1,HP/2,WP/2)
    h2 = conv3x3(p1, params["w2"], params["b2"], relu=True)    # (B,c2,HP/2,WP/2)
    u2 = upsample2(h2)                                         # (B,c2,HP,WP)
    head = fused_head(h1, u2, params, opt)                     # (B,2+opac,HP,WP)

    head = head[:, :, 0:H, 0:W]                                # crop to input
    regressed_pts = head[:, 0:1]
    refine_depth = jax.lax.stop_gradient(head[:, 1:2])
    opacity = head[:, 2:3] if opt.est_opacity else None
    return regressed_pts, opacity, refine_depth


# ----------------------------------- main ------------------------------------ #

if __name__ == "__main__":
    opt = SimpleNamespace(
        depth_com=True,            # -> channels_in = 4
        est_opacity=True,          # -> channels_out = 2
        regressor_model="Unet64",  # -> pad = 64
        inverse_depth_com=False,
        normalize_depth=False,
        min_z=0.5,
        max_z=10.0,
    )
    channels_in = 4 if opt.depth_com else 3
    channels_out = 2 if opt.est_opacity else 1

    key = jax.random.PRNGKey(0)
    k_in, k_p = jax.random.split(key)

    B, C, H, W = 2, channels_in, 48, 48      # exercises pad-to-64 + crop path
    depth_input = jax.random.normal(k_in, (B, C, H, W), jnp.float32)
    params = init_params(k_p, channels_in, channels_out)

    fwd = jax.jit(lambda p, x: depth_regressor_forward(p, x, opt))
    regressed_pts, opacity, refine_depth = fwd(params, depth_input)
    jax.block_until_ready((regressed_pts, opacity, refine_depth))

    assert regressed_pts.shape == (B, 1, H, W)
    assert refine_depth.shape == (B, 1, H, W)
    assert opacity.shape == (B, 1, H, W)
    # depth lies in [min_z, max_z] after sigmoid + affine (tolerance for the
    # bf16 MXU path and the approx EUP reciprocal in the sigmoid)
    assert float(regressed_pts.min()) >= opt.min_z - 5e-2
    assert float(regressed_pts.max()) <= opt.max_z + 5e-2
    assert float(opacity.min()) >= -1e-2 and float(opacity.max()) <= 1.0 + 1e-2
    # non-inverse mode: refine_depth == regressed_pts (detach only)
    assert float(jnp.max(jnp.abs(refine_depth - regressed_pts))) < 1e-5

    print("KERNEL_OK")
</pallas_src>

<mosaic_0001>
module attributes {stable_mosaic.version = 11 : i64} {
  func.func @_conv3x3_kernel(%arg0: i32, %arg1: i32, %arg2: memref<1x1x8x4480xbf16, #tpu.memory_space<vmem>>, %arg3: memref<8x72xbf16, #tpu.memory_space<vmem>>, %arg4: memref<8x1xf32, #tpu.memory_space<vmem>>, %arg5: memref<1x1x8x4224xbf16, #tpu.memory_space<vmem>>) attributes {dimension_semantics = [#tpu.dimension_semantics<parallel>, #tpu.dimension_semantics<parallel>], iteration_bounds = array<i64: 2, 1>, scalar_prefetch = 0 : i64, scratch_operands = 0 : i64, tpu.core_type = #tpu.core_type<tc>, window_params = [{transform_indices = @transform_0, window_bounds = array<i64: 1, 1, 8, 4480>}, {pipeline_mode = #tpu.pipeline_mode<synchronous>, transform_indices = @transform_1, window_bounds = array<i64: 8, 72>}, {pipeline_mode = #tpu.pipeline_mode<synchronous>, transform_indices = @transform_2, window_bounds = array<i64: 8, 1>}, {transform_indices = @transform_3, window_bounds = array<i64: 1, 1, 8, 4224>}]} {
    %c0 = arith.constant 0 : index
    %c0_0 = arith.constant 0 : index
    %c0_1 = arith.constant 0 : index
    %c0_2 = arith.constant 0 : index
    %0 = vector.load %arg2[%c0, %c0_0, %c0_1, %c0_2] : memref<1x1x8x4480xbf16, #tpu.memory_space<vmem>>, vector<1x1x8x4480xbf16>
    %1 = vector.shape_cast %0 : vector<1x1x8x4480xbf16> to vector<8x4480xbf16>
    %2 = vector.extract_strided_slice %1 {offsets = [0, 0], sizes = [8, 4224], strides = [1, 1]} : vector<8x4480xbf16> to vector<8x4224xbf16>
    %3 = vector.extract_strided_slice %1 {offsets = [0, 1], sizes = [8, 4224], strides = [1, 1]} : vector<8x4480xbf16> to vector<8x4224xbf16>
    %4 = vector.extract_strided_slice %1 {offsets = [0, 2], sizes = [8, 4224], strides = [1, 1]} : vector<8x4480xbf16> to vector<8x4224xbf16>
    %5 = vector.extract_strided_slice %1 {offsets = [0, 66], sizes = [8, 4224], strides = [1, 1]} : vector<8x4480xbf16> to vector<8x4224xbf16>
    %6 = vector.extract_strided_slice %1 {offsets = [0, 67], sizes = [8, 4224], strides = [1, 1]} : vector<8x4480xbf16> to vector<8x4224xbf16>
    %7 = vector.extract_strided_slice %1 {offsets = [0, 68], sizes = [8, 4224], strides = [1, 1]} : vector<8x4480xbf16> to vector<8x4224xbf16>
    %8 = vector.extract_strided_slice %1 {offsets = [0, 132], sizes = [8, 4224], strides = [1, 1]} : vector<8x4480xbf16> to vector<8x4224xbf16>
    %9 = vector.extract_strided_slice %1 {offsets = [0, 133], sizes = [8, 4224], strides = [1, 1]} : vector<8x4480xbf16> to vector<8x4224xbf16>
    %10 = vector.extract_strided_slice %1 {offsets = [0, 134], sizes = [8, 4224], strides = [1, 1]} : vector<8x4480xbf16> to vector<8x4224xbf16>
    %11 = tpu.concatenate %2, %3, %4, %5, %6, %7, %8, %9, %10 in 0 : vector<8x4224xbf16>, vector<8x4224xbf16>, vector<8x4224xbf16>, vector<8x4224xbf16>, vector<8x4224xbf16>, vector<8x4224xbf16>, vector<8x4224xbf16>, vector<8x4224xbf16>, vector<8x4224xbf16> -> vector<72x4224xbf16>
    %c0_3 = arith.constant 0 : index
    %c0_4 = arith.constant 0 : index
    %12 = vector.load %arg3[%c0_3, %c0_4] : memref<8x72xbf16, #tpu.memory_space<vmem>>, vector<8x72xbf16>
    %cst = arith.constant dense<0.000000e+00> : vector<8x4224xf32>
    %13 = tpu.matmul %12, %11, %cst {dimension_numbers = #tpu.dot_dimension_numbers<[1], [0], [0], [1], [0, 0, 1, 1], [], []>} : vector<8x72xbf16>, vector<72x4224xbf16>, vector<8x4224xf32> -> vector<8x4224xf32>
    %c0_5 = arith.constant 0 : index
    %c0_6 = arith.constant 0 : index
    %14 = vector.load %arg4[%c0_5, %c0_6] : memref<8x1xf32, #tpu.memory_space<vmem>>, vector<8x1xf32>
    %15 = vector.broadcast %14 : vector<8x1xf32> to vector<8x4224xf32>
    %16 = arith.addf %13, %15 : vector<8x4224xf32>
    %cst_7 = arith.constant 0.000000e+00 : f32
    %17 = vector.broadcast %cst_7 : f32 to vector<8x4224xf32>
    %18 = arith.maximumf %16, %17 : vector<8x4224xf32>
    %19 = arith.truncf %18 : vector<8x4224xf32> to vector<8x4224xbf16>
    %c0_8 = arith.constant 0 : index
    %c0_9 = arith.constant 0 : index
    %c0_10 = arith.constant 0 : index
    %c0_11 = arith.constant 0 : index
    %20 = vector.load %arg5[%c0_8, %c0_9, %c0_10, %c0_11] : memref<1x1x8x4224xbf16, #tpu.memory_space<vmem>>, vector<1x1x8x4224xbf16>
    %21 = vector.shape_cast %20 : vector<1x1x8x4224xbf16> to vector<8x4224xbf16>
    %22 = vector.shape_cast %19 : vector<8x4224xbf16> to vector<1x1x8x4224xbf16>
    tpu.vector_store %arg5[%c0_8, %c0_9, %c0_10, %c0_11], %22 {strides = array<i32>} : memref<1x1x8x4224xbf16, #tpu.memory_space<vmem>>, vector<1x1x8x4224xbf16>,
    return
  }
  func.func @transform_0(%arg0: i32, %arg1: i32) -> (i32, i32, i32, i32) {
    %c0_i32 = arith.constant 0 : i32
    %c0_i32_0 = arith.constant 0 : i32
    %c0_i32_1 = arith.constant 0 : i32
    return %arg0, %arg1, %c0_i32, %c0_i32_0 : i32, i32, i32, i32
  }
  func.func @transform_1(%arg0: i32, %arg1: i32) -> (i32, i32) {
    %c0_i32 = arith.constant 0 : i32
    %c0_i32_0 = arith.constant 0 : i32
    %c0_i32_1 = arith.constant 0 : i32
    return %c0_i32, %c0_i32_0 : i32, i32
  }
  func.func @transform_2(%arg0: i32, %arg1: i32) -> (i32, i32) {
    %c0_i32 = arith.constant 0 : i32
    %c0_i32_0 = arith.constant 0 : i32
    %c0_i32_1 = arith.constant 0 : i32
    return %c0_i32, %c0_i32_0 : i32, i32
  }
  func.func @transform_3(%arg0: i32, %arg1: i32) -> (i32, i32, i32, i32) {
    %c0_i32 = arith.constant 0 : i32
    %c0_i32_0 = arith.constant 0 : i32
    %c0_i32_1 = arith.constant 0 : i32
    return %arg0, %arg1, %c0_i32, %c0_i32_0 : i32, i32, i32, i32
  }
}

module attributes {stable_mosaic.version = 11 : i64} {
  func.func @_conv3x3_kernel(%arg0: i32, %arg1: i32, %arg2: memref<1x1x8x1280xbf16, #tpu.memory_space<vmem>>, %arg3: memref<16x72xbf16, #tpu.memory_space<vmem>>, %arg4: memref<16x1xf32, #tpu.memory_space<vmem>>, %arg5: memref<1x1x16x1088xbf16, #tpu.memory_space<vmem>>) attributes {dimension_semantics = [#tpu.dimension_semantics<parallel>, #tpu.dimension_semantics<parallel>], iteration_bounds = array<i64: 2, 1>, scalar_prefetch = 0 : i64, scratch_operands = 0 : i64, tpu.core_type = #tpu.core_type<tc>, window_params = [{transform_indices = @transform_0, window_bounds = array<i64: 1, 1, 8, 1280>}, {pipeline_mode = #tpu.pipeline_mode<synchronous>, transform_indices = @transform_1, window_bounds = array<i64: 16, 72>}, {pipeline_mode = #tpu.pipeline_mode<synchronous>, transform_indices = @transform_2, window_bounds = array<i64: 16, 1>}, {transform_indices = @transform_3, window_bounds = array<i64: 1, 1, 16, 1088>}]} {
    %c0 = arith.constant 0 : index
    %c0_0 = arith.constant 0 : index
    %c0_1 = arith.constant 0 : index
    %c0_2 = arith.constant 0 : index
    %0 = vector.load %arg2[%c0, %c0_0, %c0_1, %c0_2] : memref<1x1x8x1280xbf16, #tpu.memory_space<vmem>>, vector<1x1x8x1280xbf16>
    %1 = vector.shape_cast %0 : vector<1x1x8x1280xbf16> to vector<8x1280xbf16>
    %2 = vector.extract_strided_slice %1 {offsets = [0, 0], sizes = [8, 1088], strides = [1, 1]} : vector<8x1280xbf16> to vector<8x1088xbf16>
    %3 = vector.extract_strided_slice %1 {offsets = [0, 1], sizes = [8, 1088], strides = [1, 1]} : vector<8x1280xbf16> to vector<8x1088xbf16>
    %4 = vector.extract_strided_slice %1 {offsets = [0, 2], sizes = [8, 1088], strides = [1, 1]} : vector<8x1280xbf16> to vector<8x1088xbf16>
    %5 = vector.extract_strided_slice %1 {offsets = [0, 34], sizes = [8, 1088], strides = [1, 1]} : vector<8x1280xbf16> to vector<8x1088xbf16>
    %6 = vector.extract_strided_slice %1 {offsets = [0, 35], sizes = [8, 1088], strides = [1, 1]} : vector<8x1280xbf16> to vector<8x1088xbf16>
    %7 = vector.extract_strided_slice %1 {offsets = [0, 36], sizes = [8, 1088], strides = [1, 1]} : vector<8x1280xbf16> to vector<8x1088xbf16>
    %8 = vector.extract_strided_slice %1 {offsets = [0, 68], sizes = [8, 1088], strides = [1, 1]} : vector<8x1280xbf16> to vector<8x1088xbf16>
    %9 = vector.extract_strided_slice %1 {offsets = [0, 69], sizes = [8, 1088], strides = [1, 1]} : vector<8x1280xbf16> to vector<8x1088xbf16>
    %10 = vector.extract_strided_slice %1 {offsets = [0, 70], sizes = [8, 1088], strides = [1, 1]} : vector<8x1280xbf16> to vector<8x1088xbf16>
    %11 = tpu.concatenate %2, %3, %4, %5, %6, %7, %8, %9, %10 in 0 : vector<8x1088xbf16>, vector<8x1088xbf16>, vector<8x1088xbf16>, vector<8x1088xbf16>, vector<8x1088xbf16>, vector<8x1088xbf16>, vector<8x1088xbf16>, vector<8x1088xbf16>, vector<8x1088xbf16> -> vector<72x1088xbf16>
    %c0_3 = arith.constant 0 : index
    %c0_4 = arith.constant 0 : index
    %12 = vector.load %arg3[%c0_3, %c0_4] : memref<16x72xbf16, #tpu.memory_space<vmem>>, vector<16x72xbf16>
    %cst = arith.constant dense<0.000000e+00> : vector<16x1088xf32>
    %13 = tpu.matmul %12, %11, %cst {dimension_numbers = #tpu.dot_dimension_numbers<[1], [0], [0], [1], [0, 0, 1, 1], [], []>} : vector<16x72xbf16>, vector<72x1088xbf16>, vector<16x1088xf32> -> vector<16x1088xf32>
    %c0_5 = arith.constant 0 : index
    %c0_6 = arith.constant 0 : index
    %14 = vector.load %arg4[%c0_5, %c0_6] : memref<16x1xf32, #tpu.memory_space<vmem>>, vector<16x1xf32>
    %15 = vector.broadcast %14 : vector<16x1xf32> to vector<16x1088xf32>
    %16 = arith.addf %13, %15 : vector<16x1088xf32>
    %cst_7 = arith.constant 0.000000e+00 : f32
    %17 = vector.broadcast %cst_7 : f32 to vector<16x1088xf32>
    %18 = arith.maximumf %16, %17 : vector<16x1088xf32>
    %19 = arith.truncf %18 : vector<16x1088xf32> to vector<16x1088xbf16>
    %c0_8 = arith.constant 0 : index
    %c0_9 = arith.constant 0 : index
    %c0_10 = arith.constant 0 : index
    %c0_11 = arith.constant 0 : index
    %20 = vector.load %arg5[%c0_8, %c0_9, %c0_10, %c0_11] : memref<1x1x16x1088xbf16, #tpu.memory_space<vmem>>, vector<1x1x16x1088xbf16>
    %21 = vector.shape_cast %20 : vector<1x1x16x1088xbf16> to vector<16x1088xbf16>
    %22 = vector.shape_cast %19 : vector<16x1088xbf16> to vector<1x1x16x1088xbf16>
    tpu.vector_store %arg5[%c0_8, %c0_9, %c0_10, %c0_11], %22 {strides = array<i32>} : memref<1x1x16x1088xbf16, #tpu.memory_space<vmem>>, vector<1x1x16x1088xbf16>,
    return
  }
  func.func @transform_0(%arg0: i32, %arg1: i32) -> (i32, i32, i32, i32) {
    %c0_i32 = arith.constant 0 : i32
    %c0_i32_0 = arith.constant 0 : i32
    %c0_i32_1 = arith.constant 0 : i32
    return %arg0, %arg1, %c0_i32, %c0_i32_0 : i32, i32, i32, i32
  }
  func.func @transform_1(%arg0: i32, %arg1: i32) -> (i32, i32) {
    %c0_i32 = arith.constant 0 : i32
    %c0_i32_0 = arith.constant 0 : i32
    %c0_i32_1 = arith.constant 0 : i32
    return %c0_i32, %c0_i32_0 : i32, i32
  }
  func.func @transform_2(%arg0: i32, %arg1: i32) -> (i32, i32) {
    %c0_i32 = arith.constant 0 : i32
    %c0_i32_0 = arith.constant 0 : i32
    %c0_i32_1 = arith.constant 0 : i32
    return %c0_i32, %c0_i32_0 : i32, i32
  }
  func.func @transform_3(%arg0: i32, %arg1: i32) -> (i32, i32, i32, i32) {
    %c0_i32 = arith.constant 0 : i32
    %c0_i32_0 = arith.constant 0 : i32
    %c0_i32_1 = arith.constant 0 : i32
    return %arg0, %arg1, %c0_i32, %c0_i32_0 : i32, i32, i32, i32
  }
}

module attributes {stable_mosaic.version = 11 : i64} {
  func.func @_head_kernel(%arg0: i32, %arg1: i32, %arg2: memref<1x1x8x4480xbf16, #tpu.memory_space<vmem>>, %arg3: memref<1x1x16x4480xbf16, #tpu.memory_space<vmem>>, %arg4: memref<8x216xbf16, #tpu.memory_space<vmem>>, %arg5: memref<8x1xf32, #tpu.memory_space<vmem>>, %arg6: memref<2x8xbf16, #tpu.memory_space<vmem>>, %arg7: memref<2x1xf32, #tpu.memory_space<vmem>>, %arg8: memref<1x1x3x4224xf32, #tpu.memory_space<vmem>>) attributes {dimension_semantics = [#tpu.dimension_semantics<parallel>, #tpu.dimension_semantics<parallel>], iteration_bounds = array<i64: 2, 1>, scalar_prefetch = 0 : i64, scratch_operands = 0 : i64, tpu.core_type = #tpu.core_type<tc>, window_params = [{transform_indices = @transform_0, window_bounds = array<i64: 1, 1, 8, 4480>}, {transform_indices = @transform_1, window_bounds = array<i64: 1, 1, 16, 4480>}, {pipeline_mode = #tpu.pipeline_mode<synchronous>, transform_indices = @transform_2, window_bounds = array<i64: 8, 216>}, {pipeline_mode = #tpu.pipeline_mode<synchronous>, transform_indices = @transform_3, window_bounds = array<i64: 8, 1>}, {pipeline_mode = #tpu.pipeline_mode<synchronous>, transform_indices = @transform_4, window_bounds = array<i64: 2, 8>}, {pipeline_mode = #tpu.pipeline_mode<synchronous>, transform_indices = @transform_5, window_bounds = array<i64: 2, 1>}, {transform_indices = @transform_6, window_bounds = array<i64: 1, 1, 3, 4224>}]} {
    %c0 = arith.constant 0 : index
    %c0_0 = arith.constant 0 : index
    %c0_1 = arith.constant 0 : index
    %c0_2 = arith.constant 0 : index
    %0 = vector.load %arg2[%c0, %c0_0, %c0_1, %c0_2] : memref<1x1x8x4480xbf16, #tpu.memory_space<vmem>>, vector<1x1x8x4480xbf16>
    %1 = vector.shape_cast %0 : vector<1x1x8x4480xbf16> to vector<8x4480xbf16>
    %c0_3 = arith.constant 0 : index
    %c0_4 = arith.constant 0 : index
    %c0_5 = arith.constant 0 : index
    %c0_6 = arith.constant 0 : index
    %2 = vector.load %arg3[%c0_3, %c0_4, %c0_5, %c0_6] : memref<1x1x16x4480xbf16, #tpu.memory_space<vmem>>, vector<1x1x16x4480xbf16>
    %3 = vector.shape_cast %2 : vector<1x1x16x4480xbf16> to vector<16x4480xbf16>
    %4 = tpu.concatenate %1, %3 in 0 : vector<8x4480xbf16>, vector<16x4480xbf16> -> vector<24x4480xbf16>
    %5 = vector.extract_strided_slice %4 {offsets = [0, 0], sizes = [24, 4224], strides = [1, 1]} : vector<24x4480xbf16> to vector<24x4224xbf16>
    %6 = vector.extract_strided_slice %4 {offsets = [0, 1], sizes = [24, 4224], strides = [1, 1]} : vector<24x4480xbf16> to vector<24x4224xbf16>
    %7 = vector.extract_strided_slice %4 {offsets = [0, 2], sizes = [24, 4224], strides = [1, 1]} : vector<24x4480xbf16> to vector<24x4224xbf16>
    %8 = vector.extract_strided_slice %4 {offsets = [0, 66], sizes = [24, 4224], strides = [1, 1]} : vector<24x4480xbf16> to vector<24x4224xbf16>
    %9 = vector.extract_strided_slice %4 {offsets = [0, 67], sizes = [24, 4224], strides = [1, 1]} : vector<24x4480xbf16> to vector<24x4224xbf16>
    %10 = vector.extract_strided_slice %4 {offsets = [0, 68], sizes = [24, 4224], strides = [1, 1]} : vector<24x4480xbf16> to vector<24x4224xbf16>
    %11 = vector.extract_strided_slice %4 {offsets = [0, 132], sizes = [24, 4224], strides = [1, 1]} : vector<24x4480xbf16> to vector<24x4224xbf16>
    %12 = vector.extract_strided_slice %4 {offsets = [0, 133], sizes = [24, 4224], strides = [1, 1]} : vector<24x4480xbf16> to vector<24x4224xbf16>
    %13 = vector.extract_strided_slice %4 {offsets = [0, 134], sizes = [24, 4224], strides = [1, 1]} : vector<24x4480xbf16> to vector<24x4224xbf16>
    %14 = tpu.concatenate %5, %6, %7, %8, %9, %10, %11, %12, %13 in 0 : vector<24x4224xbf16>, vector<24x4224xbf16>, vector<24x4224xbf16>, vector<24x4224xbf16>, vector<24x4224xbf16>, vector<24x4224xbf16>, vector<24x4224xbf16>, vector<24x4224xbf16>, vector<24x4224xbf16> -> vector<216x4224xbf16>
    %c0_7 = arith.constant 0 : index
    %c0_8 = arith.constant 0 : index
    %15 = vector.load %arg4[%c0_7, %c0_8] : memref<8x216xbf16, #tpu.memory_space<vmem>>, vector<8x216xbf16>
    %cst = arith.constant dense<0.000000e+00> : vector<8x4224xf32>
    %16 = tpu.matmul %15, %14, %cst {dimension_numbers = #tpu.dot_dimension_numbers<[1], [0], [0], [1], [0, 0, 1, 1], [], []>} : vector<8x216xbf16>, vector<216x4224xbf16>, vector<8x4224xf32> -> vector<8x4224xf32>
    %c0_9 = arith.constant 0 : index
    %c0_10 = arith.constant 0 : index
    %17 = vector.load %arg5[%c0_9, %c0_10] : memref<8x1xf32, #tpu.memory_space<vmem>>, vector<8x1xf32>
    %18 = vector.broadcast %17 : vector<8x1xf32> to vector<8x4224xf32>
    %19 = arith.addf %16, %18 : vector<8x4224xf32>
    %cst_11 = arith.constant 0.000000e+00 : f32
    %20 = vector.broadcast %cst_11 : f32 to vector<8x4224xf32>
    %21 = arith.maximumf %19, %20 : vector<8x4224xf32>
    %22 = arith.truncf %21 : vector<8x4224xf32> to vector<8x4224xbf16>
    %c0_12 = arith.constant 0 : index
    %c0_13 = arith.constant 0 : index
    %23 = vector.load %arg6[%c0_12, %c0_13] : memref<2x8xbf16, #tpu.memory_space<vmem>>, vector<2x8xbf16>
    %cst_14 = arith.constant dense<0.000000e+00> : vector<2x4224xf32>
    %24 = tpu.matmul %23, %22, %cst_14 {dimension_numbers = #tpu.dot_dimension_numbers<[1], [0], [0], [1], [0, 0, 1, 1], [], []>} : vector<2x8xbf16>, vector<8x4224xbf16>, vector<2x4224xf32> -> vector<2x4224xf32>
    %c0_15 = arith.constant 0 : index
    %c0_16 = arith.constant 0 : index
    %25 = vector.load %arg7[%c0_15, %c0_16] : memref<2x1xf32, #tpu.memory_space<vmem>>, vector<2x1xf32>
    %26 = vector.broadcast %25 : vector<2x1xf32> to vector<2x4224xf32>
    %27 = arith.addf %24, %26 : vector<2x4224xf32>
    %cst_17 = arith.constant 0.000000e+00 : f32
    %28 = vector.broadcast %cst_17 : f32 to vector<2x4224xf32>
    %29 = arith.subf %28, %27 : vector<2x4224xf32>
    %30 = math.exp %29 : vector<2x4224xf32>
    %cst_18 = arith.constant 1.000000e+00 : f32
    %31 = vector.broadcast %cst_18 : f32 to vector<2x4224xf32>
    %32 = arith.addf %31, %30 : vector<2x4224xf32>
    %33 = tpu.reciprocal %32 {approx = true} : vector<2x4224xf32> -> vector<2x4224xf32>
    %34 = vector.extract_strided_slice %33 {offsets = [0, 0], sizes = [1, 4224], strides = [1, 1]} : vector<2x4224xf32> to vector<1x4224xf32>
    %cst_19 = arith.constant 9.500000e+00 : f32
    %35 = vector.broadcast %cst_19 : f32 to vector<1x4224xf32>
    %36 = arith.mulf %34, %35 : vector<1x4224xf32>
    %cst_20 = arith.constant 5.000000e-01 : f32
    %37 = vector.broadcast %cst_20 : f32 to vector<1x4224xf32>
    %38 = arith.addf %36, %37 : vector<1x4224xf32>
    %c0_21 = arith.constant 0 : index
    %c0_22 = arith.constant 0 : index
    %c0_23 = arith.constant 0 : index
    %c0_24 = arith.constant 0 : index
    %39 = vector.load %arg8[%c0_21, %c0_22, %c0_23, %c0_24] : memref<1x1x3x4224xf32, #tpu.memory_space<vmem>>, vector<1x1x1x4224xf32>
    %40 = vector.shape_cast %39 : vector<1x1x1x4224xf32> to vector<1x4224xf32>
    %41 = vector.shape_cast %38 : vector<1x4224xf32> to vector<1x1x1x4224xf32>
    tpu.vector_store %arg8[%c0_21, %c0_22, %c0_23, %c0_24], %41 {strides = array<i32>} : memref<1x1x3x4224xf32, #tpu.memory_space<vmem>>, vector<1x1x1x4224xf32>,
    %c0_25 = arith.constant 0 : index
    %c0_26 = arith.constant 0 : index
    %c1 = arith.constant 1 : index
    %c0_27 = arith.constant 0 : index
    %42 = vector.load %arg8[%c0_25, %c0_26, %c1, %c0_27] : memref<1x1x3x4224xf32, #tpu.memory_space<vmem>>, vector<1x1x1x4224xf32>
    %43 = vector.shape_cast %42 : vector<1x1x1x4224xf32> to vector<1x4224xf32>
    %44 = vector.shape_cast %38 : vector<1x4224xf32> to vector<1x1x1x4224xf32>
    tpu.vector_store %arg8[%c0_25, %c0_26, %c1, %c0_27], %44 {strides = array<i32>} : memref<1x1x3x4224xf32, #tpu.memory_space<vmem>>, vector<1x1x1x4224xf32>,
    %45 = vector.extract_strided_slice %33 {offsets = [1, 0], sizes = [1, 4224], strides = [1, 1]} : vector<2x4224xf32> to vector<1x4224xf32>
    %c0_28 = arith.constant 0 : index
    %c0_29 = arith.constant 0 : index
    %c2 = arith.constant 2 : index
    %c0_30 = arith.constant 0 : index
    %46 = vector.load %arg8[%c0_28, %c0_29, %c2, %c0_30] : memref<1x1x3x4224xf32, #tpu.memory_space<vmem>>, vector<1x1x1x4224xf32>
    %47 = vector.shape_cast %46 : vector<1x1x1x4224xf32> to vector<1x4224xf32>
    %48 = vector.shape_cast %45 : vector<1x4224xf32> to vector<1x1x1x4224xf32>
    tpu.vector_store %arg8[%c0_28, %c0_29, %c2, %c0_30], %48 {strides = array<i32>} : memref<1x1x3x4224xf32, #tpu.memory_space<vmem>>, vector<1x1x1x4224xf32>,
    return
  }
  func.func @transform_0(%arg0: i32, %arg1: i32) -> (i32, i32, i32, i32) {
    %c0_i32 = arith.constant 0 : i32
    %c0_i32_0 = arith.constant 0 : i32
    %c0_i32_1 = arith.constant 0 : i32
    return %arg0, %arg1, %c0_i32, %c0_i32_0 : i32, i32, i32, i32
  }
  func.func @transform_1(%arg0: i32, %arg1: i32) -> (i32, i32, i32, i32) {
    %c0_i32 = arith.constant 0 : i32
    %c0_i32_0 = arith.constant 0 : i32
    %c0_i32_1 = arith.constant 0 : i32
    return %arg0, %arg1, %c0_i32, %c0_i32_0 : i32, i32, i32, i32
  }
  func.func @transform_2(%arg0: i32, %arg1: i32) -> (i32, i32) {
    %c0_i32 = arith.constant 0 : i32
    %c0_i32_0 = arith.constant 0 : i32
    %c0_i32_1 = arith.constant 0 : i32
    return %c0_i32, %c0_i32_0 : i32, i32
  }
  func.func @transform_3(%arg0: i32, %arg1: i32) -> (i32, i32) {
    %c0_i32 = arith.constant 0 : i32
    %c0_i32_0 = arith.constant 0 : i32
    %c0_i32_1 = arith.constant 0 : i32
    return %c0_i32, %c0_i32_0 : i32, i32
  }
  func.func @transform_4(%arg0: i32, %arg1: i32) -> (i32, i32) {
    %c0_i32 = arith.constant 0 : i32
    %c0_i32_0 = arith.constant 0 : i32
    %c0_i32_1 = arith.constant 0 : i32
    return %c0_i32, %c0_i32_0 : i32, i32
  }
  func.func @transform_5(%arg0: i32, %arg1: i32) -> (i32, i32) {
    %c0_i32 = arith.constant 0 : i32
    %c0_i32_0 = arith.constant 0 : i32
    %c0_i32_1 = arith.constant 0 : i32
    return %c0_i32, %c0_i32_0 : i32, i32
  }
  func.func @transform_6(%arg0: i32, %arg1: i32) -> (i32, i32, i32, i32) {
    %c0_i32 = arith.constant 0 : i32
    %c0_i32_0 = arith.constant 0 : i32
    %c0_i32_1 = arith.constant 0 : i32
    return %arg0, %arg1, %c0_i32, %c0_i32_0 : i32, i32, i32, i32
  }
}

</mosaic_0001>

<bundles_post_ra>
// kernel: _lambda_.3
= control target key start
LH: loop header
LB: loop body
LE: loop exit
PB: predicated region body
PF: predicated region fallthrough
CT: control target
= control target key end

     0   :  { %s3000_s12 = smov 0   ;;  %s3002_s13 = smov 0   ;;  %s4724_s0 = inlined_call_operand.vmem [shape: bf16[2,1,8,4480], index: 0, kind: input, shape index: {}]   ;;  %s4725_s1 = inlined_call_operand.vmem [shape: bf16[8,72], index: 1, kind: input, shape index: {}]   ;;  %s4726_s2 = inlined_call_operand.vmem [shape: f32[8,1], index: 2, kind: input, shape index: {}]   ;;  %s4727_s3 = inlined_call_operand.vmem [shape: bf16[2,1,8,4224], index: 3, kind: output, shape index: {}]  }
   0x1   :  { %s3004_s14 = smov 0  }
   0x2 LB: > { %s25_s15 = sadd.s32 1, %s2963_s13  ;;  %p2744_p0 = scmp.ge.s32.totalorder %s2967_s14, 1  ;;  %s2967_s14 = sphi %s3004_s14, %s13_s14   ;;  %s2963_s13 = sphi %s3002_s13, %s4861_s13   ;;  %s2959_s12 = sphi %s3000_s12, %s4860_s12  }
   0x3   : > { %p27_p1 = scmp.ge.s32.totalorder %s25_s15, 2  ;;  %p157_p2 = scmp.lt.s32.totalorder %s2967_s14, 3 }
   0x5   : > { %s4863_s15 = smov (%p27_p1, %s25_s15), 0  ;;  %p158_p3 = pnand %p2744_p0, %p157_p2 }
   0x7   : > { %161 = sbr.rel (%p158_p3) target bundleno = 885 (0x375), region = 32 }
   0xc   : > { %p189_p4 = scmp.lt.s32.totalorder %s2959_s12, 1  ;;  %s2969_s20 = smov 127   ;;  %vm1096_vm0 = vcmask 998400   ;;  %vm1130_vm1 = vcmask 1043456   ;;  %vm892_vm2 = vcmask 1014784   ;;  %vm994_vm3 = vcmask 1006592  }
   0xd   : > { %s2970_s21 = smov 126   ;;  %s2971_s22 = smov 122   ;;  %vm685_vm4 = vcmask 498688   ;;  %vm787_vm5 = vcmask 490496   ;;  %vm583_vm6 = vcmask 506880   ;;  %vm481_vm7 = vcmask 1031168  }
   0xe   : > { %s4865_s12 = smov (!%p189_p4, %s2959_s12), 1  ;;  %s2972_s23 = smov 124   ;;  %vm379_vm8 = vcmask 1039360   ;;  %vm1666_vm9 = vcmask 588800   ;;  %vm2979_vm10 = vmmov 0  }
   0xf   : > { %s2871_s16 = smul.u32 140, %s4865_s12  ;;  %s2973_s24 = smov 123  }
  0x10   : > { %s2974_s25 = smov 61   ;;  %s2975_s26 = smov 60  }
  0x11   : > { %s3024_s19 = scalar_lea.vmem %s4724_s0, %s2871_s16  ;;  %s2976_s27 = smov 62  }
  0x12   : > { %v209_v0 = vld [vmem:[%s3024_s19 + $0x8] sm:$0xff]  ;;  %v208_v1 = vld [vmem:[%s3024_s19] sm:$0xff]  ;;  %v210_v6 = vld [vmem:[%s3024_s19 + $0x10] sm:$0xff]  ;;  %s2872_s7 = smul.u32 132, %s4865_s12 }
  0x13   : > { %v3028_v2 = vcombine.low %v209_v0, %v209_v0  ;;  %v3030_v3 = vcombine.low %v208_v1, %v208_v1  ;;  %v3034_v4 = vcombine.high %v208_v1, %v208_v1  ;;  %v3038_v5 = vcombine.high %v209_v0, %v209_v0  ;;  %v211_v9 = vld [vmem:[%s3024_s19 + $0x18] sm:$0xff]  ;;  %v212_v12 = vld [vmem:[%s3024_s19 + $0x20] sm:$0xff]  ;;  %v213_v15 = vld [vmem:[%s3024_s19 + $0x28] sm:$0xff] }
  0x14   : > { %v3045_v7 = vcombine.high %v210_v6, %v210_v6  ;;  %v3047_v8 = vcombine.low %v210_v6, %v210_v6  ;;  %v3054_v10 = vcombine.high %v211_v9, %v211_v9  ;;  %v3056_v11 = vcombine.low %v211_v9, %v211_v9  ;;  %v214_v18 = vld [vmem:[%s3024_s19 + $0x30] sm:$0xff]  ;;  %v215_v21 = vld [vmem:[%s3024_s19 + $0x38] sm:$0xff]  ;;  %v216_v24 = vld [vmem:[%s3024_s19 + $0x40] sm:$0xff]  ;;  %s4662_s10 = scalar_lea.vmem %s4727_s3, %s2872_s7 }
  0x15   : > { %315 = vrot.lane.b32.xlu1 %v3028_v2, %s2969_s20  ;;  %311 = vrot.lane.b32.xlu0 %v3030_v3, %s2969_s20  ;;  %v3063_v13 = vcombine.high %v212_v12, %v212_v12  ;;  %v3065_v14 = vcombine.low %v212_v12, %v212_v12  ;;  %v3072_v16 = vcombine.high %v213_v15, %v213_v15  ;;  %v217_v27 = vld [vmem:[%s3024_s19 + $0x48] sm:$0xff]  ;;  %v218_v30 = vld [vmem:[%s3024_s19 + $0x50] sm:$0xff]  ;;  %v4728_v1 = vmov 0  }
  0x16   : > { %v3074_v17 = vcombine.low %v213_v15, %v213_v15  ;;  %v3081_v19 = vcombine.high %v214_v18, %v214_v18  ;;  %v3083_v20 = vcombine.low %v214_v18, %v214_v18  ;;  %v3090_v22 = vcombine.high %v215_v21, %v215_v21  ;;  %v219_v33 = vld [vmem:[%s3024_s19 + $0x58] sm:$0xff]  ;;  %v220_v36 = vld [vmem:[%s3024_s19 + $0x60] sm:$0xff]  ;;  %v221_v39 = vld [vmem:[%s3024_s19 + $0x68] sm:$0xff]  ;;  %1801 = vmatprep.mubr.bf16.mxu0 %v4728_v1 }
  0x17   : > { %v3092_v23 = vcombine.low %v215_v21, %v215_v21  ;;  %v3099_v25 = vcombine.high %v216_v24, %v216_v24  ;;  %v3101_v26 = vcombine.low %v216_v24, %v216_v24  ;;  %v3108_v28 = vcombine.high %v217_v27, %v217_v27  ;;  %v222_v42 = vld [vmem:[%s3024_s19 + $0x70] sm:$0xff]  ;;  %v223_v45 = vld [vmem:[%s3024_s19 + $0x78] sm:$0xff]  ;;  %v224_v48 = vld [vmem:[%s3024_s19 + $0x80] sm:$0xff]  ;;  %1842 = vmatprep.mubr.bf16.mxu1 %v4728_v1 }
  0x18   : > { %4777 = vst [vmem:[#allocation2_spill] sm:$0xff] %v3074_v17  ;;  %v3110_v29 = vcombine.low %v217_v27, %v217_v27  ;;  %v3117_v31 = vcombine.high %v218_v30, %v218_v30  ;;  %v3119_v32 = vcombine.low %v218_v30, %v218_v30  ;;  %v3126_v34 = vcombine.high %v219_v33, %v219_v33 }
  0x19   : > { %317 = vrot.lane.b32.xlu1 %v3038_v5, %s2969_s20  ;;  %313 = vrot.lane.b32.xlu0 %v3034_v4, %s2969_s20  ;;  %v3128_v35 = vcombine.low %v219_v33, %v219_v33  ;;  %v3135_v37 = vcombine.high %v220_v36, %v220_v36  ;;  %v3137_v38 = vcombine.low %v220_v36, %v220_v36 }
  0x1a   : > { %v3144_v40 = vcombine.high %v221_v39, %v221_v39  ;;  %v3146_v41 = vcombine.low %v221_v39, %v221_v39  ;;  %v3153_v43 = vcombine.high %v222_v42, %v222_v42  ;;  %v3155_v44 = vcombine.low %v222_v42, %v222_v42  ;;  %2908 = vset.pattern.permute.xlu0 %v4728_v1 }
  0x1b   : > { %v3162_v46 = vcombine.high %v223_v45, %v223_v45  ;;  %v3164_v47 = vcombine.low %v223_v45, %v223_v45  ;;  %v3171_v49 = vcombine.low %v224_v48, %v224_v48  ;;  %v3173_v50 = vcombine.high %v224_v48, %v224_v48 }
  0x1c   : > { %4778 = vst [vmem:[#allocation3_spill] sm:$0xff] %v3144_v40  ;;  %4779 = vst [vmem:[#allocation4_spill] sm:$0xff] %v3153_v43 }
  0x1d   : > { %321 = vrot.lane.b32.xlu1 %v3045_v7, %s2969_s20  ;;  %319 = vrot.lane.b32.xlu0 %v3047_v8, %s2969_s20  ;;  %4780 = vst [vmem:[#allocation5_spill] sm:$0xff] %v3155_v44  ;;  %4781 = vst [vmem:[#allocation6_spill] sm:$0xff] %v3162_v46 }
  0x1e   : > { %4782 = vst [vmem:[#allocation7_spill] sm:$0xff] %v3164_v47  ;;  %4783 = vst [vmem:[#allocation8_spill] sm:$0xff] %v3171_v49 }
  0x1f   : > { %4784 = vst [vmem:[#allocation9_spill] sm:$0xff] %v3173_v50 }
  0x21   : > { %325 = vrot.lane.b32.xlu1 %v3054_v10, %s2969_s20  ;;  %323 = vrot.lane.b32.xlu0 %v3056_v11, %s2969_s20 }
  0x25   : > { %329 = vrot.lane.b32.xlu1 %v3063_v13, %s2969_s20  ;;  %327 = vrot.lane.b32.xlu0 %v3065_v14, %s2969_s20 }
  0x29   : > { %333 = vrot.lane.b32.xlu1 %v3072_v16, %s2969_s20  ;;  %331 = vrot.lane.b32.xlu0 %v3074_v17, %s2969_s20 }
  0x2d   : > { %337 = vrot.lane.b32.xlu1 %v3081_v19, %s2969_s20  ;;  %335 = vrot.lane.b32.xlu0 %v3083_v20, %s2969_s20 }
  0x31   : > { %341 = vrot.lane.b32.xlu1 %v3090_v22, %s2969_s20  ;;  %339 = vrot.lane.b32.xlu0 %v3092_v23, %s2969_s20 }
  0x35   : > { %345 = vrot.lane.b32.xlu1 %v3099_v25, %s2969_s20  ;;  %343 = vrot.lane.b32.xlu0 %v3101_v26, %s2969_s20 }
  0x39   : > { %349 = vrot.lane.b32.xlu1 %v3108_v28, %s2969_s20  ;;  %347 = vrot.lane.b32.xlu0 %v3110_v29, %s2969_s20 }
  0x3d   : > { %353 = vrot.lane.b32.xlu1 %v3117_v31, %s2969_s20  ;;  %351 = vrot.lane.b32.xlu0 %v3119_v32, %s2969_s20 }
  0x41   : > { %357 = vrot.lane.b32.xlu1 %v3126_v34, %s2969_s20  ;;  %355 = vrot.lane.b32.xlu0 %v3128_v35, %s2969_s20 }
  0x45   : > { %361 = vrot.lane.b32.xlu1 %v3135_v37, %s2969_s20  ;;  %359 = vrot.lane.b32.xlu0 %v3137_v38, %s2969_s20 }
  0x49   : > { %365 = vrot.lane.b32.xlu1 %v3144_v40, %s2969_s20  ;;  %363 = vrot.lane.b32.xlu0 %v3146_v41, %s2969_s20 }
  0x4d   : > { %369 = vrot.lane.b32.xlu1 %v3153_v43, %s2969_s20  ;;  %367 = vrot.lane.b32.xlu0 %v3155_v44, %s2969_s20 }
  0x51   : > { %373 = vrot.lane.b32.xlu1 %v3162_v46, %s2969_s20  ;;  %371 = vrot.lane.b32.xlu0 %v3164_v47, %s2969_s20 }
  0x55   : > { %377 = vrot.lane.b32.xlu1 %v3173_v50, %s2969_s20  ;;  %375 = vrot.lane.b32.xlu0 %v3171_v49, %s2969_s20 }
  0x59   : > { %415 = vrot.lane.b32.xlu1 %v3034_v4, %s2970_s21  ;;  %413 = vrot.lane.b32.xlu0 %v3030_v3, %s2970_s21 }
  0x5d   : > { %419 = vrot.lane.b32.xlu1 %v3038_v5, %s2970_s21  ;;  %417 = vrot.lane.b32.xlu0 %v3028_v2, %s2970_s21 }
  0x61   : > { %423 = vrot.lane.b32.xlu1 %v3045_v7, %s2970_s21  ;;  %421 = vrot.lane.b32.xlu0 %v3047_v8, %s2970_s21 }
  0x65   : > { %427 = vrot.lane.b32.xlu1 %v3054_v10, %s2970_s21  ;;  %425 = vrot.lane.b32.xlu0 %v3056_v11, %s2970_s21 }
  0x69   : > { %431 = vrot.lane.b32.xlu1 %v3063_v13, %s2970_s21  ;;  %429 = vrot.lane.b32.xlu0 %v3065_v14, %s2970_s21 }
  0x6d   : > { %435 = vrot.lane.b32.xlu1 %v3072_v16, %s2970_s21  ;;  %433 = vrot.lane.b32.xlu0 %v3074_v17, %s2970_s21 }
  0x71   : > { %439 = vrot.lane.b32.xlu1 %v3081_v19, %s2970_s21  ;;  %437 = vrot.lane.b32.xlu0 %v3083_v20, %s2970_s21 }
  0x75   : > { %443 = vrot.lane.b32.xlu1 %v3090_v22, %s2970_s21  ;;  %441 = vrot.lane.b32.xlu0 %v3092_v23, %s2970_s21 }
  0x79   : > { %447 = vrot.lane.b32.xlu1 %v3099_v25, %s2970_s21  ;;  %445 = vrot.lane.b32.xlu0 %v3101_v26, %s2970_s21 }
  0x7d   : > { %451 = vrot.lane.b32.xlu1 %v3108_v28, %s2970_s21  ;;  %449 = vrot.lane.b32.xlu0 %v3110_v29, %s2970_s21 }
  0x81   : > { %1028 = vrot.lane.b32.xlu1 %v3034_v4, %s2971_s22  ;;  %453 = vrot.lane.b32.xlu0 %v3119_v32, %s2970_s21 }
  0x85   : > { %1032 = vrot.lane.b32.xlu1 %v3038_v5, %s2971_s22  ;;  %1030 = vrot.lane.b32.xlu0 %v3028_v2, %s2971_s22 }
  0x87   : > { %v3227_v51 = vpop.permute.xlu1 %315  ;;  %v3229_v52 = vpop.permute.xlu0 %311 }
  0x89   : > { %828 = vrot.lane.b32.xlu1 %v3038_v5, %s2972_s23  ;;  %826 = vrot.lane.b32.xlu0 %v3028_v2, %s2972_s23 }
  0x8b   : > { %v3235_v53 = vpop.permute.xlu1 %317  ;;  %v3237_v54 = vpop.permute.xlu0 %313 }
  0x8d   : > { %930 = vrot.lane.b32.xlu1 %v3038_v5, %s2973_s24  ;;  %928 = vrot.lane.b32.xlu0 %v3028_v2, %s2973_s24 }
  0x8f   : > { %v3243_v55 = vpop.permute.xlu1 %321  ;;  %v3245_v56 = vpop.permute.xlu0 %319 }
  0x91   : > { %926 = vrot.lane.b32.xlu1 %v3034_v4, %s2973_s24  ;;  %824 = vrot.lane.b32.xlu0 %v3034_v4, %s2972_s23 }
  0x93   : > { %v3251_v57 = vpop.permute.xlu1 %325  ;;  %v3253_v58 = vpop.permute.xlu0 %323 }
  0x95   : > { %621 = vrot.lane.b32.xlu1 %v3028_v2, %s2974_s25  ;;  %619 = vrot.lane.b32.xlu0 %v3034_v4, %s2974_s25 }
  0x97   : > { %v3259_v59 = vpop.permute.xlu1 %329  ;;  %v3261_v60 = vpop.permute.xlu0 %327 }
  0x99   : > { %723 = vrot.lane.b32.xlu1 %v3028_v2, %s2975_s26  ;;  %721 = vrot.lane.b32.xlu0 %v3034_v4, %s2975_s26 }
  0x9b   : > { %v3267_v61 = vpop.permute.xlu1 %333  ;;  %v3269_v62 = vpop.permute.xlu0 %331 }
  0x9c   : > { %4785 = vst [vmem:[#allocation10_spill] sm:$0xff] %v3267_v61 }
  0x9d   : > { %719 = vrot.lane.b32.xlu1 %v3030_v3, %s2975_s26  ;;  %617 = vrot.lane.b32.xlu0 %v3030_v3, %s2974_s25 }
  0x9f   : > { %v3275_v63 = vpop.permute.xlu1 %337  ;;  %v3277_v0 = vpop.permute.xlu0 %335 }
  0xa0   : > { %4786 = vst [vmem:[#allocation11_spill] sm:$0xff] %v3275_v63  ;;  %4787 = vst [vmem:[#allocation12_spill] sm:$0xff] %v3277_v0 }
  0xa1   : > { %519 = vrot.lane.b32.xlu1 %v3028_v2, %s2976_s27  ;;  %517 = vrot.lane.b32.xlu0 %v3034_v4, %s2976_s27 }
  0xa3   : > { %v3285_v6 = vpop.permute.xlu1 %341  ;;  %v3287_v9 = vpop.permute.xlu0 %339 }
  0xa4   : > { %4788 = vst [vmem:[#allocation13_spill] sm:$0xff] %v3285_v6  ;;  %4789 = vst [vmem:[#allocation14_spill] sm:$0xff] %v3287_v9 }
  0xa5   : > { %1034 = vrot.lane.b32.xlu1 %v3047_v8, %s2971_s22  ;;  %515 = vrot.lane.b32.xlu0 %v3030_v3, %s2976_s27 }
  0xa7   : > { %v3294_v12 = vpop.permute.xlu1 %345  ;;  %v3296_v15 = vpop.permute.xlu0 %343 }
  0xa8   : > { %4790 = vst [vmem:[#allocation15_spill] sm:$0xff] %v3294_v12  ;;  %4791 = vst [vmem:[#allocation16_spill] sm:$0xff] %v3296_v15 }
  0xa9   : > { %1038 = vrot.lane.b32.xlu1 %v3056_v11, %s2971_s22  ;;  %1036 = vrot.lane.b32.xlu0 %v3045_v7, %s2971_s22 }
  0xab   : > { %v3302_v18 = vpop.permute.xlu1 %349  ;;  %v3304_v21 = vpop.permute.xlu0 %347 }
  0xac   : > { %4792 = vst [vmem:[#allocation17_spill] sm:$0xff] %v3302_v18  ;;  %4793 = vst [vmem:[#allocation18_spill] sm:$0xff] %v3304_v21 }
  0xad   : > { %830 = vrot.lane.b32.xlu1 %v3047_v8, %s2972_s23  ;;  %1040 = vrot.lane.b32.xlu0 %v3054_v10, %s2971_s22 }
  0xaf   : > { %v3310_v24 = vpop.permute.xlu1 %353  ;;  %v3312_v27 = vpop.permute.xlu0 %351 }
  0xb0   : > { %4794 = vst [vmem:[#allocation19_spill] sm:$0xff] %v3310_v24  ;;  %4795 = vst [vmem:[#allocation20_spill] sm:$0xff] %v3312_v27 }
  0xb1   : > { %932 = vrot.lane.b32.xlu1 %v3047_v8, %s2973_s24  ;;  %832 = vrot.lane.b32.xlu0 %v3045_v7, %s2972_s23 }
  0xb3   : > { %v3318_v30 = vpop.permute.xlu1 %357  ;;  %v3320_v33 = vpop.permute.xlu0 %355 }
  0xb4   : > { %4796 = vst [vmem:[#allocation21_spill] sm:$0xff] %v3318_v30  ;;  %4797 = vst [vmem:[#allocation22_spill] sm:$0xff] %v3320_v33 }
  0xb5   : > { %834 = vrot.lane.b32.xlu1 %v3056_v11, %s2972_s23  ;;  %934 = vrot.lane.b32.xlu0 %v3045_v7, %s2973_s24 }
  0xb7   : > { %v3326_v36 = vpop.permute.xlu1 %361  ;;  %v3328_v39 = vpop.permute.xlu0 %359 }
  0xb8   : > { %4798 = vst [vmem:[#allocation23_spill] sm:$0xff] %v3326_v36  ;;  %4799 = vst [vmem:[#allocation24_spill] sm:$0xff] %v3328_v39 }
  0xb9   : > { %936 = vrot.lane.b32.xlu1 %v3056_v11, %s2973_s24  ;;  %836 = vrot.lane.b32.xlu0 %v3054_v10, %s2972_s23 }
  0xbb   : > { %v3334_v42 = vpop.permute.xlu1 %365  ;;  %v3336_v45 = vpop.permute.xlu0 %363 }
  0xbc   : > { %4800 = vst [vmem:[#allocation25_spill] sm:$0xff] %v3334_v42  ;;  %4801 = vst [vmem:[#allocation26_spill] sm:$0xff] %v3336_v45 }
  0xbd   : > { %623 = vrot.lane.b32.xlu1 %v3038_v5, %s2974_s25  ;;  %938 = vrot.lane.b32.xlu0 %v3054_v10, %s2973_s24 }
  0xbf   : > { %v3342_v48 = vpop.permute.xlu1 %369  ;;  %v3344_v1 = vpop.permute.xlu0 %367 }
  0xc0   : > { %4802 = vst [vmem:[#allocation27_spill] sm:$0xff] %v3342_v48  ;;  %4803 = vst [vmem:[#allocation28_spill] sm:$0xff] %v3344_v1 }
  0xc1   : > { %725 = vrot.lane.b32.xlu1 %v3038_v5, %s2975_s26  ;;  %625 = vrot.lane.b32.xlu0 %v3047_v8, %s2974_s25 }
  0xc3   : > { %v3350_v36 = vpop.permute.xlu1 %373  ;;  %v3352_v42 = vpop.permute.xlu0 %371 }
  0xc4   : > { %4804 = vst [vmem:[#allocation29_spill] sm:$0xff] %v3350_v36  ;;  %4805 = vst [vmem:[#allocation30_spill] sm:$0xff] %v3352_v42 }
  0xc5   : > { %627 = vrot.lane.b32.xlu1 %v3045_v7, %s2974_s25  ;;  %727 = vrot.lane.b32.xlu0 %v3047_v8, %s2975_s26 }
  0xc7   : > { %v3358_v45 = vpop.permute.xlu1 %377  ;;  %v3360_v48 = vpop.permute.xlu0 %375 }
  0xc8   : > { %4806 = vst [vmem:[#allocation31_spill] sm:$0xff] %v3358_v45  ;;  %4807 = vst [vmem:[#allocation32_spill] sm:$0xff] %v3360_v48 }
  0xc9   : > { %729 = vrot.lane.b32.xlu1 %v3045_v7, %s2975_s26  ;;  %629 = vrot.lane.b32.xlu0 %v3056_v11, %s2974_s25 }
  0xcb   : > { %v3366_v1 = vpop.permute.xlu1 %415  ;;  %v3368_v36 = vpop.permute.xlu0 %413 }
  0xcd   : > { %521 = vrot.lane.b32.xlu1 %v3038_v5, %s2976_s27  ;;  %731 = vrot.lane.b32.xlu0 %v3056_v11, %s2975_s26 }
  0xcf   : > { %v3374_v42 = vpop.permute.xlu1 %419  ;;  %v3376_v45 = vpop.permute.xlu0 %417 }
  0xd1   : > { %525 = vrot.lane.b32.xlu1 %v3045_v7, %s2976_s27  ;;  %523 = vrot.lane.b32.xlu0 %v3047_v8, %s2976_s27 }
  0xd3   : > { %v3382_v48 = vpop.permute.xlu1 %423  ;;  %v3384_v30 = vpop.permute.xlu0 %421 }
  0xd5   : > { %1042 = vrot.lane.b32.xlu1 %v3065_v14, %s2971_s22  ;;  %527 = vrot.lane.b32.xlu0 %v3056_v11, %s2976_s27 }
  0xd7   : > { %v3390_v39 = vpop.permute.xlu1 %427  ;;  %v3392_v50 = vpop.permute.xlu0 %425 }
  0xd9   : > { %1046 = vrot.lane.b32.xlu1 %v3074_v17, %s2971_s22  ;;  %1044 = vrot.lane.b32.xlu0 %v3063_v13, %s2971_s22 }
  0xdb   : > { %v3398_v24 = vpop.permute.xlu1 %431  ;;  %v3400_v33 = vpop.permute.xlu0 %429 }
  0xdd   : > { %838 = vrot.lane.b32.xlu1 %v3065_v14, %s2972_s23  ;;  %1048 = vrot.lane.b32.xlu0 %v3072_v16, %s2971_s22 }
  0xdf   : > { %v3406_v49 = vpop.permute.xlu1 %435  ;;  %v3408_v18 = vpop.permute.xlu0 %433 }
  0xe0   : > { %4808 = vst [vmem:[#allocation33_spill] sm:$0xff] %v3406_v49 }
  0xe1   : > { %940 = vrot.lane.b32.xlu1 %v3065_v14, %s2973_s24  ;;  %840 = vrot.lane.b32.xlu0 %v3063_v13, %s2972_s23 }
  0xe3   : > { %v3414_v27 = vpop.permute.xlu1 %439  ;;  %v3416_v46 = vpop.permute.xlu0 %437 }
  0xe4   : > { %4809 = vst [vmem:[#allocation34_spill] sm:$0xff] %v3414_v27  ;;  %4810 = vst [vmem:[#allocation35_spill] sm:$0xff] %v3416_v46 }
  0xe5   : > { %842 = vrot.lane.b32.xlu1 %v3074_v17, %s2972_s23  ;;  %942 = vrot.lane.b32.xlu0 %v3063_v13, %s2973_s24 }
  0xe7   : > { %v3422_v12 = vpop.permute.xlu1 %443  ;;  %v3424_v21 = vpop.permute.xlu0 %441 }
  0xe8   : > { %4811 = vst [vmem:[#allocation36_spill] sm:$0xff] %v3422_v12  ;;  %4812 = vst [vmem:[#allocation37_spill] sm:$0xff] %v3424_v21 }
  0xe9   : > { %944 = vrot.lane.b32.xlu1 %v3074_v17, %s2973_s24  ;;  %844 = vrot.lane.b32.xlu0 %v3072_v16, %s2972_s23 }
  0xeb   : > { %v3430_v43 = vpop.permute.xlu1 %447  ;;  %v3432_v47 = vpop.permute.xlu0 %445 }
  0xec   : > { %4813 = vst [vmem:[#allocation38_spill] sm:$0xff] %v3430_v43  ;;  %4814 = vst [vmem:[#allocation39_spill] sm:$0xff] %v3432_v47 }
  0xed   : > { %631 = vrot.lane.b32.xlu1 %v3054_v10, %s2974_s25  ;;  %946 = vrot.lane.b32.xlu0 %v3072_v16, %s2973_s24 }
  0xef   : > { %v3438_v6 = vpop.permute.xlu1 %451  ;;  %v3440_v12 = vpop.permute.xlu0 %449 }
  0xf0   : > { %4815 = vst [vmem:[#allocation40_spill] sm:$0xff] %v3438_v6  ;;  %4816 = vst [vmem:[#allocation41_spill] sm:$0xff] %v3440_v12 }
  0xf1   : > { %733 = vrot.lane.b32.xlu1 %v3054_v10, %s2975_s26  ;;  %633 = vrot.lane.b32.xlu0 %v3065_v14, %s2974_s25 }
  0xf3   : > { %v1029_v15 = vpop.permute.xlu1 %1028  ;;  %v3446_v43 = vpop.permute.xlu0 %453 }
  0xf4   : > { %4817 = vst [vmem:[#allocation42_spill] sm:$0xff] %v3446_v43 }
  0xf5   : > { %635 = vrot.lane.b32.xlu1 %v3063_v13, %s2974_s25  ;;  %735 = vrot.lane.b32.xlu0 %v3065_v14, %s2975_s26 }
  0xf7   : > { %v3452_v47 = vpop.permute.xlu1 %1032  ;;  %v1031_v6 = vpop.permute.xlu0 %1030 }
  0xf8   : > { %v1098_v12 = vsel %vm1096_vm0, %v1031_v6, %v3452_v47  ;;  %v1097_v44 = vsel %vm1096_vm0, %v1029_v15, %v1031_v6 }
  0xf9   : > { %737 = vrot.lane.b32.xlu1 %v3063_v13, %s2975_s26  ;;  %637 = vrot.lane.b32.xlu0 %v3074_v17, %s2974_s25  ;;  %v1671_v43 = vsel %vm1130_vm1, %v1097_v44, 0 }
  0xfa   : > { %2782 = vmatprep.subr.msk.bf16.mxu0 %vm1130_vm1, %v1098_v12 }
  0xfb   : > { %1776 = vmatpush1.bf16.msra.mxu0 %v1671_v43  ;;  %v3463_v27 = vpop.permute.xlu1 %828  ;;  %v827_v21 = vpop.permute.xlu0 %826 }
  0xfc   : > { %v894_v44 = vsel %vm892_vm2, %v827_v21, %v3463_v27 }
  0xfd   : > { %529 = vrot.lane.b32.xlu1 %v3054_v10, %s2976_s27  ;;  %739 = vrot.lane.b32.xlu0 %v3074_v17, %s2975_s26 }
  0xff   : > { %v3469_v6 = vpop.permute.xlu1 %930  ;;  %v929_v15 = vpop.permute.xlu0 %928 }
 0x100   : > { %v996_v43 = vsel %vm994_vm3, %v929_v15, %v3469_v6 }
 0x101   : > { %533 = vrot.lane.b32.xlu1 %v3063_v13, %s2976_s27  ;;  %531 = vrot.lane.b32.xlu0 %v3065_v14, %s2976_s27  ;;  %v1533_v12 = vsel %vm1130_vm1, %v894_v44, %v996_v43 }
 0x102   : > { %1777 = vmatprep.subr.bf16.mxu0 %v1533_v12 }
 0x103   : > { %v927_v63 = vpop.permute.xlu1 %926  ;;  %v825_v9 = vpop.permute.xlu0 %824 }
 0x104   : > { %v995_v49 = vsel %vm994_vm3, %v927_v63, %v929_v15  ;;  %v893_v46 = vsel %vm892_vm2, %v825_v9, %v827_v21 }
 0x105   : > { %1050 = vrot.lane.b32.xlu1 %v3083_v20, %s2971_s22  ;;  %535 = vrot.lane.b32.xlu0 %v3074_v17, %s2976_s27  ;;  %v1529_v61 = vsel %vm1130_vm1, %v893_v46, %v995_v49 }
 0x106   : > { %1778 = vmatpush1.bf16.msra.mxu0 %v1529_v61 }
 0x107   : > { %v3487_v0 = vpop.permute.xlu1 %621  ;;  %v620_v40 = vpop.permute.xlu0 %619 }
 0x108   : > { %v687_v21 = vsel %vm685_vm4, %v620_v40, %v3487_v0 }
 0x109   : > { %1054 = vrot.lane.b32.xlu1 %v3092_v23, %s2971_s22  ;;  %1052 = vrot.lane.b32.xlu0 %v3081_v19, %s2971_s22 }
 0x10b   : > { %v3493_v63 = vpop.permute.xlu1 %723  ;;  %v722_v9 = vpop.permute.xlu0 %721 }
 0x10c   : > { %v789_v46 = vsel %vm787_vm5, %v722_v9, %v3493_v63 }
 0x10d   : > { %846 = vrot.lane.b32.xlu1 %v3083_v20, %s2972_s23  ;;  %1056 = vrot.lane.b32.xlu0 %v3090_v22, %s2971_s22  ;;  %v1401_v49 = vsel %vm1130_vm1, %v687_v21, %v789_v46 }
 0x10e   : > { %1779 = vmatprep.subr.bf16.mxu0 %v1401_v49  ;;  %v381_v49 = vsel %vm379_vm8, %v3237_v54, %v3227_v51 }
 0x10f   : > { %v720_v61 = vpop.permute.xlu1 %719  ;;  %v618_v15 = vpop.permute.xlu0 %617 }
 0x110   : > { %v788_v44 = vsel %vm787_vm5, %v720_v61, %v722_v9  ;;  %v686_v43 = vsel %vm685_vm4, %v618_v15, %v620_v40  ;;  %v483_v9 = vsel %vm481_vm7, %v3366_v1, %v3376_v45 }
 0x111   : > { %948 = vrot.lane.b32.xlu1 %v3083_v20, %s2973_s24  ;;  %848 = vrot.lane.b32.xlu0 %v3081_v19, %s2972_s23  ;;  %v1397_v12 = vsel %vm1130_vm1, %v686_v43, %v788_v44  ;;  %v482_v44 = vsel %vm481_vm7, %v3368_v36, %v3366_v1 }
 0x112   : > { %1780 = vmatpush1.bf16.msra.mxu0 %v1397_v12 }
 0x113   : > { %v3511_v17 = vpop.permute.xlu1 %519  ;;  %v518_v21 = vpop.permute.xlu0 %517 }
 0x114   : > { %v585_v40 = vsel %vm583_vm6, %v518_v21, %v3511_v17 }
 0x115   : > { %850 = vrot.lane.b32.xlu1 %v3092_v23, %s2972_s23  ;;  %950 = vrot.lane.b32.xlu0 %v3081_v19, %s2973_s24  ;;  %v1269_v46 = vsel %vm1130_vm1, %v483_v9, %v585_v40  ;;  %v380_v9 = vsel %vm379_vm8, %v3229_v52, %v3237_v54  ;;  %v1137_v40 = vsel %vm1130_vm1, %v3034_v4, %v381_v49 }
 0x116   : > { %1781 = vmatprep.subr.bf16.mxu0 %v1269_v46  ;;  %v1133_v52 = vsel %vm1130_vm1, %v3030_v3, %v380_v9 }
 0x117   : > { %v1035_v61 = vpop.permute.xlu1 %1034  ;;  %v516_v15 = vpop.permute.xlu0 %515 }
 0x118   : > { %v584_v43 = vsel %vm583_vm6, %v516_v15, %v518_v21  ;;  %v1099_v36 = vsel %vm1096_vm0, %v3452_v47, %v1035_v61 }
 0x119   : > { %952 = vrot.lane.b32.xlu1 %v3092_v23, %s2973_s24  ;;  %852 = vrot.lane.b32.xlu0 %v3090_v22, %s2972_s23  ;;  %v1265_v12 = vsel %vm1130_vm1, %v482_v44, %v584_v43  ;;  %v1677_v4 = vsel %vm1130_vm1, %v1099_v36, 0 }
 0x11a   : > { %1782 = vmatpush1.bf16.msra.mxu0 %v1265_v12  ;;  %v4818_v12 = vmov 0  }
 0x11b   : > { %v1039_v46 = vpop.permute.xlu1 %1038  ;;  %1783 = vmatprep.subr.bf16.mxu0 %v1137_v40  ;;  %v1037_v1 = vpop.permute.xlu0 %1036 }
 0x11c   : > { %v1100_v21 = vsel %vm1096_vm0, %v1035_v61, %v1037_v1  ;;  %v1101_v54 = vsel %vm1096_vm0, %v1037_v1, %v1039_v46  ;;  %v3557_v61 = vld [vmem:[%s4725_s1] sm:$0xf] }
 0x11d   : > { %639 = vrot.lane.b32.xlu1 %v3072_v16, %s2974_s25  ;;  %954 = vrot.lane.b32.xlu0 %v3090_v22, %s2973_s24  ;;  %v1683_v15 = vsel %vm1130_vm1, %v1101_v54, 0 }
 0x11e   : > { %2784 = vmatprep.subr.msk.bf16.mxu1 %vm1130_vm1, %v1100_v21  ;;  %1784 = vmatpush1.bf16.msra.mxu0 %v1133_v52 }
 0x11f   : > { %1817 = vmatpush1.bf16.msra.mxu1 %v1677_v4  ;;  %v831_v47 = vpop.permute.xlu1 %830  ;;  %v3552_v49 = vpop.permute.xlu0 %1040 }
 0x120   : > { %v1102_v3 = vsel %vm1096_vm0, %v1039_v46, %v3552_v49  ;;  %v895_v21 = vsel %vm892_vm2, %v3463_v27, %v831_v47 }
 0x121   : > { %741 = vrot.lane.b32.xlu1 %v3072_v16, %s2975_s26  ;;  %641 = vrot.lane.b32.xlu0 %v3083_v20, %s2974_s25 }
 0x122   : > { %2786 = vmatprep.subr.msk.bf16.mxu0 %vm1130_vm1, %v1102_v3  ;;  %2783 = vmatmul.mubr.msk.bf16.vlgmr.msra.gmra.mxu0 %vm1666_vm9, %v3557_v61 }
 0x123   : > { %1858 = vmatpush1.bf16.msra.mxu0 %v1683_v15  ;;  %v933_v44 = vpop.permute.xlu1 %932  ;;  %v833_v43 = vpop.permute.xlu0 %832  ;;  %1883 = vmatprep.mubr.bf16.mxu0 %v4818_v12 }
 0x124   : > { %v997_v9 = vsel %vm994_vm3, %v3469_v6, %v933_v44  ;;  %v896_v1 = vsel %vm892_vm2, %v831_v47, %v833_v43 }
 0x125   : > { %643 = vrot.lane.b32.xlu1 %v3081_v19, %s2974_s25  ;;  %743 = vrot.lane.b32.xlu0 %v3083_v20, %s2975_s26  ;;  %v1537_v6 = vsel %vm1130_vm1, %v895_v21, %v997_v9 }
 0x127   : > { %v835_v40 = vpop.permute.xlu1 %834  ;;  %v935_v46 = vpop.permute.xlu0 %934 }
 0x128   : > { %v998_v36 = vsel %vm994_vm3, %v933_v44, %v935_v46  ;;  %v897_v9 = vsel %vm892_vm2, %v833_v43, %v835_v40 }
 0x129   : > { %745 = vrot.lane.b32.xlu1 %v3081_v19, %s2975_s26  ;;  %645 = vrot.lane.b32.xlu0 %v3092_v23, %s2974_s25  ;;  %v1541_v52 = vsel %vm1130_vm1, %v896_v1, %v998_v36 }
 0x12a   : > { %1818 = vmatprep.subr.bf16.mxu1 %v1541_v52 }
 0x12b   : > { %v937_v4 = vpop.permute.xlu1 %936  ;;  %1819 = vmatpush1.bf16.msra.mxu1 %v1537_v6  ;;  %v3586_v54 = vpop.permute.xlu0 %836 }
 0x12c   : > { %v999_v27 = vsel %vm994_vm3, %v935_v46, %v937_v4  ;;  %v898_v15 = vsel %vm892_vm2, %v835_v40, %v3586_v54 }
 0x12d   : > { %537 = vrot.lane.b32.xlu1 %v3072_v16, %s2976_s27  ;;  %747 = vrot.lane.b32.xlu0 %v3092_v23, %s2975_s26  ;;  %v1545_v46 = vsel %vm1130_vm1, %v897_v9, %v999_v27 }
 0x12f   : > { %v624_v47 = vpop.permute.xlu1 %623  ;;  %v3593_v3 = vpop.permute.xlu0 %938 }
 0x130   : > { %v1000_v44 = vsel %vm994_vm3, %v937_v4, %v3593_v3  ;;  %v688_v27 = vsel %vm685_vm4, %v3487_v0, %v624_v47 }
 0x131   : > { %541 = vrot.lane.b32.xlu1 %v3081_v19, %s2976_s27  ;;  %539 = vrot.lane.b32.xlu0 %v3083_v20, %s2976_s27  ;;  %v1549_v1 = vsel %vm1130_vm1, %v898_v15, %v1000_v44 }
 0x132   : > { %1859 = vmatprep.subr.bf16.mxu0 %v1549_v1 }
 0x133   : > { %v726_v36 = vpop.permute.xlu1 %725  ;;  %1860 = vmatpush1.bf16.msra.mxu0 %v1545_v46  ;;  %v626_v21 = vpop.permute.xlu0 %625 }
 0x134   : > { %v790_v43 = vsel %vm787_vm5, %v3493_v63, %v726_v36  ;;  %v689_v6 = vsel %vm685_vm4, %v624_v47, %v626_v21 }
 0x135   : > { %1058 = vrot.lane.b32.xlu1 %v3101_v26, %s2971_s22  ;;  %543 = vrot.lane.b32.xlu0 %v3092_v23, %s2976_s27  ;;  %v1405_v63 = vsel %vm1130_vm1, %v688_v27, %v790_v43 }
 0x137   : > { %v628_v40 = vpop.permute.xlu1 %627  ;;  %v728_v52 = vpop.permute.xlu0 %727 }
 0x138   : > { %v791_v4 = vsel %vm787_vm5, %v726_v36, %v728_v52  ;;  %v690_v43 = vsel %vm685_vm4, %v626_v21, %v628_v40  ;;  %v383_v21 = vsel %vm379_vm8, %v3235_v53, %v3245_v56 }
 0x139   : > { %1062 = vrot.lane.b32.xlu1 %v3110_v29, %s2971_s22  ;;  %1060 = vrot.lane.b32.xlu0 %v3099_v25, %s2971_s22  ;;  %v1409_v15 = vsel %vm1130_vm1, %v689_v6, %v791_v4 }
 0x13a   : > { %1820 = vmatprep.subr.bf16.mxu1 %v1409_v15 }
 0x13b   : > { %v730_v44 = vpop.permute.xlu1 %729  ;;  %1821 = vmatpush1.bf16.msra.mxu1 %v1405_v63  ;;  %v3622_v9 = vpop.permute.xlu0 %629 }
 0x13c   : > { %v792_v0 = vsel %vm787_vm5, %v728_v52, %v730_v44  ;;  %v691_v46 = vsel %vm685_vm4, %v628_v40, %v3622_v9  ;;  %v485_v40 = vsel %vm481_vm7, %v3374_v42, %v3384_v30 }
 0x13d   : > { %854 = vrot.lane.b32.xlu1 %v3101_v26, %s2972_s23  ;;  %1064 = vrot.lane.b32.xlu0 %v3108_v28, %s2971_s22  ;;  %v1413_v52 = vsel %vm1130_vm1, %v690_v43, %v792_v0  ;;  %v385_v43 = vsel %vm379_vm8, %v3243_v55, %v3253_v58 }
 0x13f   : > { %v522_v47 = vpop.permute.xlu1 %521  ;;  %v3629_v1 = vpop.permute.xlu0 %731 }
 0x140   : > { %v793_v36 = vsel %vm787_vm5, %v730_v44, %v3629_v1  ;;  %v586_v4 = vsel %vm583_vm6, %v3511_v17, %v522_v47  ;;  %v484_v44 = vsel %vm481_vm7, %v3376_v45, %v3374_v42  ;;  %v1145_v45 = vsel %vm1130_vm1, %v3038_v5, %v383_v21 }
 0x141   : > { %956 = vrot.lane.b32.xlu1 %v3101_v26, %s2973_s24  ;;  %856 = vrot.lane.b32.xlu0 %v3099_v25, %s2972_s23  ;;  %v1417_v6 = vsel %vm1130_vm1, %v691_v46, %v793_v36  ;;  %v1273_v0 = vsel %vm1130_vm1, %v484_v44, %v586_v4  ;;  %v382_v46 = vsel %vm379_vm8, %v3227_v51, %v3235_v53 }
 0x142   : > { %1861 = vmatprep.subr.bf16.mxu0 %v1417_v6  ;;  %v487_v6 = vsel %vm481_vm7, %v3382_v48, %v3392_v50  ;;  %v486_v53 = vsel %vm481_vm7, %v3384_v30, %v3382_v48  ;;  %v1153_v21 = vsel %vm1130_vm1, %v3045_v7, %v385_v43 }
 0x143   : > { %v526_v27 = vpop.permute.xlu1 %525  ;;  %1862 = vmatpush1.bf16.msra.mxu0 %v1413_v52  ;;  %v524_v15 = vpop.permute.xlu0 %523  ;;  %v1141_v52 = vsel %vm1130_vm1, %v3028_v2, %v382_v46 }
 0x144   : > { %v587_v63 = vsel %vm583_vm6, %v522_v47, %v524_v15  ;;  %v588_v47 = vsel %vm583_vm6, %v524_v15, %v526_v27 }
 0x145   : > { %858 = vrot.lane.b32.xlu1 %v3110_v29, %s2972_s23  ;;  %958 = vrot.lane.b32.xlu0 %v3099_v25, %s2973_s24  ;;  %v1277_v17 = vsel %vm1130_vm1, %v485_v40, %v587_v63  ;;  %v1281_v4 = vsel %vm1130_vm1, %v486_v53, %v588_v47 }
 0x146   : > { %1822 = vmatprep.subr.bf16.mxu1 %v1277_v17 }
 0x147   : > { %v1043_v36 = vpop.permute.xlu1 %1042  ;;  %1823 = vmatpush1.bf16.msra.mxu1 %v1273_v0  ;;  %v3664_v42 = vpop.permute.xlu0 %527 }
 0x148   : > { %v589_v51 = vsel %vm583_vm6, %v526_v27, %v3664_v42  ;;  %1824 = vmatprep.subr.bf16.mxu1 %v1145_v45  ;;  %v384_v27 = vsel %vm379_vm8, %v3245_v56, %v3243_v55  ;;  %v1103_v30 = vsel %vm1096_vm0, %v3552_v49, %v1043_v36 }
 0x149   : > { %960 = vrot.lane.b32.xlu1 %v3110_v29, %s2973_s24  ;;  %860 = vrot.lane.b32.xlu0 %v3108_v28, %s2972_s23  ;;  %v1285_v5 = vsel %vm1130_vm1, %v487_v6, %v589_v51  ;;  %v1149_v2 = vsel %vm1130_vm1, %v3047_v8, %v384_v27  ;;  %v1689_v55 = vsel %vm1130_vm1, %v1103_v30, 0 }
 0x14a   : > { %1863 = vmatprep.subr.bf16.mxu0 %v1285_v5 }
 0x14b   : > { %v1047_v48 = vpop.permute.xlu1 %1046  ;;  %1825 = vmatpush1.bf16.msra.mxu1 %v1141_v52  ;;  %1864 = vmatpush1.bf16.msra.mxu0 %v1281_v4  ;;  %v1045_v15 = vpop.permute.xlu0 %1044 }
 0x14c   : > { %1865 = vmatprep.subr.bf16.mxu0 %v1153_v21  ;;  %v1104_v40 = vsel %vm1096_vm0, %v1043_v36, %v1045_v15  ;;  %v1105_v7 = vsel %vm1096_vm0, %v1045_v15, %v1047_v48 }
 0x14d   : > { %647 = vrot.lane.b32.xlu1 %v3090_v22, %s2974_s25  ;;  %962 = vrot.lane.b32.xlu0 %v3108_v28, %s2973_s24  ;;  %v1695_v8 = vsel %vm1130_vm1, %v1105_v7, 0 }
 0x14e   : > { %2788 = vmatprep.subr.msk.bf16.mxu1 %vm1130_vm1, %v1104_v40  ;;  %2785 = vmatmul.mubr.msk.bf16.vlgmr.msra.gmra.mxu1 %vm1666_vm9, %v3557_v61 }
 0x14f   : > { %v839_v56 = vpop.permute.xlu1 %838  ;;  %1866 = vmatpush1.bf16.msra.mxu0 %v1149_v2  ;;  %1899 = vmatpush1.bf16.msra.mxu1 %v1689_v55  ;;  %v3706_v49 = vpop.permute.xlu0 %1048 }
 0x150   : > { %v1106_v63 = vsel %vm1096_vm0, %v1047_v48, %v3706_v49  ;;  %1924 = vmatprep.mubr.bf16.mxu1 %v4818_v12  ;;  %v899_v43 = vsel %vm892_vm2, %v3586_v54, %v839_v56 }
 0x151   : > { %749 = vrot.lane.b32.xlu1 %v3090_v22, %s2975_s26  ;;  %649 = vrot.lane.b32.xlu0 %v3101_v26, %s2974_s25 }
 0x152   : > { %2790 = vmatprep.subr.msk.bf16.mxu0 %vm1130_vm1, %v1106_v63  ;;  %2787 = vmatmul.mubr.msk.bf16.vlgmr.msra.gmra.mxu0 %vm1666_vm9, %v3557_v61 }
 0x153   : > { %v941_v44 = vpop.permute.xlu1 %940  ;;  %1940 = vmatpush1.bf16.msra.mxu0 %v1695_v8  ;;  %v841_v17 = vpop.permute.xlu0 %840  ;;  %1965 = vmatprep.mubr.bf16.mxu0 %v4818_v12 }
 0x154   : > { %v1001_v0 = vsel %vm994_vm3, %v3593_v3, %v941_v44  ;;  %v900_v36 = vsel %vm892_vm2, %v839_v56, %v841_v17 }
 0x155   : > { %651 = vrot.lane.b32.xlu1 %v3099_v25, %s2974_s25  ;;  %751 = vrot.lane.b32.xlu0 %v3101_v26, %s2975_s26  ;;  %v1553_v3 = vsel %vm1130_vm1, %v899_v43, %v1001_v0 }
 0x157   : > { %v843_v46 = vpop.permute.xlu1 %842  ;;  %v943_v47 = vpop.permute.xlu0 %942 }
 0x158   : > { %v1002_v45 = vsel %vm994_vm3, %v941_v44, %v943_v47  ;;  %v901_v30 = vsel %vm892_vm2, %v841_v17, %v843_v46 }
 0x159   : > { %753 = vrot.lane.b32.xlu1 %v3099_v25, %s2975_s26  ;;  %653 = vrot.lane.b32.xlu0 %v3110_v29, %s2974_s25  ;;  %v1557_v6 = vsel %vm1130_vm1, %v900_v36, %v1002_v45 }
 0x15a   : > { %1900 = vmatprep.subr.bf16.mxu1 %v1557_v6 }
 0x15b   : > { %v945_v51 = vpop.permute.xlu1 %944  ;;  %1901 = vmatpush1.bf16.msra.mxu1 %v1553_v3  ;;  %v3736_v53 = vpop.permute.xlu0 %844 }
 0x15c   : > { %v1003_v54 = vsel %vm994_vm3, %v943_v47, %v945_v51  ;;  %v902_v4 = vsel %vm892_vm2, %v843_v46, %v3736_v53 }
 0x15d   : > { %545 = vrot.lane.b32.xlu1 %v3090_v22, %s2976_s27  ;;  %755 = vrot.lane.b32.xlu0 %v3110_v29, %s2975_s26  ;;  %v1561_v15 = vsel %vm1130_vm1, %v901_v30, %v1003_v54 }
 0x15f   : > { %v632_v5 = vpop.permute.xlu1 %631  ;;  %v3743_v52 = vpop.permute.xlu0 %946 }
 0x160   : > { %v1004_v27 = vsel %vm994_vm3, %v945_v51, %v3743_v52  ;;  %v692_v8 = vsel %vm685_vm4, %v3622_v9, %v632_v5 }
 0x161   : > { %549 = vrot.lane.b32.xlu1 %v3099_v25, %s2976_s27  ;;  %547 = vrot.lane.b32.xlu0 %v3101_v26, %s2976_s27  ;;  %v1565_v48 = vsel %vm1130_vm1, %v902_v4, %v1004_v27  ;;  %v387_v4 = vsel %vm379_vm8, %v3251_v57, %v3261_v60  ;;  %v489_v27 = vsel %vm481_vm7, %v3390_v39, %v3400_v33 }
 0x162   : > { %1941 = vmatprep.subr.bf16.mxu0 %v1565_v48  ;;  %v488_v48 = vsel %vm481_vm7, %v3392_v50, %v3390_v39  ;;  %v1161_v39 = vsel %vm1130_vm1, %v3054_v10, %v387_v4 }
 0x163   : > { %v734_v21 = vpop.permute.xlu1 %733  ;;  %1942 = vmatpush1.bf16.msra.mxu0 %v1561_v15  ;;  %v634_v40 = vpop.permute.xlu0 %633 }
 0x164   : > { %v794_v2 = vsel %vm787_vm5, %v3629_v1, %v734_v21  ;;  %v693_v56 = vsel %vm685_vm4, %v632_v5, %v634_v40 }
 0x165   : > { %1066 = vrot.lane.b32.xlu1 %v3119_v32, %s2971_s22  ;;  %551 = vrot.lane.b32.xlu0 %v3110_v29, %s2976_s27  ;;  %v1421_v1 = vsel %vm1130_vm1, %v692_v8, %v794_v2  ;;  %v388_v8 = vsel %vm379_vm8, %v3261_v60, %v3259_v59 }
 0x167   : > { %v636_v55 = vpop.permute.xlu1 %635  ;;  %v736_v7 = vpop.permute.xlu0 %735 }
 0x168   : > { %v795_v63 = vsel %vm787_vm5, %v734_v21, %v736_v7  ;;  %v694_v43 = vsel %vm685_vm4, %v634_v40, %v636_v55  ;;  %v386_v21 = vsel %vm379_vm8, %v3253_v58, %v3251_v57  ;;  %v490_v58 = vsel %vm481_vm7, %v3400_v33, %v3398_v24 }
 0x169   : > { %1070 = vrot.lane.b32.xlu1 %v3128_v35, %s2971_s22  ;;  %1068 = vrot.lane.b32.xlu0 %v3117_v31, %s2971_s22  ;;  %v1425_v44 = vsel %vm1130_vm1, %v693_v56, %v795_v63  ;;  %v1157_v56 = vsel %vm1130_vm1, %v3056_v11, %v386_v21  ;;  %v1165_v11 = vsel %vm1130_vm1, %v3065_v14, %v388_v8 }
 0x16a   : > { %1902 = vmatprep.subr.bf16.mxu1 %v1425_v44 }
 0x16b   : > { %v738_v17 = vpop.permute.xlu1 %737  ;;  %1903 = vmatpush1.bf16.msra.mxu1 %v1421_v1  ;;  %v3772_v0 = vpop.permute.xlu0 %637 }
 0x16c   : > { %v796_v9 = vsel %vm787_vm5, %v736_v7, %v738_v17  ;;  %v695_v36 = vsel %vm685_vm4, %v636_v55, %v3772_v0  ;;  %v389_v55 = vsel %vm379_vm8, %v3259_v59, %v3269_v62  ;;  %v491_v7 = vsel %vm481_vm7, %v3398_v24, %v3408_v18 }
 0x16d   : > { %862 = vrot.lane.b32.xlu1 %v3119_v32, %s2972_s23  ;;  %1072 = vrot.lane.b32.xlu0 %v3126_v34, %s2971_s22  ;;  %v1429_v3 = vsel %vm1130_vm1, %v694_v43, %v796_v9  ;;  %v1169_v1 = vsel %vm1130_vm1, %v3063_v13, %v389_v55 }
 0x16f   : > { %v530_v46 = vpop.permute.xlu1 %529  ;;  %v3779_v47 = vpop.permute.xlu0 %739 }
 0x170   : > { %v797_v45 = vsel %vm787_vm5, %v738_v17, %v3779_v47  ;;  %v590_v51 = vsel %vm583_vm6, %v3664_v42, %v530_v46 }
 0x171   : > { %964 = vrot.lane.b32.xlu1 %v3119_v32, %s2973_s24  ;;  %864 = vrot.lane.b32.xlu0 %v3117_v31, %s2972_s23  ;;  %v1433_v6 = vsel %vm1130_vm1, %v695_v36, %v797_v45  ;;  %v1289_v15 = vsel %vm1130_vm1, %v488_v48, %v590_v51 }
 0x172   : > { %1943 = vmatprep.subr.bf16.mxu0 %v1433_v6 }
 0x173   : > { %v534_v54 = vpop.permute.xlu1 %533  ;;  %1944 = vmatpush1.bf16.msra.mxu0 %v1429_v3  ;;  %v532_v5 = vpop.permute.xlu0 %531 }
 0x174   : > { %v591_v30 = vsel %vm583_vm6, %v530_v46, %v532_v5  ;;  %v592_v40 = vsel %vm583_vm6, %v532_v5, %v534_v54 }
 0x175   : > { %866 = vrot.lane.b32.xlu1 %v3128_v35, %s2972_s23  ;;  %966 = vrot.lane.b32.xlu0 %v3117_v31, %s2973_s24  ;;  %v1293_v42 = vsel %vm1130_vm1, %v489_v27, %v591_v30  ;;  %v1297_v63 = vsel %vm1130_vm1, %v490_v58, %v592_v40 }
 0x176   : > { %1904 = vmatprep.subr.bf16.mxu1 %v1293_v42 }
 0x177   : > { %v1051_v2 = vpop.permute.xlu1 %1050  ;;  %1905 = vmatpush1.bf16.msra.mxu1 %v1289_v15  ;;  %v3814_v50 = vpop.permute.xlu0 %535 }
 0x178   : > { %v593_v57 = vsel %vm583_vm6, %v534_v54, %v3814_v50  ;;  %1906 = vmatprep.subr.bf16.mxu1 %v1161_v39  ;;  %v1107_v24 = vsel %vm1096_vm0, %v3706_v49, %v1051_v2 }
 0x179   : > { %968 = vrot.lane.b32.xlu1 %v3128_v35, %s2973_s24  ;;  %868 = vrot.lane.b32.xlu0 %v3126_v34, %s2972_s23  ;;  %v1301_v10 = vsel %vm1130_vm1, %v491_v7, %v593_v57  ;;  %v1701_v59 = vsel %vm1130_vm1, %v1107_v24, 0 }
 0x17a   : > { %1945 = vmatprep.subr.bf16.mxu0 %v1301_v10 }
 0x17b   : > { %v1055_v33 = vpop.permute.xlu1 %1054  ;;  %1907 = vmatpush1.bf16.msra.mxu1 %v1157_v56  ;;  %1946 = vmatpush1.bf16.msra.mxu0 %v1297_v63  ;;  %v1053_v44 = vpop.permute.xlu0 %1052 }
 0x17c   : > { %1947 = vmatprep.subr.bf16.mxu0 %v1169_v1  ;;  %v1108_v17 = vsel %vm1096_vm0, %v1051_v2, %v1053_v44  ;;  %v1109_v13 = vsel %vm1096_vm0, %v1053_v44, %v1055_v33 }
 0x17d   : > { %655 = vrot.lane.b32.xlu1 %v3108_v28, %s2974_s25  ;;  %970 = vrot.lane.b32.xlu0 %v3126_v34, %s2973_s24  ;;  %v1707_v14 = vsel %vm1130_vm1, %v1109_v13, 0  ;;  %v4819_v13 = vld [vmem:[#allocation3_spill] sm:$0xff] }
 0x17e   : > { %2792 = vmatprep.subr.msk.bf16.mxu1 %vm1130_vm1, %v1108_v17  ;;  %2789 = vmatmul.mubr.msk.bf16.vlgmr.msra.gmra.mxu1 %vm1666_vm9, %v3557_v61 }
 0x17f   : > { %v847_v60 = vpop.permute.xlu1 %846  ;;  %1948 = vmatpush1.bf16.msra.mxu0 %v1165_v11  ;;  %1981 = vmatpush1.bf16.msra.mxu1 %v1701_v59  ;;  %v3856_v49 = vpop.permute.xlu0 %1056 }
 0x180   : > { %v1110_v9 = vsel %vm1096_vm0, %v1055_v33, %v3856_v49  ;;  %2006 = vmatprep.mubr.bf16.mxu1 %v4818_v12  ;;  %v903_v54 = vsel %vm892_vm2, %v3736_v53, %v847_v60 }
 0x181   : > { %757 = vrot.lane.b32.xlu1 %v3108_v28, %s2975_s26  ;;  %657 = vrot.lane.b32.xlu0 %v3119_v32, %s2974_s25 }
 0x182   : > { %2794 = vmatprep.subr.msk.bf16.mxu0 %vm1130_vm1, %v1110_v9  ;;  %2791 = vmatmul.mubr.msk.bf16.vlgmr.msra.gmra.mxu0 %vm1666_vm9, %v3557_v61 }
 0x183   : > { %v949_v46 = vpop.permute.xlu1 %948  ;;  %2022 = vmatpush1.bf16.msra.mxu0 %v1707_v14  ;;  %v849_v36 = vpop.permute.xlu0 %848  ;;  %2047 = vmatprep.mubr.bf16.mxu0 %v4818_v12 }
 0x184   : > { %v1005_v45 = vsel %vm994_vm3, %v3743_v52, %v949_v46  ;;  %v904_v3 = vsel %vm892_vm2, %v847_v60, %v849_v36 }
 0x185   : > { %659 = vrot.lane.b32.xlu1 %v3117_v31, %s2974_s25  ;;  %759 = vrot.lane.b32.xlu0 %v3119_v32, %s2975_s26  ;;  %v1569_v52 = vsel %vm1130_vm1, %v903_v54, %v1005_v45  ;;  %v4820_v45 = vld [vmem:[#allocation12_spill] sm:$0xff] }
 0x187   : > { %v851_v43 = vpop.permute.xlu1 %850  ;;  %v951_v6 = vpop.permute.xlu0 %950 }
 0x188   : > { %v1006_v51 = vsel %vm994_vm3, %v949_v46, %v951_v6  ;;  %v905_v21 = vsel %vm892_vm2, %v849_v36, %v851_v43 }
 0x189   : > { %761 = vrot.lane.b32.xlu1 %v3117_v31, %s2975_s26  ;;  %661 = vrot.lane.b32.xlu0 %v3128_v35, %s2974_s25  ;;  %v1573_v5 = vsel %vm1130_vm1, %v904_v3, %v1006_v51  ;;  %v4822_v3 = vld [vmem:[#allocation35_spill] sm:$0xff]  ;;  %v4823_v51 = vld [vmem:[#allocation33_spill] sm:$0xff] }
 0x18a   : > { %1982 = vmatprep.subr.bf16.mxu1 %v1573_v5  ;;  %v493_v54 = vsel %vm481_vm7, %v4823_v51, %v4822_v3 }
 0x18b   : > { %v953_v4 = vpop.permute.xlu1 %952  ;;  %1983 = vmatpush1.bf16.msra.mxu1 %v1569_v52  ;;  %v3886_v27 = vpop.permute.xlu0 %852  ;;  %v492_v52 = vsel %vm481_vm7, %v3408_v18, %v4823_v51 }
 0x18c   : > { %v1007_v53 = vsel %vm994_vm3, %v951_v6, %v953_v4  ;;  %v906_v42 = vsel %vm892_vm2, %v851_v43, %v3886_v27  ;;  %v4821_v43 = vld [vmem:[#allocation10_spill] sm:$0xff] }
 0x18d   : > { %553 = vrot.lane.b32.xlu1 %v3108_v28, %s2976_s27  ;;  %763 = vrot.lane.b32.xlu0 %v3128_v35, %s2975_s26  ;;  %v1577_v2 = vsel %vm1130_vm1, %v905_v21, %v1007_v53  ;;  %v391_v6 = vsel %vm379_vm8, %v4821_v43, %v4820_v45  ;;  %v390_v53 = vsel %vm379_vm8, %v3269_v62, %v4821_v43  ;;  %v4824_v21 = vld [vmem:[#allocation14_spill] sm:$0xff] }
 0x18f   : > { %v640_v30 = vpop.permute.xlu1 %639  ;;  %v3893_v48 = vpop.permute.xlu0 %954 }
 0x190   : > { %v1008_v15 = vsel %vm994_vm3, %v953_v4, %v3893_v48  ;;  %v696_v63 = vsel %vm685_vm4, %v3772_v0, %v640_v30 }
 0x191   : > { %455 = vrot.lane.b32.xlu1 %v3117_v31, %s2970_s21  ;;  %555 = vrot.lane.b32.xlu0 %v3119_v32, %s2976_s27  ;;  %v1581_v40 = vsel %vm1130_vm1, %v906_v42, %v1008_v15  ;;  %v1177_v15 = vsel %vm1130_vm1, %v3072_v16, %v391_v6 }
 0x192   : > { %2023 = vmatprep.subr.bf16.mxu0 %v1581_v40  ;;  %v4825_v40 = vld [vmem:[#allocation11_spill] sm:$0xff] }
 0x193   : > { %v742_v39 = vpop.permute.xlu1 %741  ;;  %2024 = vmatpush1.bf16.msra.mxu0 %v1577_v2  ;;  %v642_v55 = vpop.permute.xlu0 %641  ;;  %v393_v2 = vsel %vm379_vm8, %v4825_v40, %v4824_v21 }
 0x194   : > { %v798_v7 = vsel %vm787_vm5, %v3779_v47, %v742_v39  ;;  %v697_v10 = vsel %vm685_vm4, %v640_v30, %v642_v55 }
 0x195   : > { %557 = vrot.lane.b32.xlu1 %v3117_v31, %s2976_s27  ;;  %457 = vrot.lane.b32.xlu0 %v3128_v35, %s2970_s21  ;;  %v1437_v47 = vsel %vm1130_vm1, %v696_v63, %v798_v7  ;;  %v392_v63 = vsel %vm379_vm8, %v4820_v45, %v4825_v40 }
 0x197   : > { %v644_v57 = vpop.permute.xlu1 %643  ;;  %v744_v58 = vpop.permute.xlu0 %743 }
 0x198   : > { %v799_v56 = vsel %vm787_vm5, %v742_v39, %v744_v58  ;;  %v698_v59 = vsel %vm685_vm4, %v642_v55, %v644_v57  ;;  %v4826_v39 = vld [vmem:[#allocation37_spill] sm:$0xff]  ;;  %v4827_v55 = vld [vmem:[#allocation34_spill] sm:$0xff] }
 0x199   : > { %1074 = vrot.lane.b32.xlu1 %v3137_v38, %s2971_s22  ;;  %559 = vrot.lane.b32.xlu0 %v3128_v35, %s2976_s27  ;;  %v1441_v8 = vsel %vm1130_vm1, %v697_v10, %v799_v56  ;;  %v495_v7 = vsel %vm481_vm7, %v4827_v55, %v4826_v39 }
 0x19a   : > { %1984 = vmatprep.subr.bf16.mxu1 %v1441_v8 }
 0x19b   : > { %v746_v24 = vpop.permute.xlu1 %745  ;;  %1985 = vmatpush1.bf16.msra.mxu1 %v1437_v47  ;;  %v3922_v33 = vpop.permute.xlu0 %645 }
 0x19c   : > { %v800_v0 = vsel %vm787_vm5, %v744_v58, %v746_v24  ;;  %v699_v17 = vsel %vm685_vm4, %v644_v57, %v3922_v33  ;;  %v494_v57 = vsel %vm481_vm7, %v4822_v3, %v4827_v55  ;;  %v4828_v58 = vld [vmem:[#allocation2_spill] sm:$0xff] }
 0x19d   : > { %1078 = vrot.lane.b32.xlu1 %v3146_v41, %s2971_s22  ;;  %1076 = vrot.lane.b32.xlu0 %v3135_v37, %s2971_s22  ;;  %v1445_v9 = vsel %vm1130_vm1, %v698_v59, %v800_v0  ;;  %v1173_v10 = vsel %vm1130_vm1, %v4828_v58, %v390_v53  ;;  %v1185_v0 = vsel %vm1130_vm1, %v3081_v19, %v393_v2 }
 0x19f   : > { %v538_v44 = vpop.permute.xlu1 %537  ;;  %v3929_v1 = vpop.permute.xlu0 %747 }
 0x1a0   : > { %v801_v11 = vsel %vm787_vm5, %v746_v24, %v3929_v1  ;;  %v594_v14 = vsel %vm583_vm6, %v3814_v50, %v538_v44 }
 0x1a1   : > { %870 = vrot.lane.b32.xlu1 %v3137_v38, %s2972_s23  ;;  %1080 = vrot.lane.b32.xlu0 %v4819_v13, %s2971_s22  ;;  %v1449_v60 = vsel %vm1130_vm1, %v699_v17, %v801_v11  ;;  %v1305_v4 = vsel %vm1130_vm1, %v492_v52, %v594_v14 }
 0x1a2   : > { %2025 = vmatprep.subr.bf16.mxu0 %v1449_v60 }
 0x1a3   : > { %v542_v46 = vpop.permute.xlu1 %541  ;;  %2026 = vmatpush1.bf16.msra.mxu0 %v1445_v9  ;;  %v540_v36 = vpop.permute.xlu0 %539 }
 0x1a4   : > { %v595_v5 = vsel %vm583_vm6, %v538_v44, %v540_v36  ;;  %v596_v30 = vsel %vm583_vm6, %v540_v36, %v542_v46 }
 0x1a5   : > { %972 = vrot.lane.b32.xlu1 %v3137_v38, %s2973_s24  ;;  %872 = vrot.lane.b32.xlu0 %v3135_v37, %s2972_s23  ;;  %v1309_v50 = vsel %vm1130_vm1, %v493_v54, %v595_v5  ;;  %v1313_v56 = vsel %vm1130_vm1, %v494_v57, %v596_v30 }
 0x1a6   : > { %1986 = vmatprep.subr.bf16.mxu1 %v1309_v50 }
 0x1a7   : > { %v1059_v42 = vpop.permute.xlu1 %1058  ;;  %1987 = vmatpush1.bf16.msra.mxu1 %v1305_v4  ;;  %v3964_v18 = vpop.permute.xlu0 %543 }
 0x1a8   : > { %v597_v62 = vsel %vm583_vm6, %v542_v46, %v3964_v18  ;;  %1988 = vmatprep.subr.bf16.mxu1 %v1177_v15  ;;  %v1111_v8 = vsel %vm1096_vm0, %v3856_v49, %v1059_v42  ;;  %v1181_v49 = vsel %vm1130_vm1, %v3083_v20, %v392_v63 }
 0x1a9   : > { %874 = vrot.lane.b32.xlu1 %v3146_v41, %s2972_s23  ;;  %974 = vrot.lane.b32.xlu0 %v3135_v37, %s2973_s24  ;;  %v1317_v16 = vsel %vm1130_vm1, %v495_v7, %v597_v62  ;;  %v1713_v17 = vsel %vm1130_vm1, %v1111_v8, 0 }
 0x1aa   : > { %2027 = vmatprep.subr.bf16.mxu0 %v1317_v16 }
 0x1ab   : > { %v1063_v47 = vpop.permute.xlu1 %1062  ;;  %1989 = vmatpush1.bf16.msra.mxu1 %v1173_v10  ;;  %2028 = vmatpush1.bf16.msra.mxu0 %v1313_v56  ;;  %v1061_v24 = vpop.permute.xlu0 %1060 }
 0x1ac   : > { %2029 = vmatprep.subr.bf16.mxu0 %v1185_v0  ;;  %v1112_v44 = vsel %vm1096_vm0, %v1059_v42, %v1061_v24  ;;  %v1113_v19 = vsel %vm1096_vm0, %v1061_v24, %v1063_v47 }
 0x1ad   : > { %976 = vrot.lane.b32.xlu1 %v3146_v41, %s2973_s24  ;;  %876 = vrot.lane.b32.xlu0 %v4819_v13, %s2972_s23  ;;  %v1719_v20 = vsel %vm1130_vm1, %v1113_v19, 0 }
 0x1ae   : > { %2796 = vmatprep.subr.msk.bf16.mxu1 %vm1130_vm1, %v1112_v44  ;;  %2793 = vmatmul.mubr.msk.bf16.vlgmr.msra.gmra.mxu1 %vm1666_vm9, %v3557_v61 }
 0x1af   : > { %v855_v11 = vpop.permute.xlu1 %854  ;;  %2030 = vmatpush1.bf16.msra.mxu0 %v1181_v49  ;;  %2063 = vmatpush1.bf16.msra.mxu1 %v1713_v17  ;;  %v4006_v59 = vpop.permute.xlu0 %1064  ;;  %v4829_v49 = vld [vmem:[#allocation5_spill] sm:$0xff] }
 0x1b0   : > { %v1114_v60 = vsel %vm1096_vm0, %v1063_v47, %v4006_v59  ;;  %2088 = vmatprep.mubr.bf16.mxu1 %v4818_v12  ;;  %v907_v3 = vsel %vm892_vm2, %v3886_v27, %v855_v11 }
 0x1b1   : > { %663 = vrot.lane.b32.xlu1 %v3126_v34, %s2974_s25  ;;  %978 = vrot.lane.b32.xlu0 %v4819_v13, %s2973_s24 }
 0x1b2   : > { %2798 = vmatprep.subr.msk.bf16.mxu0 %vm1130_vm1, %v1114_v60  ;;  %2795 = vmatmul.mubr.msk.bf16.vlgmr.msra.gmra.mxu0 %vm1666_vm9, %v3557_v61 }
 0x1b3   : > { %v957_v9 = vpop.permute.xlu1 %956  ;;  %2104 = vmatpush1.bf16.msra.mxu0 %v1719_v20  ;;  %v857_v14 = vpop.permute.xlu0 %856  ;;  %2129 = vmatprep.mubr.bf16.mxu0 %v4818_v12 }
 0x1b4   : > { %v1009_v46 = vsel %vm994_vm3, %v3893_v48, %v957_v9  ;;  %v908_v43 = vsel %vm892_vm2, %v855_v11, %v857_v14 }
 0x1b5   : > { %765 = vrot.lane.b32.xlu1 %v3126_v34, %s2975_s26  ;;  %665 = vrot.lane.b32.xlu0 %v3137_v38, %s2974_s25  ;;  %v1585_v48 = vsel %vm1130_vm1, %v907_v3, %v1009_v46 }
 0x1b7   : > { %v859_v36 = vpop.permute.xlu1 %858  ;;  %v959_v45 = vpop.permute.xlu0 %958 }
 0x1b8   : > { %v1010_v6 = vsel %vm994_vm3, %v957_v9, %v959_v45  ;;  %v909_v30 = vsel %vm892_vm2, %v857_v14, %v859_v36  ;;  %v4830_v9 = vld [vmem:[#allocation16_spill] sm:$0xff]  ;;  %v4831_v14 = vld [vmem:[#allocation13_spill] sm:$0xff] }
 0x1b9   : > { %667 = vrot.lane.b32.xlu1 %v3135_v37, %s2974_s25  ;;  %767 = vrot.lane.b32.xlu0 %v3137_v38, %s2975_s26  ;;  %v1589_v51 = vsel %vm1130_vm1, %v908_v43, %v1010_v6  ;;  %v395_v46 = vsel %vm379_vm8, %v4831_v14, %v4830_v9 }
 0x1ba   : > { %2064 = vmatprep.subr.bf16.mxu1 %v1589_v51  ;;  %v4834_v51 = vld [vmem:[#allocation7_spill] sm:$0xff] }
 0x1bb   : > { %v961_v54 = vpop.permute.xlu1 %960  ;;  %2065 = vmatpush1.bf16.msra.mxu1 %v1585_v48  ;;  %v4036_v5 = vpop.permute.xlu0 %860 }
 0x1bc   : > { %v1011_v27 = vsel %vm994_vm3, %v959_v45, %v961_v54  ;;  %v910_v4 = vsel %vm892_vm2, %v859_v36, %v4036_v5  ;;  %v4832_v36 = vld [vmem:[#allocation39_spill] sm:$0xff]  ;;  %v4833_v45 = vld [vmem:[#allocation36_spill] sm:$0xff] }
 0x1bd   : > { %769 = vrot.lane.b32.xlu1 %v3135_v37, %s2975_s26  ;;  %669 = vrot.lane.b32.xlu0 %v3146_v41, %s2974_s25  ;;  %v1593_v15 = vsel %vm1130_vm1, %v909_v30, %v1011_v27  ;;  %v497_v43 = vsel %vm481_vm7, %v4833_v45, %v4832_v36  ;;  %v496_v3 = vsel %vm481_vm7, %v4826_v39, %v4833_v45  ;;  %v4836_v30 = vld [vmem:[#allocation18_spill] sm:$0xff] }
 0x1be   : > { %v394_v27 = vsel %vm379_vm8, %v4824_v21, %v4831_v14 }
 0x1bf   : > { %v648_v52 = vpop.permute.xlu1 %647  ;;  %v4043_v50 = vpop.permute.xlu0 %962 }
 0x1c0   : > { %v1012_v53 = vsel %vm994_vm3, %v961_v54, %v4043_v50  ;;  %v700_v58 = vsel %vm685_vm4, %v3922_v33, %v648_v52 }
 0x1c1   : > { %459 = vrot.lane.b32.xlu1 %v3126_v34, %s2970_s21  ;;  %771 = vrot.lane.b32.xlu0 %v3146_v41, %s2975_s26  ;;  %v1597_v42 = vsel %vm1130_vm1, %v910_v4, %v1012_v53  ;;  %v1193_v53 = vsel %vm1130_vm1, %v3090_v22, %v395_v46  ;;  %v4840_v22 = vld [vmem:[#allocation6_spill] sm:$0xff] }
 0x1c2   : > { %2105 = vmatprep.subr.bf16.mxu0 %v1597_v42  ;;  %v4837_v42 = vld [vmem:[#allocation15_spill] sm:$0xff] }
 0x1c3   : > { %v750_v40 = vpop.permute.xlu1 %749  ;;  %2106 = vmatpush1.bf16.msra.mxu0 %v1593_v15  ;;  %v650_v2 = vpop.permute.xlu0 %649  ;;  %v397_v15 = vsel %vm379_vm8, %v4837_v42, %v4836_v30 }
 0x1c4   : > { %v802_v55 = vsel %vm787_vm5, %v3929_v1, %v750_v40  ;;  %v701_v57 = vsel %vm685_vm4, %v648_v52, %v650_v2 }
 0x1c5   : > { %561 = vrot.lane.b32.xlu1 %v3126_v34, %s2976_s27  ;;  %461 = vrot.lane.b32.xlu0 %v3137_v38, %s2970_s21  ;;  %v1453_v1 = vsel %vm1130_vm1, %v700_v58, %v802_v55  ;;  %v396_v58 = vsel %vm379_vm8, %v4830_v9, %v4837_v42 }
 0x1c7   : > { %v652_v7 = vpop.permute.xlu1 %651  ;;  %v752_v62 = vpop.permute.xlu0 %751 }
 0x1c8   : > { %v803_v16 = vsel %vm787_vm5, %v750_v40, %v752_v62  ;;  %v702_v44 = vsel %vm685_vm4, %v650_v2, %v652_v7  ;;  %v4838_v40 = vld [vmem:[#allocation41_spill] sm:$0xff]  ;;  %v4839_v2 = vld [vmem:[#allocation38_spill] sm:$0xff] }
 0x1c9   : > { %463 = vrot.lane.b32.xlu1 %v3135_v37, %s2970_s21  ;;  %563 = vrot.lane.b32.xlu0 %v3137_v38, %s2976_s27  ;;  %v1457_v10 = vsel %vm1130_vm1, %v701_v57, %v803_v16  ;;  %v499_v55 = vsel %vm481_vm7, %v4839_v2, %v4838_v40  ;;  %v1189_v57 = vsel %vm1130_vm1, %v3092_v23, %v394_v27 }
 0x1ca   : > { %2066 = vmatprep.subr.bf16.mxu1 %v1457_v10  ;;  %v1197_v23 = vsel %vm1130_vm1, %v3101_v26, %v396_v58 }
 0x1cb   : > { %v754_v56 = vpop.permute.xlu1 %753  ;;  %2067 = vmatpush1.bf16.msra.mxu1 %v1453_v1  ;;  %v4072_v63 = vpop.permute.xlu0 %653 }
 0x1cc   : > { %v804_v33 = vsel %vm787_vm5, %v752_v62, %v754_v56  ;;  %v703_v24 = vsel %vm685_vm4, %v652_v7, %v4072_v63  ;;  %v498_v7 = vsel %vm481_vm7, %v4832_v36, %v4839_v2 }
 0x1cd   : > { %565 = vrot.lane.b32.xlu1 %v3135_v37, %s2976_s27  ;;  %465 = vrot.lane.b32.xlu0 %v3146_v41, %s2970_s21  ;;  %v1461_v19 = vsel %vm1130_vm1, %v702_v44, %v804_v33  ;;  %v1201_v33 = vsel %vm1130_vm1, %v3099_v25, %v397_v15 }
 0x1cf   : > { %v546_v8 = vpop.permute.xlu1 %545  ;;  %v4079_v47 = vpop.permute.xlu0 %755 }
 0x1d0   : > { %v805_v0 = vsel %vm787_vm5, %v754_v56, %v4079_v47  ;;  %v598_v11 = vsel %vm583_vm6, %v3964_v18, %v546_v8  ;;  %v4835_v18 = vld [vmem:[#allocation4_spill] sm:$0xff] }
 0x1d1   : > { %1082 = vrot.lane.b32.xlu1 %v4829_v49, %s2971_s22  ;;  %567 = vrot.lane.b32.xlu0 %v3146_v41, %s2976_s27  ;;  %v1465_v17 = vsel %vm1130_vm1, %v703_v24, %v805_v0  ;;  %v1321_v54 = vsel %vm1130_vm1, %v496_v3, %v598_v11 }
 0x1d2   : > { %2107 = vmatprep.subr.bf16.mxu0 %v1465_v17 }
 0x1d3   : > { %v550_v60 = vpop.permute.xlu1 %549  ;;  %2108 = vmatpush1.bf16.msra.mxu0 %v1461_v19  ;;  %v548_v20 = vpop.permute.xlu0 %547 }
 0x1d4   : > { %v599_v6 = vsel %vm583_vm6, %v546_v8, %v548_v20  ;;  %v600_v52 = vsel %vm583_vm6, %v548_v20, %v550_v60 }
 0x1d5   : > { %1086 = vrot.lane.b32.xlu1 %v4834_v51, %s2971_s22  ;;  %1084 = vrot.lane.b32.xlu0 %v4835_v18, %s2971_s22  ;;  %v1325_v48 = vsel %vm1130_vm1, %v497_v43, %v599_v6  ;;  %v1329_v16 = vsel %vm1130_vm1, %v498_v7, %v600_v52 }
 0x1d6   : > { %2068 = vmatprep.subr.bf16.mxu1 %v1325_v48 }
 0x1d7   : > { %v1067_v4 = vpop.permute.xlu1 %1066  ;;  %2069 = vmatpush1.bf16.msra.mxu1 %v1321_v54  ;;  %v4114_v39 = vpop.permute.xlu0 %551 }
 0x1d8   : > { %v601_v21 = vsel %vm583_vm6, %v550_v60, %v4114_v39  ;;  %2070 = vmatprep.subr.bf16.mxu1 %v1193_v53  ;;  %v1115_v10 = vsel %vm1096_vm0, %v4006_v59, %v1067_v4 }
 0x1d9   : > { %878 = vrot.lane.b32.xlu1 %v4829_v49, %s2972_s23  ;;  %1088 = vrot.lane.b32.xlu0 %v4840_v22, %s2971_s22  ;;  %v1333_v62 = vsel %vm1130_vm1, %v499_v55, %v601_v21  ;;  %v1725_v59 = vsel %vm1130_vm1, %v1115_v10, 0 }
 0x1da   : > { %2109 = vmatprep.subr.bf16.mxu0 %v1333_v62 }
 0x1db   : > { %v1071_v1 = vpop.permute.xlu1 %1070  ;;  %2071 = vmatpush1.bf16.msra.mxu1 %v1189_v57  ;;  %2110 = vmatpush1.bf16.msra.mxu0 %v1329_v16  ;;  %v1069_v56 = vpop.permute.xlu0 %1068 }
 0x1dc   : > { %2111 = vmatprep.subr.bf16.mxu0 %v1201_v33  ;;  %v1116_v8 = vsel %vm1096_vm0, %v1067_v4, %v1069_v56  ;;  %v1117_v25 = vsel %vm1096_vm0, %v1069_v56, %v1071_v1 }
 0x1dd   : > { %980 = vrot.lane.b32.xlu1 %v4829_v49, %s2973_s24  ;;  %880 = vrot.lane.b32.xlu0 %v4835_v18, %s2972_s23  ;;  %v1731_v26 = vsel %vm1130_vm1, %v1117_v25, 0 }
 0x1de   : > { %2800 = vmatprep.subr.msk.bf16.mxu1 %vm1130_vm1, %v1116_v8  ;;  %2797 = vmatmul.mubr.msk.bf16.vlgmr.msra.gmra.mxu1 %vm1666_vm9, %v3557_v61 }
 0x1df   : > { %v863_v24 = vpop.permute.xlu1 %862  ;;  %2112 = vmatpush1.bf16.msra.mxu0 %v1197_v23  ;;  %2145 = vmatpush1.bf16.msra.mxu1 %v1725_v59  ;;  %v4156_v0 = vpop.permute.xlu0 %1072 }
 0x1e0   : > { %v1118_v44 = vsel %vm1096_vm0, %v1071_v1, %v4156_v0  ;;  %2170 = vmatprep.mubr.bf16.mxu1 %v4818_v12  ;;  %v911_v14 = vsel %vm892_vm2, %v4036_v5, %v863_v24 }
 0x1e1   : > { %882 = vrot.lane.b32.xlu1 %v4834_v51, %s2972_s23  ;;  %982 = vrot.lane.b32.xlu0 %v4835_v18, %s2973_s24 }
 0x1e2   : > { %2802 = vmatprep.subr.msk.bf16.mxu0 %vm1130_vm1, %v1118_v44  ;;  %2799 = vmatmul.mubr.msk.bf16.vlgmr.msra.gmra.mxu0 %vm1666_vm9, %v3557_v61  ;;  %v4841_v44 = vld [vmem:[#allocation20_spill] sm:$0xff] }
 0x1e3   : > { %v965_v17 = vpop.permute.xlu1 %964  ;;  %2186 = vmatpush1.bf16.msra.mxu0 %v1731_v26  ;;  %v865_v19 = vpop.permute.xlu0 %864  ;;  %2211 = vmatprep.mubr.bf16.mxu0 %v4818_v12  ;;  %v4842_v26 = vld [vmem:[#allocation17_spill] sm:$0xff] }
 0x1e4   : > { %v1013_v11 = vsel %vm994_vm3, %v4043_v50, %v965_v17  ;;  %v912_v61 = vsel %vm892_vm2, %v863_v24, %v865_v19 }
 0x1e5   : > { %984 = vrot.lane.b32.xlu1 %v4834_v51, %s2973_s24  ;;  %884 = vrot.lane.b32.xlu0 %v4840_v22, %s2972_s23  ;;  %v1601_v50 = vsel %vm1130_vm1, %v911_v14, %v1013_v11  ;;  %v4844_v11 = vld [vmem:[#allocation40_spill] sm:$0xff]  ;;  %v398_v14 = vsel %vm379_vm8, %v4836_v30, %v4842_v26 }
 0x1e7   : > { %v867_v60 = vpop.permute.xlu1 %866  ;;  %v967_v20 = vpop.permute.xlu0 %966 }
 0x1e8   : > { %v1014_v9 = vsel %vm994_vm3, %v965_v17, %v967_v20  ;;  %v913_v54 = vsel %vm892_vm2, %v865_v19, %v867_v60  ;;  %v399_v17 = vsel %vm379_vm8, %v4842_v26, %v4841_v44  ;;  %v4843_v19 = vld [vmem:[#allocation42_spill] sm:$0xff] }
 0x1e9   : > { %671 = vrot.lane.b32.xlu1 %v4819_v13, %s2974_s25  ;;  %986 = vrot.lane.b32.xlu0 %v4840_v22, %s2973_s24  ;;  %v1605_v46 = vsel %vm1130_vm1, %v912_v61, %v1014_v9  ;;  %v500_v61 = vsel %vm481_vm7, %v4838_v40, %v4844_v11  ;;  %v1209_v40 = vsel %vm1130_vm1, %v3108_v28, %v399_v17 }
 0x1ea   : > { %2146 = vmatprep.subr.bf16.mxu1 %v1605_v46 }
 0x1eb   : > { %v969_v36 = vpop.permute.xlu1 %968  ;;  %2147 = vmatpush1.bf16.msra.mxu1 %v1601_v50  ;;  %v4186_v45 = vpop.permute.xlu0 %868 }
 0x1ec   : > { %v1015_v5 = vsel %vm994_vm3, %v967_v20, %v969_v36  ;;  %v914_v3 = vsel %vm892_vm2, %v867_v60, %v4186_v45  ;;  %v501_v60 = vsel %vm481_vm7, %v4844_v11, %v4843_v19 }
 0x1ed   : > { %773 = vrot.lane.b32.xlu1 %v4819_v13, %s2975_s26  ;;  %673 = vrot.lane.b32.xlu0 %v4829_v49, %s2974_s25  ;;  %v1609_v52 = vsel %vm1130_vm1, %v913_v54, %v1015_v5  ;;  %v2943_v5 = vld [vmem:[%s3024_s19 + $0x88] ss:$0 sps:$4 sm:$0xff]   ;;  %v4846_v54 = vld [vmem:[#allocation22_spill] sm:$0xff] }
 0x1ef   : > { %v656_v43 = vpop.permute.xlu1 %655  ;;  %v4193_v6 = vpop.permute.xlu0 %970 }
 0x1f0   : > { %v1016_v48 = vsel %vm994_vm3, %v969_v36, %v4193_v6  ;;  %v704_v7 = vsel %vm685_vm4, %v4072_v63, %v656_v43  ;;  %v4845_v36 = vld [vmem:[#allocation8_spill] sm:$0xff] }
 0x1f1   : > { %675 = vrot.lane.b32.xlu1 %v4835_v18, %s2974_s25  ;;  %775 = vrot.lane.b32.xlu0 %v4829_v49, %s2975_s26  ;;  %v1613_v27 = vsel %vm1130_vm1, %v914_v3, %v1016_v48 }
 0x1f2   : > { %2187 = vmatprep.subr.bf16.mxu0 %v1613_v27  ;;  %v4847_v27 = vld [vmem:[#allocation19_spill] sm:$0xff] }
 0x1f3   : > { %v758_v4 = vpop.permute.xlu1 %757  ;;  %2188 = vmatpush1.bf16.msra.mxu0 %v1609_v52  ;;  %v658_v53 = vpop.permute.xlu0 %657  ;;  %v401_v28 = vsel %vm379_vm8, %v4847_v27, %v4846_v54 }
 0x1f4   : > { %v806_v42 = vsel %vm787_vm5, %v4079_v47, %v758_v4  ;;  %v705_v55 = vsel %vm685_vm4, %v656_v43, %v658_v53  ;;  %v1205_v43 = vsel %vm1130_vm1, %v3110_v29, %v398_v14  ;;  %v4848_v29 = vld [vmem:[#allocation9_spill] sm:$0xff] }
 0x1f5   : > { %777 = vrot.lane.b32.xlu1 %v4835_v18, %s2975_s26  ;;  %677 = vrot.lane.b32.xlu0 %v4834_v51, %s2974_s25  ;;  %v1469_v47 = vsel %vm1130_vm1, %v704_v7, %v806_v42 }
 0x1f7   : > { %v660_v15 = vpop.permute.xlu1 %659  ;;  %v760_v2 = vpop.permute.xlu0 %759 }
 0x1f8   : > { %v807_v21 = vsel %vm787_vm5, %v758_v4, %v760_v2  ;;  %v706_v33 = vsel %vm685_vm4, %v658_v53, %v660_v15 }
 0x1f9   : > { %467 = vrot.lane.b32.xlu1 %v4819_v13, %s2970_s21  ;;  %779 = vrot.lane.b32.xlu0 %v4834_v51, %s2975_s26  ;;  %v1473_v62 = vsel %vm1130_vm1, %v705_v55, %v807_v21  ;;  %v400_v55 = vsel %vm379_vm8, %v4841_v44, %v4847_v27 }
 0x1fa   : > { %2148 = vmatprep.subr.bf16.mxu1 %v1473_v62 }
 0x1fb   : > { %v762_v57 = vpop.permute.xlu1 %761  ;;  %2149 = vmatpush1.bf16.msra.mxu1 %v1469_v47  ;;  %v4222_v16 = vpop.permute.xlu0 %661  ;;  %v1217_v47 = vsel %vm1130_vm1, %v3117_v31, %v401_v28 }
 0x1fc   : > { %v808_v63 = vsel %vm787_vm5, %v760_v2, %v762_v57  ;;  %v707_v1 = vsel %vm685_vm4, %v660_v15, %v4222_v16  ;;  %v4294_v2 = vld [vmem:[%s4725_s1] sm:$0xf] }
 0x1fd   : > { %569 = vrot.lane.b32.xlu1 %v4819_v13, %s2976_s27  ;;  %469 = vrot.lane.b32.xlu0 %v4829_v49, %s2970_s21  ;;  %v1477_v23 = vsel %vm1130_vm1, %v706_v33, %v808_v63 }
 0x1ff   : > { %v554_v58 = vpop.permute.xlu1 %553  ;;  %v4229_v10 = vpop.permute.xlu0 %763 }
 0x200   : > { %v809_v56 = vsel %vm787_vm5, %v762_v57, %v4229_v10  ;;  %v602_v59 = vsel %vm583_vm6, %v4114_v39, %v554_v58 }
 0x201   : > { %471 = vrot.lane.b32.xlu1 %v4835_v18, %s2970_s21  ;;  %571 = vrot.lane.b32.xlu0 %v4829_v49, %s2976_s27  ;;  %v1481_v8 = vsel %vm1130_vm1, %v707_v1, %v809_v56  ;;  %v1337_v9 = vsel %vm1130_vm1, %v500_v61, %v602_v59 }
 0x202   : > { %2189 = vmatprep.subr.bf16.mxu0 %v1481_v8 }
 0x203   : > { %v456_v25 = vpop.permute.xlu1 %455  ;;  %2190 = vmatpush1.bf16.msra.mxu0 %v1477_v23  ;;  %v556_v24 = vpop.permute.xlu0 %555 }
 0x204   : > { %v603_v20 = vsel %vm583_vm6, %v554_v58, %v556_v24  ;;  %v502_v53 = vsel %vm481_vm7, %v4843_v19, %v456_v25 }
 0x205   : > { %573 = vrot.lane.b32.xlu1 %v4835_v18, %s2976_s27  ;;  %473 = vrot.lane.b32.xlu0 %v4834_v51, %s2970_s21  ;;  %v1341_v39 = vsel %vm1130_vm1, %v501_v60, %v603_v20 }
 0x206   : > { %2150 = vmatprep.subr.bf16.mxu1 %v1341_v39 }
 0x207   : > { %v558_v46 = vpop.permute.xlu1 %557  ;;  %2151 = vmatpush1.bf16.msra.mxu1 %v1337_v9  ;;  %v4263_v50 = vpop.permute.xlu0 %457 }
 0x208   : > { %2152 = vmatprep.subr.bf16.mxu1 %v1209_v40  ;;  %v604_v30 = vsel %vm583_vm6, %v556_v24, %v558_v46  ;;  %v503_v52 = vsel %vm481_vm7, %v456_v25, %v4263_v50 }
 0x209   : > { %1090 = vrot.lane.b32.xlu1 %v4845_v36, %s2971_s22  ;;  %575 = vrot.lane.b32.xlu0 %v4834_v51, %s2976_s27  ;;  %v1345_v15 = vsel %vm1130_vm1, %v502_v53, %v604_v30  ;;  %v4378_v53 = vpop.f32.mrf.mxu0 }
 0x20b   : > { %v1075_v3 = vpop.permute.xlu1 %1074  ;;  %2153 = vmatpush1.bf16.msra.mxu1 %v1205_v43  ;;  %v4275_v48 = vpop.permute.xlu0 %559 }
 0x20c   : > { %v605_v4 = vsel %vm583_vm6, %v558_v46, %v4275_v48  ;;  %v1119_v21 = vsel %vm1096_vm0, %v4156_v0, %v1075_v3  ;;  %v1213_v0 = vsel %vm1130_vm1, %v3119_v32, %v400_v55  ;;  %v4383_v55 = vpop.f32.mrf.mxu0 }
 0x20d   : > { %1094 = vrot.lane.b32.xlu1 %v2943_v5, %s2971_s22  ;;  %1092 = vrot.lane.b32.xlu0 %v4848_v29, %s2971_s22  ;;  %v1349_v42 = vsel %vm1130_vm1, %v503_v52, %v605_v4  ;;  %v1737_v63 = vsel %vm1130_vm1, %v1119_v21, 0  ;;  %v1660_v21 = vld [vmem:[%s4726_s2] sm:$0xff] }
 0x20e   : > { %2191 = vmatprep.subr.bf16.mxu0 %v1349_v42  ;;  %2801 = vmatmul.mubr.msk.bf16.vlgmr.msra.gmra.mxu1 %vm1666_vm9, %v4294_v2 }
 0x20f   : > { %v1079_v7 = vpop.permute.xlu1 %1078  ;;  %2192 = vmatpush1.bf16.msra.mxu0 %v1345_v15  ;;  %v1077_v62 = vpop.permute.xlu0 %1076  ;;  %2252 = vmatprep.mubr.bf16.mxu1 %v4818_v12 }
 0x210   : > { %v1120_v57 = vsel %vm1096_vm0, %v1075_v3, %v1077_v62  ;;  %2193 = vmatprep.subr.bf16.mxu0 %v1217_v47  ;;  %v1121_v31 = vsel %vm1096_vm0, %v1077_v62, %v1079_v7 }
 0x211   : > { %888 = vrot.lane.b32.xlu1 %v4848_v29, %s2972_s23  ;;  %886 = vrot.lane.b32.xlu0 %v4845_v36, %s2972_s23  ;;  %v1743_v33 = vsel %vm1130_vm1, %v1121_v31, 0 }
 0x212   : > { %2804 = vmatprep.subr.msk.bf16.mxu1 %vm1130_vm1, %v1120_v57 }
 0x213   : > { %2227 = vmatpush1.bf16.msra.mxu1 %v1737_v63  ;;  %v871_v58 = vpop.permute.xlu1 %870  ;;  %2194 = vmatpush1.bf16.msra.mxu0 %v1213_v0  ;;  %v4316_v1 = vpop.permute.xlu0 %1080 }
 0x214   : > { %v1122_v56 = vsel %vm1096_vm0, %v1079_v7, %v4316_v1  ;;  %v915_v26 = vsel %vm892_vm2, %v4186_v45, %v871_v58  ;;  %v1807_v7 = vpop.f32.mrf.mxu0 }
 0x215   : > { %990 = vrot.lane.b32.xlu1 %v4848_v29, %s2973_s24  ;;  %988 = vrot.lane.b32.xlu0 %v4845_v36, %s2973_s24 }
 0x216   : > { %2806 = vmatprep.subr.msk.bf16.mxu0 %vm1130_vm1, %v1122_v56  ;;  %2803 = vmatmul.mubr.msk.bf16.vlgmr.msra.gmra.mxu0 %vm1666_vm9, %v4294_v2  ;;  %v1808_v31 = vpop.f32.mrf.mxu0 }
 0x217   : > { %v973_v32 = vpop.permute.xlu1 %972  ;;  %2268 = vmatpush1.bf16.msra.mxu0 %v1743_v33  ;;  %v873_v8 = vpop.permute.xlu0 %872  ;;  %2293 = vmatprep.mubr.bf16.mxu0 %v4818_v12 }
 0x218   : > { %v1017_v23 = vsel %vm994_vm3, %v4193_v6, %v973_v32  ;;  %v916_v24 = vsel %vm892_vm2, %v871_v58, %v873_v8 }
 0x219   : > { %992 = vrot.lane.b32.xlu1 %v2943_v5, %s2973_s24  ;;  %890 = vrot.lane.b32.xlu0 %v2943_v5, %s2972_s23  ;;  %v1617_v6 = vsel %vm1130_vm1, %v915_v26, %v1017_v23 }
 0x21b   : > { %v875_v59 = vpop.permute.xlu1 %874  ;;  %v975_v25 = vpop.permute.xlu0 %974 }
 0x21c   : > { %v1018_v44 = vsel %vm994_vm3, %v973_v32, %v975_v25  ;;  %v917_v9 = vsel %vm892_vm2, %v873_v8, %v875_v59 }
 0x21d   : > { %681 = vrot.lane.b32.xlu1 %v4845_v36, %s2974_s25  ;;  %679 = vrot.lane.b32.xlu0 %v4840_v22, %s2974_s25  ;;  %v1621_v17 = vsel %vm1130_vm1, %v916_v24, %v1018_v44 }
 0x21e   : > { %2228 = vmatprep.subr.bf16.mxu1 %v1621_v17 }
 0x21f   : > { %v977_v19 = vpop.permute.xlu1 %976  ;;  %2229 = vmatpush1.bf16.msra.mxu1 %v1617_v6  ;;  %v4343_v11 = vpop.permute.xlu0 %876  ;;  %v4849_v6 = vld [vmem:[#allocation24_spill] sm:$0xff] }
 0x220   : > { %v1019_v45 = vsel %vm994_vm3, %v975_v25, %v977_v19  ;;  %v918_v61 = vsel %vm892_vm2, %v875_v59, %v4343_v11  ;;  %v4406_v59 = vpop.f32.mrf.mxu0 }
 0x221   : > { %783 = vrot.lane.b32.xlu1 %v4845_v36, %s2975_s26  ;;  %781 = vrot.lane.b32.xlu0 %v4840_v22, %s2975_s26  ;;  %v1625_v46 = vsel %vm1130_vm1, %v917_v9, %v1019_v45 }
 0x222   : > { %v4408_v24 = vpop.f32.mrf.mxu0 }
 0x223   : > { %v664_v60 = vpop.permute.xlu1 %663  ;;  %v4350_v20 = vpop.permute.xlu0 %978 }
 0x224   : > { %v1020_v39 = vsel %vm994_vm3, %v977_v19, %v4350_v20  ;;  %v708_v52 = vsel %vm685_vm4, %v4222_v16, %v664_v60  ;;  %v4385_v16 = vpop.f32.mrf.mxu1  ;;  %v4850_v19 = vld [vmem:[#allocation21_spill] sm:$0xff] }
 0x225   : > { %785 = vrot.lane.b32.xlu1 %v4848_v29, %s2975_s26  ;;  %683 = vrot.lane.b32.xlu0 %v4848_v29, %s2974_s25  ;;  %v1629_v14 = vsel %vm1130_vm1, %v918_v61, %v1020_v39  ;;  %v403_v45 = vsel %vm379_vm8, %v4850_v19, %v4849_v6  ;;  %v1889_v39 = vpop.f32.mrf.mxu0 }
 0x226   : > { %2269 = vmatprep.subr.bf16.mxu0 %v1629_v14  ;;  %v4401_v58 = vpop.f32.mrf.mxu1 }
 0x227   : > { %v766_v40 = vpop.permute.xlu1 %765  ;;  %2270 = vmatpush1.bf16.msra.mxu0 %v1625_v46  ;;  %v666_v5 = vpop.permute.xlu0 %665 }
 0x228   : > { %v810_v43 = vsel %vm787_vm5, %v4229_v10, %v766_v40  ;;  %v709_v27 = vsel %vm685_vm4, %v664_v60, %v666_v5  ;;  %v1848_v32 = vpop.f32.mrf.mxu1 }
 0x229   : > { %477 = vrot.lane.b32.xlu1 %v4845_v36, %s2970_s21  ;;  %475 = vrot.lane.b32.xlu0 %v4840_v22, %s2970_s21  ;;  %v1485_v10 = vsel %vm1130_vm1, %v708_v52, %v810_v43 }
 0x22a   : > { %v1849_v25 = vpop.f32.mrf.mxu1 }
 0x22b   : > { %v668_v30 = vpop.permute.xlu1 %667  ;;  %v768_v3 = vpop.permute.xlu0 %767 }
 0x22c   : > { %v811_v28 = vsel %vm787_vm5, %v766_v40, %v768_v3 }
 0x22d   : > { %579 = vrot.lane.b32.xlu1 %v4845_v36, %s2976_s27  ;;  %577 = vrot.lane.b32.xlu0 %v4840_v22, %s2976_s27  ;;  %v1489_v4 = vsel %vm1130_vm1, %v709_v27, %v811_v28 }
 0x22e   : > { %2230 = vmatprep.subr.bf16.mxu1 %v1489_v4 }
 0x22f   : > { %v770_v42 = vpop.permute.xlu1 %769  ;;  %2231 = vmatpush1.bf16.msra.mxu1 %v1485_v10  ;;  %v4381_v15 = vpop.permute.xlu0 %669 }
 0x230   : > { %v812_v62 = vsel %vm787_vm5, %v768_v3, %v770_v42  ;;  %v711_v63 = vsel %vm685_vm4, %v668_v30, %v4381_v15  ;;  %v1225_v3 = vsel %vm1130_vm1, %v3126_v34, %v403_v45 }
 0x231   : > { %581 = vrot.lane.b32.xlu1 %v4848_v29, %s2976_s27  ;;  %479 = vrot.lane.b32.xlu0 %v4848_v29, %s2970_s21  ;;  %v710_v29 = vsel %vm685_vm4, %v666_v5, %v668_v30  ;;  %v402_v5 = vsel %vm379_vm8, %v4846_v54, %v4850_v19 }
 0x232   : > { %v1493_v33 = vsel %vm1130_vm1, %v710_v29, %v812_v62  ;;  %v1221_v27 = vsel %vm1130_vm1, %v3128_v35, %v402_v5 }
 0x233   : > { %v460_v47 = vpop.permute.xlu1 %459  ;;  %v4395_v57 = vpop.permute.xlu0 %771 }
 0x234   : > { %v813_v0 = vsel %vm787_vm5, %v770_v42, %v4395_v57  ;;  %v504_v9 = vsel %vm481_vm7, %v4263_v50, %v460_v47  ;;  %v4851_v42 = vld [vmem:[#allocation26_spill] sm:$0xff] }
 0x235   : > { %v1497_v56 = vsel %vm1130_vm1, %v711_v63, %v813_v0  ;;  %1663 = vperm.xlu0 %2908, %v1660_v21   ;;  %v4852_v21 = vld [vmem:[#allocation23_spill] sm:$0xff] }
 0x236   : > { %2271 = vmatprep.subr.bf16.mxu0 %v1497_v56  ;;  %v405_v7 = vsel %vm379_vm8, %v4852_v21, %v4851_v42 }
 0x237   : > { %v562_v8 = vpop.permute.xlu1 %561  ;;  %2272 = vmatpush1.bf16.msra.mxu0 %v1493_v33  ;;  %v462_v23 = vpop.permute.xlu0 %461  ;;  %v404_v33 = vsel %vm379_vm8, %v4849_v6, %v4852_v21 }
 0x238   : > { %v606_v44 = vsel %vm583_vm6, %v4275_v48, %v562_v8  ;;  %v505_v60 = vsel %vm481_vm7, %v460_v47, %v462_v23  ;;  %v1890_v48 = vpop.f32.mrf.mxu0 }
 0x239   : > { %v1353_v46 = vsel %vm1130_vm1, %v504_v9, %v606_v44 }
 0x23b   : > { %v464_v26 = vpop.permute.xlu1 %463  ;;  %v564_v17 = vpop.permute.xlu0 %563 }
 0x23c   : > { %v607_v61 = vsel %vm583_vm6, %v562_v8, %v564_v17  ;;  %v506_v63 = vsel %vm481_vm7, %v462_v23, %v464_v26  ;;  %v1233_v23 = vsel %vm1130_vm1, %v3135_v37, %v405_v7 }
 0x23d   : > { %v1357_v14 = vsel %vm1130_vm1, %v505_v60, %v607_v61 }
 0x23e   : > { %2232 = vmatprep.subr.bf16.mxu1 %v1357_v14  ;;  %v4421_v40 = vpop.f32.mrf.mxu1 }
 0x23f   : > { %v566_v43 = vpop.permute.xlu1 %565  ;;  %2233 = vmatpush1.bf16.msra.mxu1 %v1353_v46  ;;  %v4426_v30 = vpop.permute.xlu0 %465 }
 0x240   : > { %2234 = vmatprep.subr.bf16.mxu1 %v1225_v3  ;;  %v4430_v50 = vpop.f32.mrf.mxu1  ;;  %v608_v4 = vsel %vm583_vm6, %v564_v17, %v566_v43  ;;  %v507_v34 = vsel %vm481_vm7, %v464_v26, %v4426_v30  ;;  %v1229_v26 = vsel %vm1130_vm1, %v3137_v38, %v404_v33 }
 0x241   : > { %v1361_v29 = vsel %vm1130_vm1, %v506_v63, %v608_v4 }
 0x242   : > { %v4434_v28 = vpop.f32.mrf.mxu0  ;;  %v1930_v52 = vpop.f32.mrf.mxu1 }
 0x243   : > { %v1083_v10 = vpop.permute.xlu1 %1082  ;;  %2235 = vmatpush1.bf16.msra.mxu1 %v1221_v27  ;;  %v4437_v54 = vpop.permute.xlu0 %567 }
 0x244   : > { %v609_v62 = vsel %vm583_vm6, %v566_v43, %v4437_v54  ;;  %v4446_v35 = vpop.f32.mrf.mxu0  ;;  %v1931_v47 = vpop.f32.mrf.mxu1  ;;  %v1123_v31 = vsel %vm1096_vm0, %v4316_v1, %v1083_v10 }
 0x245   : > { %v1365_v0 = vsel %vm1130_vm1, %v507_v34, %v609_v62  ;;  %v1749_v44 = vsel %vm1130_vm1, %v1123_v31, 0 }
 0x246   : > { %2273 = vmatprep.subr.bf16.mxu0 %v1365_v0  ;;  %2805 = vmatmul.mubr.msk.bf16.vlgmr.msra.gmra.mxu1 %vm1666_vm9, %v4294_v2  ;;  %v1971_v56 = vpop.f32.mrf.mxu0 }
 0x247   : > { %v1087_v32 = vpop.permute.xlu1 %1086  ;;  %2274 = vmatpush1.bf16.msra.mxu0 %v1361_v29  ;;  %v1085_v8 = vpop.permute.xlu0 %1084  ;;  %2334 = vmatprep.mubr.bf16.mxu1 %v4818_v12 }
 0x248   : > { %v1124_v1 = vsel %vm1096_vm0, %v1083_v10, %v1085_v8  ;;  %2275 = vmatprep.subr.bf16.mxu0 %v1233_v23  ;;  %v1972_v25 = vpop.f32.mrf.mxu0  ;;  %v1125_v17 = vsel %vm1096_vm0, %v1085_v8, %v1087_v32 }
 0x249   : > { %2808 = vmatprep.subr.msk.bf16.mxu1 %vm1130_vm1, %v1124_v1  ;;  %v1755_v45 = vsel %vm1130_vm1, %v1125_v17, 0 }
 0x24a   : > { %2309 = vmatpush1.bf16.msra.mxu1 %v1749_v44 }
 0x24b   : > { %v879_v6 = vpop.permute.xlu1 %878  ;;  %2276 = vmatpush1.bf16.msra.mxu0 %v1229_v26  ;;  %v4467_v19 = vpop.permute.xlu0 %1088 }
 0x24c   : > { %v1126_v37 = vsel %vm1096_vm0, %v1087_v32, %v4467_v19  ;;  %v919_v48 = vsel %vm892_vm2, %v4343_v11, %v879_v6 }
 0x24d   : > { %2810 = vmatprep.subr.msk.bf16.mxu0 %vm1130_vm1, %v1126_v37 }
 0x24e   : > { %2807 = vmatmul.mubr.msk.bf16.vlgmr.msra.gmra.mxu0 %vm1666_vm9, %v4294_v2 }
 0x24f   : > { %v981_v60 = vpop.permute.xlu1 %980  ;;  %2350 = vmatpush1.bf16.msra.mxu0 %v1755_v45  ;;  %v881_v61 = vpop.permute.xlu0 %880  ;;  %2375 = vmatprep.mubr.bf16.mxu0 %v4818_v12 }
 0x250   : > { %v1021_v38 = vsel %vm994_vm3, %v4350_v20, %v981_v60  ;;  %v920_v14 = vsel %vm892_vm2, %v879_v6, %v881_v61 }
 0x251   : > { %v1633_v43 = vsel %vm1130_vm1, %v919_v48, %v1021_v38 }
 0x253   : > { %v883_v39 = vpop.permute.xlu1 %882  ;;  %v983_v9 = vpop.permute.xlu0 %982 }
 0x254   : > { %v1022_v46 = vsel %vm994_vm3, %v981_v60, %v983_v9  ;;  %v921_v21 = vsel %vm892_vm2, %v881_v61, %v883_v39 }
 0x255   : > { %v1637_v5 = vsel %vm1130_vm1, %v920_v14, %v1022_v46 }
 0x256   : > { %2310 = vmatprep.subr.bf16.mxu1 %v1637_v5  ;;  %v4853_v5 = vld [vmem:[#allocation28_spill] sm:$0xff] }
 0x257   : > { %v985_v3 = vpop.permute.xlu1 %984  ;;  %2311 = vmatpush1.bf16.msra.mxu1 %v1633_v43  ;;  %v4484_v27 = vpop.permute.xlu0 %884  ;;  %v4854_v43 = vld [vmem:[#allocation25_spill] sm:$0xff] }
 0x258   : > { %v1023_v20 = vsel %vm994_vm3, %v983_v9, %v985_v3  ;;  %v922_v10 = vsel %vm892_vm2, %v883_v39, %v4484_v27 }
 0x259   : > { %v1641_v34 = vsel %vm1130_vm1, %v921_v21, %v1023_v20 }
 0x25b   : > { %v672_v52 = vpop.permute.xlu1 %671  ;;  %v4487_v4 = vpop.permute.xlu0 %986 }
 0x25c   : > { %v1024_v11 = vsel %vm994_vm3, %v985_v3, %v4487_v4  ;;  %v712_v33 = vsel %vm685_vm4, %v4381_v15, %v672_v52  ;;  %v407_v3 = vsel %vm379_vm8, %v4854_v43, %v4853_v5 }
 0x25d   : > { %v1645_v7 = vsel %vm1130_vm1, %v922_v10, %v1024_v11 }
 0x25e   : > { %2351 = vmatprep.subr.bf16.mxu0 %v1645_v7 }
 0x25f   : > { %v774_v62 = vpop.permute.xlu1 %773  ;;  %2352 = vmatpush1.bf16.msra.mxu0 %v1641_v34  ;;  %v674_v47 = vpop.permute.xlu0 %673 }
 0x260   : > { %v814_v63 = vsel %vm787_vm5, %v4395_v57, %v774_v62  ;;  %v713_v29 = vsel %vm685_vm4, %v672_v52, %v674_v47 }
 0x261   : > { %v1501_v8 = vsel %vm1130_vm1, %v712_v33, %v814_v63 }
 0x263   : > { %v676_v0 = vpop.permute.xlu1 %675  ;;  %v776_v31 = vpop.permute.xlu0 %775 }
 0x264   : > { %v815_v56 = vsel %vm787_vm5, %v774_v62, %v776_v31  ;;  %v714_v17 = vsel %vm685_vm4, %v674_v47, %v676_v0  ;;  %v406_v62 = vsel %vm379_vm8, %v4851_v42, %v4854_v43  ;;  %v4856_v42 = vld [vmem:[#allocation27_spill] sm:$0xff] }
 0x265   : > { %v1505_v32 = vsel %vm1130_vm1, %v713_v29, %v815_v56 }
 0x266   : > { %2312 = vmatprep.subr.bf16.mxu1 %v1505_v32  ;;  %v4855_v32 = vld [vmem:[#allocation30_spill] sm:$0xff] }
 0x267   : > { %v778_v23 = vpop.permute.xlu1 %777  ;;  %2313 = vmatpush1.bf16.msra.mxu1 %v1501_v8  ;;  %v4504_v1 = vpop.permute.xlu0 %677  ;;  %v409_v8 = vsel %vm379_vm8, %v4856_v42, %v4855_v32 }
 0x268   : > { %v816_v57 = vsel %vm787_vm5, %v776_v31, %v778_v23  ;;  %v715_v26 = vsel %vm685_vm4, %v676_v0, %v4504_v1  ;;  %v1241_v0 = vsel %vm1130_vm1, %v4819_v13, %v407_v3 }
 0x269   : > { %v1509_v37 = vsel %vm1130_vm1, %v714_v17, %v816_v57 }
 0x26b   : > { %v468_v25 = vpop.permute.xlu1 %467  ;;  %v4507_v44 = vpop.permute.xlu0 %779 }
 0x26c   : > { %v817_v15 = vsel %vm787_vm5, %v778_v23, %v4507_v44  ;;  %v508_v21 = vsel %vm481_vm7, %v4426_v30, %v468_v25  ;;  %v1237_v30 = vsel %vm1130_vm1, %v3146_v41, %v406_v62 }
 0x26d   : > { %v1513_v6 = vsel %vm1130_vm1, %v715_v26, %v817_v15  ;;  %v408_v15 = vsel %vm379_vm8, %v4853_v5, %v4856_v42 }
 0x26e   : > { %2353 = vmatprep.subr.bf16.mxu0 %v1513_v6  ;;  %v4516_v45 = vpop.f32.mrf.mxu1 }
 0x26f   : > { %v570_v60 = vpop.permute.xlu1 %569  ;;  %2354 = vmatpush1.bf16.msra.mxu0 %v1509_v37  ;;  %v470_v61 = vpop.permute.xlu0 %469  ;;  %v1249_v37 = vsel %vm1130_vm1, %v4835_v18, %v409_v8 }
 0x270   : > { %v4518_v38 = vpop.f32.mrf.mxu1  ;;  %v610_v14 = vsel %vm583_vm6, %v4437_v54, %v570_v60  ;;  %v509_v20 = vsel %vm481_vm7, %v468_v25, %v470_v61 }
 0x271   : > { %v1369_v54 = vsel %vm1130_vm1, %v508_v21, %v610_v14 }
 0x272   : > { %v4520_v39 = vpop.f32.mrf.mxu0  ;;  %v2012_v9 = vpop.f32.mrf.mxu1 }
 0x273   : > { %v472_v46 = vpop.permute.xlu1 %471  ;;  %v572_v48 = vpop.permute.xlu0 %571 }
 0x274   : > { %v611_v52 = vsel %vm583_vm6, %v570_v60, %v572_v48  ;;  %v4529_v10 = vpop.f32.mrf.mxu0  ;;  %v2013_v11 = vpop.f32.mrf.mxu1  ;;  %v510_v57 = vsel %vm481_vm7, %v470_v61, %v472_v46  ;;  %v1245_v61 = vsel %vm1130_vm1, %v4829_v49, %v408_v15  ;;  %v4857_v15 = vld [vmem:[#allocation32_spill] sm:$0xff] }
 0x275   : > { %v1373_v7 = vsel %vm1130_vm1, %v509_v20, %v611_v52 }
 0x276   : > { %2314 = vmatprep.subr.bf16.mxu1 %v1373_v7  ;;  %v2053_v34 = vpop.f32.mrf.mxu0 }
 0x277   : > { %v574_v47 = vpop.permute.xlu1 %573  ;;  %2315 = vmatpush1.bf16.msra.mxu1 %v1369_v54  ;;  %v4538_v63 = vpop.permute.xlu0 %473 }
 0x278   : > { %2316 = vmatprep.subr.bf16.mxu1 %v1241_v0  ;;  %v2054_v31 = vpop.f32.mrf.mxu0  ;;  %v612_v29 = vsel %vm583_vm6, %v572_v48, %v574_v47  ;;  %v511_v23 = vsel %vm481_vm7, %v472_v46, %v4538_v63  ;;  %v2978_v48 = vmov 0.0  }
 0x279   : > { %v1377_v26 = vsel %vm1130_vm1, %v510_v57, %v612_v29 }
 0x27b   : > { %v1091_v56 = vpop.permute.xlu1 %1090  ;;  %2317 = vmatpush1.bf16.msra.mxu1 %v1237_v30  ;;  %v4545_v33 = vpop.permute.xlu0 %575 }
 0x27c   : > { %v613_v13 = vsel %vm583_vm6, %v574_v47, %v4545_v33  ;;  %v1127_v25 = vsel %vm1096_vm0, %v4467_v19, %v1091_v56 }
 0x27d   : > { %v1381_v41 = vsel %vm1130_vm1, %v511_v23, %v613_v13  ;;  %v1761_v60 = vsel %vm1130_vm1, %v1127_v25, 0 }
 0x27e   : > { %2355 = vmatprep.subr.bf16.mxu0 %v1381_v41  ;;  %2809 = vmatmul.mubr.msk.bf16.vlgmr.msra.gmra.mxu1 %vm1666_vm9, %v4294_v2 }
 0x27f   : > { %v1095_v17 = vpop.permute.xlu1 %1094  ;;  %2356 = vmatpush1.bf16.msra.mxu0 %v1377_v26  ;;  %v1093_v6 = vpop.permute.xlu0 %1092  ;;  %2416 = vmatprep.mubr.bf16.mxu1 %v4818_v12 }
 0x280   : > { %v1128_v19 = vsel %vm1096_vm0, %v1091_v56, %v1093_v6  ;;  %2357 = vmatprep.subr.bf16.mxu0 %v1249_v37  ;;  %v1129_v9 = vsel %vm1096_vm0, %v1093_v6, %v1095_v17  ;;  %v4858_v17 = vld [vmem:[#allocation29_spill] sm:$0xff] }
 0x281   : > { %2812 = vmatprep.subr.msk.bf16.mxu1 %vm1130_vm1, %v1128_v19  ;;  %v1767_v12 = vsel %vm1130_vm1, %v1129_v9, 0  ;;  %v411_v6 = vsel %vm379_vm8, %v4858_v17, %v4857_v15 }
 0x282   : > { %2391 = vmatpush1.bf16.msra.mxu1 %v1761_v60 }
 0x283   : > { %v889_v14 = vpop.permute.xlu1 %888  ;;  %2358 = vmatpush1.bf16.msra.mxu0 %v1245_v61  ;;  %v887_v46 = vpop.permute.xlu0 %886 }
 0x284   : > { %2857 = vmatprep.subr.bf16.mxu0 %v2978_v48  ;;  %v923_v49 = vsel %vm892_vm2, %v4484_v27, %v887_v46  ;;  %v924_v43 = vsel %vm892_vm2, %v887_v46, %v889_v14 }
 0x286   : > { %2811 = vmatmul.mubr.msk.bf16.vlgmr.msra.gmra.mxu0 %vm1666_vm9, %v4294_v2 }
 0x287   : > { %v991_v18 = vpop.permute.xlu1 %990  ;;  %2858 = vmatpush3.bf16.msra.mxu0 %v1767_v12  ;;  %v989_v5 = vpop.permute.xlu0 %988  ;;  %2867 = vmatprep.mubr.msk.bf16.mxu0 %vm2979_vm10, %v2978_v48 }
 0x288   : > { %v1025_v3 = vsel %vm994_vm3, %v4487_v4, %v989_v5  ;;  %v1026_v20 = vsel %vm994_vm3, %v989_v5, %v991_v18  ;;  %2859 = vmatprep.subr.bf16.mxu0 %v2978_v48 }
 0x289   : > { %v1653_v52 = vsel %vm1130_vm1, %v924_v43, %v1026_v20  ;;  %v1649_v11 = vsel %vm1130_vm1, %v923_v49, %v1025_v3 }
 0x28a   : > { %2392 = vmatprep.subr.bf16.mxu1 %v1653_v52 }
 0x28b   : > { %v993_v21 = vpop.permute.xlu1 %992  ;;  %2393 = vmatpush1.bf16.msra.mxu1 %v1649_v11  ;;  %v891_v7 = vpop.permute.xlu0 %890 }
 0x28c   : > { %v1027_v54 = vsel %vm994_vm3, %v991_v18, %v993_v21  ;;  %v925_v27 = vsel %vm892_vm2, %v889_v14, %v891_v7 }
 0x28d   : > { %v1657_v34 = vsel %vm1130_vm1, %v925_v27, %v1027_v54  ;;  %v4859_v54 = vld [vmem:[#allocation31_spill] sm:$0xff] }
 0x28e   : > { %2860 = vmatpush3.bf16.msra.mxu0 %v1657_v34 }
 0x28f   : > { %v682_v4 = vpop.permute.xlu1 %681  ;;  %v680_v62 = vpop.permute.xlu0 %679  ;;  %2861 = vmatprep.subr.bf16.mxu0 %v2978_v48 }
 0x290   : > { %v716_v31 = vsel %vm685_vm4, %v4504_v1, %v680_v62  ;;  %v717_v30 = vsel %vm685_vm4, %v680_v62, %v682_v4 }
 0x293   : > { %v784_v47 = vpop.permute.xlu1 %783  ;;  %v782_v0 = vpop.permute.xlu0 %781 }
 0x294   : > { %v818_v29 = vsel %vm787_vm5, %v4507_v44, %v782_v0  ;;  %v819_v56 = vsel %vm787_vm5, %v782_v0, %v784_v47 }
 0x295   : > { %v1521_v42 = vsel %vm1130_vm1, %v717_v30, %v819_v56  ;;  %v1517_v8 = vsel %vm1130_vm1, %v716_v31, %v818_v29 }
 0x296   : > { %2394 = vmatprep.subr.bf16.mxu1 %v1521_v42 }
 0x297   : > { %v786_v23 = vpop.permute.xlu1 %785  ;;  %2395 = vmatpush1.bf16.msra.mxu1 %v1517_v8  ;;  %v684_v13 = vpop.permute.xlu0 %683 }
 0x298   : > { %v820_v57 = vsel %vm787_vm5, %v784_v47, %v786_v23  ;;  %v718_v41 = vsel %vm685_vm4, %v682_v4, %v684_v13 }
 0x299   : > { %v1525_v1 = vsel %vm1130_vm1, %v718_v41, %v820_v57 }
 0x29a   : > { %2862 = vmatpush3.bf16.msra.mxu0 %v1525_v1 }
 0x29b   : > { %v478_v25 = vpop.permute.xlu1 %477  ;;  %v476_v26 = vpop.permute.xlu0 %475  ;;  %2863 = vmatprep.subr.bf16.mxu0 %v2978_v48 }
 0x29c   : > { %v512_v60 = vsel %vm481_vm7, %v4538_v63, %v476_v26  ;;  %v513_v61 = vsel %vm481_vm7, %v476_v26, %v478_v25  ;;  %v410_v63 = vsel %vm379_vm8, %v4855_v32, %v4858_v17  ;;  %v412_v32 = vsel %vm379_vm8, %v4857_v15, %v4859_v54 }
 0x29d   : > { %v1253_v27 = vsel %vm1130_vm1, %v4834_v51, %v410_v63  ;;  %v1261_v4 = vsel %vm1130_vm1, %v4845_v36, %v412_v32 }
 0x29e   : > { %v4603_v44 = vpop.f32.mrf.mxu1 }
 0x29f   : > { %v580_v37 = vpop.permute.xlu1 %579  ;;  %v578_v19 = vpop.permute.xlu0 %577 }
 0x2a0   : > { %v614_v9 = vsel %vm583_vm6, %v4545_v33, %v578_v19  ;;  %v615_v14 = vsel %vm583_vm6, %v578_v19, %v580_v37  ;;  %v4614_v46 = vpop.f32.mrf.mxu1  ;;  %v1257_v33 = vsel %vm1130_vm1, %v4840_v22, %v411_v6 }
 0x2a1   : > { %v1389_v12 = vsel %vm1130_vm1, %v513_v61, %v615_v14  ;;  %v1385_v18 = vsel %vm1130_vm1, %v512_v60, %v614_v9 }
 0x2a2   : > { %2396 = vmatprep.subr.bf16.mxu1 %v1389_v12  ;;  %v4618_v5 = vpop.f32.mrf.mxu0  ;;  %v2094_v49 = vpop.f32.mrf.mxu1 }
 0x2a3   : > { %v582_v43 = vpop.permute.xlu1 %581  ;;  %2397 = vmatpush1.bf16.msra.mxu1 %v1385_v18  ;;  %v480_v3 = vpop.permute.xlu0 %479 }
 0x2a4   : > { %v616_v20 = vsel %vm583_vm6, %v580_v37, %v582_v43  ;;  %v514_v52 = vsel %vm481_vm7, %v478_v25, %v480_v3  ;;  %2398 = vmatprep.subr.bf16.mxu1 %v1257_v33  ;;  %v2133_v11 = vpop.f32.mrf.mxu0  ;;  %v2095_v21 = vpop.f32.mrf.mxu1 }
 0x2a5   : > { %v1393_v7 = vsel %vm1130_vm1, %v514_v52, %v616_v20 }
 0x2a6   : > { %2864 = vmatpush3.bf16.msra.mxu0 %v1393_v7  ;;  %v2135_v34 = vpop.f32.mrf.mxu0 }
 0x2a7   : > { %2399 = vmatpush1.bf16.msra.mxu1 %v1253_v27  ;;  %2865 = vmatprep.subr.bf16.mxu0 %v2978_v48 }
 0x2a8   : > { %v2136_v22 = vpop.f32.mrf.mxu0 }
 0x2aa   : > { %2813 = vmatmul.mubr.msk.bf16.vlgmr.msra.gmra.mxu1 %vm1666_vm9, %v4294_v2  ;;  %2866 = vmatpush3.bf16.msra.mxu0 %v1261_v4 }
 0x2ad   : > { %2868 = vmatmul.mubr.msk.bf16.vlgmr.msra.gmra.mxu0 %vm1666_vm9, %v4294_v2 }
 0x2b0   : > { %v4640_v62 = vpop.permute.xlu0 %1663 }
 0x2b1   : > { %v1845_v51 = vadd.f32 %v4385_v16, %v4640_v62  ;;  %v1804_v48 = vadd.f32 %v4378_v53, %v4640_v62  ;;  %v1806_v47 = vadd.f32 %v4383_v55, %v4640_v62  ;;  %v1847_v36 = vadd.f32 %v4401_v58, %v4640_v62 }
 0x2b2   : > { %v1886_v0 = vadd.f32 %v4406_v59, %v4640_v62  ;;  %v1888_v2 = vadd.f32 %v4408_v24, %v4640_v62  ;;  %v1927_v31 = vadd.f32 %v4421_v40, %v4640_v62  ;;  %v1929_v16 = vadd.f32 %v4430_v50, %v4640_v62 }
 0x2b3   : > { %v2467_v30 = vmax.f32 %v1845_v51, 0.0  ;;  %v2465_v53 = vmax.f32 %v1804_v48, 0.0  ;;  %v2466_v29 = vmax.f32 %v1806_v47, 0.0  ;;  %v2468_v56 = vmax.f32 %v1847_v36, 0.0 }
 0x2b4   : > { %v2469_v55 = vmax.f32 %v1886_v0, 0.0  ;;  %v2470_v58 = vmax.f32 %v1888_v2, 0.0  ;;  %v2471_v59 = vmax.f32 %v1927_v31, 0.0  ;;  %v2472_v24 = vmax.f32 %v1929_v16, 0.0 }
 0x2b5   : > { %v2834_v40 = vpack.c.bf16 %v2466_v29, %v2465_v53  ;;  %v2835_v42 = vpack.c.bf16 %v2468_v56, %v2467_v30  ;;  %v1968_v50 = vadd.f32 %v4434_v28, %v4640_v62  ;;  %v1970_v8 = vadd.f32 %v4446_v35, %v4640_v62 }
 0x2b6   : > { %v2836_v23 = vpack.c.bf16 %v2470_v58, %v2469_v55  ;;  %v2837_v13 = vpack.c.bf16 %v2472_v24, %v2471_v59  ;;  %v2009_v57 = vadd.f32 %v4516_v45, %v4640_v62  ;;  %v2011_v41 = vadd.f32 %v4518_v38, %v4640_v62 }
 0x2b7   : > { %2631 = vst [vmem:[%s4662_s10] sm:$0xff] %v2834_v40  ;;  %2632 = vst [vmem:[%s4662_s10 + $0x8] sm:$0xff] %v2835_v42  ;;  %v2473_v1 = vmax.f32 %v1968_v50, 0.0  ;;  %v2474_v25 = vmax.f32 %v1970_v8, 0.0  ;;  %v2050_v26 = vadd.f32 %v4520_v39, %v4640_v62  ;;  %v2052_v28 = vadd.f32 %v4529_v10, %v4640_v62 }
 0x2b8   : > { %2633 = vst [vmem:[%s4662_s10 + $0x10] sm:$0xff] %v2836_v23  ;;  %2634 = vst [vmem:[%s4662_s10 + $0x18] sm:$0xff] %v2837_v13  ;;  %v2475_v35 = vmax.f32 %v2009_v57, 0.0  ;;  %v2476_v15 = vmax.f32 %v2011_v41, 0.0  ;;  %v2091_v45 = vadd.f32 %v4603_v44, %v4640_v62  ;;  %v2093_v38 = vadd.f32 %v4614_v46, %v4640_v62 }
 0x2b9   : > { %v2838_v17 = vpack.c.bf16 %v2474_v25, %v2473_v1  ;;  %v2477_v6 = vmax.f32 %v2050_v26, 0.0  ;;  %v2478_v39 = vmax.f32 %v2052_v28, 0.0  ;;  %v2132_v10 = vadd.f32 %v4618_v5, %v4640_v62 }
 0x2ba   : > { %v2839_v37 = vpack.c.bf16 %v2476_v15, %v2475_v35  ;;  %v2479_v19 = vmax.f32 %v2091_v45, 0.0  ;;  %v2480_v60 = vmax.f32 %v2093_v38, 0.0  ;;  %v2134_v61 = vadd.f32 %v2133_v11, %v4640_v62 }
 0x2bb   : > { %2635 = vst [vmem:[%s4662_s10 + $0x20] sm:$0xff] %v2838_v17  ;;  %v2840_v9 = vpack.c.bf16 %v2478_v39, %v2477_v6  ;;  %v2481_v44 = vmax.f32 %v2132_v10, 0.0 }
 0x2bc   : > { %2636 = vst [vmem:[%s4662_s10 + $0x28] sm:$0xff] %v2839_v37  ;;  %v2841_v14 = vpack.c.bf16 %v2480_v60, %v2479_v19  ;;  %v2482_v46 = vmax.f32 %v2134_v61, 0.0 }
 0x2bd   : > { %2637 = vst [vmem:[%s4662_s10 + $0x30] sm:$0xff] %v2840_v9 }
 0x2be   : > { %2638 = vst [vmem:[%s4662_s10 + $0x38] sm:$0xff] %v2841_v14  ;;  %v2842_v12 = vpack.c.bf16 %v2482_v46, %v2481_v44 }
 0x2c0   : > { %2639 = vst [vmem:[%s4662_s10 + $0x40] sm:$0xff] %v2842_v12 }
 0x2ce   : > { %v2172_v18 = vpop.f32.mrf.mxu1 }
 0x2cf   : > { %v2173_v49 = vadd.f32 %v2172_v18, %v4640_v62 }
 0x2d0   : > { %v2174_v5 = vpop.f32.mrf.mxu1 }
 0x2d1   : > { %v2483_v63 = vmax.f32 %v2173_v49, 0.0  ;;  %v2175_v43 = vadd.f32 %v2174_v5, %v4640_v62 }
 0x2d2   : > { %v2176_v3 = vpop.f32.mrf.mxu1 }
 0x2d3   : > { %v2484_v33 = vmax.f32 %v2175_v43, 0.0 }
 0x2d4   : > { %v2177_v20 = vpop.f32.mrf.mxu1 }
 0x2d5   : > { %v2843_v52 = vpack.c.bf16 %v2484_v33, %v2483_v63 }
 0x2d6   : > { %v2213_v11 = vpop.f32.mrf.mxu0 }
 0x2d7   : > { %2640 = vst [vmem:[%s4662_s10 + $0x48] sm:$0xff] %v2843_v52  ;;  %v2214_v21 = vadd.f32 %v2213_v11, %v4640_v62 }
 0x2d8   : > { %v2215_v7 = vpop.f32.mrf.mxu0 }
 0x2d9   : > { %v2485_v54 = vmax.f32 %v2214_v21, 0.0  ;;  %v2216_v32 = vadd.f32 %v2215_v7, %v4640_v62 }
 0x2da   : > { %v2217_v27 = vpop.f32.mrf.mxu0 }
 0x2db   : > { %v2486_v34 = vmax.f32 %v2216_v32, 0.0 }
 0x2dc   : > { %v2218_v22 = vpop.f32.mrf.mxu0 }
 0x2dd   : > { %v2844_v4 = vpack.c.bf16 %v2486_v34, %v2485_v54 }
 0x2df   : > { %2641 = vst [vmem:[%s4662_s10 + $0x50] sm:$0xff] %v2844_v4 }
 0x306   : > { %v2254_v51 = vpop.f32.mrf.mxu1 }
 0x307   : > { %v2255_v48 = vadd.f32 %v2254_v51, %v4640_v62 }
 0x308   : > { %v2256_v47 = vpop.f32.mrf.mxu1 }
 0x309   : > { %v2487_v36 = vmax.f32 %v2255_v48, 0.0  ;;  %v2257_v0 = vadd.f32 %v2256_v47, %v4640_v62 }
 0x30a   : > { %v2258_v2 = vpop.f32.mrf.mxu1 }
 0x30b   : > { %v2488_v31 = vmax.f32 %v2257_v0, 0.0 }
 0x30c   : > { %v2259_v16 = vpop.f32.mrf.mxu1 }
 0x30d   : > { %v2845_v30 = vpack.c.bf16 %v2488_v31, %v2487_v36 }
 0x30e   : > { %v2295_v53 = vpop.f32.mrf.mxu0 }
 0x30f   : > { %2642 = vst [vmem:[%s4662_s10 + $0x58] sm:$0xff] %v2845_v30  ;;  %v2296_v29 = vadd.f32 %v2295_v53, %v4640_v62 }
 0x310   : > { %v2297_v56 = vpop.f32.mrf.mxu0 }
 0x311   : > { %v2489_v55 = vmax.f32 %v2296_v29, 0.0  ;;  %v2298_v58 = vadd.f32 %v2297_v56, %v4640_v62 }
 0x312   : > { %v2299_v59 = vpop.f32.mrf.mxu0 }
 0x313   : > { %v2490_v24 = vmax.f32 %v2298_v58, 0.0 }
 0x314   : > { %v2300_v40 = vpop.f32.mrf.mxu0 }
 0x315   : > { %v2846_v42 = vpack.c.bf16 %v2490_v24, %v2489_v55 }
 0x317   : > { %2643 = vst [vmem:[%s4662_s10 + $0x60] sm:$0xff] %v2846_v42 }
 0x33e   : > { %v2336_v50 = vpop.f32.mrf.mxu1 }
 0x33f   : > { %v2337_v8 = vadd.f32 %v2336_v50, %v4640_v62 }
 0x340   : > { %v2338_v23 = vpop.f32.mrf.mxu1 }
 0x341   : > { %v2491_v13 = vmax.f32 %v2337_v8, 0.0  ;;  %v2339_v57 = vadd.f32 %v2338_v23, %v4640_v62 }
 0x342   : > { %v2340_v41 = vpop.f32.mrf.mxu1 }
 0x343   : > { %v2492_v1 = vmax.f32 %v2339_v57, 0.0 }
 0x344   : > { %v2341_v25 = vpop.f32.mrf.mxu1 }
 0x345   : > { %v2847_v26 = vpack.c.bf16 %v2492_v1, %v2491_v13 }
 0x346   : > { %v2377_v28 = vpop.f32.mrf.mxu0 }
 0x347   : > { %2644 = vst [vmem:[%s4662_s10 + $0x68] sm:$0xff] %v2847_v26  ;;  %v2378_v35 = vadd.f32 %v2377_v28, %v4640_v62 }
 0x348   : > { %v2379_v15 = vpop.f32.mrf.mxu0 }
 0x349   : > { %v2493_v45 = vmax.f32 %v2378_v35, 0.0  ;;  %v2380_v38 = vadd.f32 %v2379_v15, %v4640_v62 }
 0x34a   : > { %v2381_v17 = vpop.f32.mrf.mxu0 }
 0x34b   : > { %v2494_v6 = vmax.f32 %v2380_v38, 0.0 }
 0x34c   : > { %v2382_v39 = vpop.f32.mrf.mxu0 }
 0x34d   : > { %v2848_v10 = vpack.c.bf16 %v2494_v6, %v2493_v45 }
 0x34f   : > { %2645 = vst [vmem:[%s4662_s10 + $0x70] sm:$0xff] %v2848_v10 }
 0x36a   : > { %v2418_v37 = vpop.f32.mrf.mxu1 }
 0x36b   : > { %v2419_v19 = vadd.f32 %v2418_v37, %v4640_v62 }
 0x36c   : > { %v2420_v60 = vpop.f32.mrf.mxu1 }
 0x36d   : > { %v2495_v61 = vmax.f32 %v2419_v19, 0.0  ;;  %v2421_v9 = vadd.f32 %v2420_v60, %v4640_v62  ;;  %v2459_v44 = vpop.f32.mrf.mxu0 }
 0x36e   : > { %v2460_v14 = vadd.f32 %v2459_v44, %v4640_v62  ;;  %v2422_v46 = vpop.f32.mrf.mxu1 }
 0x36f   : > { %v2496_v12 = vmax.f32 %v2421_v9, 0.0  ;;  %v2869_v18 = vpop.f32.mrf.mxu0 }
 0x370   : > { %v2497_v49 = vmax.f32 %v2460_v14, 0.0  ;;  %v2423_v5 = vpop.f32.mrf.mxu1 }
 0x371   : > { %v2849_v63 = vpack.c.bf16 %v2496_v12, %v2495_v61  ;;  %v2462_v43 = vpop.f32.mrf.mxu0 }
 0x372   : > { %v2850_v3 = vpack.c.bf16 %v2497_v49, %v2497_v49 }
 0x373   : > { %2646 = vst [vmem:[%s4662_s10 + $0x78] sm:$0xff] %v2849_v63  ;;  %v2870_v33 = vpop.f32.mrf.mxu0 }
 0x374   : > { %2647 = vst [vmem:[%s4662_s10 + $0x80] sm:$0xf] %v2850_v3 }
 0x375 PF: > { %s13_s14 = sadd.s32 1, %s2967_s14   ;;  %s4860_s12 = smov %s2963_s13 }
 0x376   : > { %p10_p5 = scmp.ge.s32.totalorder %s13_s14, 4   ;;  %s4861_s13 = smov %s4863_s15 }
 0x378   :  { %12 = sbr.rel (!%p10_p5) target bundleno = 2 (0x2), region = 62 }

// kernel: _lambda_.4
= control target key start
LH: loop header
LB: loop body
LE: loop exit
PB: predicated region body
PF: predicated region fallthrough
CT: control target
= control target key end

     0   :  { %s1222_s12 = smov 0   ;;  %s1224_s13 = smov 0   ;;  %s1668_s0 = inlined_call_operand.vmem [shape: bf16[2,1,8,1280], index: 0, kind: input, shape index: {}]   ;;  %s1669_s1 = inlined_call_operand.vmem [shape: bf16[16,72], index: 1, kind: input, shape index: {}]   ;;  %s1670_s2 = inlined_call_operand.vmem [shape: f32[16,1], index: 2, kind: input, shape index: {}]   ;;  %s1671_s3 = inlined_call_operand.vmem [shape: bf16[2,1,16,1088], index: 3, kind: output, shape index: {}]  }
   0x1   :  { %s1226_s14 = smov 0  }
   0x2 LB: > { %s25_s15 = sadd.s32 1, %s1185_s13  ;;  %p1052_p0 = scmp.ge.s32.totalorder %s1189_s14, 1  ;;  %s1189_s14 = sphi %s1226_s14, %s13_s14   ;;  %s1185_s13 = sphi %s1224_s13, %s1673_s13   ;;  %s1181_s12 = sphi %s1222_s12, %s1672_s12  }
   0x3   : > { %p27_p1 = scmp.ge.s32.totalorder %s25_s15, 2  ;;  %p157_p2 = scmp.lt.s32.totalorder %s1189_s14, 3 }
   0x5   : > { %s1675_s15 = smov (%p27_p1, %s25_s15), 0  ;;  %p158_p3 = pnand %p1052_p0, %p157_p2 }
   0x6   : > { %p189_p4 = scmp.lt.s32.totalorder (!%p158_p3), %s1181_s12, 1  ;;  %s1191_s20 = smov (!%p158_p3), 58  }
   0x7   : > { %161 = sbr.rel (%p158_p3) target bundleno = 494 (0x1ee), region = 32  ;;  %s1192_s21 = smov (!%p158_p3), 60  }
   0x8   : > { %s1193_s22 = smov (!%p158_p3), 59   ;;  %s1194_s23 = smov (!%p158_p3), 93  }
   0x9   : > { %s1195_s24 = smov (!%p158_p3), 92   ;;  %s1196_s25 = smov (!%p158_p3), 126  }
   0xa   : > { %s1197_s26 = smov (!%p158_p3), 94   ;;  %s1198_s27 = smov (!%p158_p3), 127  }
   0xc   : > { %s1677_s12 = smov (!%p189_p4, %s1181_s12), 1  ;;  %v1199_v6 = vmov 0   ;;  %vm453_vm0 = vcmask 474112   ;;  %vm463_vm1 = vcmask 1043456   ;;  %vm393_vm2 = vcmask 490496   ;;  %v610_v47 = vld [vmem:[%s1670_s2] sm:$0xff] }
   0xd   : > { %s1117_s16 = smul.u32 40, %s1677_s12  ;;  %690 = vmatprep.mubr.bf16.mxu0 %v1199_v6  ;;  %733 = vmatprep.mubr.bf16.mxu1 %v1199_v6  ;;  %vm423_vm3 = vcmask 482304   ;;  %vm335_vm4 = vcmask 760832   ;;  %vm362_vm5 = vcmask 752640   ;;  %vm281_vm6 = vcmask 1031168   ;;  %v611_v50 = vld [vmem:[%s1670_s2 + $0x8] sm:$0xff] }
   0xe   : > { %1155 = vset.pattern.permute.xlu0 %v1199_v6  ;;  %1154 = vset.pattern.permute.xlu1 %v1199_v6  ;;  %vm308_vm7 = vcmask 769024   ;;  %vm254_vm8 = vcmask 1039360   ;;  %vm627_vm9 = vcmask 588800   ;;  %vm1201_vm10 = vmmov 0   ;;  %s1118_s7 = smul.u32 72, %s1677_s12 }
   0xf   : > { %s1246_s19 = scalar_lea.vmem %s1668_s0, %s1117_s16  ;;  %vm949_vm11 = vcmask 519168  }
  0x10   : > { %v209_v0 = vld [vmem:[%s1246_s19 + $0x8] sm:$0xff]  ;;  %v208_v1 = vld [vmem:[%s1246_s19] sm:$0xff]  ;;  %v210_v5 = vld [vmem:[%s1246_s19 + $0x10] sm:$0xff]  ;;  %s1637_s10 = scalar_lea.vmem %s1671_s3, %s1118_s7 }
  0x11   : > { %v1250_v2 = vcombine.low %v209_v0, %v209_v0  ;;  %v1252_v3 = vcombine.low %v208_v1, %v208_v1  ;;  %v1258_v4 = vcombine.high %v208_v1, %v208_v1  ;;  %v1309_v7 = vcombine.low %v210_v5, %v210_v5  ;;  %v211_v9 = vld [vmem:[%s1246_s19 + $0x18] sm:$0xff]  ;;  %v212_v12 = vld [vmem:[%s1246_s19 + $0x20] sm:$0xff] }
  0x12   : > { %v1311_v8 = vcombine.high %v209_v0, %v209_v0  ;;  %v1318_v10 = vcombine.low %v211_v9, %v211_v9  ;;  %v1320_v11 = vcombine.high %v210_v5, %v210_v5  ;;  %v1383_v13 = vcombine.low %v212_v12, %v212_v12 }
  0x13   : > { %437 = vrot.lane.b32.xlu1 %v1250_v2, %s1191_s20  ;;  %433 = vrot.lane.b32.xlu0 %v1252_v3, %s1191_s20  ;;  %v1385_v14 = vcombine.high %v211_v9, %v211_v9  ;;  %v1064_v15 = vcombine.high %v212_v12, %v212_v12  ;;  %v1483_v9 = vld [vmem:[%s1669_s1] sm:$0xff]  }
  0x17   : > { %375 = vrot.lane.b32.xlu1 %v1258_v4, %s1192_s21  ;;  %435 = vrot.lane.b32.xlu0 %v1258_v4, %s1191_s20 }
  0x1b   : > { %405 = vrot.lane.b32.xlu1 %v1258_v4, %s1193_s22  ;;  %377 = vrot.lane.b32.xlu0 %v1250_v2, %s1192_s21 }
  0x1f   : > { %373 = vrot.lane.b32.xlu1 %v1252_v3, %s1192_s21  ;;  %407 = vrot.lane.b32.xlu0 %v1250_v2, %s1193_s22 }
  0x23   : > { %319 = vrot.lane.b32.xlu1 %v1258_v4, %s1194_s23  ;;  %403 = vrot.lane.b32.xlu0 %v1252_v3, %s1193_s22 }
  0x27   : > { %346 = vrot.lane.b32.xlu1 %v1258_v4, %s1195_s24  ;;  %321 = vrot.lane.b32.xlu0 %v1250_v2, %s1194_s23 }
  0x2b   : > { %317 = vrot.lane.b32.xlu1 %v1252_v3, %s1194_s23  ;;  %348 = vrot.lane.b32.xlu0 %v1250_v2, %s1195_s24 }
  0x2f   : > { %265 = vrot.lane.b32.xlu1 %v1258_v4, %s1196_s25  ;;  %344 = vrot.lane.b32.xlu0 %v1252_v3, %s1195_s24 }
  0x33   : > { %292 = vrot.lane.b32.xlu1 %v1258_v4, %s1197_s26  ;;  %267 = vrot.lane.b32.xlu0 %v1250_v2, %s1196_s25 }
  0x37   : > { %263 = vrot.lane.b32.xlu1 %v1252_v3, %s1196_s25  ;;  %294 = vrot.lane.b32.xlu0 %v1250_v2, %s1197_s26 }
  0x3b   : > { %238 = vrot.lane.b32.xlu1 %v1258_v4, %s1198_s27  ;;  %290 = vrot.lane.b32.xlu0 %v1252_v3, %s1197_s26 }
  0x3f   : > { %236 = vrot.lane.b32.xlu1 %v1252_v3, %s1198_s27  ;;  %240 = vrot.lane.b32.xlu0 %v1250_v2, %s1198_s27 }
  0x43   : > { %441 = vrot.lane.b32.xlu1 %v1309_v7, %s1191_s20  ;;  %439 = vrot.lane.b32.xlu0 %v1311_v8, %s1191_s20 }
  0x47   : > { %445 = vrot.lane.b32.xlu1 %v1318_v10, %s1191_s20  ;;  %443 = vrot.lane.b32.xlu0 %v1320_v11, %s1191_s20 }
  0x4b   : > { %381 = vrot.lane.b32.xlu1 %v1309_v7, %s1192_s21  ;;  %379 = vrot.lane.b32.xlu0 %v1311_v8, %s1192_s21 }
  0x4f   : > { %411 = vrot.lane.b32.xlu1 %v1309_v7, %s1193_s22  ;;  %409 = vrot.lane.b32.xlu0 %v1311_v8, %s1193_s22 }
  0x53   : > { %385 = vrot.lane.b32.xlu1 %v1318_v10, %s1192_s21  ;;  %383 = vrot.lane.b32.xlu0 %v1320_v11, %s1192_s21 }
  0x57   : > { %415 = vrot.lane.b32.xlu1 %v1318_v10, %s1193_s22  ;;  %413 = vrot.lane.b32.xlu0 %v1320_v11, %s1193_s22 }
  0x5b   : > { %325 = vrot.lane.b32.xlu1 %v1309_v7, %s1194_s23  ;;  %323 = vrot.lane.b32.xlu0 %v1311_v8, %s1194_s23 }
  0x5f   : > { %352 = vrot.lane.b32.xlu1 %v1309_v7, %s1195_s24  ;;  %350 = vrot.lane.b32.xlu0 %v1311_v8, %s1195_s24 }
  0x63   : > { %329 = vrot.lane.b32.xlu1 %v1318_v10, %s1194_s23  ;;  %327 = vrot.lane.b32.xlu0 %v1320_v11, %s1194_s23 }
  0x67   : > { %356 = vrot.lane.b32.xlu1 %v1318_v10, %s1195_s24  ;;  %354 = vrot.lane.b32.xlu0 %v1320_v11, %s1195_s24 }
  0x6b   : > { %271 = vrot.lane.b32.xlu1 %v1309_v7, %s1196_s25  ;;  %269 = vrot.lane.b32.xlu0 %v1311_v8, %s1196_s25 }
  0x6f   : > { %298 = vrot.lane.b32.xlu1 %v1309_v7, %s1197_s26  ;;  %296 = vrot.lane.b32.xlu0 %v1311_v8, %s1197_s26 }
  0x73   : > { %275 = vrot.lane.b32.xlu1 %v1318_v10, %s1196_s25  ;;  %273 = vrot.lane.b32.xlu0 %v1320_v11, %s1196_s25 }
  0x77   : > { %302 = vrot.lane.b32.xlu1 %v1318_v10, %s1197_s26  ;;  %300 = vrot.lane.b32.xlu0 %v1320_v11, %s1197_s26 }
  0x7b   : > { %244 = vrot.lane.b32.xlu1 %v1309_v7, %s1198_s27  ;;  %242 = vrot.lane.b32.xlu0 %v1311_v8, %s1198_s27 }
  0x7f   : > { %248 = vrot.lane.b32.xlu1 %v1318_v10, %s1198_s27  ;;  %246 = vrot.lane.b32.xlu0 %v1320_v11, %s1198_s27 }
  0x83   : > { %449 = vrot.lane.b32.xlu1 %v1383_v13, %s1191_s20  ;;  %447 = vrot.lane.b32.xlu0 %v1385_v14, %s1191_s20 }
  0x85   : > { %v1391_v16 = vpop.permute.xlu1 %437  ;;  %v434_v17 = vpop.permute.xlu0 %433 }
  0x87   : > { %387 = vrot.lane.b32.xlu1 %v1385_v14, %s1192_s21  ;;  %451 = vrot.lane.b32.xlu0 %v1064_v15, %s1191_s20 }
  0x89   : > { %v376_v18 = vpop.permute.xlu1 %375  ;;  %v436_v19 = vpop.permute.xlu0 %435 }
  0x8a   : > { %v455_v20 = vsel %vm453_vm0, %v436_v19, %v1391_v16  ;;  %v454_v21 = vsel %vm453_vm0, %v434_v17, %v436_v19 }
  0x8b   : > { %417 = vrot.lane.b32.xlu1 %v1385_v14, %s1193_s22  ;;  %389 = vrot.lane.b32.xlu0 %v1383_v13, %s1192_s21  ;;  %v632_v22 = vsel %vm463_vm1, %v454_v21, 0 }
  0x8c   : > { %1066 = vmatprep.subr.msk.bf16.mxu0 %vm463_vm1, %v455_v20 }
  0x8d   : > { %665 = vmatpush1.bf16.msra.mxu0 %v632_v22  ;;  %v406_v23 = vpop.permute.xlu1 %405  ;;  %v1405_v24 = vpop.permute.xlu0 %377 }
  0x8e   : > { %v395_v27 = vsel %vm393_vm2, %v376_v18, %v1405_v24 }
  0x8f   : > { %391 = vrot.lane.b32.xlu1 %v1064_v15, %s1192_s21  ;;  %419 = vrot.lane.b32.xlu0 %v1383_v13, %s1193_s22 }
  0x91   : > { %v374_v25 = vpop.permute.xlu1 %373  ;;  %v1410_v26 = vpop.permute.xlu0 %407 }
  0x92   : > { %v425_v28 = vsel %vm423_vm3, %v406_v23, %v1410_v26  ;;  %v394_v32 = vsel %vm393_vm2, %v374_v25, %v376_v18 }
  0x93   : > { %331 = vrot.lane.b32.xlu1 %v1385_v14, %s1194_s23  ;;  %421 = vrot.lane.b32.xlu0 %v1064_v15, %s1193_s22  ;;  %v578_v29 = vsel %vm463_vm1, %v395_v27, %v425_v28 }
  0x94   : > { %666 = vmatprep.subr.bf16.mxu0 %v578_v29 }
  0x95   : > { %v320_v30 = vpop.permute.xlu1 %319  ;;  %v404_v31 = vpop.permute.xlu0 %403 }
  0x96   : > { %v424_v33 = vsel %vm423_vm3, %v404_v31, %v406_v23 }
  0x97   : > { %358 = vrot.lane.b32.xlu1 %v1385_v14, %s1195_s24  ;;  %333 = vrot.lane.b32.xlu0 %v1383_v13, %s1194_s23  ;;  %v574_v34 = vsel %vm463_vm1, %v394_v32, %v424_v33 }
  0x98   : > { %667 = vmatpush1.bf16.msra.mxu0 %v574_v34 }
  0x99   : > { %v347_v35 = vpop.permute.xlu1 %346  ;;  %v1427_v36 = vpop.permute.xlu0 %321 }
  0x9a   : > { %v337_v39 = vsel %vm335_vm4, %v320_v30, %v1427_v36 }
  0x9b   : > { %277 = vrot.lane.b32.xlu1 %v1385_v14, %s1196_s25  ;;  %360 = vrot.lane.b32.xlu0 %v1383_v13, %s1195_s24 }
  0x9d   : > { %v318_v37 = vpop.permute.xlu1 %317  ;;  %v1433_v38 = vpop.permute.xlu0 %348 }
  0x9e   : > { %v364_v40 = vsel %vm362_vm5, %v347_v35, %v1433_v38  ;;  %v336_v44 = vsel %vm335_vm4, %v318_v37, %v320_v30 }
  0x9f   : > { %304 = vrot.lane.b32.xlu1 %v1385_v14, %s1197_s26  ;;  %279 = vrot.lane.b32.xlu0 %v1383_v13, %s1196_s25  ;;  %v542_v41 = vsel %vm463_vm1, %v337_v39, %v364_v40 }
  0xa0   : > { %668 = vmatprep.subr.bf16.mxu0 %v542_v41 }
  0xa1   : > { %v266_v42 = vpop.permute.xlu1 %265  ;;  %v345_v43 = vpop.permute.xlu0 %344 }
  0xa2   : > { %v363_v45 = vsel %vm362_vm5, %v345_v43, %v347_v35 }
  0xa3   : > { %250 = vrot.lane.b32.xlu1 %v1385_v14, %s1198_s27  ;;  %306 = vrot.lane.b32.xlu0 %v1383_v13, %s1197_s26  ;;  %v538_v46 = vsel %vm463_vm1, %v336_v44, %v363_v45 }
  0xa4   : > { %669 = vmatpush1.bf16.msra.mxu0 %v538_v46 }
  0xa5   : > { %v293_v48 = vpop.permute.xlu1 %292  ;;  %v1454_v49 = vpop.permute.xlu0 %267 }
  0xa6   : > { %v283_v53 = vsel %vm281_vm6, %v266_v42, %v1454_v49 }
  0xa7   : > { %252 = vrot.lane.b32.xlu0 %v1383_v13, %s1198_s27  ;;  %614 = vperm.xlu1 %1154, %v610_v47  }
  0xa9   : > { %v264_v51 = vpop.permute.xlu1 %263  ;;  %v1461_v52 = vpop.permute.xlu0 %294 }
  0xaa   : > { %v310_v54 = vsel %vm308_vm7, %v293_v48, %v1461_v52  ;;  %v282_v58 = vsel %vm281_vm6, %v264_v51, %v266_v42 }
  0xab   : > { %v506_v55 = vsel %vm463_vm1, %v283_v53, %v310_v54  ;;  %619 = vperm.xlu0 %1155, %v611_v50  }
  0xac   : > { %670 = vmatprep.subr.bf16.mxu0 %v506_v55 }
  0xad   : > { %v239_v56 = vpop.permute.xlu1 %238  ;;  %v291_v57 = vpop.permute.xlu0 %290 }
  0xae   : > { %v309_v59 = vsel %vm308_vm7, %v291_v57, %v293_v48 }
  0xaf   : > { %v502_v60 = vsel %vm463_vm1, %v282_v58, %v309_v59 }
  0xb0   : > { %671 = vmatpush1.bf16.msra.mxu0 %v502_v60 }
  0xb1   : > { %v237_v61 = vpop.permute.xlu1 %236  ;;  %v1471_v62 = vpop.permute.xlu0 %240 }
  0xb2   : > { %v255_v63 = vsel %vm254_vm8, %v237_v61, %v239_v56  ;;  %v256_v0 = vsel %vm254_vm8, %v239_v56, %v1471_v62 }
  0xb3   : > { %v470_v1 = vsel %vm463_vm1, %v1258_v4, %v256_v0  ;;  %v466_v5 = vsel %vm463_vm1, %v1252_v3, %v255_v63 }
  0xb4   : > { %672 = vmatprep.subr.bf16.mxu0 %v470_v1 }
  0xb5   : > { %v442_v12 = vpop.permute.xlu1 %441  ;;  %673 = vmatpush1.bf16.msra.mxu0 %v466_v5  ;;  %v440_v15 = vpop.permute.xlu0 %439 }
  0xb6   : > { %v457_v17 = vsel %vm453_vm0, %v440_v15, %v442_v12  ;;  %v456_v18 = vsel %vm453_vm0, %v1391_v16, %v440_v15 }
  0xb7   : > { %1068 = vmatprep.subr.msk.bf16.mxu1 %vm463_vm1, %v457_v17  ;;  %v638_v4 = vsel %vm463_vm1, %v456_v18, 0 }
  0xb8   : > { %708 = vmatpush1.bf16.msra.mxu1 %v638_v4  ;;  %1067 = vmatmul.mubr.msk.bf16.vlgmr.msra.gmra.mxu0 %vm627_vm9, %v1483_v9 }
  0xb9   : > { %v1492_v3 = vpop.permute.xlu1 %445  ;;  %v444_v19 = vpop.permute.xlu0 %443  ;;  %776 = vmatprep.mubr.bf16.mxu0 %v1199_v6 }
  0xba   : > { %v458_v20 = vsel %vm453_vm0, %v442_v12, %v444_v19  ;;  %v459_v21 = vsel %vm453_vm0, %v444_v19, %v1492_v3 }
  0xbb   : > { %v644_v16 = vsel %vm463_vm1, %v458_v20, 0  ;;  %1070 = vmatprep.subr.msk.bf16.mxu0 %vm463_vm1, %v459_v21 }
  0xbc   : > { %751 = vmatpush1.bf16.msra.mxu0 %v644_v16 }
  0xbd   : > { %v382_v22 = vpop.permute.xlu1 %381  ;;  %v380_v23 = vpop.permute.xlu0 %379 }
  0xbe   : > { %v396_v28 = vsel %vm393_vm2, %v1405_v24, %v380_v23  ;;  %v397_v29 = vsel %vm393_vm2, %v380_v23, %v382_v22 }
  0xc1   : > { %v412_v25 = vpop.permute.xlu1 %411  ;;  %v410_v27 = vpop.permute.xlu0 %409 }
  0xc2   : > { %v426_v30 = vsel %vm423_vm3, %v1410_v26, %v410_v27  ;;  %v427_v31 = vsel %vm423_vm3, %v410_v27, %v412_v25 }
  0xc3   : > { %v586_v32 = vsel %vm463_vm1, %v397_v29, %v427_v31  ;;  %v582_v33 = vsel %vm463_vm1, %v396_v28, %v426_v30 }
  0xc4   : > { %709 = vmatprep.subr.bf16.mxu1 %v586_v32 }
  0xc5   : > { %v1508_v34 = vpop.permute.xlu1 %385  ;;  %710 = vmatpush1.bf16.msra.mxu1 %v582_v33  ;;  %v384_v35 = vpop.permute.xlu0 %383 }
  0xc6   : > { %v398_v24 = vsel %vm393_vm2, %v382_v22, %v384_v35  ;;  %v399_v40 = vsel %vm393_vm2, %v384_v35, %v1508_v34 }
  0xc9   : > { %v1510_v37 = vpop.permute.xlu1 %415  ;;  %v414_v39 = vpop.permute.xlu0 %413 }
  0xca   : > { %v428_v26 = vsel %vm423_vm3, %v412_v25, %v414_v39  ;;  %v429_v41 = vsel %vm423_vm3, %v414_v39, %v1510_v37 }
  0xcb   : > { %v594_v42 = vsel %vm463_vm1, %v399_v40, %v429_v41  ;;  %v590_v43 = vsel %vm463_vm1, %v398_v24, %v428_v26 }
  0xcc   : > { %752 = vmatprep.subr.bf16.mxu0 %v594_v42 }
  0xcd   : > { %v326_v44 = vpop.permute.xlu1 %325  ;;  %753 = vmatpush1.bf16.msra.mxu0 %v590_v43  ;;  %v324_v45 = vpop.permute.xlu0 %323 }
  0xce   : > { %v338_v48 = vsel %vm335_vm4, %v1427_v36, %v324_v45  ;;  %v339_v50 = vsel %vm335_vm4, %v324_v45, %v326_v44 }
  0xd1   : > { %v353_v46 = vpop.permute.xlu1 %352  ;;  %v351_v47 = vpop.permute.xlu0 %350 }
  0xd2   : > { %v365_v51 = vsel %vm362_vm5, %v1433_v38, %v351_v47  ;;  %v366_v53 = vsel %vm362_vm5, %v351_v47, %v353_v46 }
  0xd3   : > { %v550_v54 = vsel %vm463_vm1, %v339_v50, %v366_v53  ;;  %v546_v55 = vsel %vm463_vm1, %v338_v48, %v365_v51 }
  0xd4   : > { %711 = vmatprep.subr.bf16.mxu1 %v550_v54 }
  0xd5   : > { %v1528_v56 = vpop.permute.xlu1 %329  ;;  %712 = vmatpush1.bf16.msra.mxu1 %v546_v55  ;;  %v328_v57 = vpop.permute.xlu0 %327 }
  0xd6   : > { %v340_v36 = vsel %vm335_vm4, %v326_v44, %v328_v57  ;;  %v341_v60 = vsel %vm335_vm4, %v328_v57, %v1528_v56 }
  0xd9   : > { %v1530_v58 = vpop.permute.xlu1 %356  ;;  %v355_v59 = vpop.permute.xlu0 %354 }
  0xda   : > { %v367_v38 = vsel %vm362_vm5, %v353_v46, %v355_v59  ;;  %v368_v61 = vsel %vm362_vm5, %v355_v59, %v1530_v58  ;;  %v1200_v46 = vmov 0.0  }
  0xdb   : > { %v558_v63 = vsel %vm463_vm1, %v341_v60, %v368_v61  ;;  %v554_v0 = vsel %vm463_vm1, %v340_v36, %v367_v38 }
  0xdc   : > { %754 = vmatprep.subr.bf16.mxu0 %v558_v63 }
  0xdd   : > { %v272_v1 = vpop.permute.xlu1 %271  ;;  %755 = vmatpush1.bf16.msra.mxu0 %v554_v0  ;;  %v270_v5 = vpop.permute.xlu0 %269 }
  0xde   : > { %v284_v17 = vsel %vm281_vm6, %v1454_v49, %v270_v5  ;;  %v285_v18 = vsel %vm281_vm6, %v270_v5, %v272_v1 }
  0xe1   : > { %v299_v12 = vpop.permute.xlu1 %298  ;;  %v297_v15 = vpop.permute.xlu0 %296 }
  0xe2   : > { %v311_v4 = vsel %vm308_vm7, %v1461_v52, %v297_v15  ;;  %v312_v19 = vsel %vm308_vm7, %v297_v15, %v299_v12 }
  0xe3   : > { %v514_v20 = vsel %vm463_vm1, %v285_v18, %v312_v19  ;;  %v510_v21 = vsel %vm463_vm1, %v284_v17, %v311_v4 }
  0xe4   : > { %713 = vmatprep.subr.bf16.mxu1 %v514_v20 }
  0xe5   : > { %v1548_v16 = vpop.permute.xlu1 %275  ;;  %714 = vmatpush1.bf16.msra.mxu1 %v510_v21  ;;  %v274_v22 = vpop.permute.xlu0 %273 }
  0xe6   : > { %v286_v49 = vsel %vm281_vm6, %v272_v1, %v274_v22  ;;  %v287_v27 = vsel %vm281_vm6, %v274_v22, %v1548_v16 }
  0xe9   : > { %v1550_v23 = vpop.permute.xlu1 %302  ;;  %v301_v25 = vpop.permute.xlu0 %300 }
  0xea   : > { %v313_v52 = vsel %vm308_vm7, %v299_v12, %v301_v25  ;;  %v314_v28 = vsel %vm308_vm7, %v301_v25, %v1550_v23 }
  0xeb   : > { %v522_v29 = vsel %vm463_vm1, %v287_v27, %v314_v28  ;;  %v518_v30 = vsel %vm463_vm1, %v286_v49, %v313_v52 }
  0xec   : > { %756 = vmatprep.subr.bf16.mxu0 %v522_v29 }
  0xed   : > { %v245_v31 = vpop.permute.xlu1 %244  ;;  %757 = vmatpush1.bf16.msra.mxu0 %v518_v30  ;;  %v243_v32 = vpop.permute.xlu0 %242 }
  0xee   : > { %v257_v33 = vsel %vm254_vm8, %v1471_v62, %v243_v32  ;;  %v258_v35 = vsel %vm254_vm8, %v243_v32, %v245_v31 }
  0xef   : > { %v478_v39 = vsel %vm463_vm1, %v1311_v8, %v258_v35  ;;  %v474_v24 = vsel %vm463_vm1, %v1250_v2, %v257_v33 }
  0xf0   : > { %715 = vmatprep.subr.bf16.mxu1 %v478_v39 }
  0xf1   : > { %v1567_v40 = vpop.permute.xlu1 %248  ;;  %716 = vmatpush1.bf16.msra.mxu1 %v474_v24  ;;  %v247_v26 = vpop.permute.xlu0 %246 }
  0xf2   : > { %v259_v41 = vsel %vm254_vm8, %v245_v31, %v247_v26  ;;  %v260_v42 = vsel %vm254_vm8, %v247_v26, %v1567_v40 }
  0xf3   : > { %v486_v62 = vsel %vm463_vm1, %v1320_v11, %v260_v42  ;;  %v482_v43 = vsel %vm463_vm1, %v1309_v7, %v259_v41 }
  0xf4   : > { %758 = vmatprep.subr.bf16.mxu0 %v486_v62  ;;  %1069 = vmatmul.mubr.msk.bf16.vlgmr.msra.gmra.mxu1 %vm627_vm9, %v1483_v9 }
  0xf5   : > { %v450_v2 = vpop.permute.xlu1 %449  ;;  %759 = vmatpush1.bf16.msra.mxu0 %v482_v43  ;;  %v448_v8 = vpop.permute.xlu0 %447  ;;  %819 = vmatprep.mubr.bf16.mxu1 %v1199_v6 }
  0xf6   : > { %v460_v44 = vsel %vm453_vm0, %v1492_v3, %v448_v8  ;;  %v461_v45 = vsel %vm453_vm0, %v448_v8, %v450_v2  ;;  %1103 = vmatprep.subr.bf16.mxu0 %v1200_v46 }
  0xf7   : > { %v650_v11 = vsel %vm463_vm1, %v460_v44, 0  ;;  %1072 = vmatprep.subr.msk.bf16.mxu1 %vm463_vm1, %v461_v45 }
  0xf8   : > { %794 = vmatpush1.bf16.msra.mxu1 %v650_v11  ;;  %1071 = vmatmul.mubr.msk.bf16.vlgmr.msra.gmra.mxu0 %vm627_vm9, %v1483_v9 }
  0xf9   : > { %v388_v7 = vpop.permute.xlu1 %387  ;;  %v452_v47 = vpop.permute.xlu0 %451  ;;  %1113 = vmatprep.mubr.msk.bf16.mxu0 %vm1201_vm10, %v1200_v46 }
  0xfa   : > { %v462_v6 = vsel %vm453_vm0, %v450_v2, %v452_v47  ;;  %v400_v59 = vsel %vm393_vm2, %v1508_v34, %v388_v7 }
  0xfb   : > { %v656_v3 = vsel %vm463_vm1, %v462_v6, 0 }
  0xfc   : > { %1104 = vmatpush3.bf16.msra.mxu0 %v656_v3 }
  0xfd   : > { %v418_v48 = vpop.permute.xlu1 %417  ;;  %v390_v50 = vpop.permute.xlu0 %389  ;;  %1105 = vmatprep.subr.bf16.mxu0 %v1200_v46 }
  0xfe   : > { %v430_v51 = vsel %vm423_vm3, %v1510_v37, %v418_v48  ;;  %v401_v55 = vsel %vm393_vm2, %v388_v7, %v390_v50 }
  0xff   : > { %v598_v60 = vsel %vm463_vm1, %v400_v59, %v430_v51 }
 0x101   : > { %v392_v53 = vpop.permute.xlu1 %391  ;;  %v420_v54 = vpop.permute.xlu0 %419 }
 0x102   : > { %v431_v57 = vsel %vm423_vm3, %v418_v48, %v420_v54  ;;  %v402_v63 = vsel %vm393_vm2, %v390_v50, %v392_v53 }
 0x103   : > { %v602_v36 = vsel %vm463_vm1, %v401_v55, %v431_v57 }
 0x104   : > { %795 = vmatprep.subr.bf16.mxu1 %v602_v36 }
 0x105   : > { %v332_v38 = vpop.permute.xlu1 %331  ;;  %796 = vmatpush1.bf16.msra.mxu1 %v598_v60  ;;  %v422_v61 = vpop.permute.xlu0 %421 }
 0x106   : > { %v432_v37 = vsel %vm423_vm3, %v420_v54, %v422_v61  ;;  %v342_v19 = vsel %vm335_vm4, %v1528_v56, %v332_v38 }
 0x107   : > { %v606_v0 = vsel %vm463_vm1, %v402_v63, %v432_v37 }
 0x108   : > { %1106 = vmatpush3.bf16.msra.mxu0 %v606_v0 }
 0x109   : > { %v359_v1 = vpop.permute.xlu1 %358  ;;  %v334_v5 = vpop.permute.xlu0 %333  ;;  %1107 = vmatprep.subr.bf16.mxu0 %v1200_v46 }
 0x10a   : > { %v369_v34 = vsel %vm362_vm5, %v1530_v58, %v359_v1  ;;  %v343_v17 = vsel %vm335_vm4, %v332_v38, %v334_v5 }
 0x10b   : > { %v562_v21 = vsel %vm463_vm1, %v342_v19, %v369_v34 }
 0x10d   : > { %v278_v12 = vpop.permute.xlu1 %277  ;;  %v361_v15 = vpop.permute.xlu0 %360 }
 0x10e   : > { %v370_v18 = vsel %vm362_vm5, %v359_v1, %v361_v15  ;;  %v570_v4 = vsel %vm463_vm1, %v334_v5, %v361_v15  ;;  %v288_v29 = vsel %vm281_vm6, %v1548_v16, %v278_v12 }
 0x10f   : > { %1108 = vmatpush3.bf16.msra.mxu0 %v570_v4  ;;  %v566_v20 = vsel %vm463_vm1, %v343_v17, %v370_v18 }
 0x110   : > { %797 = vmatprep.subr.bf16.mxu1 %v566_v20  ;;  %1109 = vmatprep.subr.bf16.mxu0 %v1200_v46 }
 0x111   : > { %v305_v22 = vpop.permute.xlu1 %304  ;;  %798 = vmatpush1.bf16.msra.mxu1 %v562_v21  ;;  %v280_v58 = vpop.permute.xlu0 %279 }
 0x112   : > { %v315_v25 = vsel %vm308_vm7, %v1550_v23, %v305_v22  ;;  %v289_v27 = vsel %vm281_vm6, %v278_v12, %v280_v58 }
 0x113   : > { %v526_v31 = vsel %vm463_vm1, %v288_v29, %v315_v25 }
 0x115   : > { %v307_v49 = vpop.permute.xlu0 %306  ;;  %v251_v52 = vpop.permute.xlu1 %250 }
 0x116   : > { %v316_v28 = vsel %vm308_vm7, %v305_v22, %v307_v49  ;;  %v534_v56 = vsel %vm463_vm1, %v280_v58, %v307_v49  ;;  %v261_v23 = vsel %vm254_vm8, %v1567_v40, %v251_v52 }
 0x117   : > { %1110 = vmatpush3.bf16.msra.mxu0 %v534_v56  ;;  %v530_v30 = vsel %vm463_vm1, %v289_v27, %v316_v28  ;;  %v490_v39 = vsel %vm463_vm1, %v1318_v10, %v261_v23 }
 0x118   : > { %799 = vmatprep.subr.bf16.mxu1 %v530_v30  ;;  %1111 = vmatprep.subr.bf16.mxu0 %v1200_v46 }
 0x119   : > { %800 = vmatpush1.bf16.msra.mxu1 %v526_v31  ;;  %v253_v32 = vpop.permute.xlu0 %252 }
 0x11a   : > { %v262_v33 = vsel %vm254_vm8, %v251_v52, %v253_v32  ;;  %v498_v35 = vsel %vm463_vm1, %v1383_v13, %v253_v32 }
 0x11b   : > { %1112 = vmatpush3.bf16.msra.mxu0 %v498_v35  ;;  %v494_v16 = vsel %vm463_vm1, %v1385_v14, %v262_v33 }
 0x11c   : > { %801 = vmatprep.subr.bf16.mxu1 %v494_v16 }
 0x11d   : > { %802 = vmatpush1.bf16.msra.mxu1 %v490_v39 }
 0x11e   : > { %1114 = vmatmul.mubr.msk.bf16.vlgmr.msra.gmra.mxu0 %vm627_vm9, %v1483_v9 }
 0x120   : > { %1073 = vmatmul.mubr.msk.bf16.vlgmr.msra.gmra.mxu1 %vm627_vm9, %v1483_v9 }
 0x122   : > { %v615_v24 = vpop.permute.xlu1 %614 }
 0x126   : > { %v1631_v13 = vpop.permute.xlu0 %619 }
 0x178   : > { %v692_v40 = vpop.f32.mrf.mxu0 }
 0x179   : > { %v693_v26 = vadd.f32 %v692_v40, %v615_v24 }
 0x17a   : > { %v694_v41 = vpop.f32.mrf.mxu0 }
 0x17b   : > { %v695_v42 = vadd.f32 %v694_v41, %v615_v24  ;;  %v871_v14 = vmax.f32 %v693_v26, 0.0 }
 0x17c   : > { %v696_v62 = vpop.f32.mrf.mxu0 }
 0x17d   : > { %v872_v43 = vmax.f32 %v695_v42, 0.0  ;;  %v697_v10 = vadd.f32 %v696_v62, %v1631_v13 }
 0x17e   : > { %v698_v9 = vpop.f32.mrf.mxu0 }
 0x17f   : > { %v1087_v2 = vpack.c.bf16 %v872_v43, %v871_v14  ;;  %v699_v8 = vadd.f32 %v698_v9, %v1631_v13  ;;  %v880_v44 = vmax.f32 %v697_v10, 0.0 }
 0x181   : > { %945 = vst [vmem:[%s1637_s10] sm:$0xff] %v1087_v2  ;;  %v881_v45 = vmax.f32 %v699_v8, 0.0 }
 0x183   : > { %v1092_v46 = vpack.c.bf16 %v881_v45, %v880_v44 }
 0x185   : > { %951 = vst [vmem:[%s1637_s10 + $0x24] sm:$0xff] %v1092_v46 }
 0x1b4   : > { %v735_v11 = vpop.f32.mrf.mxu1 }
 0x1b5   : > { %v736_v7 = vadd.f32 %v735_v11, %v615_v24 }
 0x1b6   : > { %v737_v47 = vpop.f32.mrf.mxu1 }
 0x1b7   : > { %v873_v6 = vmax.f32 %v736_v7, 0.0  ;;  %v738_v3 = vadd.f32 %v737_v47, %v615_v24 }
 0x1b8   : > { %v778_v48 = vpop.f32.mrf.mxu0  ;;  %v739_v50 = vpop.f32.mrf.mxu1 }
 0x1b9   : > { %v874_v51 = vmax.f32 %v738_v3, 0.0  ;;  %v779_v53 = vadd.f32 %v778_v48, %v615_v24  ;;  %v740_v54 = vadd.f32 %v739_v50, %v1631_v13 }
 0x1ba   : > { %v780_v55 = vpop.f32.mrf.mxu0  ;;  %v741_v57 = vpop.f32.mrf.mxu1 }
 0x1bb   : > { %v1088_v59 = vpack.c.bf16 %v874_v51, %v873_v6  ;;  %v875_v36 = vmax.f32 %v779_v53, 0.0  ;;  %v781_v60 = vadd.f32 %v780_v55, %v615_v24  ;;  %v882_v38 = vmax.f32 %v740_v54, 0.0 }
 0x1bc   : > { %v742_v61 = vadd.f32 %v741_v57, %v1631_v13  ;;  %v782_v63 = vpop.f32.mrf.mxu0 }
 0x1bd   : > { %946 = vst [vmem:[%s1637_s10 + $0x8] sm:$0xff] %v1088_v59  ;;  %v876_v37 = vmax.f32 %v781_v60, 0.0  ;;  %v783_v0 = vadd.f32 %v782_v63, %v1631_v13 }
 0x1be   : > { %v883_v1 = vmax.f32 %v742_v61, 0.0  ;;  %v784_v5 = vpop.f32.mrf.mxu0 }
 0x1bf   : > { %v1089_v34 = vpack.c.bf16 %v876_v37, %v875_v36  ;;  %v884_v12 = vmax.f32 %v783_v0, 0.0  ;;  %v785_v15 = vadd.f32 %v784_v5, %v1631_v13 }
 0x1c0   : > { %v1093_v17 = vpack.c.bf16 %v883_v1, %v882_v38 }
 0x1c1   : > { %947 = vst [vmem:[%s1637_s10 + $0x10] sm:$0xff] %v1089_v34  ;;  %v885_v18 = vmax.f32 %v785_v15, 0.0 }
 0x1c2   : > { %952 = vst [vmem:[%s1637_s10 + $0x2c] sm:$0xff] %v1093_v17 }
 0x1c3   : > { %v1094_v4 = vpack.c.bf16 %v885_v18, %v884_v12 }
 0x1c5   : > { %953 = vst [vmem:[%s1637_s10 + $0x34] sm:$0xff] %v1094_v4 }
 0x1de   : > { %v864_v19 = vpop.f32.mrf.mxu0 }
 0x1df   : > { %v865_v20 = vadd.f32 %v864_v19, %v615_v24 }
 0x1e0   : > { %v821_v21 = vpop.f32.mrf.mxu1  ;;  %v1115_v22 = vpop.f32.mrf.mxu0 }
 0x1e1   : > { %v879_v58 = vmax.f32 %v865_v20, 0.0  ;;  %v822_v25 = vadd.f32 %v821_v21, %v615_v24 }
 0x1e2   : > { %v823_v49 = vpop.f32.mrf.mxu1  ;;  %v867_v27 = vpop.f32.mrf.mxu0 }
 0x1e3   : > { %v1091_v52 = vpack.c.bf16 %v879_v58, %v879_v58  ;;  %v824_v28 = vadd.f32 %v823_v49, %v615_v24  ;;  %v868_v56 = vadd.f32 %v867_v27, %v1631_v13  ;;  %v877_v31 = vmax.f32 %v822_v25, 0.0 }
 0x1e4   : > { %v825_v29 = vpop.f32.mrf.mxu1  ;;  %v1116_v30 = vpop.f32.mrf.mxu0 }
 0x1e5   : > { %950 = vst.msk [vmem:[%s1637_s10 + $0x20] sm:$0xf] %vm949_vm11, %v1091_v52  ;;  %v878_v23 = vmax.f32 %v824_v28, 0.0  ;;  %v888_v32 = vmax.f32 %v868_v56, 0.0  ;;  %v826_v33 = vadd.f32 %v825_v29, %v1631_v13 }
 0x1e6   : > { %v827_v35 = vpop.f32.mrf.mxu1 }
 0x1e7   : > { %v1090_v16 = vpack.c.bf16 %v878_v23, %v877_v31  ;;  %v1096_v39 = vpack.c.bf16 %v888_v32, %v888_v32  ;;  %v828_v40 = vadd.f32 %v827_v35, %v1631_v13  ;;  %v886_v24 = vmax.f32 %v826_v33, 0.0 }
 0x1e9   : > { %948 = vst [vmem:[%s1637_s10 + $0x18] sm:$0xff] %v1090_v16  ;;  %955 = vst.msk [vmem:[%s1637_s10 + $0x44] sm:$0xf] %vm949_vm11, %v1096_v39  ;;  %v887_v26 = vmax.f32 %v828_v40, 0.0 }
 0x1eb   : > { %v1095_v41 = vpack.c.bf16 %v887_v26, %v886_v24 }
 0x1ed   : > { %954 = vst [vmem:[%s1637_s10 + $0x3c] sm:$0xff] %v1095_v41 }
 0x1ee PF: > { %s13_s14 = sadd.s32 1, %s1189_s14   ;;  %s1672_s12 = smov %s1185_s13 }
 0x1ef   : > { %p10_p5 = scmp.ge.s32.totalorder %s13_s14, 4   ;;  %s1673_s13 = smov %s1675_s15 }
 0x1f1   :  { %12 = sbr.rel (!%p10_p5) target bundleno = 2 (0x2), region = 62 }

// kernel: _lambda_.5
= control target key start
LH: loop header
LB: loop body
LE: loop exit
PB: predicated region body
PF: predicated region fallthrough
CT: control target
= control target key end

     0   :  { %s6451_s21 = smov 0   ;;  %s6453_s22 = smov 0   ;;  %s10106_s0 = inlined_call_operand.vmem [shape: bf16[2,1,8,4480], index: 0, kind: input, shape index: {}]   ;;  %s10107_s1 = inlined_call_operand.vmem [shape: bf16[2,1,16,4480], index: 1, kind: input, shape index: {}]   ;;  %s10108_s2 = inlined_call_operand.vmem [shape: bf16[8,216], index: 2, kind: input, shape index: {}]   ;;  %s10109_s3 = inlined_call_operand.vmem [shape: f32[8,1], index: 3, kind: input, shape index: {}]   ;;  %s10110_s4 = inlined_call_operand.vmem [shape: bf16[2,8], index: 4, kind: input, shape index: {}]   ;;  %s10111_s5 = inlined_call_operand.vmem [shape: f32[2,1], index: 5, kind: input, shape index: {}]   ;;  %s10112_s6 = inlined_call_operand.vmem [shape: f32[2,1,3,4224], index: 6, kind: output, shape index: {}]  }
   0x1   :  { %s6455_s23 = smov 0  }
   0x2 LB: > { %s28_s24 = sadd.s32 1, %s6398_s22  ;;  %p5899_p0 = scmp.ge.s32.totalorder %s6402_s23, 1  ;;  %s6402_s23 = sphi %s6455_s23, %s16_s23   ;;  %s6398_s22 = sphi %s6453_s22, %s10437_s22   ;;  %s6394_s21 = sphi %s6451_s21, %s10436_s21  }
   0x3   : > { %p30_p1 = scmp.ge.s32.totalorder %s28_s24, 2  ;;  %p248_p2 = scmp.lt.s32.totalorder %s6402_s23, 3 }
   0x5   : > { %s10439_s24 = smov (%p30_p1, %s28_s24), 0  ;;  %p249_p3 = pnand %p5899_p0, %p248_p2 }
   0x7   : > { %252 = sbr.rel (%p249_p3) target bundleno = 1674 (0x68a), region = 44 }
   0xc   : > { %p295_p4 = scmp.lt.s32.totalorder %s6394_s21, 1  ;;  %vm641_vm0 = vcmask 1043456   ;;  %s6404_s9 = smov 127   ;;  %vm3350_vm1 = vcmask 719872   ;;  %vm1761_vm2 = vcmask 498688   ;;  %vm1997_vm3 = vcmask 490496  }
   0xd   : > { %s6405_s10 = smov 61   ;;  %s6406_s11 = smov 60   ;;  %vm1525_vm4 = vcmask 506880   ;;  %vm1289_vm5 = vcmask 1031168   ;;  %vm1053_vm6 = vcmask 1039360   ;;  %vm2709_vm7 = vcmask 998400  }
   0xe   : > { %s10441_s21 = smov (!%p295_p4, %s6394_s21), 1  ;;  %s6407_s12 = smov 62   ;;  %vm2473_vm8 = vcmask 1006592   ;;  %vm2234_vm9 = vcmask 1014784   ;;  %vm4222_vm10 = vcmask 64512   ;;  %vm6414_vm11 = vmmov 0  }
   0xf   : > { %s6100_s25 = smul.u32 140, %s10441_s21  ;;  %s6408_s13 = smov 126  }
  0x10   : > { %s6101_s26 = smul.u32 280, %s10441_s21  ;;  %s6409_s14 = smov 122  }
  0x11   : > { %s6476_s29 = scalar_lea.vmem %s10106_s0, %s6100_s25  ;;  %s6410_s15 = smov 123  }
  0x12   : > { %s6481_s8 = scalar_lea.vmem %s10107_s1, %s6101_s26  ;;  %v324_v0 = vld [vmem:[%s6476_s29 + $0x8] sm:$0xff]  ;;  %v323_v1 = vld [vmem:[%s6476_s29] sm:$0xff]  ;;  %v325_v2 = vld [vmem:[%s6476_s29 + $0x10] sm:$0xff]  ;;  %s6411_s16 = smov 124  }
  0x13   : > { %v342_v3 = vld [vmem:[%s6481_s8 + $0x8] sm:$0xff]  ;;  %v5905_v4 = vcombine.low %v324_v0, %v324_v0  ;;  %v341_v5 = vld [vmem:[%s6481_s8] sm:$0xff]  ;;  %v5903_v6 = vcombine.low %v323_v1, %v323_v1  ;;  %v5904_v7 = vcombine.high %v323_v1, %v323_v1  ;;  %v5906_v8 = vcombine.high %v324_v0, %v324_v0  ;;  %v343_v9 = vld [vmem:[%s6481_s8 + $0x10] sm:$0xff] }
  0x14   : > { %v5940_v10 = vcombine.low %v342_v3, %v342_v3  ;;  %v5938_v11 = vcombine.low %v341_v5, %v341_v5  ;;  %v5939_v12 = vcombine.high %v341_v5, %v341_v5  ;;  %v5941_v13 = vcombine.high %v342_v3, %v342_v3  ;;  %v326_v22 = vld [vmem:[%s6476_s29 + $0x18] sm:$0xff]  ;;  %v327_v34 = vld [vmem:[%s6476_s29 + $0x20] sm:$0xff]  ;;  %v328_v44 = vld [vmem:[%s6476_s29 + $0x28] sm:$0xff] }
  0x15   : > { %v5908_v14 = vcombine.high %v325_v2, %v325_v2  ;;  %v5943_v15 = vcombine.high %v343_v9, %v343_v9  ;;  %v5907_v16 = vcombine.low %v325_v2, %v325_v2  ;;  %v5942_v17 = vcombine.low %v343_v9, %v343_v9  ;;  %v344_v23 = vld [vmem:[%s6481_s8 + $0x18] sm:$0xff]  ;;  %v345_v35 = vld [vmem:[%s6481_s8 + $0x20] sm:$0xff]  ;;  %v346_v45 = vld [vmem:[%s6481_s8 + $0x28] sm:$0xff] }
  0x16   : > { %v6490_v18 = vsel %vm641_vm0, %v5905_v4, %v5940_v10  ;;  %v6493_v19 = vsel %vm641_vm0, %v5903_v6, %v5938_v11  ;;  %v6496_v20 = vsel %vm641_vm0, %v5906_v8, %v5941_v13  ;;  %v6499_v21 = vsel %vm641_vm0, %v5904_v7, %v5939_v12  ;;  %v329_v54 = vld [vmem:[%s6476_s29 + $0x30] sm:$0xff]  ;;  %v330_v0 = vld [vmem:[%s6476_s29 + $0x38] sm:$0xff]  ;;  %v331_v10 = vld [vmem:[%s6476_s29 + $0x40] sm:$0xff] }
  0x17   : > { %10249 = vst [vmem:[#allocation2_spill] sm:$0xff] %v6490_v18  ;;  %10250 = vst [vmem:[#allocation3_spill] sm:$0xff] %v6496_v20  ;;  %v6504_v24 = vrot.slane %v6490_v18, 4  ;;  %v6507_v25 = vrot.slane %v6493_v19, 4  ;;  %v6514_v26 = vrot.slane %v6496_v20, 4  ;;  %v6517_v27 = vrot.slane %v6499_v21, 4 }
  0x18   : > { %v5910_v28 = vcombine.high %v326_v22, %v326_v22  ;;  %v5945_v29 = vcombine.high %v344_v23, %v344_v23  ;;  %v6520_v30 = vsel %vm641_vm0, %v5908_v14, %v5943_v15  ;;  %v6523_v31 = vsel %vm641_vm0, %v5907_v16, %v5942_v17  ;;  %v347_v55 = vld [vmem:[%s6481_s8 + $0x30] sm:$0xff]  ;;  %v348_v1 = vld [vmem:[%s6481_s8 + $0x38] sm:$0xff]  ;;  %v349_v11 = vld [vmem:[%s6481_s8 + $0x40] sm:$0xff] }
  0x19   : > { %921 = vrot.lane.b32.xlu1 %v6504_v24, %s6404_s9  ;;  %917 = vrot.lane.b32.xlu0 %v6507_v25, %s6404_s9  ;;  %v5909_v32 = vcombine.low %v326_v22, %v326_v22  ;;  %v5944_v33 = vcombine.low %v344_v23, %v344_v23  ;;  %v6532_v36 = vrot.slane %v6520_v30, 4  ;;  %v6535_v37 = vrot.slane %v6523_v31, 4 }
  0x1a   : > { %v6538_v38 = vsel %vm641_vm0, %v5910_v28, %v5945_v29  ;;  %v5912_v39 = vcombine.high %v327_v34, %v327_v34  ;;  %v5947_v41 = vcombine.high %v345_v35, %v345_v35  ;;  %v5911_v42 = vcombine.low %v327_v34, %v327_v34  ;;  %v332_v28 = vld [vmem:[%s6476_s29 + $0x48] sm:$0xff] }
  0x1b   : > { %v6541_v40 = vsel %vm641_vm0, %v5909_v32, %v5944_v33  ;;  %v5946_v43 = vcombine.low %v345_v35, %v345_v35  ;;  %v6550_v46 = vrot.slane %v6538_v38, 4  ;;  %v5914_v48 = vcombine.high %v328_v44, %v328_v44  ;;  %v350_v29 = vld [vmem:[%s6481_s8 + $0x48] sm:$0xff] }
  0x1c   : > { %v6553_v47 = vrot.slane %v6541_v40, 4  ;;  %v5949_v49 = vcombine.high %v346_v45, %v346_v45  ;;  %v6556_v50 = vsel %vm641_vm0, %v5912_v39, %v5947_v41  ;;  %v5913_v52 = vcombine.low %v328_v44, %v328_v44  ;;  %v333_v44 = vld [vmem:[%s6476_s29 + $0x50] sm:$0xff] }
  0x1d   : > { %923 = vrot.lane.b32.xlu1 %v6514_v26, %s6404_s9  ;;  %919 = vrot.lane.b32.xlu0 %v6517_v27, %s6404_s9  ;;  %v6559_v51 = vsel %vm641_vm0, %v5911_v42, %v5946_v43  ;;  %v5948_v53 = vcombine.low %v346_v45, %v346_v45  ;;  %v6568_v56 = vrot.slane %v6556_v50, 4  ;;  %v5916_v59 = vcombine.high %v329_v54, %v329_v54  ;;  %v351_v45 = vld [vmem:[%s6481_s8 + $0x50] sm:$0xff] }
  0x1e   : > { %v6571_v57 = vrot.slane %v6559_v51, 4  ;;  %v6574_v58 = vsel %vm641_vm0, %v5914_v48, %v5949_v49  ;;  %v5951_v61 = vcombine.high %v347_v55, %v347_v55  ;;  %v5915_v62 = vcombine.low %v329_v54, %v329_v54 }
  0x1f   : > { %10251 = vst [vmem:[#allocation4_spill] sm:$0xff] %v6574_v58  ;;  %v6577_v60 = vsel %vm641_vm0, %v5913_v52, %v5948_v53  ;;  %v5950_v63 = vcombine.low %v347_v55, %v347_v55  ;;  %v6586_v2 = vrot.slane %v6574_v58, 4  ;;  %v5918_v4 = vcombine.high %v330_v0, %v330_v0 }
  0x20   : > { %v6589_v3 = vrot.slane %v6577_v60, 4  ;;  %v5953_v5 = vcombine.high %v348_v1, %v348_v1  ;;  %v6592_v6 = vsel %vm641_vm0, %v5916_v59, %v5951_v61  ;;  %v5917_v8 = vcombine.low %v330_v0, %v330_v0 }
  0x21   : > { %927 = vrot.lane.b32.xlu1 %v6532_v36, %s6404_s9  ;;  %925 = vrot.lane.b32.xlu0 %v6535_v37, %s6404_s9  ;;  %10252 = vst [vmem:[#allocation5_spill] sm:$0xff] %v6586_v2  ;;  %10253 = vst [vmem:[#allocation6_spill] sm:$0xff] %v6592_v6  ;;  %v6595_v7 = vsel %vm641_vm0, %v5915_v62, %v5950_v63  ;;  %v5952_v9 = vcombine.low %v348_v1, %v348_v1  ;;  %v6604_v12 = vrot.slane %v6592_v6, 4  ;;  %v334_v62 = vld [vmem:[%s6476_s29 + $0x58] sm:$0xff] }
  0x22   : > { %10254 = vst [vmem:[#allocation7_spill] sm:$0xff] %v6595_v7  ;;  %v6607_v13 = vrot.slane %v6595_v7, 4  ;;  %v6610_v14 = vsel %vm641_vm0, %v5918_v4, %v5953_v5  ;;  %v5920_v15 = vcombine.high %v331_v10, %v331_v10  ;;  %v5955_v17 = vcombine.high %v349_v11, %v349_v11  ;;  %v352_v63 = vld [vmem:[%s6481_s8 + $0x58] sm:$0xff] }
  0x23   : > { %10255 = vst [vmem:[#allocation8_spill] sm:$0xff] %v6604_v12  ;;  %10257 = vst [vmem:[#allocation10_spill] sm:$0xff] %v6610_v14  ;;  %v6613_v16 = vsel %vm641_vm0, %v5917_v8, %v5952_v9  ;;  %v5919_v22 = vcombine.low %v331_v10, %v331_v10  ;;  %v5954_v23 = vcombine.low %v349_v11, %v349_v11  ;;  %v6622_v32 = vrot.slane %v6610_v14, 4 }
  0x24   : > { %10256 = vst [vmem:[#allocation9_spill] sm:$0xff] %v6607_v13  ;;  %10258 = vst [vmem:[#allocation11_spill] sm:$0xff] %v6613_v16  ;;  %v6625_v33 = vrot.slane %v6613_v16, 4  ;;  %v5922_v34 = vcombine.high %v332_v28, %v332_v28  ;;  %v5957_v35 = vcombine.high %v350_v29, %v350_v29  ;;  %v6628_v39 = vsel %vm641_vm0, %v5920_v15, %v5955_v17  ;;  %v335_v15 = vld [vmem:[%s6476_s29 + $0x60] sm:$0xff] }
  0x25   : > { %931 = vrot.lane.b32.xlu1 %v6550_v46, %s6404_s9  ;;  %929 = vrot.lane.b32.xlu0 %v6553_v47, %s6404_s9  ;;  %10259 = vst [vmem:[#allocation12_spill] sm:$0xff] %v6622_v32  ;;  %10261 = vst [vmem:[#allocation14_spill] sm:$0xff] %v6628_v39  ;;  %v6631_v41 = vsel %vm641_vm0, %v5919_v22, %v5954_v23  ;;  %v5921_v42 = vcombine.low %v332_v28, %v332_v28  ;;  %v6640_v48 = vrot.slane %v6628_v39, 4  ;;  %v353_v17 = vld [vmem:[%s6481_s8 + $0x60] sm:$0xff] }
  0x26   : > { %10260 = vst [vmem:[#allocation13_spill] sm:$0xff] %v6625_v33  ;;  %10262 = vst [vmem:[#allocation15_spill] sm:$0xff] %v6631_v41  ;;  %v5956_v43 = vcombine.low %v350_v29, %v350_v29  ;;  %v6643_v49 = vrot.slane %v6631_v41, 4  ;;  %v6646_v52 = vsel %vm641_vm0, %v5922_v34, %v5957_v35  ;;  %v5924_v53 = vcombine.high %v333_v44, %v333_v44 }
  0x27   : > { %10263 = vst [vmem:[#allocation16_spill] sm:$0xff] %v6640_v48  ;;  %10265 = vst [vmem:[#allocation18_spill] sm:$0xff] %v6646_v52  ;;  %v5959_v55 = vcombine.high %v351_v45, %v351_v45  ;;  %v5923_v59 = vcombine.low %v333_v44, %v333_v44  ;;  %v5958_v61 = vcombine.low %v351_v45, %v351_v45  ;;  %v6658_v0 = vrot.slane %v6646_v52, 4  ;;  %v336_v44 = vld [vmem:[%s6476_s29 + $0x68] sm:$0xff] }
  0x28   : > { %10264 = vst [vmem:[#allocation17_spill] sm:$0xff] %v6643_v49  ;;  %v6649_v54 = vsel %vm641_vm0, %v5921_v42, %v5956_v43  ;;  %v5926_v4 = vcombine.high %v334_v62, %v334_v62  ;;  %v5961_v5 = vcombine.high %v352_v63, %v352_v63  ;;  %v5925_v10 = vcombine.low %v334_v62, %v334_v62  ;;  %v354_v45 = vld [vmem:[%s6481_s8 + $0x68] sm:$0xff] }
  0x29   : > { %935 = vrot.lane.b32.xlu1 %v6568_v56, %s6404_s9  ;;  %933 = vrot.lane.b32.xlu0 %v6571_v57, %s6404_s9  ;;  %10266 = vst [vmem:[#allocation19_spill] sm:$0xff] %v6649_v54  ;;  %10267 = vst [vmem:[#allocation20_spill] sm:$0xff] %v6658_v0  ;;  %v6661_v1 = vrot.slane %v6649_v54, 4  ;;  %v6664_v8 = vsel %vm641_vm0, %v5924_v53, %v5959_v55  ;;  %v6667_v9 = vsel %vm641_vm0, %v5923_v59, %v5958_v61 }
  0x2a   : > { %10269 = vst [vmem:[#allocation22_spill] sm:$0xff] %v6664_v8  ;;  %10270 = vst [vmem:[#allocation23_spill] sm:$0xff] %v6667_v9  ;;  %v5960_v11 = vcombine.low %v352_v63, %v352_v63  ;;  %v6676_v22 = vrot.slane %v6664_v8, 4  ;;  %v6679_v23 = vrot.slane %v6667_v9, 4  ;;  %v6682_v28 = vsel %vm641_vm0, %v5926_v4, %v5961_v5  ;;  %v364_v8 = vld [vmem:[%s6481_s8 + $0xb4] sm:$0xff] }
  0x2b   : > { %10268 = vst [vmem:[#allocation21_spill] sm:$0xff] %v6661_v1  ;;  %10273 = vst [vmem:[#allocation26_spill] sm:$0xff] %v6682_v28  ;;  %v5928_v29 = vcombine.high %v335_v15, %v335_v15  ;;  %v5963_v35 = vcombine.high %v353_v17, %v353_v17  ;;  %v5927_v42 = vcombine.low %v335_v15, %v335_v15  ;;  %v6694_v53 = vrot.slane %v6682_v28, 4  ;;  %v356_v28 = vld [vmem:[%s6481_s8 + $0x78] sm:$0xff] }
  0x2c   : > { %10271 = vst [vmem:[#allocation24_spill] sm:$0xff] %v6676_v22  ;;  %10272 = vst [vmem:[#allocation25_spill] sm:$0xff] %v6679_v23  ;;  %v6685_v34 = vsel %vm641_vm0, %v5925_v10, %v5960_v11  ;;  %v5962_v43 = vcombine.low %v353_v17, %v353_v17  ;;  %v5930_v59 = vcombine.high %v336_v44, %v336_v44  ;;  %v337_v10 = vld [vmem:[%s6476_s29 + $0x70] sm:$0xff] }
  0x2d   : > { %939 = vrot.lane.b32.xlu1 %v6586_v2, %s6404_s9  ;;  %937 = vrot.lane.b32.xlu0 %v6589_v3, %s6404_s9  ;;  %10274 = vst [vmem:[#allocation27_spill] sm:$0xff] %v6685_v34  ;;  %10275 = vst [vmem:[#allocation28_spill] sm:$0xff] %v6694_v53  ;;  %v6697_v55 = vrot.slane %v6685_v34, 4  ;;  %v5965_v61 = vcombine.high %v354_v45, %v354_v45  ;;  %v6700_v62 = vsel %vm641_vm0, %v5928_v29, %v5963_v35  ;;  %v355_v11 = vld [vmem:[%s6481_s8 + $0x70] sm:$0xff]  ;;  %v357_v34 = vld [vmem:[%s6481_s8 + $0x80] sm:$0xff] }
  0x2e   : > { %10277 = vst [vmem:[#allocation30_spill] sm:$0xff] %v6700_v62  ;;  %v6703_v63 = vsel %vm641_vm0, %v5927_v42, %v5962_v43  ;;  %v5929_v4 = vcombine.low %v336_v44, %v336_v44  ;;  %v5964_v5 = vcombine.low %v354_v45, %v354_v45  ;;  %v6712_v15 = vrot.slane %v6700_v62, 4 }
  0x2f   : > { %10276 = vst [vmem:[#allocation29_spill] sm:$0xff] %v6697_v55  ;;  %10278 = vst [vmem:[#allocation31_spill] sm:$0xff] %v6703_v63  ;;  %v6715_v17 = vrot.slane %v6703_v63, 4  ;;  %v6718_v29 = vsel %vm641_vm0, %v5930_v59, %v5965_v61  ;;  %v5932_v35 = vcombine.high %v337_v10, %v337_v10  ;;  %v5967_v43 = vcombine.high %v355_v11, %v355_v11 }
  0x30   : > { %10279 = vst [vmem:[#allocation32_spill] sm:$0xff] %v6712_v15  ;;  %10281 = vst [vmem:[#allocation34_spill] sm:$0xff] %v6718_v29  ;;  %v6721_v42 = vsel %vm641_vm0, %v5929_v4, %v5964_v5  ;;  %v5931_v44 = vcombine.low %v337_v10, %v337_v10  ;;  %v5966_v45 = vcombine.low %v355_v11, %v355_v11  ;;  %v6730_v59 = vrot.slane %v6718_v29, 4 }
  0x31   : > { %943 = vrot.lane.b32.xlu1 %v6604_v12, %s6404_s9  ;;  %941 = vrot.lane.b32.xlu0 %v6607_v13, %s6404_s9  ;;  %10280 = vst [vmem:[#allocation33_spill] sm:$0xff] %v6715_v17  ;;  %10282 = vst [vmem:[#allocation35_spill] sm:$0xff] %v6721_v42  ;;  %v6733_v61 = vrot.slane %v6721_v42, 4  ;;  %v5969_v5 = vcombine.high %v356_v28, %v356_v28  ;;  %v6736_v62 = vsel %vm641_vm0, %v5932_v35, %v5967_v43 }
  0x32   : > { %10283 = vst [vmem:[#allocation36_spill] sm:$0xff] %v6730_v59  ;;  %10285 = vst [vmem:[#allocation38_spill] sm:$0xff] %v6736_v62  ;;  %v6739_v10 = vsel %vm641_vm0, %v5931_v44, %v5966_v45  ;;  %v5968_v63 = vcombine.low %v356_v28, %v356_v28  ;;  %v6748_v29 = vrot.slane %v6736_v62, 4  ;;  %v5970_v45 = vcombine.low %v357_v34, %v357_v34 }
  0x33   : > { %10284 = vst [vmem:[#allocation37_spill] sm:$0xff] %v6733_v61  ;;  %10286 = vst [vmem:[#allocation39_spill] sm:$0xff] %v6739_v10  ;;  %v6751_v35 = vrot.slane %v6739_v10, 4  ;;  %v6881_v9 = vcombine.high %v364_v8, %v364_v8 }
  0x34   : > { %10287 = vst [vmem:[#allocation40_spill] sm:$0xff] %v6748_v29 }
  0x35   : > { %947 = vrot.lane.b32.xlu1 %v6622_v32, %s6404_s9  ;;  %945 = vrot.lane.b32.xlu0 %v6625_v33, %s6404_s9  ;;  %10288 = vst [vmem:[#allocation41_spill] sm:$0xff] %v6751_v35  ;;  %10298 = vst [vmem:[#allocation51_spill] sm:$0xff] %v6881_v9 }
  0x39   : > { %951 = vrot.lane.b32.xlu1 %v6640_v48, %s6404_s9  ;;  %949 = vrot.lane.b32.xlu0 %v6643_v49, %s6404_s9 }
  0x3d   : > { %955 = vrot.lane.b32.xlu1 %v6658_v0, %s6404_s9  ;;  %953 = vrot.lane.b32.xlu0 %v6661_v1, %s6404_s9 }
  0x41   : > { %959 = vrot.lane.b32.xlu1 %v6676_v22, %s6404_s9  ;;  %957 = vrot.lane.b32.xlu0 %v6679_v23, %s6404_s9  ;;  %v6892_v23 = vsel %vm641_vm0, %v6586_v2, %v6881_v9 }
  0x42   : > { %10299 = vst [vmem:[#allocation52_spill] sm:$0xff] %v6892_v23 }
  0x45   : > { %963 = vrot.lane.b32.xlu1 %v6694_v53, %s6404_s9  ;;  %961 = vrot.lane.b32.xlu0 %v6697_v55, %s6404_s9  ;;  %v338_v53 = vld [vmem:[%s6476_s29 + $0x78] sm:$0xff] }
  0x46   : > { %v5934_v4 = vcombine.high %v338_v53, %v338_v53  ;;  %v5933_v11 = vcombine.low %v338_v53, %v338_v53 }
  0x48   : > { %v6754_v43 = vsel %vm641_vm0, %v5934_v4, %v5969_v5  ;;  %v6757_v28 = vsel %vm641_vm0, %v5933_v11, %v5968_v63 }
  0x49   : > { %967 = vrot.lane.b32.xlu1 %v6712_v15, %s6404_s9  ;;  %965 = vrot.lane.b32.xlu0 %v6715_v17, %s6404_s9  ;;  %v339_v15 = vld [vmem:[%s6476_s29 + $0x80] sm:$0xff]  ;;  %10289 = vst [vmem:[#allocation42_spill] sm:$0xff] %v6754_v43  ;;  %10290 = vst [vmem:[#allocation43_spill] sm:$0xff] %v6757_v28  ;;  %v6764_v62 = vrot.slane %v6754_v43, 4  ;;  %v6767_v4 = vrot.slane %v6757_v28, 4 }
  0x4a   : > { %v5935_v53 = vcombine.low %v339_v15, %v339_v15  ;;  %v5936_v44 = vcombine.high %v339_v15, %v339_v15  ;;  %v362_v28 = vld [vmem:[%s6481_s8 + $0xa4] sm:$0xff] }
  0x4b   : > { %10291 = vst [vmem:[#allocation44_spill] sm:$0xff] %v6764_v62  ;;  %10292 = vst [vmem:[#allocation45_spill] sm:$0xff] %v6767_v4  ;;  %v6843_v10 = vcombine.high %v362_v28, %v362_v28 }
  0x4c   : > { %v6773_v63 = vsel %vm641_vm0, %v5935_v53, %v5970_v45  ;;  %v360_v53 = vld [vmem:[%s6481_s8 + $0x94] sm:$0xff] }
  0x4d   : > { %971 = vrot.lane.b32.xlu1 %v6730_v59, %s6404_s9  ;;  %969 = vrot.lane.b32.xlu0 %v6733_v61, %s6404_s9  ;;  %v5971_v59 = vcombine.high %v357_v34, %v357_v34  ;;  %10294 = vst [vmem:[#allocation47_spill] sm:$0xff] %v6773_v63  ;;  %v359_v34 = vld [vmem:[%s6481_s8 + $0x8c] sm:$0xff]  ;;  %v6784_v11 = vrot.slane %v6773_v63, 4  ;;  %v361_v63 = vld [vmem:[%s6481_s8 + $0x9c] sm:$0xff]  ;;  %v6855_v42 = vsel %vm641_vm0, %v6550_v46, %v6843_v10 }
  0x4e   : > { %v6786_v43 = vcombine.high %v359_v34, %v359_v34 }
  0x4f   : > { %v6770_v5 = vsel %vm641_vm0, %v5936_v44, %v5971_v59  ;;  %10296 = vst [vmem:[#allocation49_spill] sm:$0xff] %v6784_v11  ;;  %v6788_v59 = vcombine.low %v359_v34, %v359_v34  ;;  %v6807_v34 = vcombine.low %v360_v53, %v360_v53 }
  0x50   : > { %10293 = vst [vmem:[#allocation46_spill] sm:$0xff] %v6770_v5  ;;  %v6781_v15 = vrot.slane %v6770_v5, 4  ;;  %v6798_v44 = vsel %vm641_vm0, %v6517_v27, %v6786_v43  ;;  %v6805_v5 = vcombine.high %v360_v53, %v360_v53  ;;  %v6826_v53 = vcombine.low %v361_v63, %v361_v63 }
  0x51   : > { %975 = vrot.lane.b32.xlu1 %v6748_v29, %s6404_s9  ;;  %973 = vrot.lane.b32.xlu0 %v6751_v35, %s6404_s9  ;;  %v6803_v45 = vsel %vm641_vm0, %v6507_v25, %v6788_v59  ;;  %10297 = vst [vmem:[#allocation50_spill] sm:$0xff] %v6807_v34  ;;  %v363_v35 = vld [vmem:[%s6481_s8 + $0xac] sm:$0xff] }
  0x52   : > { %10295 = vst [vmem:[#allocation48_spill] sm:$0xff] %v6781_v15  ;;  %v6841_v29 = vsel %vm641_vm0, %v6535_v37, %v6826_v53  ;;  %v6862_v17 = vcombine.high %v363_v35, %v363_v35 }
  0x54   : > { %v6874_v55 = vsel %vm641_vm0, %v6568_v56, %v6862_v17 }
  0x55   : > { %979 = vrot.lane.b32.xlu1 %v6764_v62, %s6404_s9  ;;  %977 = vrot.lane.b32.xlu0 %v6767_v4, %s6404_s9  ;;  %v6824_v62 = vcombine.high %v361_v63, %v361_v63  ;;  %v6845_v63 = vcombine.low %v362_v28, %v362_v28  ;;  %v6864_v28 = vcombine.low %v363_v35, %v363_v35 }
  0x56   : > { %v6883_v35 = vcombine.low %v364_v8, %v364_v8 }
  0x57   : > { %v6836_v4 = vsel %vm641_vm0, %v6532_v36, %v6824_v62  ;;  %v6860_v61 = vsel %vm641_vm0, %v6553_v47, %v6845_v63  ;;  %v6879_v22 = vsel %vm641_vm0, %v6571_v57, %v6864_v28 }
  0x58   : > { %v6897_v0 = vsel %vm641_vm0, %v6589_v3, %v6883_v35 }
  0x59   : > { %983 = vrot.lane.b32.xlu1 %v6781_v15, %s6404_s9  ;;  %981 = vrot.lane.b32.xlu0 %v6784_v11, %s6404_s9  ;;  %v6817_v15 = vsel %vm641_vm0, %v6514_v26, %v6805_v5  ;;  %v6822_v11 = vsel %vm641_vm0, %v6504_v24, %v6807_v34 }
  0x5d   : > { %987 = vrot.lane.b32.xlu1 %v6798_v44, %s6404_s9  ;;  %985 = vrot.lane.b32.xlu0 %v6803_v45, %s6404_s9 }
  0x61   : > { %991 = vrot.lane.b32.xlu1 %v6817_v15, %s6404_s9  ;;  %989 = vrot.lane.b32.xlu0 %v6822_v11, %s6404_s9 }
  0x65   : > { %995 = vrot.lane.b32.xlu1 %v6836_v4, %s6404_s9  ;;  %993 = vrot.lane.b32.xlu0 %v6841_v29, %s6404_s9 }
  0x69   : > { %999 = vrot.lane.b32.xlu1 %v6855_v42, %s6404_s9  ;;  %997 = vrot.lane.b32.xlu0 %v6860_v61, %s6404_s9 }
  0x6d   : > { %1003 = vrot.lane.b32.xlu1 %v6874_v55, %s6404_s9  ;;  %1001 = vrot.lane.b32.xlu0 %v6879_v22, %s6404_s9 }
  0x71   : > { %1007 = vrot.lane.b32.xlu1 %v6892_v23, %s6404_s9  ;;  %1005 = vrot.lane.b32.xlu0 %v6897_v0, %s6404_s9 }
  0x75   : > { %1697 = vrot.lane.b32.xlu1 %v6807_v34, %s6405_s10  ;;  %1695 = vrot.lane.b32.xlu0 %v6786_v43, %s6405_s10 }
  0x79   : > { %1865 = vrot.lane.b32.xlu1 %v6504_v24, %s6406_s11  ;;  %1863 = vrot.lane.b32.xlu0 %v6517_v27, %s6406_s11 }
  0x7d   : > { %1861 = vrot.lane.b32.xlu1 %v6507_v25, %s6406_s11  ;;  %1693 = vrot.lane.b32.xlu0 %v6788_v59, %s6405_s10 }
  0x81   : > { %1629 = vrot.lane.b32.xlu1 %v6490_v18, %s6405_s10  ;;  %1627 = vrot.lane.b32.xlu0 %v6499_v21, %s6405_s10 }
  0x85   : > { %1459 = vrot.lane.b32.xlu1 %v6798_v44, %s6407_s12  ;;  %1625 = vrot.lane.b32.xlu0 %v6493_v19, %s6405_s10 }
  0x89   : > { %1457 = vrot.lane.b32.xlu1 %v6803_v45, %s6407_s12  ;;  %1461 = vrot.lane.b32.xlu0 %v6822_v11, %s6407_s12 }
  0x8b   : > { %v6927_v8 = vpop.permute.xlu1 %921  ;;  %v6929_v52 = vpop.permute.xlu0 %917 }
  0x8d   : > { %1225 = vrot.lane.b32.xlu1 %v6807_v34, %s6408_s13  ;;  %1223 = vrot.lane.b32.xlu0 %v6786_v43, %s6408_s13 }
  0x8f   : > { %v6935_v54 = vpop.permute.xlu1 %923  ;;  %v6937_v39 = vpop.permute.xlu0 %919 }
  0x91   : > { %1393 = vrot.lane.b32.xlu1 %v6504_v24, %s6407_s12  ;;  %1391 = vrot.lane.b32.xlu0 %v6517_v27, %s6407_s12 }
  0x93   : > { %v6943_v1 = vpop.permute.xlu1 %927  ;;  %v6945_v48 = vpop.permute.xlu0 %925 }
  0x94   : > { %10300 = vst [vmem:[#allocation53_spill] sm:$0xff] %v6943_v1 }
  0x95   : > { %1389 = vrot.lane.b32.xlu1 %v6507_v25, %s6407_s12  ;;  %1221 = vrot.lane.b32.xlu0 %v6788_v59, %s6408_s13 }
  0x97   : > { %v6951_v41 = vpop.permute.xlu1 %931  ;;  %v6953_v49 = vpop.permute.xlu0 %929 }
  0x98   : > { %10301 = vst [vmem:[#allocation54_spill] sm:$0xff] %v6951_v41  ;;  %10302 = vst [vmem:[#allocation55_spill] sm:$0xff] %v6953_v49 }
  0x99   : > { %1157 = vrot.lane.b32.xlu1 %v6490_v18, %s6408_s13  ;;  %1155 = vrot.lane.b32.xlu0 %v6499_v21, %s6408_s13 }
  0x9b   : > { %v6959_v32 = vpop.permute.xlu1 %935  ;;  %v6961_v14 = vpop.permute.xlu0 %933 }
  0x9c   : > { %10303 = vst [vmem:[#allocation56_spill] sm:$0xff] %v6959_v32  ;;  %10304 = vst [vmem:[#allocation57_spill] sm:$0xff] %v6961_v14 }
  0x9d   : > { %2641 = vrot.lane.b32.xlu1 %v6786_v43, %s6409_s14  ;;  %1153 = vrot.lane.b32.xlu0 %v6493_v19, %s6408_s13 }
  0x9f   : > { %v6967_v25 = vpop.permute.xlu1 %939  ;;  %v6969_v41 = vpop.permute.xlu0 %937 }
  0xa0   : > { %10305 = vst [vmem:[#allocation58_spill] sm:$0xff] %v6967_v25  ;;  %10306 = vst [vmem:[#allocation59_spill] sm:$0xff] %v6969_v41 }
  0xa1   : > { %2645 = vrot.lane.b32.xlu1 %v6805_v5, %s6409_s14  ;;  %2643 = vrot.lane.b32.xlu0 %v6807_v34, %s6409_s14 }
  0xa3   : > { %v6975_v32 = vpop.permute.xlu1 %943  ;;  %v6977_v14 = vpop.permute.xlu0 %941 }
  0xa4   : > { %10307 = vst [vmem:[#allocation60_spill] sm:$0xff] %v6975_v32  ;;  %10308 = vst [vmem:[#allocation61_spill] sm:$0xff] %v6977_v14 }
  0xa5   : > { %2577 = vrot.lane.b32.xlu1 %v6496_v20, %s6409_s14  ;;  %2575 = vrot.lane.b32.xlu0 %v6490_v18, %s6409_s14 }
  0xa7   : > { %v6983_v6 = vpop.permute.xlu1 %947  ;;  %v6985_v25 = vpop.permute.xlu0 %945 }
  0xa8   : > { %10309 = vst [vmem:[#allocation62_spill] sm:$0xff] %v6983_v6  ;;  %10310 = vst [vmem:[#allocation63_spill] sm:$0xff] %v6985_v25 }
  0xa9   : > { %2407 = vrot.lane.b32.xlu1 %v6822_v11, %s6410_s15  ;;  %2573 = vrot.lane.b32.xlu0 %v6499_v21, %s6409_s14 }
  0xab   : > { %v6991_v32 = vpop.permute.xlu1 %951  ;;  %v6993_v14 = vpop.permute.xlu0 %949 }
  0xac   : > { %10311 = vst [vmem:[#allocation64_spill] sm:$0xff] %v6991_v32  ;;  %10312 = vst [vmem:[#allocation65_spill] sm:$0xff] %v6993_v14 }
  0xad   : > { %2405 = vrot.lane.b32.xlu1 %v6798_v44, %s6410_s15  ;;  %2409 = vrot.lane.b32.xlu0 %v6817_v15, %s6410_s15 }
  0xaf   : > { %v6999_v6 = vpop.permute.xlu1 %955  ;;  %v7001_v25 = vpop.permute.xlu0 %953 }
  0xb0   : > { %10313 = vst [vmem:[#allocation66_spill] sm:$0xff] %v6999_v6  ;;  %10314 = vst [vmem:[#allocation67_spill] sm:$0xff] %v7001_v25 }
  0xb1   : > { %2170 = vrot.lane.b32.xlu1 %v6805_v5, %s6411_s16  ;;  %2168 = vrot.lane.b32.xlu0 %v6807_v34, %s6411_s16 }
  0xb3   : > { %v7007_v32 = vpop.permute.xlu1 %959  ;;  %v7009_v14 = vpop.permute.xlu0 %957 }
  0xb4   : > { %10315 = vst [vmem:[#allocation68_spill] sm:$0xff] %v7007_v32  ;;  %10316 = vst [vmem:[#allocation69_spill] sm:$0xff] %v7009_v14 }
  0xb5   : > { %2341 = vrot.lane.b32.xlu1 %v6514_v26, %s6410_s15  ;;  %2339 = vrot.lane.b32.xlu0 %v6504_v24, %s6410_s15 }
  0xb7   : > { %v7015_v6 = vpop.permute.xlu1 %963  ;;  %v7017_v25 = vpop.permute.xlu0 %961 }
  0xb8   : > { %10317 = vst [vmem:[#allocation70_spill] sm:$0xff] %v7015_v6  ;;  %10318 = vst [vmem:[#allocation71_spill] sm:$0xff] %v7017_v25 }
  0xb9   : > { %2337 = vrot.lane.b32.xlu1 %v6517_v27, %s6410_s15  ;;  %2166 = vrot.lane.b32.xlu0 %v6786_v43, %s6411_s16 }
  0xbb   : > { %v7023_v41 = vpop.permute.xlu1 %967  ;;  %v7025_v32 = vpop.permute.xlu0 %965 }
  0xbc   : > { %10319 = vst [vmem:[#allocation72_spill] sm:$0xff] %v7023_v41  ;;  %10320 = vst [vmem:[#allocation73_spill] sm:$0xff] %v7025_v32 }
  0xbd   : > { %1701 = vrot.lane.b32.xlu1 %v6826_v53, %s6405_s10  ;;  %1699 = vrot.lane.b32.xlu0 %v6805_v5, %s6405_s10 }
  0xbf   : > { %v7031_v24 = vpop.permute.xlu1 %971  ;;  %v7033_v6 = vpop.permute.xlu0 %969 }
  0xc0   : > { %10321 = vst [vmem:[#allocation74_spill] sm:$0xff] %v7031_v24  ;;  %10322 = vst [vmem:[#allocation75_spill] sm:$0xff] %v7033_v6 }
  0xc1   : > { %1869 = vrot.lane.b32.xlu1 %v6535_v37, %s6406_s11  ;;  %1867 = vrot.lane.b32.xlu0 %v6514_v26, %s6406_s11 }
  0xc3   : > { %v7039_v27 = vpop.permute.xlu1 %975  ;;  %v7041_v41 = vpop.permute.xlu0 %973 }
  0xc4   : > { %10323 = vst [vmem:[#allocation76_spill] sm:$0xff] %v7039_v27  ;;  %10324 = vst [vmem:[#allocation77_spill] sm:$0xff] %v7041_v41 }
  0xc5   : > { %2102 = vrot.lane.b32.xlu1 %v6496_v20, %s6411_s16  ;;  %2100 = vrot.lane.b32.xlu0 %v6490_v18, %s6411_s16 }
  0xc7   : > { %v7047_v32 = vpop.permute.xlu1 %979  ;;  %v7049_v24 = vpop.permute.xlu0 %977 }
  0xc8   : > { %10325 = vst [vmem:[#allocation78_spill] sm:$0xff] %v7047_v32  ;;  %10326 = vst [vmem:[#allocation79_spill] sm:$0xff] %v7049_v24  ;;  %v7070_v24 = vld [vmem:[%s10108_s2] sm:$0xff] }
  0xc9   : > { %1631 = vrot.lane.b32.xlu1 %v6496_v20, %s6405_s10  ;;  %2098 = vrot.lane.b32.xlu0 %v6499_v21, %s6411_s16 }
  0xcb   : > { %v7055_v6 = vpop.permute.xlu1 %983  ;;  %v7057_v27 = vpop.permute.xlu0 %981 }
  0xcc   : > { %10327 = vst [vmem:[#allocation80_spill] sm:$0xff] %v7055_v6  ;;  %10328 = vst [vmem:[#allocation81_spill] sm:$0xff] %v7057_v27 }
  0xcd   : > { %1931 = vrot.lane.b32.xlu1 %v6798_v44, %s6406_s11  ;;  %1633 = vrot.lane.b32.xlu0 %v6523_v31, %s6405_s10  ;;  %v7078_v44 = vcombine.high %v7070_v24, %v7070_v24 }
  0xcf   : > { %v7063_v41 = vpop.permute.xlu1 %987  ;;  %v7065_v32 = vpop.permute.xlu0 %985  ;;  %6011 = vmatprep.mubr.msk.bf16.mxu0 %vm3350_vm1, %v7078_v44  ;;  %6013 = vmatprep.mubr.msk.bf16.mxu1 %vm3350_vm1, %v7078_v44 }
  0xd1   : > { %1929 = vrot.lane.b32.xlu1 %v6803_v45, %s6406_s11  ;;  %1933 = vrot.lane.b32.xlu0 %v6822_v11, %s6406_s11 }
  0xd3   : > { %v7080_v6 = vpop.permute.xlu1 %991  ;;  %v7082_v27 = vpop.permute.xlu0 %989 }
  0xd5   : > { %1465 = vrot.lane.b32.xlu1 %v6841_v29, %s6407_s12  ;;  %1463 = vrot.lane.b32.xlu0 %v6817_v15, %s6407_s12 }
  0xd7   : > { %v7092_v11 = vpop.permute.xlu1 %995  ;;  %v7094_v45 = vpop.permute.xlu0 %993 }
  0xd8   : > { %10329 = vst [vmem:[#allocation82_spill] sm:$0xff] %v7092_v11 }
  0xd9   : > { %1705 = vrot.lane.b32.xlu1 %v6845_v63, %s6405_s10  ;;  %1703 = vrot.lane.b32.xlu0 %v6824_v62, %s6405_s10 }
  0xdb   : > { %v7100_v25 = vpop.permute.xlu1 %999  ;;  %v7102_v14 = vpop.permute.xlu0 %997 }
  0xdc   : > { %10330 = vst [vmem:[#allocation83_spill] sm:$0xff] %v7100_v25  ;;  %10331 = vst [vmem:[#allocation84_spill] sm:$0xff] %v7102_v14 }
  0xdd   : > { %1873 = vrot.lane.b32.xlu1 %v6553_v47, %s6406_s11  ;;  %1871 = vrot.lane.b32.xlu0 %v6532_v36, %s6406_s11 }
  0xdf   : > { %v7108_v16 = vpop.permute.xlu1 %1003  ;;  %v7110_v12 = vpop.permute.xlu0 %1001 }
  0xe0   : > { %10332 = vst [vmem:[#allocation85_spill] sm:$0xff] %v7108_v16  ;;  %10333 = vst [vmem:[#allocation86_spill] sm:$0xff] %v7110_v12 }
  0xe1   : > { %1229 = vrot.lane.b32.xlu1 %v6826_v53, %s6408_s13  ;;  %1227 = vrot.lane.b32.xlu0 %v6805_v5, %s6408_s13 }
  0xe3   : > { %v7116_v33 = vpop.permute.xlu1 %1007  ;;  %v7118_v25 = vpop.permute.xlu0 %1005 }
  0xe4   : > { %10334 = vst [vmem:[#allocation87_spill] sm:$0xff] %v7116_v33  ;;  %10335 = vst [vmem:[#allocation88_spill] sm:$0xff] %v7118_v25 }
  0xe5   : > { %1397 = vrot.lane.b32.xlu1 %v6535_v37, %s6407_s12  ;;  %1395 = vrot.lane.b32.xlu0 %v6514_v26, %s6407_s12 }
  0xe7   : > { %v7124_v7 = vpop.permute.xlu1 %1697  ;;  %v1696_v16 = vpop.permute.xlu0 %1695 }
  0xe8   : > { %v1796_v12 = vsel %vm1761_vm2, %v1696_v16, %v7124_v7 }
  0xe9   : > { %1637 = vrot.lane.b32.xlu1 %v6541_v40, %s6405_s10  ;;  %1635 = vrot.lane.b32.xlu0 %v6520_v30, %s6405_s10 }
  0xeb   : > { %v7130_v33 = vpop.permute.xlu1 %1865  ;;  %v1864_v25 = vpop.permute.xlu0 %1863 }
  0xec   : > { %v1999_v26 = vsel %vm1997_vm3, %v1864_v25, %v7130_v33 }
  0xed   : > { %1161 = vrot.lane.b32.xlu1 %v6523_v31, %s6408_s13  ;;  %1159 = vrot.lane.b32.xlu0 %v6496_v20, %s6408_s13  ;;  %v3079_v13 = vsel %vm641_vm0, %v1796_v12, %v1999_v26 }
  0xee   : > { %3453 = vmatprep.subr.bf16.mxu0 %v3079_v13 }
  0xef   : > { %v1862_v2 = vpop.permute.xlu1 %1861  ;;  %v1694_v23 = vpop.permute.xlu0 %1693 }
  0xf0   : > { %v1998_v58 = vsel %vm1997_vm3, %v1862_v2, %v1864_v25  ;;  %v1795_v9 = vsel %vm1761_vm2, %v1694_v23, %v1696_v16 }
  0xf1   : > { %1469 = vrot.lane.b32.xlu1 %v6860_v61, %s6407_s12  ;;  %1467 = vrot.lane.b32.xlu0 %v6836_v4, %s6407_s12  ;;  %v3075_v1 = vsel %vm641_vm0, %v1795_v9, %v1998_v58 }
  0xf2   : > { %3454 = vmatpush1.bf16.msra.mxu0 %v3075_v1 }
  0xf3   : > { %v7148_v49 = vpop.permute.xlu1 %1629  ;;  %v1628_v11 = vpop.permute.xlu0 %1627 }
  0xf4   : > { %v1763_v12 = vsel %vm1761_vm2, %v1628_v11, %v7148_v49 }
  0xf5   : > { %1233 = vrot.lane.b32.xlu1 %v6845_v63, %s6408_s13  ;;  %1231 = vrot.lane.b32.xlu0 %v6824_v62, %s6408_s13 }
  0xf6   : > { %3455 = vmatprep.subr.bf16.mxu0 %v1763_v12 }
  0xf7   : > { %v1460_v2 = vpop.permute.xlu1 %1459  ;;  %v1626_v13 = vpop.permute.xlu0 %1625 }
  0xf8   : > { %v1762_v16 = vsel %vm1761_vm2, %v1626_v13, %v1628_v11 }
  0xf9   : > { %1401 = vrot.lane.b32.xlu1 %v6553_v47, %s6407_s12  ;;  %1399 = vrot.lane.b32.xlu0 %v6532_v36, %s6407_s12 }
  0xfa   : > { %3456 = vmatpush1.bf16.msra.mxu0 %v1762_v16 }
  0xfb   : > { %v1458_v58 = vpop.permute.xlu1 %1457  ;;  %v7161_v1 = vpop.permute.xlu0 %1461 }
  0xfc   : > { %v1560_v9 = vsel %vm1525_vm4, %v1460_v2, %v7161_v1  ;;  %v1559_v23 = vsel %vm1525_vm4, %v1458_v58, %v1460_v2 }
  0xfd   : > { %1165 = vrot.lane.b32.xlu1 %v6541_v40, %s6408_s13  ;;  %1163 = vrot.lane.b32.xlu0 %v6520_v30, %s6408_s13 }
  0xfe   : > { %3457 = vmatprep.subr.bf16.mxu0 %v1560_v9 }
  0xff   : > { %3458 = vmatpush1.bf16.msra.mxu0 %v1559_v23  ;;  %v7170_v25 = vpop.permute.xlu1 %1225  ;;  %v1224_v11 = vpop.permute.xlu0 %1223 }
 0x100   : > { %v1324_v2 = vsel %vm1289_vm5, %v1224_v11, %v7170_v25 }
 0x101   : > { %2649 = vrot.lane.b32.xlu1 %v6824_v62, %s6409_s14  ;;  %2647 = vrot.lane.b32.xlu0 %v6826_v53, %s6409_s14 }
 0x103   : > { %v7176_v26 = vpop.permute.xlu1 %1393  ;;  %v1392_v12 = vpop.permute.xlu0 %1391 }
 0x104   : > { %v1527_v13 = vsel %vm1525_vm4, %v1392_v12, %v7176_v26 }
 0x105   : > { %2581 = vrot.lane.b32.xlu1 %v6520_v30, %s6409_s14  ;;  %2579 = vrot.lane.b32.xlu0 %v6523_v31, %s6409_s14  ;;  %v2947_v16 = vsel %vm641_vm0, %v1324_v2, %v1527_v13 }
 0x106   : > { %3459 = vmatprep.subr.bf16.mxu0 %v2947_v16 }
 0x107   : > { %v1390_v58 = vpop.permute.xlu1 %1389  ;;  %v1222_v9 = vpop.permute.xlu0 %1221 }
 0x108   : > { %v1526_v23 = vsel %vm1525_vm4, %v1390_v58, %v1392_v12  ;;  %v1323_v14 = vsel %vm1289_vm5, %v1222_v9, %v1224_v11  ;;  %v1054_v9 = vsel %vm1053_vm6, %v6929_v52, %v6937_v39 }
 0x109   : > { %2413 = vrot.lane.b32.xlu1 %v6836_v4, %s6410_s15  ;;  %2411 = vrot.lane.b32.xlu0 %v6841_v29, %s6410_s15  ;;  %v2943_v18 = vsel %vm641_vm0, %v1323_v14, %v1526_v23  ;;  %v1055_v14 = vsel %vm1053_vm6, %v6937_v39, %v6927_v8 }
 0x10a   : > { %3460 = vmatpush1.bf16.msra.mxu0 %v2943_v18  ;;  %v1088_v18 = vsel %vm1053_vm6, %v7063_v41, %v7082_v27  ;;  %v2815_v23 = vsel %vm641_vm0, %v6786_v43, %v1055_v14 }
 0x10b   : > { %v7194_v20 = vpop.permute.xlu1 %1157  ;;  %v1156_v34 = vpop.permute.xlu0 %1155 }
 0x10c   : > { %v1291_v2 = vsel %vm1289_vm5, %v1156_v34, %v7194_v20 }
 0x10d   : > { %2653 = vrot.lane.b32.xlu1 %v6843_v10, %s6409_s14  ;;  %2651 = vrot.lane.b32.xlu0 %v6845_v63, %s6409_s14 }
 0x10e   : > { %3461 = vmatprep.subr.bf16.mxu0 %v1291_v2 }
 0x10f   : > { %v2642_v11 = vpop.permute.xlu1 %2641  ;;  %v1154_v12 = vpop.permute.xlu0 %1153 }
 0x110   : > { %v1290_v13 = vsel %vm1289_vm5, %v1154_v12, %v1156_v34  ;;  %v1087_v34 = vsel %vm1053_vm6, %v7065_v32, %v7063_v41 }
 0x111   : > { %2174 = vrot.lane.b32.xlu1 %v6824_v62, %s6411_s16  ;;  %2172 = vrot.lane.b32.xlu0 %v6826_v53, %s6411_s16 }
 0x112   : > { %3462 = vmatpush1.bf16.msra.mxu0 %v1290_v13 }
 0x113   : > { %3463 = vmatprep.subr.bf16.mxu0 %v1088_v18  ;;  %v7213_v16 = vpop.permute.xlu1 %2645  ;;  %v2644_v58 = vpop.permute.xlu0 %2643 }
 0x114   : > { %v2744_v39 = vsel %vm2709_vm7, %v2644_v58, %v7213_v16  ;;  %v2743_v41 = vsel %vm2709_vm7, %v2642_v11, %v2644_v58 }
 0x115   : > { %2345 = vrot.lane.b32.xlu1 %v6532_v36, %s6410_s15  ;;  %2343 = vrot.lane.b32.xlu0 %v6535_v37, %s6410_s15  ;;  %v2811_v36 = vsel %vm641_vm0, %v6788_v59, %v1054_v9 }
 0x116   : > { %3464 = vmatpush1.bf16.msra.mxu0 %v1087_v34 }
 0x117   : > { %3465 = vmatprep.subr.bf16.mxu0 %v2815_v23  ;;  %v7227_v2 = vpop.permute.xlu1 %2577  ;;  %v2576_v12 = vpop.permute.xlu0 %2575 }
 0x119   : > { %2585 = vrot.lane.b32.xlu1 %v6538_v38, %s6409_s14  ;;  %2583 = vrot.lane.b32.xlu0 %v6541_v40, %s6409_s14 }
 0x11a   : > { %3466 = vmatpush1.bf16.msra.mxu0 %v2811_v36 }
 0x11b   : > { %v2408_v37 = vpop.permute.xlu1 %2407  ;;  %v2574_v32 = vpop.permute.xlu0 %2573  ;;  %3467 = vmatprep.subr.bf16.mxu0 %v6499_v21  ;;  %v3355_v21 = vsel %vm641_vm0, %v2743_v41, 0 }
 0x11c   : > { %v2710_v13 = vsel %vm2709_vm7, %v2574_v32, %v2576_v12 }
 0x11d   : > { %2106 = vrot.lane.b32.xlu1 %v6520_v30, %s6411_s16  ;;  %2104 = vrot.lane.b32.xlu0 %v6523_v31, %s6411_s16 }
 0x11e   : > { %3468 = vmatpush1.bf16.msra.mxu0 %v6493_v19  ;;  %v2711_v19 = vsel %vm2709_vm7, %v2576_v12, %v7227_v2 }
 0x11f   : > { %6010 = vmatprep.subr.msk.bf16.mxu0 %vm641_vm0, %v2744_v39  ;;  %v2406_v52 = vpop.permute.xlu1 %2405  ;;  %v7245_v43 = vpop.permute.xlu0 %2409 }
 0x120   : > { %v2508_v18 = vsel %vm2473_vm8, %v2408_v37, %v7245_v43 }
 0x121   : > { %2417 = vrot.lane.b32.xlu1 %v6855_v42, %s6410_s15  ;;  %2415 = vrot.lane.b32.xlu0 %v6860_v61, %s6410_s15 }
 0x122   : > { %3474 = vmatpush2.bf16.msra.mxu0 %v3355_v21 }
 0x123   : > { %3475 = vmatprep.subr.bf16.mxu0 %v2711_v19  ;;  %v7254_v59 = vpop.permute.xlu1 %2170  ;;  %v2169_v11 = vpop.permute.xlu0 %2168 }
 0x124   : > { %v2269_v34 = vsel %vm2234_vm9, %v2169_v11, %v7254_v59 }
 0x125   : > { %1937 = vrot.lane.b32.xlu1 %v6841_v29, %s6406_s11  ;;  %1935 = vrot.lane.b32.xlu0 %v6817_v15, %s6406_s11  ;;  %v2507_v29 = vsel %vm2473_vm8, %v2406_v52, %v2408_v37 }
 0x126   : > { %3476 = vmatpush2.bf16.msra.mxu0 %v2710_v13 }
 0x127   : > { %3477 = vmatprep.subr.bf16.mxu0 %v2508_v18  ;;  %v7263_v14 = vpop.permute.xlu1 %2341  ;;  %v2340_v58 = vpop.permute.xlu0 %2339 }
 0x128   : > { %v2475_v9 = vsel %vm2473_vm8, %v2340_v58, %v7263_v14 }
 0x129   : > { %2178 = vrot.lane.b32.xlu1 %v6843_v10, %s6411_s16  ;;  %2176 = vrot.lane.b32.xlu0 %v6845_v63, %s6411_s16  ;;  %v3211_v15 = vsel %vm641_vm0, %v2269_v34, %v2475_v9 }
 0x12a   : > { %3478 = vmatpush2.bf16.msra.mxu0 %v2507_v29 }
 0x12b   : > { %3479 = vmatprep.subr.bf16.mxu0 %v3211_v15  ;;  %v2338_v23 = vpop.permute.xlu1 %2337  ;;  %v2167_v12 = vpop.permute.xlu0 %2166 }
 0x12c   : > { %v2474_v36 = vsel %vm2473_vm8, %v2338_v23, %v2340_v58  ;;  %v2268_v32 = vsel %vm2234_vm9, %v2167_v12, %v2169_v11 }
 0x12d   : > { %2349 = vrot.lane.b32.xlu1 %v6550_v46, %s6410_s15  ;;  %2347 = vrot.lane.b32.xlu0 %v6553_v47, %s6410_s15  ;;  %v3207_v39 = vsel %vm641_vm0, %v2268_v32, %v2474_v36 }
 0x12e   : > { %3480 = vmatpush2.bf16.msra.mxu0 %v3207_v39 }
 0x12f   : > { %v1702_v37 = vpop.permute.xlu1 %1701  ;;  %v1700_v41 = vpop.permute.xlu0 %1699 }
 0x130   : > { %v1798_v19 = vsel %vm1761_vm2, %v1700_v41, %v1702_v37  ;;  %v1797_v47 = vsel %vm1761_vm2, %v7124_v7, %v1700_v41 }
 0x131   : > { %1709 = vrot.lane.b32.xlu1 %v6864_v28, %s6405_s10  ;;  %1707 = vrot.lane.b32.xlu0 %v6843_v10, %s6405_s10 }
 0x133   : > { %v1870_v52 = vpop.permute.xlu1 %1869  ;;  %v1868_v21 = vpop.permute.xlu0 %1867 }
 0x134   : > { %v2001_v11 = vsel %vm1997_vm3, %v1868_v21, %v1870_v52  ;;  %v2000_v13 = vsel %vm1997_vm3, %v7130_v33, %v1868_v21 }
 0x135   : > { %1877 = vrot.lane.b32.xlu1 %v6571_v57, %s6406_s11  ;;  %1875 = vrot.lane.b32.xlu0 %v6550_v46, %s6406_s11  ;;  %v3087_v18 = vsel %vm641_vm0, %v1798_v19, %v2001_v11  ;;  %v3083_v58 = vsel %vm641_vm0, %v1797_v47, %v2000_v13 }
 0x136   : > { %3494 = vmatprep.subr.bf16.mxu1 %v3087_v18 }
 0x137   : > { %v7298_v34 = vpop.permute.xlu1 %2102  ;;  %3495 = vmatpush1.bf16.msra.mxu1 %v3083_v58  ;;  %v2101_v9 = vpop.permute.xlu0 %2100 }
 0x138   : > { %v2236_v7 = vsel %vm2234_vm9, %v2101_v9, %v7298_v34 }
 0x139   : > { %2110 = vrot.lane.b32.xlu1 %v6538_v38, %s6411_s16  ;;  %2108 = vrot.lane.b32.xlu0 %v6541_v40, %s6411_s16 }
 0x13a   : > { %3481 = vmatprep.subr.bf16.mxu0 %v2236_v7 }
 0x13b   : > { %v1632_v33 = vpop.permute.xlu1 %1631  ;;  %v2099_v29 = vpop.permute.xlu0 %2098 }
 0x13c   : > { %v2235_v15 = vsel %vm2234_vm9, %v2099_v29, %v2101_v9  ;;  %v1764_v32 = vsel %vm1761_vm2, %v7148_v49, %v1632_v33 }
 0x13d   : > { %1641 = vrot.lane.b32.xlu1 %v6559_v51, %s6405_s10  ;;  %1639 = vrot.lane.b32.xlu0 %v6538_v38, %s6405_s10 }
 0x13e   : > { %3482 = vmatpush2.bf16.msra.mxu0 %v2235_v15 }
 0x13f   : > { %v1932_v23 = vpop.permute.xlu1 %1931  ;;  %v1634_v12 = vpop.permute.xlu0 %1633 }
 0x140   : > { %v1765_v36 = vsel %vm1761_vm2, %v1632_v33, %v1634_v12 }
 0x141   : > { %1941 = vrot.lane.b32.xlu1 %v6860_v61, %s6406_s11  ;;  %1939 = vrot.lane.b32.xlu0 %v6836_v4, %s6406_s11  ;;  %v7329_v61 = vcombine.low %v7070_v24, %v7070_v24 }
 0x142   : > { %3496 = vmatprep.subr.bf16.mxu1 %v1765_v36 }
 0x143   : > { %3497 = vmatpush1.bf16.msra.mxu1 %v1764_v32  ;;  %v1930_v39 = vpop.permute.xlu1 %1929  ;;  %v7318_v41 = vpop.permute.xlu0 %1933 }
 0x144   : > { %v2032_v21 = vsel %vm1997_vm3, %v1932_v23, %v7318_v41  ;;  %v2031_v19 = vsel %vm1997_vm3, %v1930_v39, %v1932_v23 }
 0x145   : > { %1473 = vrot.lane.b32.xlu1 %v6879_v22, %s6407_s12  ;;  %1471 = vrot.lane.b32.xlu0 %v6855_v42, %s6407_s12 }
 0x146   : > { %3483 = vmatprep.subr.bf16.mxu0 %v2032_v21 }
 0x147   : > { %3484 = vmatpush2.bf16.msra.mxu0 %v2031_v19  ;;  %v7331_v49 = vpop.permute.xlu1 %1465  ;;  %v1464_v4 = vpop.permute.xlu0 %1463 }
 0x148   : > { %v1562_v11 = vsel %vm1525_vm4, %v1464_v4, %v7331_v49  ;;  %v1561_v47 = vsel %vm1525_vm4, %v7161_v1, %v1464_v4 }
 0x149   : > { %1713 = vrot.lane.b32.xlu1 %v6883_v35, %s6405_s10  ;;  %1711 = vrot.lane.b32.xlu0 %v6862_v17, %s6405_s10 }
 0x14a   : > { %3498 = vmatprep.subr.bf16.mxu1 %v1562_v11  ;;  %3486 = vmatmul.mubr.bf16.vlgmr.msra.gmra.mxu0 %v7329_v61 }
 0x14b   : > { %3499 = vmatpush1.bf16.msra.mxu1 %v1561_v47  ;;  %v7342_v24 = vpop.permute.xlu1 %1705  ;;  %v1704_v13 = vpop.permute.xlu0 %1703  ;;  %6015 = vmatprep.mubr.msk.bf16.mxu0 %vm3350_vm1, %v7078_v44 }
 0x14c   : > { %v1799_v58 = vsel %vm1761_vm2, %v1702_v37, %v1704_v13  ;;  %v1800_v9 = vsel %vm1761_vm2, %v1704_v13, %v7342_v24 }
 0x14d   : > { %1881 = vrot.lane.b32.xlu1 %v6589_v3, %s6406_s11  ;;  %1879 = vrot.lane.b32.xlu0 %v6568_v56, %s6406_s11 }
 0x14f   : > { %v7350_v1 = vpop.permute.xlu1 %1873  ;;  %v1872_v18 = vpop.permute.xlu0 %1871 }
 0x150   : > { %v2002_v7 = vsel %vm1997_vm3, %v1870_v52, %v1872_v18  ;;  %v2003_v33 = vsel %vm1997_vm3, %v1872_v18, %v7350_v1 }
 0x151   : > { %1237 = vrot.lane.b32.xlu1 %v6864_v28, %s6408_s13  ;;  %1235 = vrot.lane.b32.xlu0 %v6843_v10, %s6408_s13  ;;  %v3095_v29 = vsel %vm641_vm0, %v1800_v9, %v2003_v33  ;;  %v3091_v15 = vsel %vm641_vm0, %v1799_v58, %v2002_v7  ;;  %v1090_v7 = vsel %vm1053_vm6, %v7080_v6, %v7094_v45 }
 0x152   : > { %3535 = vmatprep.subr.bf16.mxu0 %v3095_v29  ;;  %v1057_v29 = vsel %vm1053_vm6, %v6935_v54, %v6945_v48 }
 0x153   : > { %v1230_v37 = vpop.permute.xlu1 %1229  ;;  %3536 = vmatpush1.bf16.msra.mxu0 %v3091_v15  ;;  %v1228_v23 = vpop.permute.xlu0 %1227 }
 0x154   : > { %v1325_v32 = vsel %vm1289_vm5, %v7170_v25, %v1228_v23  ;;  %v1326_v39 = vsel %vm1289_vm5, %v1228_v23, %v1230_v37  ;;  %v1089_v23 = vsel %vm1053_vm6, %v7082_v27, %v7080_v6  ;;  %v10336_v6 = vld [vmem:[#allocation50_spill] sm:$0xff] }
 0x155   : > { %1405 = vrot.lane.b32.xlu1 %v6571_v57, %s6407_s12  ;;  %1403 = vrot.lane.b32.xlu0 %v6550_v46, %s6407_s12 }
 0x157   : > { %v1398_v52 = vpop.permute.xlu1 %1397  ;;  %v1396_v36 = vpop.permute.xlu0 %1395 }
 0x158   : > { %v1528_v21 = vsel %vm1525_vm4, %v7176_v26, %v1396_v36  ;;  %v1529_v19 = vsel %vm1525_vm4, %v1396_v36, %v1398_v52  ;;  %v1056_v36 = vsel %vm1053_vm6, %v6927_v8, %v6935_v54 }
 0x159   : > { %1645 = vrot.lane.b32.xlu1 %v6577_v60, %s6405_s10  ;;  %1643 = vrot.lane.b32.xlu0 %v6556_v50, %s6405_s10  ;;  %v2955_v46 = vsel %vm641_vm0, %v1326_v39, %v1529_v19  ;;  %v2951_v4 = vsel %vm641_vm0, %v1325_v32, %v1528_v21  ;;  %v2819_v27 = vsel %vm641_vm0, %v10336_v6, %v1056_v36 }
 0x15a   : > { %3500 = vmatprep.subr.bf16.mxu1 %v2955_v46 }
 0x15b   : > { %v7380_v11 = vpop.permute.xlu1 %1637  ;;  %3501 = vmatpush1.bf16.msra.mxu1 %v2951_v4  ;;  %v1636_v25 = vpop.permute.xlu0 %1635  ;;  %v10337_v4 = vld [vmem:[#allocation3_spill] sm:$0xff] }
 0x15c   : > { %v1767_v26 = vsel %vm1761_vm2, %v1636_v25, %v7380_v11  ;;  %v1766_v47 = vsel %vm1761_vm2, %v1634_v12, %v1636_v25 }
 0x15d   : > { %1169 = vrot.lane.b32.xlu1 %v6559_v51, %s6408_s13  ;;  %1167 = vrot.lane.b32.xlu0 %v6538_v38, %s6408_s13 }
 0x15e   : > { %3537 = vmatprep.subr.bf16.mxu0 %v1767_v26 }
 0x15f   : > { %3538 = vmatpush1.bf16.msra.mxu0 %v1766_v47  ;;  %v1162_v13 = vpop.permute.xlu1 %1161  ;;  %v1160_v18 = vpop.permute.xlu0 %1159  ;;  %v10338_v47 = vld [vmem:[#allocation2_spill] sm:$0xff] }
 0x160   : > { %v1293_v58 = vsel %vm1289_vm5, %v1160_v18, %v1162_v13  ;;  %v1292_v9 = vsel %vm1289_vm5, %v7194_v20, %v1160_v18 }
 0x161   : > { %1477 = vrot.lane.b32.xlu1 %v6897_v0, %s6407_s12  ;;  %1475 = vrot.lane.b32.xlu0 %v6874_v55, %s6407_s12 }
 0x162   : > { %3502 = vmatprep.subr.bf16.mxu1 %v1293_v58 }
 0x163   : > { %3503 = vmatpush1.bf16.msra.mxu1 %v1292_v9  ;;  %v7396_v12 = vpop.permute.xlu1 %1469  ;;  %v1468_v33 = vpop.permute.xlu0 %1467 }
 0x164   : > { %3504 = vmatprep.subr.bf16.mxu1 %v1090_v7  ;;  %v1564_v20 = vsel %vm1525_vm4, %v1468_v33, %v7396_v12  ;;  %v1563_v15 = vsel %vm1525_vm4, %v7331_v49, %v1468_v33  ;;  %v2823_v49 = vsel %vm641_vm0, %v6805_v5, %v1057_v29  ;;  %v10339_v33 = vld [vmem:[#allocation84_spill] sm:$0xff]  ;;  %v10340_v29 = vld [vmem:[#allocation82_spill] sm:$0xff] }
 0x165   : > { %1241 = vrot.lane.b32.xlu1 %v6883_v35, %s6408_s13  ;;  %1239 = vrot.lane.b32.xlu0 %v6862_v17, %s6408_s13  ;;  %v1091_v6 = vsel %vm1053_vm6, %v7094_v45, %v10340_v29 }
 0x166   : > { %3539 = vmatprep.subr.bf16.mxu0 %v1564_v20  ;;  %v1092_v20 = vsel %vm1053_vm6, %v10340_v29, %v10339_v33 }
 0x167   : > { %3505 = vmatpush1.bf16.msra.mxu1 %v1089_v23  ;;  %3540 = vmatpush1.bf16.msra.mxu0 %v1563_v15  ;;  %v7418_v32 = vpop.permute.xlu1 %1233  ;;  %v1232_v39 = vpop.permute.xlu0 %1231  ;;  %v10341_v15 = vld [vmem:[#allocation55_spill] sm:$0xff]  ;;  %v10342_v23 = vld [vmem:[#allocation53_spill] sm:$0xff] }
 0x168   : > { %3506 = vmatprep.subr.bf16.mxu1 %v2823_v49  ;;  %v1327_v21 = vsel %vm1289_vm5, %v1230_v37, %v1232_v39  ;;  %v1328_v5 = vsel %vm1289_vm5, %v1232_v39, %v7418_v32  ;;  %v1059_v36 = vsel %vm1053_vm6, %v10342_v23, %v10341_v15 }
 0x169   : > { %1409 = vrot.lane.b32.xlu1 %v6589_v3, %s6407_s12  ;;  %1407 = vrot.lane.b32.xlu0 %v6568_v56, %s6407_s12 }
 0x16b   : > { %3507 = vmatpush1.bf16.msra.mxu1 %v2819_v27  ;;  %v7428_v54 = vpop.permute.xlu1 %1401  ;;  %v1400_v8 = vpop.permute.xlu0 %1399  ;;  %v1058_v27 = vsel %vm1053_vm6, %v6945_v48, %v10342_v23 }
 0x16c   : > { %v1530_v19 = vsel %vm1525_vm4, %v1398_v52, %v1400_v8  ;;  %v1531_v46 = vsel %vm1525_vm4, %v1400_v8, %v7428_v54  ;;  %3508 = vmatprep.subr.bf16.mxu1 %v10337_v4  ;;  %v2827_v48 = vsel %vm641_vm0, %v6826_v53, %v1058_v27  ;;  %v10345_v27 = vld [vmem:[#allocation52_spill] sm:$0xff] }
 0x16d   : > { %1173 = vrot.lane.b32.xlu1 %v6577_v60, %s6408_s13  ;;  %1171 = vrot.lane.b32.xlu0 %v6556_v50, %s6408_s13  ;;  %v2963_v25 = vsel %vm641_vm0, %v1328_v5, %v1531_v46  ;;  %v2959_v37 = vsel %vm641_vm0, %v1327_v21, %v1530_v19  ;;  %v2831_v21 = vsel %vm641_vm0, %v6824_v62, %v1059_v36 }
 0x16e   : > { %3541 = vmatprep.subr.bf16.mxu0 %v2963_v25 }
 0x16f   : > { %v7443_v26 = vpop.permute.xlu1 %1165  ;;  %3542 = vmatpush1.bf16.msra.mxu0 %v2959_v37  ;;  %v1164_v52 = vpop.permute.xlu0 %1163  ;;  %3509 = vmatpush1.bf16.msra.mxu1 %v10338_v47 }
 0x170   : > { %v1295_v18 = vsel %vm1289_vm5, %v1164_v52, %v7443_v26  ;;  %v1294_v58 = vsel %vm1289_vm5, %v1162_v13, %v1164_v52 }
 0x171   : > { %2657 = vrot.lane.b32.xlu1 %v6862_v17, %s6409_s14  ;;  %2655 = vrot.lane.b32.xlu0 %v6864_v28, %s6409_s14 }
 0x172   : > { %3543 = vmatprep.subr.bf16.mxu0 %v1295_v18 }
 0x173   : > { %v2650_v9 = vpop.permute.xlu1 %2649  ;;  %3544 = vmatpush1.bf16.msra.mxu0 %v1294_v58  ;;  %v2648_v7 = vpop.permute.xlu0 %2647 }
 0x174   : > { %3545 = vmatprep.subr.bf16.mxu0 %v1092_v20  ;;  %v2746_v49 = vsel %vm2709_vm7, %v2648_v7, %v2650_v9  ;;  %v2745_v39 = vsel %vm2709_vm7, %v7213_v16, %v2648_v7  ;;  %v10344_v20 = vld [vmem:[#allocation4_spill] sm:$0xff] }
 0x175   : > { %2589 = vrot.lane.b32.xlu1 %v6556_v50, %s6409_s14  ;;  %2587 = vrot.lane.b32.xlu0 %v6559_v51, %s6409_s14  ;;  %v3361_v13 = vsel %vm641_vm0, %v2745_v39, 0 }
 0x176   : > { %6012 = vmatprep.subr.msk.bf16.mxu1 %vm641_vm0, %v2746_v49 }
 0x177   : > { %3515 = vmatpush2.bf16.msra.mxu1 %v3361_v13  ;;  %v2582_v16 = vpop.permute.xlu1 %2581  ;;  %3546 = vmatpush1.bf16.msra.mxu0 %v1091_v6  ;;  %v2580_v8 = vpop.permute.xlu0 %2579 }
 0x178   : > { %3547 = vmatprep.subr.bf16.mxu0 %v2831_v21  ;;  %v2713_v5 = vsel %vm2709_vm7, %v2580_v8, %v2582_v16  ;;  %v2712_v19 = vsel %vm2709_vm7, %v7227_v2, %v2580_v8  ;;  %v10343_v2 = vld [vmem:[#allocation51_spill] sm:$0xff] }
 0x179   : > { %2421 = vrot.lane.b32.xlu1 %v6874_v55, %s6410_s15  ;;  %2419 = vrot.lane.b32.xlu0 %v6879_v22, %s6410_s15 }
 0x17a   : > { %3516 = vmatprep.subr.bf16.mxu1 %v2713_v5 }
 0x17b   : > { %3517 = vmatpush2.bf16.msra.mxu1 %v2712_v19  ;;  %v2414_v45 = vpop.permute.xlu1 %2413  ;;  %3548 = vmatpush1.bf16.msra.mxu0 %v2827_v48  ;;  %v2412_v62 = vpop.permute.xlu0 %2411 }
 0x17c   : > { %v2510_v46 = vsel %vm2473_vm8, %v2412_v62, %v2414_v45  ;;  %v2509_v4 = vsel %vm2473_vm8, %v7245_v43, %v2412_v62  ;;  %3549 = vmatprep.subr.bf16.mxu0 %v6520_v30 }
 0x17d   : > { %2661 = vrot.lane.b32.xlu1 %v10343_v2, %s6409_s14  ;;  %2659 = vrot.lane.b32.xlu0 %v6883_v35, %s6409_s14 }
 0x17e   : > { %3518 = vmatprep.subr.bf16.mxu1 %v2510_v46  ;;  %v10346_v46 = vld [vmem:[#allocation5_spill] sm:$0xff] }
 0x17f   : > { %3519 = vmatpush2.bf16.msra.mxu1 %v2509_v4  ;;  %v7493_v53 = vpop.permute.xlu1 %2653  ;;  %3550 = vmatpush1.bf16.msra.mxu0 %v6523_v31  ;;  %v2652_v25 = vpop.permute.xlu0 %2651 }
 0x180   : > { %v2747_v37 = vsel %vm2709_vm7, %v2650_v9, %v2652_v25  ;;  %v2748_v43 = vsel %vm2709_vm7, %v2652_v25, %v7493_v53 }
 0x181   : > { %2182 = vrot.lane.b32.xlu1 %v6862_v17, %s6411_s16  ;;  %2180 = vrot.lane.b32.xlu0 %v6864_v28, %s6411_s16  ;;  %v3367_v30 = vsel %vm641_vm0, %v2747_v37, 0 }
 0x182   : > { %6014 = vmatprep.subr.msk.bf16.mxu0 %vm641_vm0, %v2748_v43 }
 0x183   : > { %v2175_v52 = vpop.permute.xlu1 %2174  ;;  %3556 = vmatpush2.bf16.msra.mxu0 %v3367_v30  ;;  %v2173_v47 = vpop.permute.xlu0 %2172 }
 0x184   : > { %v2270_v58 = vsel %vm2234_vm9, %v7254_v59, %v2173_v47  ;;  %v2271_v9 = vsel %vm2234_vm9, %v2173_v47, %v2175_v52 }
 0x185   : > { %2353 = vrot.lane.b32.xlu1 %v6568_v56, %s6410_s15  ;;  %2351 = vrot.lane.b32.xlu0 %v6571_v57, %s6410_s15 }
 0x187   : > { %v2346_v31 = vpop.permute.xlu1 %2345  ;;  %v2344_v18 = vpop.permute.xlu0 %2343 }
 0x188   : > { %v2476_v7 = vsel %vm2473_vm8, %v7263_v14, %v2344_v18  ;;  %v2477_v29 = vsel %vm2473_vm8, %v2344_v18, %v2346_v31 }
 0x189   : > { %2593 = vrot.lane.b32.xlu1 %v10344_v20, %s6409_s14  ;;  %2591 = vrot.lane.b32.xlu0 %v6577_v60, %s6409_s14  ;;  %v3219_v56 = vsel %vm641_vm0, %v2271_v9, %v2477_v29  ;;  %v3215_v57 = vsel %vm641_vm0, %v2270_v58, %v2476_v7  ;;  %v10347_v9 = vld [vmem:[#allocation9_spill] sm:$0xff] }
 0x18a   : > { %3520 = vmatprep.subr.bf16.mxu1 %v3219_v56 }
 0x18b   : > { %v7521_v23 = vpop.permute.xlu1 %2585  ;;  %3521 = vmatpush2.bf16.msra.mxu1 %v3215_v57  ;;  %v2584_v59 = vpop.permute.xlu0 %2583 }
 0x18c   : > { %v2715_v14 = vsel %vm2709_vm7, %v2584_v59, %v7521_v23  ;;  %v2714_v36 = vsel %vm2709_vm7, %v2582_v16, %v2584_v59 }
 0x18d   : > { %2114 = vrot.lane.b32.xlu1 %v6556_v50, %s6411_s16  ;;  %2112 = vrot.lane.b32.xlu0 %v6559_v51, %s6411_s16 }
 0x18e   : > { %3557 = vmatprep.subr.bf16.mxu0 %v2715_v14 }
 0x18f   : > { %3558 = vmatpush2.bf16.msra.mxu0 %v2714_v36  ;;  %v7530_v49 = vpop.permute.xlu1 %2106  ;;  %v2105_v39 = vpop.permute.xlu0 %2104 }
 0x190   : > { %v2238_v13 = vsel %vm2234_vm9, %v2105_v39, %v7530_v49  ;;  %v2237_v6 = vsel %vm2234_vm9, %v7298_v34, %v2105_v39 }
 0x191   : > { %2425 = vrot.lane.b32.xlu1 %v10345_v27, %s6410_s15  ;;  %2423 = vrot.lane.b32.xlu0 %v6897_v0, %s6410_s15 }
 0x192   : > { %3522 = vmatprep.subr.bf16.mxu1 %v2238_v13 }
 0x193   : > { %3523 = vmatpush2.bf16.msra.mxu1 %v2237_v6  ;;  %v7540_v16 = vpop.permute.xlu1 %2417  ;;  %v2416_v8 = vpop.permute.xlu0 %2415  ;;  %v10348_v6 = vld [vmem:[#allocation7_spill] sm:$0xff] }
 0x194   : > { %v2512_v21 = vsel %vm2473_vm8, %v2416_v8, %v7540_v16  ;;  %v2511_v5 = vsel %vm2473_vm8, %v2414_v45, %v2416_v8  ;;  %v7562_v45 = vld [vmem:[%s6481_s8 + $0xbc] sm:$0xff] }
 0x195   : > { %1945 = vrot.lane.b32.xlu1 %v6879_v22, %s6406_s11  ;;  %1943 = vrot.lane.b32.xlu0 %v6855_v42, %s6406_s11  ;;  %v7573_v25 = vcombine.low %v7562_v45, %v7562_v45 }
 0x196   : > { %3559 = vmatprep.subr.bf16.mxu0 %v2512_v21 }
 0x197   : > { %3560 = vmatpush2.bf16.msra.mxu0 %v2511_v5  ;;  %v7549_v34 = vpop.permute.xlu1 %1937  ;;  %v1936_v19 = vpop.permute.xlu0 %1935 }
 0x198   : > { %v2034_v48 = vsel %vm1997_vm3, %v1936_v19, %v7549_v34  ;;  %v2033_v62 = vsel %vm1997_vm3, %v7318_v41, %v1936_v19 }
 0x199   : > { %2186 = vrot.lane.b32.xlu1 %v10343_v2, %s6411_s16  ;;  %2184 = vrot.lane.b32.xlu0 %v6883_v35, %s6411_s16 }
 0x19a   : > { %3524 = vmatprep.subr.bf16.mxu1 %v2034_v48 }
 0x19b   : > { %3525 = vmatpush2.bf16.msra.mxu1 %v2033_v62  ;;  %v7559_v22 = vpop.permute.xlu1 %2178  ;;  %v2177_v42 = vpop.permute.xlu0 %2176 }
 0x19c   : > { %v2272_v37 = vsel %vm2234_vm9, %v2175_v52, %v2177_v42  ;;  %v2273_v43 = vsel %vm2234_vm9, %v2177_v42, %v7559_v22 }
 0x19d   : > { %2357 = vrot.lane.b32.xlu1 %v10346_v46, %s6410_s15  ;;  %2355 = vrot.lane.b32.xlu0 %v6589_v3, %s6410_s15 }
 0x19e   : > { %3527 = vmatmul.mubr.bf16.vlgmr.msra.gmra.mxu1 %v7329_v61 }
 0x19f   : > { %v7569_v41 = vpop.permute.xlu1 %2349  ;;  %v2348_v4 = vpop.permute.xlu0 %2347  ;;  %6017 = vmatprep.mubr.msk.bf16.mxu1 %vm3350_vm1, %v7078_v44 }
 0x1a0   : > { %v2478_v30 = vsel %vm2473_vm8, %v2346_v31, %v2348_v4  ;;  %v2479_v3 = vsel %vm2473_vm8, %v2348_v4, %v7569_v41 }
 0x1a1   : > { %1717 = vrot.lane.b32.xlu1 %v7573_v25, %s6405_s10  ;;  %1715 = vrot.lane.b32.xlu0 %v10343_v2, %s6405_s10  ;;  %v3227_v47 = vsel %vm641_vm0, %v2273_v43, %v2479_v3  ;;  %v3223_v18 = vsel %vm641_vm0, %v2272_v37, %v2478_v30 }
 0x1a2   : > { %3561 = vmatprep.subr.bf16.mxu0 %v3227_v47  ;;  %v10349_v47 = vld [vmem:[#allocation13_spill] sm:$0xff] }
 0x1a3   : > { %v1710_v52 = vpop.permute.xlu1 %1709  ;;  %3562 = vmatpush2.bf16.msra.mxu0 %v3223_v18  ;;  %v1708_v58 = vpop.permute.xlu0 %1707 }
 0x1a4   : > { %v1801_v29 = vsel %vm1761_vm2, %v7342_v24, %v1708_v58  ;;  %v1802_v56 = vsel %vm1761_vm2, %v1708_v58, %v1710_v52 }
 0x1a5   : > { %1885 = vrot.lane.b32.xlu1 %v10347_v9, %s6406_s11  ;;  %1883 = vrot.lane.b32.xlu0 %v10346_v46, %s6406_s11 }
 0x1a7   : > { %v1878_v31 = vpop.permute.xlu1 %1877  ;;  %v1876_v7 = vpop.permute.xlu0 %1875 }
 0x1a8   : > { %v2004_v57 = vsel %vm1997_vm3, %v7350_v1, %v1876_v7  ;;  %v2005_v59 = vsel %vm1997_vm3, %v1876_v7, %v1878_v31 }
 0x1a9   : > { %2118 = vrot.lane.b32.xlu1 %v10344_v20, %s6411_s16  ;;  %2116 = vrot.lane.b32.xlu0 %v6577_v60, %s6411_s16  ;;  %v3103_v14 = vsel %vm641_vm0, %v1802_v56, %v2005_v59  ;;  %v3099_v36 = vsel %vm641_vm0, %v1801_v29, %v2004_v57 }
 0x1aa   : > { %3576 = vmatprep.subr.bf16.mxu1 %v3103_v14 }
 0x1ab   : > { %v7605_v39 = vpop.permute.xlu1 %2110  ;;  %3577 = vmatpush1.bf16.msra.mxu1 %v3099_v36  ;;  %v2109_v24 = vpop.permute.xlu0 %2108 }
 0x1ac   : > { %v2240_v1 = vsel %vm2234_vm9, %v2109_v24, %v7605_v39  ;;  %v2239_v13 = vsel %vm2234_vm9, %v7530_v49, %v2109_v24  ;;  %v7628_v49 = vsel %vm641_vm0, %v10347_v9, %v7573_v25 }
 0x1ad   : > { %1649 = vrot.lane.b32.xlu1 %v10348_v6, %s6405_s10  ;;  %1647 = vrot.lane.b32.xlu0 %v10344_v20, %s6405_s10 }
 0x1ae   : > { %3563 = vmatprep.subr.bf16.mxu0 %v2240_v1 }
 0x1af   : > { %3564 = vmatpush2.bf16.msra.mxu0 %v2239_v13  ;;  %v7615_v8 = vpop.permute.xlu1 %1641  ;;  %v1640_v21 = vpop.permute.xlu0 %1639 }
 0x1b0   : > { %v1769_v5 = vsel %vm1761_vm2, %v1640_v21, %v7615_v8  ;;  %v1768_v19 = vsel %vm1761_vm2, %v7380_v11, %v1640_v21 }
 0x1b1   : > { %1949 = vrot.lane.b32.xlu1 %v6897_v0, %s6406_s11  ;;  %1947 = vrot.lane.b32.xlu0 %v6874_v55, %s6406_s11  ;;  %v7637_v0 = vld [vmem:[%s6481_s8 + $0xc4] sm:$0xff] }
 0x1b2   : > { %3578 = vmatprep.subr.bf16.mxu1 %v1769_v5  ;;  %v7647_v37 = vcombine.low %v7637_v0, %v7637_v0 }
 0x1b3   : > { %3579 = vmatpush1.bf16.msra.mxu1 %v1768_v19  ;;  %v7630_v48 = vpop.permute.xlu1 %1941  ;;  %v1940_v62 = vpop.permute.xlu0 %1939  ;;  %v10351_v19 = vld [vmem:[#allocation11_spill] sm:$0xff] }
 0x1b4   : > { %v2036_v42 = vsel %vm1997_vm3, %v1940_v62, %v7630_v48  ;;  %v2035_v11 = vsel %vm1997_vm3, %v7549_v34, %v1940_v62  ;;  %v7651_v34 = vcombine.high %v7562_v45, %v7562_v45  ;;  %v10352_v62 = vld [vmem:[#allocation6_spill] sm:$0xff] }
 0x1b5   : > { %1481 = vrot.lane.b32.xlu1 %v7628_v49, %s6407_s12  ;;  %1479 = vrot.lane.b32.xlu0 %v10345_v27, %s6407_s12 }
 0x1b6   : > { %3565 = vmatprep.subr.bf16.mxu0 %v2036_v42 }
 0x1b7   : > { %3566 = vmatpush2.bf16.msra.mxu0 %v2035_v11  ;;  %v7643_v55 = vpop.permute.xlu1 %1473  ;;  %v1472_v4 = vpop.permute.xlu0 %1471 }
 0x1b8   : > { %v1566_v43 = vsel %vm1525_vm4, %v1472_v4, %v7643_v55  ;;  %v1565_v30 = vsel %vm1525_vm4, %v7396_v12, %v1472_v4  ;;  %v10350_v12 = vld [vmem:[#allocation8_spill] sm:$0xff] }
 0x1b9   : > { %1721 = vrot.lane.b32.xlu1 %v7647_v37, %s6405_s10  ;;  %1719 = vrot.lane.b32.xlu0 %v7651_v34, %s6405_s10 }
 0x1ba   : > { %3580 = vmatprep.subr.bf16.mxu1 %v1566_v43  ;;  %3568 = vmatmul.mubr.bf16.vlgmr.msra.gmra.mxu0 %v7329_v61  ;;  %v7713_v43 = vsel %vm641_vm0, %v10349_v47, %v7647_v37 }
 0x1bb   : > { %3581 = vmatpush1.bf16.msra.mxu1 %v1565_v30  ;;  %v7662_v3 = vpop.permute.xlu1 %1713  ;;  %v1712_v45 = vpop.permute.xlu0 %1711  ;;  %6019 = vmatprep.mubr.msk.bf16.mxu0 %vm3350_vm1, %v7078_v44  ;;  %v7718_v30 = vsel %vm641_vm0, %v10350_v12, %v7651_v34 }
 0x1bc   : > { %v1803_v7 = vsel %vm1761_vm2, %v1710_v52, %v1712_v45  ;;  %v1804_v29 = vsel %vm1761_vm2, %v1712_v45, %v7662_v3 }
 0x1bd   : > { %1889 = vrot.lane.b32.xlu1 %v10349_v47, %s6406_s11  ;;  %1887 = vrot.lane.b32.xlu0 %v10350_v12, %s6406_s11 }
 0x1bf   : > { %v7670_v18 = vpop.permute.xlu1 %1881  ;;  %v1880_v58 = vpop.permute.xlu0 %1879 }
 0x1c0   : > { %v2006_v56 = vsel %vm1997_vm3, %v1878_v31, %v1880_v58  ;;  %v2007_v57 = vsel %vm1997_vm3, %v1880_v58, %v7670_v18 }
 0x1c1   : > { %1245 = vrot.lane.b32.xlu1 %v7573_v25, %s6408_s13  ;;  %1243 = vrot.lane.b32.xlu0 %v10343_v2, %s6408_s13  ;;  %v3111_v59 = vsel %vm641_vm0, %v1804_v29, %v2007_v57  ;;  %v3107_v14 = vsel %vm641_vm0, %v1803_v7, %v2006_v56  ;;  %v10353_v56 = vld [vmem:[#allocation86_spill] sm:$0xff]  ;;  %v10354_v57 = vld [vmem:[#allocation83_spill] sm:$0xff] }
 0x1c2   : > { %3617 = vmatprep.subr.bf16.mxu0 %v3111_v59  ;;  %v1094_v59 = vsel %vm1053_vm6, %v10354_v57, %v10353_v56 }
 0x1c3   : > { %v1238_v52 = vpop.permute.xlu1 %1237  ;;  %3618 = vmatpush1.bf16.msra.mxu0 %v3107_v14  ;;  %v1236_v36 = vpop.permute.xlu0 %1235 }
 0x1c4   : > { %v1329_v1 = vsel %vm1289_vm5, %v7418_v32, %v1236_v36  ;;  %v1330_v13 = vsel %vm1289_vm5, %v1236_v36, %v1238_v52  ;;  %v10355_v36 = vld [vmem:[#allocation57_spill] sm:$0xff] }
 0x1c5   : > { %1413 = vrot.lane.b32.xlu1 %v10347_v9, %s6407_s12  ;;  %1411 = vrot.lane.b32.xlu0 %v10346_v46, %s6407_s12 }
 0x1c7   : > { %v1406_v31 = vpop.permute.xlu1 %1405  ;;  %v1404_v24 = vpop.permute.xlu0 %1403 }
 0x1c8   : > { %v1532_v21 = vsel %vm1525_vm4, %v7428_v54, %v1404_v24  ;;  %v1533_v5 = vsel %vm1525_vm4, %v1404_v24, %v1406_v31  ;;  %v10356_v24 = vld [vmem:[#allocation54_spill] sm:$0xff] }
 0x1c9   : > { %1653 = vrot.lane.b32.xlu1 %v10351_v19, %s6405_s10  ;;  %1651 = vrot.lane.b32.xlu0 %v10352_v62, %s6405_s10  ;;  %v2971_v46 = vsel %vm641_vm0, %v1330_v13, %v1533_v5  ;;  %v2967_v42 = vsel %vm641_vm0, %v1329_v1, %v1532_v21  ;;  %v1061_v1 = vsel %vm1053_vm6, %v10356_v24, %v10355_v36 }
 0x1ca   : > { %3582 = vmatprep.subr.bf16.mxu1 %v2971_v46  ;;  %v1093_v21 = vsel %vm1053_vm6, %v10339_v33, %v10354_v57  ;;  %v1060_v5 = vsel %vm1053_vm6, %v10341_v15, %v10356_v24  ;;  %v10358_v24 = vld [vmem:[#allocation85_spill] sm:$0xff] }
 0x1cb   : > { %v7700_v11 = vpop.permute.xlu1 %1645  ;;  %3583 = vmatpush1.bf16.msra.mxu1 %v2967_v42  ;;  %v1644_v32 = vpop.permute.xlu0 %1643  ;;  %v2835_v33 = vsel %vm641_vm0, %v6845_v63, %v1060_v5 }
 0x1cc   : > { %v1771_v54 = vsel %vm1761_vm2, %v1644_v32, %v7700_v11  ;;  %v1770_v4 = vsel %vm1761_vm2, %v7615_v8, %v1644_v32 }
 0x1cd   : > { %1177 = vrot.lane.b32.xlu1 %v10348_v6, %s6408_s13  ;;  %1175 = vrot.lane.b32.xlu0 %v10344_v20, %s6408_s13 }
 0x1ce   : > { %3619 = vmatprep.subr.bf16.mxu0 %v1771_v54 }
 0x1cf   : > { %3620 = vmatpush1.bf16.msra.mxu0 %v1770_v4  ;;  %v1170_v45 = vpop.permute.xlu1 %1169  ;;  %v1168_v8 = vpop.permute.xlu0 %1167 }
 0x1d0   : > { %v1297_v58 = vsel %vm1289_vm5, %v1168_v8, %v1170_v45  ;;  %v1296_v7 = vsel %vm1289_vm5, %v7443_v26, %v1168_v8 }
 0x1d1   : > { %1485 = vrot.lane.b32.xlu1 %v7713_v43, %s6407_s12  ;;  %1483 = vrot.lane.b32.xlu0 %v7718_v30, %s6407_s12 }
 0x1d2   : > { %3584 = vmatprep.subr.bf16.mxu1 %v1297_v58 }
 0x1d3   : > { %3585 = vmatpush1.bf16.msra.mxu1 %v1296_v7  ;;  %v7727_v29 = vpop.permute.xlu1 %1477  ;;  %v1476_v14 = vpop.permute.xlu0 %1475 }
 0x1d4   : > { %3586 = vmatprep.subr.bf16.mxu1 %v1094_v59  ;;  %v1568_v26 = vsel %vm1525_vm4, %v1476_v14, %v7727_v29  ;;  %v1567_v13 = vsel %vm1525_vm4, %v7643_v55, %v1476_v14  ;;  %v2839_v55 = vsel %vm641_vm0, %v6843_v10, %v1061_v1  ;;  %v10357_v14 = vld [vmem:[#allocation88_spill] sm:$0xff] }
 0x1d5   : > { %1247 = vrot.lane.b32.xlu1 %v7651_v34, %s6408_s13  ;;  %1009 = vrot.lane.b32.xlu0 %v7628_v49, %s6404_s9  ;;  %v1096_v1 = vsel %vm1053_vm6, %v10358_v24, %v10357_v14 }
 0x1d6   : > { %3621 = vmatprep.subr.bf16.mxu0 %v1568_v26  ;;  %v10360_v26 = vld [vmem:[#allocation56_spill] sm:$0xff] }
 0x1d7   : > { %3587 = vmatpush1.bf16.msra.mxu1 %v1093_v21  ;;  %3622 = vmatpush1.bf16.msra.mxu0 %v1567_v13  ;;  %v7749_v46 = vpop.permute.xlu1 %1241  ;;  %v1240_v42 = vpop.permute.xlu0 %1239 }
 0x1d8   : > { %3588 = vmatprep.subr.bf16.mxu1 %v2839_v55  ;;  %v1331_v54 = vsel %vm1289_vm5, %v1238_v52, %v1240_v42  ;;  %v1332_v10 = vsel %vm1289_vm5, %v1240_v42, %v7749_v46  ;;  %v1095_v55 = vsel %vm1053_vm6, %v10353_v56, %v10358_v24 }
 0x1d9   : > { %1415 = vrot.lane.b32.xlu1 %v10350_v12, %s6407_s12  ;;  %1249 = vrot.lane.b32.xlu0 %v7647_v37, %s6408_s13 }
 0x1db   : > { %3589 = vmatpush1.bf16.msra.mxu1 %v2835_v33  ;;  %v7759_v15 = vpop.permute.xlu1 %1409  ;;  %v1408_v32 = vpop.permute.xlu0 %1407 }
 0x1dc   : > { %v1534_v4 = vsel %vm1525_vm4, %v1406_v31, %v1408_v32  ;;  %v1535_v8 = vsel %vm1525_vm4, %v1408_v32, %v7759_v15  ;;  %3590 = vmatprep.subr.bf16.mxu1 %v6538_v38 }
 0x1dd   : > { %1179 = vrot.lane.b32.xlu1 %v10352_v62, %s6408_s13  ;;  %1417 = vrot.lane.b32.xlu0 %v10349_v47, %s6407_s12  ;;  %v2979_v63 = vsel %vm641_vm0, %v1332_v10, %v1535_v8  ;;  %v2975_v52 = vsel %vm641_vm0, %v1331_v54, %v1534_v4 }
 0x1de   : > { %3623 = vmatprep.subr.bf16.mxu0 %v2979_v63 }
 0x1df   : > { %v7774_v58 = vpop.permute.xlu1 %1173  ;;  %3624 = vmatpush1.bf16.msra.mxu0 %v2975_v52  ;;  %v1172_v31 = vpop.permute.xlu0 %1171  ;;  %3591 = vmatpush1.bf16.msra.mxu1 %v6541_v40  ;;  %v10359_v40 = vld [vmem:[#allocation59_spill] sm:$0xff] }
 0x1e0   : > { %v1299_v38 = vsel %vm1289_vm5, %v1172_v31, %v7774_v58  ;;  %v1298_v7 = vsel %vm1289_vm5, %v1170_v45, %v1172_v31  ;;  %v1063_v13 = vsel %vm1053_vm6, %v10360_v26, %v10359_v40 }
 0x1e1   : > { %1011 = vrot.lane.b32.xlu1 %v7718_v30, %s6404_s9  ;;  %1181 = vrot.lane.b32.xlu0 %v10351_v19, %s6408_s13  ;;  %v2847_v32 = vsel %vm641_vm0, %v6862_v17, %v1063_v13 }
 0x1e2   : > { %3625 = vmatprep.subr.bf16.mxu0 %v1299_v38 }
 0x1e3   : > { %v2658_v57 = vpop.permute.xlu1 %2657  ;;  %3626 = vmatpush1.bf16.msra.mxu0 %v1298_v7  ;;  %v2656_v59 = vpop.permute.xlu0 %2655 }
 0x1e4   : > { %v2749_v21 = vsel %vm2709_vm7, %v7493_v53, %v2656_v59  ;;  %3627 = vmatprep.subr.bf16.mxu0 %v1096_v1  ;;  %v2750_v5 = vsel %vm2709_vm7, %v2656_v59, %v2658_v57  ;;  %v1062_v53 = vsel %vm1053_vm6, %v10355_v36, %v10360_v26 }
 0x1e5   : > { %2663 = vrot.lane.b32.xlu1 %v7573_v25, %s6409_s14  ;;  %1013 = vrot.lane.b32.xlu0 %v7713_v43, %s6404_s9  ;;  %v3373_v45 = vsel %vm641_vm0, %v2749_v21, 0  ;;  %v2843_v56 = vsel %vm641_vm0, %v6864_v28, %v1062_v53  ;;  %v10361_v53 = vld [vmem:[#allocation10_spill] sm:$0xff] }
 0x1e6   : > { %6016 = vmatprep.subr.msk.bf16.mxu1 %vm641_vm0, %v2750_v5 }
 0x1e7   : > { %3597 = vmatpush2.bf16.msra.mxu1 %v3373_v45  ;;  %v2590_v42 = vpop.permute.xlu1 %2589  ;;  %3628 = vmatpush1.bf16.msra.mxu0 %v1095_v55  ;;  %v2588_v33 = vpop.permute.xlu0 %2587 }
 0x1e8   : > { %3629 = vmatprep.subr.bf16.mxu0 %v2847_v32  ;;  %v2717_v54 = vsel %vm2709_vm7, %v2588_v33, %v2590_v42  ;;  %v2716_v10 = vsel %vm2709_vm7, %v7521_v23, %v2588_v33 }
 0x1e9   : > { %2595 = vrot.lane.b32.xlu1 %v10348_v6, %s6409_s14  ;;  %2665 = vrot.lane.b32.xlu0 %v7651_v34, %s6409_s14 }
 0x1ea   : > { %3598 = vmatprep.subr.bf16.mxu1 %v2717_v54 }
 0x1eb   : > { %3599 = vmatpush2.bf16.msra.mxu1 %v2716_v10  ;;  %v2422_v36 = vpop.permute.xlu1 %2421  ;;  %3630 = vmatpush1.bf16.msra.mxu0 %v2843_v56  ;;  %v2420_v17 = vpop.permute.xlu0 %2419 }
 0x1ec   : > { %v2514_v4 = vsel %vm2473_vm8, %v2420_v17, %v2422_v36  ;;  %v2513_v8 = vsel %vm2473_vm8, %v7540_v16, %v2420_v17  ;;  %3631 = vmatprep.subr.bf16.mxu0 %v6556_v50 }
 0x1ed   : > { %2427 = vrot.lane.b32.xlu1 %v7628_v49, %s6410_s15  ;;  %2597 = vrot.lane.b32.xlu0 %v10352_v62, %s6409_s14 }
 0x1ee   : > { %3600 = vmatprep.subr.bf16.mxu1 %v2514_v4 }
 0x1ef   : > { %3601 = vmatpush2.bf16.msra.mxu1 %v2513_v8  ;;  %v7824_v28 = vpop.permute.xlu1 %2661  ;;  %3632 = vmatpush1.bf16.msra.mxu0 %v6559_v51  ;;  %v2660_v23 = vpop.permute.xlu0 %2659  ;;  %v7838_v51 = vcombine.high %v7637_v0, %v7637_v0 }
 0x1f0   : > { %v2751_v63 = vsel %vm2709_vm7, %v2658_v57, %v2660_v23  ;;  %v2752_v16 = vsel %vm2709_vm7, %v2660_v23, %v7824_v28 }
 0x1f1   : > { %2667 = vrot.lane.b32.xlu1 %v7647_v37, %s6409_s14  ;;  %2429 = vrot.lane.b32.xlu0 %v7718_v30, %s6410_s15  ;;  %v3379_v50 = vsel %vm641_vm0, %v2751_v63, 0 }
 0x1f2   : > { %6018 = vmatprep.subr.msk.bf16.mxu0 %vm641_vm0, %v2752_v16 }
 0x1f3   : > { %v2183_v52 = vpop.permute.xlu1 %2182  ;;  %3638 = vmatpush2.bf16.msra.mxu0 %v3379_v50  ;;  %v2181_v31 = vpop.permute.xlu0 %2180 }
 0x1f4   : > { %v2274_v57 = vsel %vm2234_vm9, %v7559_v22, %v2181_v31  ;;  %v2275_v59 = vsel %vm2234_vm9, %v2181_v31, %v2183_v52 }
 0x1f5   : > { %2188 = vrot.lane.b32.xlu1 %v7573_v25, %s6411_s16  ;;  %2669 = vrot.lane.b32.xlu0 %v7838_v51, %s6409_s14 }
 0x1f7   : > { %v2354_v38 = vpop.permute.xlu1 %2353  ;;  %v2352_v7 = vpop.permute.xlu0 %2351 }
 0x1f8   : > { %v2480_v24 = vsel %vm2473_vm8, %v7569_v41, %v2352_v7  ;;  %v2481_v1 = vsel %vm2473_vm8, %v2352_v7, %v2354_v38 }
 0x1f9   : > { %2359 = vrot.lane.b32.xlu1 %v10347_v9, %s6410_s15  ;;  %2190 = vrot.lane.b32.xlu0 %v7651_v34, %s6411_s16  ;;  %v3235_v0 = vsel %vm641_vm0, %v2275_v59, %v2481_v1  ;;  %v3231_v26 = vsel %vm641_vm0, %v2274_v57, %v2480_v24  ;;  %v367_v57 = vld [vmem:[%s6481_s8 + $0xcc] sm:$0xff] }
 0x1fa   : > { %3602 = vmatprep.subr.bf16.mxu1 %v3235_v0  ;;  %v7929_v59 = vcombine.low %v367_v57, %v367_v57 }
 0x1fb   : > { %v7856_v13 = vpop.permute.xlu1 %2593  ;;  %3603 = vmatpush2.bf16.msra.mxu1 %v3231_v26  ;;  %v2592_v22 = vpop.permute.xlu0 %2591 }
 0x1fc   : > { %v2719_v41 = vsel %vm2709_vm7, %v2592_v22, %v7856_v13  ;;  %v2718_v21 = vsel %vm2709_vm7, %v2590_v42, %v2592_v22 }
 0x1fd   : > { %2599 = vrot.lane.b32.xlu1 %v10351_v19, %s6409_s14  ;;  %2361 = vrot.lane.b32.xlu0 %v10350_v12, %s6410_s15 }
 0x1fe   : > { %3639 = vmatprep.subr.bf16.mxu0 %v2719_v41 }
 0x1ff   : > { %3640 = vmatpush2.bf16.msra.mxu0 %v2718_v21  ;;  %v7865_v9 = vpop.permute.xlu1 %2114  ;;  %v2113_v5 = vpop.permute.xlu0 %2112 }
 0x200   : > { %v2242_v45 = vsel %vm2234_vm9, %v2113_v5, %v7865_v9  ;;  %v2241_v55 = vsel %vm2234_vm9, %v7605_v39, %v2113_v5  ;;  %v10362_v39 = vld [vmem:[#allocation12_spill] sm:$0xff] }
 0x201   : > { %2120 = vrot.lane.b32.xlu1 %v10348_v6, %s6411_s16  ;;  %2601 = vrot.lane.b32.xlu0 %v10361_v53, %s6409_s14  ;;  %v7887_v54 = vsel %vm641_vm0, %v10362_v39, %v7838_v51 }
 0x202   : > { %3604 = vmatprep.subr.bf16.mxu1 %v2242_v45  ;;  %v10363_v45 = vld [vmem:[#allocation17_spill] sm:$0xff] }
 0x203   : > { %3605 = vmatpush2.bf16.msra.mxu1 %v2241_v55  ;;  %v7875_v12 = vpop.permute.xlu1 %2425  ;;  %v2424_v42 = vpop.permute.xlu0 %2423 }
 0x204   : > { %v2516_v33 = vsel %vm2473_vm8, %v2424_v42, %v7875_v12  ;;  %v2515_v32 = vsel %vm2473_vm8, %v2422_v36, %v2424_v42 }
 0x205   : > { %2431 = vrot.lane.b32.xlu1 %v7713_v43, %s6410_s15  ;;  %2122 = vrot.lane.b32.xlu0 %v10352_v62, %s6411_s16 }
 0x206   : > { %3641 = vmatprep.subr.bf16.mxu0 %v2516_v33 }
 0x207   : > { %3642 = vmatpush2.bf16.msra.mxu0 %v2515_v32  ;;  %v7889_v10 = vpop.permute.xlu1 %1945  ;;  %v1944_v56 = vpop.permute.xlu0 %1943 }
 0x208   : > { %v2038_v17 = vsel %vm1997_vm3, %v1944_v56, %v7889_v10  ;;  %v2037_v36 = vsel %vm1997_vm3, %v7630_v48, %v1944_v56 }
 0x209   : > { %1951 = vrot.lane.b32.xlu1 %v10345_v27, %s6406_s11  ;;  %2433 = vrot.lane.b32.xlu0 %v7887_v54, %s6410_s15 }
 0x20a   : > { %3606 = vmatprep.subr.bf16.mxu1 %v2038_v17 }
 0x20b   : > { %3607 = vmatpush2.bf16.msra.mxu1 %v2037_v36  ;;  %v7899_v4 = vpop.permute.xlu1 %2186  ;;  %v2185_v8 = vpop.permute.xlu0 %2184 }
 0x20c   : > { %v2276_v23 = vsel %vm2234_vm9, %v2183_v52, %v2185_v8  ;;  %v2277_v63 = vsel %vm2234_vm9, %v2185_v8, %v7899_v4 }
 0x20d   : > { %2192 = vrot.lane.b32.xlu1 %v7647_v37, %s6411_s16  ;;  %1953 = vrot.lane.b32.xlu0 %v7628_v49, %s6406_s11 }
 0x20e   : > { %3609 = vmatmul.mubr.bf16.vlgmr.msra.gmra.mxu1 %v7329_v61 }
 0x20f   : > { %v7906_v48 = vpop.permute.xlu1 %2357  ;;  %v2356_v27 = vpop.permute.xlu0 %2355  ;;  %6021 = vmatprep.mubr.msk.bf16.mxu1 %vm3350_vm1, %v7078_v44 }
 0x210   : > { %v2482_v16 = vsel %vm2473_vm8, %v2354_v38, %v2356_v27  ;;  %v2483_v50 = vsel %vm2473_vm8, %v2356_v27, %v7906_v48 }
 0x211   : > { %2363 = vrot.lane.b32.xlu1 %v10349_v47, %s6410_s15  ;;  %2194 = vrot.lane.b32.xlu0 %v7838_v51, %s6411_s16  ;;  %v3243_v49 = vsel %vm641_vm0, %v2277_v63, %v2483_v50  ;;  %v3239_v31 = vsel %vm641_vm0, %v2276_v23, %v2482_v16  ;;  %v7992_v50 = vcombine.high %v367_v57, %v367_v57 }
 0x212   : > { %3643 = vmatprep.subr.bf16.mxu0 %v3243_v49 }
 0x213   : > { %v7922_v52 = vpop.permute.xlu1 %1717  ;;  %3644 = vmatpush2.bf16.msra.mxu0 %v3239_v31  ;;  %v1716_v7 = vpop.permute.xlu0 %1715 }
 0x214   : > { %v1805_v24 = vsel %vm1761_vm2, %v7662_v3, %v1716_v7  ;;  %v1806_v1 = vsel %vm1761_vm2, %v1716_v7, %v7922_v52 }
 0x215   : > { %1723 = vrot.lane.b32.xlu1 %v7838_v51, %s6405_s10  ;;  %2365 = vrot.lane.b32.xlu0 %v10362_v39, %s6410_s15 }
 0x217   : > { %v1886_v47 = vpop.permute.xlu1 %1885  ;;  %v1884_v38 = vpop.permute.xlu0 %1883 }
 0x218   : > { %v2008_v0 = vsel %vm1997_vm3, %v7670_v18, %v1884_v38  ;;  %v2009_v26 = vsel %vm1997_vm3, %v1884_v38, %v1886_v47 }
 0x219   : > { %1891 = vrot.lane.b32.xlu1 %v10362_v39, %s6406_s11  ;;  %1725 = vrot.lane.b32.xlu0 %v7929_v59, %s6405_s10  ;;  %v3119_v22 = vsel %vm641_vm0, %v1806_v1, %v2009_v26  ;;  %v3115_v41 = vsel %vm641_vm0, %v1805_v24, %v2008_v0  ;;  %v10365_v1 = vld [vmem:[#allocation16_spill] sm:$0xff] }
 0x21a   : > { %3658 = vmatprep.subr.bf16.mxu1 %v3119_v22 }
 0x21b   : > { %v7944_v3 = vpop.permute.xlu1 %2118  ;;  %3659 = vmatpush1.bf16.msra.mxu1 %v3115_v41  ;;  %v2117_v21 = vpop.permute.xlu0 %2116 }
 0x21c   : > { %v2244_v18 = vsel %vm2234_vm9, %v2117_v21, %v7944_v3  ;;  %v2243_v5 = vsel %vm2234_vm9, %v7865_v9, %v2117_v21 }
 0x21d   : > { %2124 = vrot.lane.b32.xlu1 %v10351_v19, %s6411_s16  ;;  %1893 = vrot.lane.b32.xlu0 %v10363_v45, %s6406_s11 }
 0x21e   : > { %3645 = vmatprep.subr.bf16.mxu0 %v2244_v18 }
 0x21f   : > { %3646 = vmatpush2.bf16.msra.mxu0 %v2243_v5  ;;  %v7954_v55 = vpop.permute.xlu1 %1649  ;;  %v1648_v42 = vpop.permute.xlu0 %1647 }
 0x220   : > { %v1773_v33 = vsel %vm1761_vm2, %v1648_v42, %v7954_v55  ;;  %v1772_v32 = vsel %vm1761_vm2, %v7700_v11, %v1648_v42  ;;  %v10364_v11 = vld [vmem:[#allocation15_spill] sm:$0xff] }
 0x221   : > { %1655 = vrot.lane.b32.xlu1 %v10361_v53, %s6405_s10  ;;  %2126 = vrot.lane.b32.xlu0 %v10361_v53, %s6411_s16 }
 0x222   : > { %3660 = vmatprep.subr.bf16.mxu1 %v1773_v33 }
 0x223   : > { %3661 = vmatpush1.bf16.msra.mxu1 %v1772_v32  ;;  %v7964_v9 = vpop.permute.xlu1 %1949  ;;  %v1948_v56 = vpop.permute.xlu0 %1947 }
 0x224   : > { %v2040_v17 = vsel %vm1997_vm3, %v1948_v56, %v7964_v9  ;;  %v2039_v36 = vsel %vm1997_vm3, %v7889_v10, %v1948_v56 }
 0x225   : > { %1955 = vrot.lane.b32.xlu1 %v7718_v30, %s6406_s11  ;;  %1657 = vrot.lane.b32.xlu0 %v10364_v11, %s6405_s10  ;;  %v7987_v30 = vsel %vm641_vm0, %v10363_v45, %v7929_v59 }
 0x226   : > { %3647 = vmatprep.subr.bf16.mxu0 %v2040_v17 }
 0x227   : > { %3648 = vmatpush2.bf16.msra.mxu0 %v2039_v36  ;;  %v7974_v8 = vpop.permute.xlu1 %1481  ;;  %v1480_v27 = vpop.permute.xlu0 %1479 }
 0x228   : > { %v1570_v23 = vsel %vm1525_vm4, %v1480_v27, %v7974_v8  ;;  %v1569_v63 = vsel %vm1525_vm4, %v7727_v29, %v1480_v27  ;;  %v7997_v29 = vld [vmem:[%s6481_s8 + $0xd4] sm:$0xff] }
 0x229   : > { %1487 = vrot.lane.b32.xlu1 %v7887_v54, %s6407_s12  ;;  %1957 = vrot.lane.b32.xlu0 %v7713_v43, %s6406_s11  ;;  %v8007_v31 = vcombine.low %v7997_v29, %v7997_v29 }
 0x22a   : > { %3662 = vmatprep.subr.bf16.mxu1 %v1570_v23  ;;  %3650 = vmatmul.mubr.bf16.vlgmr.msra.gmra.mxu0 %v7329_v61 }
 0x22b   : > { %3663 = vmatpush1.bf16.msra.mxu1 %v1569_v63  ;;  %v7990_v10 = vpop.permute.xlu1 %1721  ;;  %v1720_v16 = vpop.permute.xlu0 %1719  ;;  %6023 = vmatprep.mubr.msk.bf16.mxu0 %vm3350_vm1, %v7078_v44 }
 0x22c   : > { %v1807_v7 = vsel %vm1761_vm2, %v7922_v52, %v1720_v16  ;;  %v1808_v57 = vsel %vm1761_vm2, %v1720_v16, %v7990_v10 }
 0x22d   : > { %1727 = vrot.lane.b32.xlu1 %v7992_v50, %s6405_s10  ;;  %1489 = vrot.lane.b32.xlu0 %v7987_v30, %s6407_s12 }
 0x22f   : > { %v8003_v43 = vpop.permute.xlu1 %1889  ;;  %v1888_v49 = vpop.permute.xlu0 %1887 }
 0x230   : > { %v2010_v38 = vsel %vm1997_vm3, %v1886_v47, %v1888_v49  ;;  %v2011_v24 = vsel %vm1997_vm3, %v1888_v49, %v8003_v43  ;;  %v10366_v47 = vld [vmem:[#allocation21_spill] sm:$0xff]  ;;  %v8061_v49 = vsel %vm641_vm0, %v10365_v1, %v7992_v50 }
 0x231   : > { %1895 = vrot.lane.b32.xlu1 %v10365_v1, %s6406_s11  ;;  %1729 = vrot.lane.b32.xlu0 %v8007_v31, %s6405_s10  ;;  %v3127_v0 = vsel %vm641_vm0, %v1808_v57, %v2011_v24  ;;  %v3123_v26 = vsel %vm641_vm0, %v1807_v7, %v2010_v38  ;;  %v8076_v24 = vsel %vm641_vm0, %v10366_v47, %v8007_v31 }
 0x232   : > { %3699 = vmatprep.subr.bf16.mxu0 %v3127_v0 }
 0x233   : > { %v8022_v52 = vpop.permute.xlu1 %1245  ;;  %3700 = vmatpush1.bf16.msra.mxu0 %v3123_v26  ;;  %v1244_v22 = vpop.permute.xlu0 %1243 }
 0x234   : > { %v1333_v18 = vsel %vm1289_vm5, %v7749_v46, %v1244_v22  ;;  %v1334_v5 = vsel %vm1289_vm5, %v1244_v22, %v8022_v52  ;;  %v10369_v22 = vld [vmem:[#allocation61_spill] sm:$0xff] }
 0x235   : > { %1251 = vrot.lane.b32.xlu1 %v7838_v51, %s6408_s13  ;;  %1897 = vrot.lane.b32.xlu0 %v10366_v47, %s6406_s11 }
 0x237   : > { %v1414_v41 = vpop.permute.xlu1 %1413  ;;  %v1412_v21 = vpop.permute.xlu0 %1411 }
 0x238   : > { %v1536_v42 = vsel %vm1525_vm4, %v7759_v15, %v1412_v21  ;;  %v1537_v33 = vsel %vm1525_vm4, %v1412_v21, %v1414_v41  ;;  %v10370_v21 = vld [vmem:[#allocation58_spill] sm:$0xff] }
 0x239   : > { %1419 = vrot.lane.b32.xlu1 %v10362_v39, %s6407_s12  ;;  %1253 = vrot.lane.b32.xlu0 %v7929_v59, %s6408_s13  ;;  %v2987_v32 = vsel %vm641_vm0, %v1334_v5, %v1537_v33  ;;  %v2983_v56 = vsel %vm641_vm0, %v1333_v18, %v1536_v42  ;;  %v10367_v39 = vld [vmem:[#allocation14_spill] sm:$0xff]  ;;  %v1065_v18 = vsel %vm1053_vm6, %v10370_v21, %v10369_v22 }
 0x23a   : > { %3664 = vmatprep.subr.bf16.mxu1 %v2987_v32  ;;  %v1064_v33 = vsel %vm1053_vm6, %v10359_v40, %v10370_v21  ;;  %v10373_v21 = vld [vmem:[#allocation60_spill] sm:$0xff] }
 0x23b   : > { %v8041_v46 = vpop.permute.xlu1 %1653  ;;  %3665 = vmatpush1.bf16.msra.mxu1 %v2983_v56  ;;  %v1652_v17 = vpop.permute.xlu0 %1651  ;;  %v2855_v56 = vsel %vm641_vm0, %v10343_v2, %v1065_v18 }
 0x23c   : > { %v1775_v15 = vsel %vm1761_vm2, %v1652_v17, %v8041_v46  ;;  %v1774_v36 = vsel %vm1761_vm2, %v7954_v55, %v1652_v17  ;;  %v10368_v55 = vld [vmem:[#allocation19_spill] sm:$0xff] }
 0x23d   : > { %1659 = vrot.lane.b32.xlu1 %v10367_v39, %s6405_s10  ;;  %1421 = vrot.lane.b32.xlu0 %v10363_v45, %s6407_s12 }
 0x23e   : > { %3701 = vmatprep.subr.bf16.mxu0 %v1775_v15 }
 0x23f   : > { %3702 = vmatpush1.bf16.msra.mxu0 %v1774_v36  ;;  %v1178_v27 = vpop.permute.xlu1 %1177  ;;  %v1176_v23 = vpop.permute.xlu0 %1175 }
 0x240   : > { %v1301_v63 = vsel %vm1289_vm5, %v1176_v23, %v1178_v27  ;;  %v1300_v16 = vsel %vm1289_vm5, %v7774_v58, %v1176_v23 }
 0x241   : > { %1183 = vrot.lane.b32.xlu1 %v10361_v53, %s6408_s13  ;;  %1661 = vrot.lane.b32.xlu0 %v10368_v55, %s6405_s10 }
 0x242   : > { %3666 = vmatprep.subr.bf16.mxu1 %v1301_v63 }
 0x243   : > { %3667 = vmatpush1.bf16.msra.mxu1 %v1300_v16  ;;  %v8063_v7 = vpop.permute.xlu1 %1485  ;;  %v1484_v57 = vpop.permute.xlu0 %1483 }
 0x244   : > { %v1572_v38 = vsel %vm1525_vm4, %v1484_v57, %v8063_v7  ;;  %v1571_v58 = vsel %vm1525_vm4, %v7974_v8, %v1484_v57  ;;  %v10371_v8 = vld [vmem:[#allocation87_spill] sm:$0xff] }
 0x245   : > { %1491 = vrot.lane.b32.xlu1 %v8061_v49, %s6407_s12  ;;  %1185 = vrot.lane.b32.xlu0 %v10364_v11, %s6408_s13  ;;  %v1097_v42 = vsel %vm1053_vm6, %v10357_v14, %v10371_v8  ;;  %v2851_v14 = vsel %vm641_vm0, %v6883_v35, %v1064_v33 }
 0x246   : > { %3703 = vmatprep.subr.bf16.mxu0 %v1572_v38 }
 0x247   : > { %3704 = vmatpush1.bf16.msra.mxu0 %v1571_v58  ;;  %v1248_v0 = vpop.permute.xlu1 %1247  ;;  %v1010_v26 = vpop.permute.xlu0 %1009 }
 0x248   : > { %v1098_v5 = vsel %vm1053_vm6, %v10371_v8, %v1010_v26  ;;  %v1335_v63 = vsel %vm1289_vm5, %v8022_v52, %v1248_v0  ;;  %v1066_v8 = vsel %vm1053_vm6, %v10369_v22, %v10373_v21 }
 0x249   : > { %1015 = vrot.lane.b32.xlu1 %v7887_v54, %s6404_s9  ;;  %1493 = vrot.lane.b32.xlu0 %v8076_v24, %s6407_s12 }
 0x24a   : > { %3668 = vmatprep.subr.bf16.mxu1 %v1098_v5 }
 0x24b   : > { %3669 = vmatpush1.bf16.msra.mxu1 %v1097_v42  ;;  %v1416_v32 = vpop.permute.xlu1 %1415  ;;  %v8095_v17 = vpop.permute.xlu0 %1249 }
 0x24c   : > { %3670 = vmatprep.subr.bf16.mxu1 %v2855_v56  ;;  %v1538_v15 = vsel %vm1525_vm4, %v1414_v41, %v1416_v32  ;;  %v1336_v2 = vsel %vm1289_vm5, %v1248_v0, %v8095_v17  ;;  %v10372_v0 = vld [vmem:[#allocation63_spill] sm:$0xff] }
 0x24d   : > { %1255 = vrot.lane.b32.xlu1 %v7992_v50, %s6408_s13  ;;  %1017 = vrot.lane.b32.xlu0 %v7987_v30, %s6404_s9  ;;  %v2991_v41 = vsel %vm641_vm0, %v1335_v63, %v1538_v15 }
 0x24f   : > { %3671 = vmatpush1.bf16.msra.mxu1 %v2851_v14  ;;  %v1180_v40 = vpop.permute.xlu1 %1179  ;;  %v8104_v36 = vpop.permute.xlu0 %1417 }
 0x250   : > { %v1539_v23 = vsel %vm1525_vm4, %v1416_v32, %v8104_v36  ;;  %3672 = vmatprep.subr.bf16.mxu1 %v10344_v20  ;;  %v1302_v52 = vsel %vm1289_vm5, %v1178_v27, %v1180_v40 }
 0x251   : > { %1423 = vrot.lane.b32.xlu1 %v10365_v1, %s6407_s12  ;;  %1257 = vrot.lane.b32.xlu0 %v8007_v31, %s6408_s13  ;;  %v2995_v35 = vsel %vm641_vm0, %v1336_v2, %v1539_v23 }
 0x252   : > { %3705 = vmatprep.subr.bf16.mxu0 %v2995_v35 }
 0x253   : > { %v1012_v16 = vpop.permute.xlu1 %1011  ;;  %3706 = vmatpush1.bf16.msra.mxu0 %v2991_v41  ;;  %v8119_v57 = vpop.permute.xlu0 %1181  ;;  %3673 = vmatpush1.bf16.msra.mxu1 %v6577_v60  ;;  %v1067_v60 = vsel %vm1053_vm6, %v10373_v21, %v10372_v0 }
 0x254   : > { %v1303_v20 = vsel %vm1289_vm5, %v1180_v40, %v8119_v57  ;;  %v1099_v27 = vsel %vm1053_vm6, %v1010_v26, %v1012_v16  ;;  %v2863_v32 = vsel %vm641_vm0, %v7651_v34, %v1067_v60 }
 0x255   : > { %1187 = vrot.lane.b32.xlu1 %v10367_v39, %s6408_s13  ;;  %1425 = vrot.lane.b32.xlu0 %v10366_v47, %s6407_s12 }
 0x256   : > { %3707 = vmatprep.subr.bf16.mxu0 %v1303_v20 }
 0x257   : > { %v2664_v38 = vpop.permute.xlu1 %2663  ;;  %3708 = vmatpush1.bf16.msra.mxu0 %v1302_v52  ;;  %v8129_v58 = vpop.permute.xlu0 %1013 }
 0x258   : > { %v1100_v18 = vsel %vm1053_vm6, %v1012_v16, %v8129_v58  ;;  %v2753_v5 = vsel %vm2709_vm7, %v7824_v28, %v2664_v38  ;;  %v2859_v28 = vsel %vm641_vm0, %v7573_v25, %v1066_v8  ;;  %v8186_v16 = vcombine.high %v7997_v29, %v7997_v29 }
 0x259   : > { %1019 = vrot.lane.b32.xlu1 %v8061_v49, %s6404_s9  ;;  %1189 = vrot.lane.b32.xlu0 %v10368_v55, %s6408_s13  ;;  %v3385_v26 = vsel %vm641_vm0, %v2753_v5, 0 }
 0x25a   : > { %3709 = vmatprep.subr.bf16.mxu0 %v1100_v18 }
 0x25b   : > { %v2596_v42 = vpop.permute.xlu1 %2595  ;;  %3710 = vmatpush1.bf16.msra.mxu0 %v1099_v27  ;;  %v2666_v33 = vpop.permute.xlu0 %2665 }
 0x25c   : > { %3711 = vmatprep.subr.bf16.mxu0 %v2863_v32  ;;  %v2754_v56 = vsel %vm2709_vm7, %v2664_v38, %v2666_v33  ;;  %v2720_v15 = vsel %vm2709_vm7, %v7856_v13, %v2596_v42  ;;  %v10374_v32 = vld [vmem:[#allocation18_spill] sm:$0xff] }
 0x25d   : > { %2671 = vrot.lane.b32.xlu1 %v7929_v59, %s6409_s14  ;;  %1021 = vrot.lane.b32.xlu0 %v8076_v24, %s6404_s9 }
 0x25e   : > { %6020 = vmatprep.subr.msk.bf16.mxu1 %vm641_vm0, %v2754_v56 }
 0x25f   : > { %3679 = vmatpush2.bf16.msra.mxu1 %v3385_v26  ;;  %v2428_v22 = vpop.permute.xlu1 %2427  ;;  %3712 = vmatpush1.bf16.msra.mxu0 %v2859_v28  ;;  %v2598_v34 = vpop.permute.xlu0 %2597 }
 0x260   : > { %v2721_v14 = vsel %vm2709_vm7, %v2596_v42, %v2598_v34  ;;  %3713 = vmatprep.subr.bf16.mxu0 %v10352_v62  ;;  %v2517_v62 = vsel %vm2473_vm8, %v7875_v12, %v2428_v22 }
 0x261   : > { %2603 = vrot.lane.b32.xlu1 %v10364_v11, %s6409_s14  ;;  %2673 = vrot.lane.b32.xlu0 %v7992_v50, %s6409_s14 }
 0x262   : > { %3680 = vmatprep.subr.bf16.mxu1 %v2721_v14 }
 0x263   : > { %3681 = vmatpush2.bf16.msra.mxu1 %v2720_v15  ;;  %v2668_v25 = vpop.permute.xlu1 %2667  ;;  %v2430_v40 = vpop.permute.xlu0 %2429  ;;  %3714 = vmatpush1.bf16.msra.mxu0 %v10348_v6 }
 0x264   : > { %v2518_v2 = vsel %vm2473_vm8, %v2428_v22, %v2430_v40  ;;  %v2755_v23 = vsel %vm2709_vm7, %v2666_v33, %v2668_v25 }
 0x265   : > { %2435 = vrot.lane.b32.xlu1 %v7987_v30, %s6410_s15  ;;  %2605 = vrot.lane.b32.xlu0 %v10367_v39, %s6409_s14  ;;  %v3391_v35 = vsel %vm641_vm0, %v2755_v23, 0 }
 0x266   : > { %3682 = vmatprep.subr.bf16.mxu1 %v2518_v2 }
 0x267   : > { %3683 = vmatpush2.bf16.msra.mxu1 %v2517_v62  ;;  %v2189_v13 = vpop.permute.xlu1 %2188  ;;  %v8174_v63 = vpop.permute.xlu0 %2669 }
 0x268   : > { %v2756_v6 = vsel %vm2709_vm7, %v2668_v25, %v8174_v63  ;;  %v2278_v18 = vsel %vm2234_vm9, %v7899_v4, %v2189_v13 }
 0x269   : > { %2675 = vrot.lane.b32.xlu1 %v8007_v31, %s6409_s14  ;;  %2437 = vrot.lane.b32.xlu0 %v8061_v49, %s6410_s15 }
 0x26a   : > { %6022 = vmatprep.subr.msk.bf16.mxu0 %vm641_vm0, %v2756_v6 }
 0x26b   : > { %3720 = vmatpush2.bf16.msra.mxu0 %v3391_v35  ;;  %v2360_v12 = vpop.permute.xlu1 %2359  ;;  %v2191_v41 = vpop.permute.xlu0 %2190 }
 0x26c   : > { %v2484_v20 = vsel %vm2473_vm8, %v7906_v48, %v2360_v12  ;;  %v2279_v21 = vsel %vm2234_vm9, %v2189_v13, %v2191_v41 }
 0x26d   : > { %2196 = vrot.lane.b32.xlu1 %v7929_v59, %s6411_s16  ;;  %2677 = vrot.lane.b32.xlu0 %v8186_v16, %s6409_s14  ;;  %v3247_v48 = vsel %vm641_vm0, %v2278_v18, %v2484_v20 }
 0x26f   : > { %v2600_v52 = vpop.permute.xlu1 %2599  ;;  %v2362_v38 = vpop.permute.xlu0 %2361 }
 0x270   : > { %v2485_v60 = vsel %vm2473_vm8, %v2360_v12, %v2362_v38  ;;  %v2722_v4 = vsel %vm2709_vm7, %v2598_v34, %v2600_v52  ;;  %v10375_v34 = vld [vmem:[#allocation20_spill] sm:$0xff] }
 0x271   : > { %2367 = vrot.lane.b32.xlu1 %v10363_v45, %s6410_s15  ;;  %2198 = vrot.lane.b32.xlu0 %v7992_v50, %s6411_s16  ;;  %v3251_v29 = vsel %vm641_vm0, %v2279_v21, %v2485_v60 }
 0x272   : > { %3684 = vmatprep.subr.bf16.mxu1 %v3251_v29 }
 0x273   : > { %v2121_v27 = vpop.permute.xlu1 %2120  ;;  %3685 = vmatpush2.bf16.msra.mxu1 %v3247_v48  ;;  %v8204_v8 = vpop.permute.xlu0 %2601 }
 0x274   : > { %v2723_v5 = vsel %vm2709_vm7, %v2600_v52, %v8204_v8 }
 0x275   : > { %2607 = vrot.lane.b32.xlu1 %v10368_v55, %s6409_s14  ;;  %2369 = vrot.lane.b32.xlu0 %v10365_v1, %s6410_s15  ;;  %v2245_v1 = vsel %vm2234_vm9, %v7944_v3, %v2121_v27  ;;  %v8235_v3 = vsel %vm641_vm0, %v10375_v34, %v8186_v16 }
 0x276   : > { %3721 = vmatprep.subr.bf16.mxu0 %v2723_v5 }
 0x277   : > { %3722 = vmatpush2.bf16.msra.mxu0 %v2722_v4  ;;  %v2432_v45 = vpop.permute.xlu1 %2431  ;;  %v8213_v42 = vpop.permute.xlu0 %2122 }
 0x278   : > { %v2246_v33 = vsel %vm2234_vm9, %v2121_v27, %v8213_v42  ;;  %v2519_v22 = vsel %vm2473_vm8, %v2430_v40, %v2432_v45 }
 0x279   : > { %2128 = vrot.lane.b32.xlu1 %v10364_v11, %s6411_s16  ;;  %2609 = vrot.lane.b32.xlu0 %v10374_v32, %s6409_s14 }
 0x27a   : > { %3686 = vmatprep.subr.bf16.mxu1 %v2246_v33 }
 0x27b   : > { %3687 = vmatpush2.bf16.msra.mxu1 %v2245_v1  ;;  %v1952_v56 = vpop.permute.xlu1 %1951  ;;  %v8223_v26 = vpop.permute.xlu0 %2433 }
 0x27c   : > { %v2520_v28 = vsel %vm2473_vm8, %v2432_v45, %v8223_v26  ;;  %v2041_v40 = vsel %vm1997_vm3, %v7964_v9, %v1952_v56 }
 0x27d   : > { %2439 = vrot.lane.b32.xlu1 %v8076_v24, %s6410_s15  ;;  %2130 = vrot.lane.b32.xlu0 %v10367_v39, %s6411_s16 }
 0x27e   : > { %3723 = vmatprep.subr.bf16.mxu0 %v2520_v28 }
 0x27f   : > { %3724 = vmatpush2.bf16.msra.mxu0 %v2519_v22  ;;  %v2193_v14 = vpop.permute.xlu1 %2192  ;;  %v8237_v15 = vpop.permute.xlu0 %1953 }
 0x280   : > { %v2042_v25 = vsel %vm1997_vm3, %v1952_v56, %v8237_v15  ;;  %v2280_v35 = vsel %vm2234_vm9, %v2191_v41, %v2193_v14 }
 0x281   : > { %1959 = vrot.lane.b32.xlu1 %v7887_v54, %s6406_s11  ;;  %2441 = vrot.lane.b32.xlu0 %v8235_v3, %s6410_s15 }
 0x282   : > { %3688 = vmatprep.subr.bf16.mxu1 %v2042_v25 }
 0x283   : > { %3689 = vmatpush2.bf16.msra.mxu1 %v2041_v40  ;;  %v2364_v2 = vpop.permute.xlu1 %2363  ;;  %v8247_v62 = vpop.permute.xlu0 %2194  ;;  %v10377_v40 = vld [vmem:[#allocation23_spill] sm:$0xff] }
 0x284   : > { %v2486_v54 = vsel %vm2473_vm8, %v2362_v38, %v2364_v2  ;;  %v2281_v9 = vsel %vm2234_vm9, %v2193_v14, %v8247_v62  ;;  %v369_v38 = vld [vmem:[%s6481_s8 + $0xdc] sm:$0xff] }
 0x285   : > { %2200 = vrot.lane.b32.xlu1 %v8007_v31, %s6411_s16  ;;  %1961 = vrot.lane.b32.xlu0 %v7987_v30, %s6406_s11  ;;  %v3255_v12 = vsel %vm641_vm0, %v2280_v35, %v2486_v54  ;;  %v8279_v60 = vcombine.low %v369_v38, %v369_v38  ;;  %v8340_v35 = vcombine.high %v369_v38, %v369_v38 }
 0x286   : > { %3691 = vmatmul.mubr.bf16.vlgmr.msra.gmra.mxu1 %v7329_v61 }
 0x287   : > { %v1724_v23 = vpop.permute.xlu1 %1723  ;;  %v8255_v13 = vpop.permute.xlu0 %2365  ;;  %6025 = vmatprep.mubr.msk.bf16.mxu1 %vm3350_vm1, %v7078_v44 }
 0x288   : > { %v2487_v6 = vsel %vm2473_vm8, %v2364_v2, %v8255_v13  ;;  %v1809_v48 = vsel %vm1761_vm2, %v7990_v10, %v1724_v23  ;;  %v10376_v10 = vld [vmem:[#allocation25_spill] sm:$0xff] }
 0x289   : > { %2371 = vrot.lane.b32.xlu1 %v10366_v47, %s6410_s15  ;;  %2202 = vrot.lane.b32.xlu0 %v8186_v16, %s6411_s16  ;;  %v3259_v30 = vsel %vm641_vm0, %v2281_v9, %v2487_v6 }
 0x28a   : > { %3725 = vmatprep.subr.bf16.mxu0 %v3259_v30 }
 0x28b   : > { %v1892_v20 = vpop.permute.xlu1 %1891  ;;  %3726 = vmatpush2.bf16.msra.mxu0 %v3255_v12  ;;  %v8270_v52 = vpop.permute.xlu0 %1725 }
 0x28c   : > { %v2012_v47 = vsel %vm1997_vm3, %v8003_v43, %v1892_v20  ;;  %v1810_v18 = vsel %vm1761_vm2, %v1724_v23, %v8270_v52 }
 0x28d   : > { %1731 = vrot.lane.b32.xlu1 %v8186_v16, %s6405_s10  ;;  %2373 = vrot.lane.b32.xlu0 %v10375_v34, %s6410_s15  ;;  %v3131_v27 = vsel %vm641_vm0, %v1809_v48, %v2012_v47 }
 0x28f   : > { %v2125_v41 = vpop.permute.xlu1 %2124  ;;  %v1894_v21 = vpop.permute.xlu0 %1893 }
 0x290   : > { %v2013_v29 = vsel %vm1997_vm3, %v1892_v20, %v1894_v21  ;;  %v2247_v33 = vsel %vm2234_vm9, %v8213_v42, %v2125_v41 }
 0x291   : > { %1899 = vrot.lane.b32.xlu1 %v10375_v34, %s6406_s11  ;;  %1733 = vrot.lane.b32.xlu0 %v8279_v60, %s6405_s10  ;;  %v3135_v43 = vsel %vm641_vm0, %v1810_v18, %v2013_v29  ;;  %v10378_v18 = vld [vmem:[#allocation24_spill] sm:$0xff] }
 0x292   : > { %3740 = vmatprep.subr.bf16.mxu1 %v3135_v43 }
 0x293   : > { %v1656_v5 = vpop.permute.xlu1 %1655  ;;  %3741 = vmatpush1.bf16.msra.mxu1 %v3131_v27  ;;  %v8292_v4 = vpop.permute.xlu0 %2126 }
 0x294   : > { %v2248_v45 = vsel %vm2234_vm9, %v2125_v41, %v8292_v4  ;;  %v1776_v22 = vsel %vm1761_vm2, %v8041_v46, %v1656_v5 }
 0x295   : > { %2132 = vrot.lane.b32.xlu1 %v10368_v55, %s6411_s16  ;;  %1901 = vrot.lane.b32.xlu0 %v10376_v10, %s6406_s11 }
 0x296   : > { %3727 = vmatprep.subr.bf16.mxu0 %v2248_v45 }
 0x297   : > { %3728 = vmatpush2.bf16.msra.mxu0 %v2247_v33  ;;  %v1956_v1 = vpop.permute.xlu1 %1955  ;;  %v8302_v56 = vpop.permute.xlu0 %1657 }
 0x298   : > { %v1777_v28 = vsel %vm1761_vm2, %v1656_v5, %v8302_v56  ;;  %v2043_v2 = vsel %vm1997_vm3, %v8237_v15, %v1956_v1  ;;  %v8335_v15 = vsel %vm641_vm0, %v10376_v10, %v8279_v60 }
 0x299   : > { %1663 = vrot.lane.b32.xlu1 %v10374_v32, %s6405_s10  ;;  %2134 = vrot.lane.b32.xlu0 %v10374_v32, %s6411_s16 }
 0x29a   : > { %3742 = vmatprep.subr.bf16.mxu1 %v1777_v28 }
 0x29b   : > { %3743 = vmatpush1.bf16.msra.mxu1 %v1776_v22  ;;  %v1488_v14 = vpop.permute.xlu1 %1487  ;;  %v8312_v42 = vpop.permute.xlu0 %1957 }
 0x29c   : > { %v2044_v25 = vsel %vm1997_vm3, %v1956_v1, %v8312_v42 }
 0x29d   : > { %1963 = vrot.lane.b32.xlu1 %v8061_v49, %s6406_s11  ;;  %1665 = vrot.lane.b32.xlu0 %v10377_v40, %s6405_s10  ;;  %v1573_v49 = vsel %vm1525_vm4, %v8063_v7, %v1488_v14 }
 0x29e   : > { %3729 = vmatprep.subr.bf16.mxu0 %v2044_v25 }
 0x29f   : > { %3730 = vmatpush2.bf16.msra.mxu0 %v2043_v2  ;;  %v1728_v46 = vpop.permute.xlu1 %1727  ;;  %v8322_v54 = vpop.permute.xlu0 %1489 }
 0x2a0   : > { %v1574_v23 = vsel %vm1525_vm4, %v1488_v14, %v8322_v54  ;;  %v1811_v41 = vsel %vm1761_vm2, %v8270_v52, %v1728_v46  ;;  %v10379_v52 = vld [vmem:[#allocation29_spill] sm:$0xff] }
 0x2a1   : > { %1495 = vrot.lane.b32.xlu1 %v8235_v3, %s6407_s12  ;;  %1965 = vrot.lane.b32.xlu0 %v8076_v24, %s6406_s11  ;;  %v8345_v24 = vld [vmem:[%s6481_s8 + $0xe4] sm:$0xff] }
 0x2a2   : > { %3744 = vmatprep.subr.bf16.mxu1 %v1574_v23  ;;  %3732 = vmatmul.mubr.bf16.vlgmr.msra.gmra.mxu0 %v7329_v61  ;;  %v8356_v20 = vcombine.low %v8345_v24, %v8345_v24 }
 0x2a3   : > { %3745 = vmatpush1.bf16.msra.mxu1 %v1573_v49  ;;  %v1896_v9 = vpop.permute.xlu1 %1895  ;;  %v8338_v6 = vpop.permute.xlu0 %1729  ;;  %6027 = vmatprep.mubr.msk.bf16.mxu0 %vm3350_vm1, %v7078_v44 }
 0x2a4   : > { %v2014_v7 = vsel %vm1997_vm3, %v1894_v21, %v1896_v9  ;;  %v1812_v38 = vsel %vm1761_vm2, %v1728_v46, %v8338_v6 }
 0x2a5   : > { %1735 = vrot.lane.b32.xlu1 %v8340_v35, %s6405_s10  ;;  %1497 = vrot.lane.b32.xlu0 %v8335_v15, %s6407_s12  ;;  %v3139_v29 = vsel %vm641_vm0, %v1811_v41, %v2014_v7  ;;  %v8424_v41 = vsel %vm641_vm0, %v10379_v52, %v8356_v20 }
 0x2a7   : > { %v1252_v30 = vpop.permute.xlu1 %1251  ;;  %v8352_v12 = vpop.permute.xlu0 %1897 }
 0x2a8   : > { %v2015_v47 = vsel %vm1997_vm3, %v1896_v9, %v8352_v12  ;;  %v1337_v28 = vsel %vm1289_vm5, %v8095_v17, %v1252_v30  ;;  %v10380_v17 = vld [vmem:[#allocation22_spill] sm:$0xff]  ;;  %v10381_v9 = vld [vmem:[#allocation27_spill] sm:$0xff] }
 0x2a9   : > { %1903 = vrot.lane.b32.xlu1 %v10378_v18, %s6406_s11  ;;  %1737 = vrot.lane.b32.xlu0 %v8356_v20, %s6405_s10  ;;  %v3143_v21 = vsel %vm641_vm0, %v1812_v38, %v2015_v47 }
 0x2aa   : > { %3781 = vmatprep.subr.bf16.mxu0 %v3143_v21 }
 0x2ab   : > { %v1420_v48 = vpop.permute.xlu1 %1419  ;;  %3782 = vmatpush1.bf16.msra.mxu0 %v3139_v29  ;;  %v8370_v43 = vpop.permute.xlu0 %1253 }
 0x2ac   : > { %v1540_v27 = vsel %vm1525_vm4, %v8104_v36, %v1420_v48  ;;  %v1338_v33 = vsel %vm1289_vm5, %v1252_v30, %v8370_v43  ;;  %v8409_v30 = vsel %vm641_vm0, %v10378_v18, %v8340_v35 }
 0x2ad   : > { %1259 = vrot.lane.b32.xlu1 %v8186_v16, %s6408_s13  ;;  %1905 = vrot.lane.b32.xlu0 %v10379_v52, %s6406_s11  ;;  %v2999_v36 = vsel %vm641_vm0, %v1337_v28, %v1540_v27  ;;  %v10383_v27 = vld [vmem:[#allocation62_spill] sm:$0xff] }
 0x2af   : > { %v1660_v5 = vpop.permute.xlu1 %1659  ;;  %v1422_v45 = vpop.permute.xlu0 %1421 }
 0x2b0   : > { %v1541_v1 = vsel %vm1525_vm4, %v1420_v48, %v1422_v45  ;;  %v10382_v48 = vld [vmem:[#allocation65_spill] sm:$0xff] }
 0x2b1   : > { %1427 = vrot.lane.b32.xlu1 %v10375_v34, %s6407_s12  ;;  %1261 = vrot.lane.b32.xlu0 %v8279_v60, %s6408_s13  ;;  %v3003_v22 = vsel %vm641_vm0, %v1338_v33, %v1541_v1  ;;  %v1778_v34 = vsel %vm1761_vm2, %v8302_v56, %v1660_v5  ;;  %v1068_v1 = vsel %vm1053_vm6, %v10372_v0, %v10383_v27 }
 0x2b2   : > { %3746 = vmatprep.subr.bf16.mxu1 %v3003_v22 }
 0x2b3   : > { %v1184_v14 = vpop.permute.xlu1 %1183  ;;  %3747 = vmatpush1.bf16.msra.mxu1 %v2999_v36  ;;  %v8389_v25 = vpop.permute.xlu0 %1661 }
 0x2b4   : > { %v1779_v2 = vsel %vm1761_vm2, %v1660_v5, %v8389_v25  ;;  %v1304_v7 = vsel %vm1289_vm5, %v8119_v57, %v1184_v14  ;;  %v1069_v5 = vsel %vm1053_vm6, %v10383_v27, %v10382_v48 }
 0x2b5   : > { %1667 = vrot.lane.b32.xlu1 %v10380_v17, %s6405_s10  ;;  %1429 = vrot.lane.b32.xlu0 %v10376_v10, %s6407_s12  ;;  %v2871_v22 = vsel %vm641_vm0, %v7838_v51, %v1069_v5 }
 0x2b6   : > { %3783 = vmatprep.subr.bf16.mxu0 %v1779_v2 }
 0x2b7   : > { %3784 = vmatpush1.bf16.msra.mxu0 %v1778_v34  ;;  %v1492_v46 = vpop.permute.xlu1 %1491  ;;  %v1186_v23 = vpop.permute.xlu0 %1185 }
 0x2b8   : > { %v1305_v49 = vsel %vm1289_vm5, %v1184_v14, %v1186_v23  ;;  %v1575_v57 = vsel %vm1525_vm4, %v8322_v54, %v1492_v46 }
 0x2b9   : > { %1191 = vrot.lane.b32.xlu1 %v10374_v32, %s6408_s13  ;;  %1669 = vrot.lane.b32.xlu0 %v10381_v9, %s6405_s10 }
 0x2ba   : > { %3748 = vmatprep.subr.bf16.mxu1 %v1305_v49 }
 0x2bb   : > { %3749 = vmatpush1.bf16.msra.mxu1 %v1304_v7  ;;  %v1016_v56 = vpop.permute.xlu1 %1015  ;;  %v8411_v38 = vpop.permute.xlu0 %1493 }
 0x2bc   : > { %v1576_v47 = vsel %vm1525_vm4, %v1492_v46, %v8411_v38  ;;  %v1101_v54 = vsel %vm1053_vm6, %v8129_v58, %v1016_v56  ;;  %v2867_v58 = vsel %vm641_vm0, %v7647_v37, %v1068_v1 }
 0x2bd   : > { %1499 = vrot.lane.b32.xlu1 %v8409_v30, %s6407_s12  ;;  %1193 = vrot.lane.b32.xlu0 %v10377_v40, %s6408_s13 }
 0x2be   : > { %3785 = vmatprep.subr.bf16.mxu0 %v1576_v47 }
 0x2bf   : > { %3786 = vmatpush1.bf16.msra.mxu0 %v1575_v57  ;;  %v1256_v21 = vpop.permute.xlu1 %1255  ;;  %v1018_v29 = vpop.permute.xlu0 %1017  ;;  %v10384_v57 = vld [vmem:[#allocation67_spill] sm:$0xff] }
 0x2c0   : > { %v1102_v33 = vsel %vm1053_vm6, %v1016_v56, %v1018_v29  ;;  %v1339_v46 = vsel %vm1289_vm5, %v8370_v43, %v1256_v21 }
 0x2c1   : > { %1023 = vrot.lane.b32.xlu1 %v8235_v3, %s6404_s9  ;;  %1501 = vrot.lane.b32.xlu0 %v8424_v41, %s6407_s12 }
 0x2c2   : > { %3750 = vmatprep.subr.bf16.mxu1 %v1102_v33 }
 0x2c3   : > { %3751 = vmatpush1.bf16.msra.mxu1 %v1101_v54  ;;  %v1424_v28 = vpop.permute.xlu1 %1423  ;;  %v8441_v36 = vpop.permute.xlu0 %1257 }
 0x2c4   : > { %3752 = vmatprep.subr.bf16.mxu1 %v2871_v22  ;;  %v1542_v14 = vsel %vm1525_vm4, %v1422_v45, %v1424_v28  ;;  %v1340_v51 = vsel %vm1289_vm5, %v1256_v21, %v8441_v36  ;;  %v10385_v21 = vld [vmem:[#allocation64_spill] sm:$0xff] }
 0x2c5   : > { %1263 = vrot.lane.b32.xlu1 %v8340_v35, %s6408_s13  ;;  %1025 = vrot.lane.b32.xlu0 %v8335_v15, %s6404_s9  ;;  %v3007_v45 = vsel %vm641_vm0, %v1339_v46, %v1542_v14  ;;  %v1070_v5 = vsel %vm1053_vm6, %v10382_v48, %v10385_v21 }
 0x2c7   : > { %3753 = vmatpush1.bf16.msra.mxu1 %v2867_v58  ;;  %v1188_v0 = vpop.permute.xlu1 %1187  ;;  %v8450_v2 = vpop.permute.xlu0 %1425 }
 0x2c8   : > { %v1543_v34 = vsel %vm1525_vm4, %v1424_v28, %v8450_v2  ;;  %3754 = vmatprep.subr.bf16.mxu1 %v10361_v53  ;;  %v1306_v43 = vsel %vm1289_vm5, %v1186_v23, %v1188_v0 }
 0x2c9   : > { %1431 = vrot.lane.b32.xlu1 %v10378_v18, %s6407_s12  ;;  %1265 = vrot.lane.b32.xlu0 %v8356_v20, %s6408_s13  ;;  %v3011_v37 = vsel %vm641_vm0, %v1340_v51, %v1543_v34 }
 0x2ca   : > { %3787 = vmatprep.subr.bf16.mxu0 %v3011_v37 }
 0x2cb   : > { %v1020_v49 = vpop.permute.xlu1 %1019  ;;  %3788 = vmatpush1.bf16.msra.mxu0 %v3007_v45  ;;  %v8465_v7 = vpop.permute.xlu0 %1189  ;;  %3755 = vmatpush1.bf16.msra.mxu1 %v10351_v19  ;;  %v1071_v19 = vsel %vm1053_vm6, %v10385_v21, %v10384_v57 }
 0x2cc   : > { %v1307_v53 = vsel %vm1289_vm5, %v1188_v0, %v8465_v7  ;;  %v1103_v23 = vsel %vm1053_vm6, %v1018_v29, %v1020_v49  ;;  %v2879_v28 = vsel %vm641_vm0, %v7992_v50, %v1071_v19 }
 0x2cd   : > { %1195 = vrot.lane.b32.xlu1 %v10380_v17, %s6408_s13  ;;  %1433 = vrot.lane.b32.xlu0 %v10379_v52, %s6407_s12 }
 0x2ce   : > { %3789 = vmatprep.subr.bf16.mxu0 %v1307_v53 }
 0x2cf   : > { %v2672_v56 = vpop.permute.xlu1 %2671  ;;  %3790 = vmatpush1.bf16.msra.mxu0 %v1306_v43  ;;  %v8475_v47 = vpop.permute.xlu0 %1021 }
 0x2d0   : > { %v1104_v27 = vsel %vm1053_vm6, %v1020_v49, %v8475_v47  ;;  %v2757_v33 = vsel %vm2709_vm7, %v8174_v63, %v2672_v56  ;;  %v2875_v63 = vsel %vm641_vm0, %v7929_v59, %v1070_v5  ;;  %v8532_v49 = vcombine.high %v8345_v24, %v8345_v24 }
 0x2d1   : > { %1027 = vrot.lane.b32.xlu1 %v8409_v30, %s6404_s9  ;;  %1197 = vrot.lane.b32.xlu0 %v10381_v9, %s6408_s13  ;;  %v3397_v29 = vsel %vm641_vm0, %v2757_v33, 0 }
 0x2d2   : > { %3791 = vmatprep.subr.bf16.mxu0 %v1104_v27 }
 0x2d3   : > { %v2604_v54 = vpop.permute.xlu1 %2603  ;;  %3792 = vmatpush1.bf16.msra.mxu0 %v1103_v23  ;;  %v2674_v1 = vpop.permute.xlu0 %2673 }
 0x2d4   : > { %3793 = vmatprep.subr.bf16.mxu0 %v2879_v28  ;;  %v2758_v22 = vsel %vm2709_vm7, %v2672_v56, %v2674_v1  ;;  %v2724_v14 = vsel %vm2709_vm7, %v8204_v8, %v2604_v54  ;;  %v10386_v28 = vld [vmem:[#allocation26_spill] sm:$0xff] }
 0x2d5   : > { %2679 = vrot.lane.b32.xlu1 %v8279_v60, %s6409_s14  ;;  %1029 = vrot.lane.b32.xlu0 %v8424_v41, %s6404_s9 }
 0x2d6   : > { %6024 = vmatprep.subr.msk.bf16.mxu1 %vm641_vm0, %v2758_v22 }
 0x2d7   : > { %3761 = vmatpush2.bf16.msra.mxu1 %v3397_v29  ;;  %v2436_v48 = vpop.permute.xlu1 %2435  ;;  %3794 = vmatpush1.bf16.msra.mxu0 %v2875_v63  ;;  %v2606_v50 = vpop.permute.xlu0 %2605 }
 0x2d8   : > { %v2725_v58 = vsel %vm2709_vm7, %v2604_v54, %v2606_v50  ;;  %3795 = vmatprep.subr.bf16.mxu0 %v10367_v39  ;;  %v2521_v39 = vsel %vm2473_vm8, %v8223_v26, %v2436_v48 }
 0x2d9   : > { %2611 = vrot.lane.b32.xlu1 %v10377_v40, %s6409_s14  ;;  %2681 = vrot.lane.b32.xlu0 %v8340_v35, %s6409_s14 }
 0x2da   : > { %3762 = vmatprep.subr.bf16.mxu1 %v2725_v58 }
 0x2db   : > { %3763 = vmatpush2.bf16.msra.mxu1 %v2724_v14  ;;  %v2676_v59 = vpop.permute.xlu1 %2675  ;;  %v2438_v0 = vpop.permute.xlu0 %2437  ;;  %3796 = vmatpush1.bf16.msra.mxu0 %v10364_v11 }
 0x2dc   : > { %v2522_v51 = vsel %vm2473_vm8, %v2436_v48, %v2438_v0  ;;  %v2759_v34 = vsel %vm2709_vm7, %v2674_v1, %v2676_v59 }
 0x2dd   : > { %2443 = vrot.lane.b32.xlu1 %v8335_v15, %s6410_s15  ;;  %2613 = vrot.lane.b32.xlu0 %v10380_v17, %s6409_s14  ;;  %v3403_v37 = vsel %vm641_vm0, %v2759_v34, 0 }
 0x2de   : > { %3764 = vmatprep.subr.bf16.mxu1 %v2522_v51 }
 0x2df   : > { %3765 = vmatpush2.bf16.msra.mxu1 %v2521_v39  ;;  %v2197_v8 = vpop.permute.xlu1 %2196  ;;  %v8520_v46 = vpop.permute.xlu0 %2677 }
 0x2e0   : > { %v2760_v11 = vsel %vm2709_vm7, %v2676_v59, %v8520_v46  ;;  %v2282_v27 = vsel %vm2234_vm9, %v8247_v62, %v2197_v8 }
 0x2e1   : > { %2683 = vrot.lane.b32.xlu1 %v8356_v20, %s6409_s14  ;;  %2445 = vrot.lane.b32.xlu0 %v8409_v30, %s6410_s15 }
 0x2e2   : > { %6026 = vmatprep.subr.msk.bf16.mxu0 %vm641_vm0, %v2760_v11 }
 0x2e3   : > { %3802 = vmatpush2.bf16.msra.mxu0 %v3403_v37  ;;  %v2368_v26 = vpop.permute.xlu1 %2367  ;;  %v2199_v45 = vpop.permute.xlu0 %2198 }
 0x2e4   : > { %v2488_v53 = vsel %vm2473_vm8, %v8255_v13, %v2368_v26  ;;  %v2283_v21 = vsel %vm2234_vm9, %v2197_v8, %v2199_v45 }
 0x2e5   : > { %2204 = vrot.lane.b32.xlu1 %v8279_v60, %s6411_s16  ;;  %2685 = vrot.lane.b32.xlu0 %v8532_v49, %s6409_s14  ;;  %v3263_v13 = vsel %vm641_vm0, %v2282_v27, %v2488_v53 }
 0x2e7   : > { %v2608_v43 = vpop.permute.xlu1 %2607  ;;  %v2370_v56 = vpop.permute.xlu0 %2369 }
 0x2e8   : > { %v2489_v19 = vsel %vm2473_vm8, %v2368_v26, %v2370_v56  ;;  %v2726_v62 = vsel %vm2709_vm7, %v2606_v50, %v2608_v43  ;;  %v10387_v50 = vld [vmem:[#allocation28_spill] sm:$0xff] }
 0x2e9   : > { %2375 = vrot.lane.b32.xlu1 %v10376_v10, %s6410_s15  ;;  %2206 = vrot.lane.b32.xlu0 %v8340_v35, %s6411_s16  ;;  %v3267_v24 = vsel %vm641_vm0, %v2283_v21, %v2489_v19 }
 0x2ea   : > { %3766 = vmatprep.subr.bf16.mxu1 %v3267_v24 }
 0x2eb   : > { %v2129_v23 = vpop.permute.xlu1 %2128  ;;  %3767 = vmatpush2.bf16.msra.mxu1 %v3263_v13  ;;  %v8550_v5 = vpop.permute.xlu0 %2609 }
 0x2ec   : > { %v2727_v33 = vsel %vm2709_vm7, %v2608_v43, %v8550_v5 }
 0x2ed   : > { %2615 = vrot.lane.b32.xlu1 %v10381_v9, %s6409_s14  ;;  %2377 = vrot.lane.b32.xlu0 %v10378_v18, %s6410_s15  ;;  %v2249_v18 = vsel %vm2234_vm9, %v8292_v4, %v2129_v23  ;;  %v8581_v4 = vsel %vm641_vm0, %v10387_v50, %v8532_v49 }
 0x2ee   : > { %3803 = vmatprep.subr.bf16.mxu0 %v2727_v33 }
 0x2ef   : > { %3804 = vmatpush2.bf16.msra.mxu0 %v2726_v62  ;;  %v2440_v10 = vpop.permute.xlu1 %2439  ;;  %v8559_v54 = vpop.permute.xlu0 %2130 }
 0x2f0   : > { %v2250_v1 = vsel %vm2234_vm9, %v2129_v23, %v8559_v54  ;;  %v2523_v48 = vsel %vm2473_vm8, %v2438_v0, %v2440_v10 }
 0x2f1   : > { %2136 = vrot.lane.b32.xlu1 %v10377_v40, %s6411_s16  ;;  %2617 = vrot.lane.b32.xlu0 %v10386_v28, %s6409_s14 }
 0x2f2   : > { %3768 = vmatprep.subr.bf16.mxu1 %v2250_v1 }
 0x2f3   : > { %3769 = vmatpush2.bf16.msra.mxu1 %v2249_v18  ;;  %v1960_v22 = vpop.permute.xlu1 %1959  ;;  %v8569_v29 = vpop.permute.xlu0 %2441 }
 0x2f4   : > { %v2524_v63 = vsel %vm2473_vm8, %v2440_v10, %v8569_v29  ;;  %v2045_v0 = vsel %vm1997_vm3, %v8312_v42, %v1960_v22 }
 0x2f5   : > { %2447 = vrot.lane.b32.xlu1 %v8424_v41, %s6410_s15  ;;  %2138 = vrot.lane.b32.xlu0 %v10380_v17, %s6411_s16 }
 0x2f6   : > { %3805 = vmatprep.subr.bf16.mxu0 %v2524_v63 }
 0x2f7   : > { %3806 = vmatpush2.bf16.msra.mxu0 %v2523_v48  ;;  %v2201_v58 = vpop.permute.xlu1 %2200  ;;  %v8583_v14 = vpop.permute.xlu0 %1961 }
 0x2f8   : > { %v2046_v59 = vsel %vm1997_vm3, %v1960_v22, %v8583_v14  ;;  %v2284_v37 = vsel %vm2234_vm9, %v2199_v45, %v2201_v58 }
 0x2f9   : > { %1967 = vrot.lane.b32.xlu1 %v8235_v3, %s6406_s11  ;;  %2449 = vrot.lane.b32.xlu0 %v8581_v4, %s6410_s15 }
 0x2fa   : > { %3770 = vmatprep.subr.bf16.mxu1 %v2046_v59 }
 0x2fb   : > { %3771 = vmatpush2.bf16.msra.mxu1 %v2045_v0  ;;  %v2372_v51 = vpop.permute.xlu1 %2371  ;;  %v8593_v39 = vpop.permute.xlu0 %2202  ;;  %v10389_v0 = vld [vmem:[#allocation31_spill] sm:$0xff] }
 0x2fc   : > { %v2490_v3 = vsel %vm2473_vm8, %v2370_v56, %v2372_v51  ;;  %v2285_v42 = vsel %vm2234_vm9, %v2201_v58, %v8593_v39  ;;  %v371_v56 = vld [vmem:[%s6481_s8 + $0xec] sm:$0xff] }
 0x2fd   : > { %2208 = vrot.lane.b32.xlu1 %v8356_v20, %s6411_s16  ;;  %1969 = vrot.lane.b32.xlu0 %v8335_v15, %s6406_s11  ;;  %v3271_v26 = vsel %vm641_vm0, %v2284_v37, %v2490_v3  ;;  %v8625_v19 = vcombine.low %v371_v56, %v371_v56  ;;  %v8686_v37 = vcombine.high %v371_v56, %v371_v56 }
 0x2fe   : > { %3773 = vmatmul.mubr.bf16.vlgmr.msra.gmra.mxu1 %v7329_v61 }
 0x2ff   : > { %v1732_v34 = vpop.permute.xlu1 %1731  ;;  %v8601_v8 = vpop.permute.xlu0 %2373  ;;  %6029 = vmatprep.mubr.msk.bf16.mxu1 %vm3350_vm1, %v7078_v44 }
 0x300   : > { %v2491_v11 = vsel %vm2473_vm8, %v2372_v51, %v8601_v8  ;;  %v1813_v13 = vsel %vm1761_vm2, %v8338_v6, %v1732_v34  ;;  %v10388_v6 = vld [vmem:[#allocation33_spill] sm:$0xff] }
 0x301   : > { %2379 = vrot.lane.b32.xlu1 %v10379_v52, %s6410_s15  ;;  %2210 = vrot.lane.b32.xlu0 %v8532_v49, %s6411_s16  ;;  %v3275_v15 = vsel %vm641_vm0, %v2285_v42, %v2491_v11 }
 0x302   : > { %3807 = vmatprep.subr.bf16.mxu0 %v3275_v15 }
 0x303   : > { %v1900_v53 = vpop.permute.xlu1 %1899  ;;  %3808 = vmatpush2.bf16.msra.mxu0 %v3271_v26  ;;  %v8616_v43 = vpop.permute.xlu0 %1733 }
 0x304   : > { %v2016_v52 = vsel %vm1997_vm3, %v8352_v12, %v1900_v53  ;;  %v1814_v27 = vsel %vm1761_vm2, %v1732_v34, %v8616_v43 }
 0x305   : > { %1739 = vrot.lane.b32.xlu1 %v8532_v49, %s6405_s10  ;;  %2381 = vrot.lane.b32.xlu0 %v10387_v50, %s6410_s15  ;;  %v3147_v23 = vsel %vm641_vm0, %v1813_v13, %v2016_v52 }
 0x307   : > { %v2133_v45 = vpop.permute.xlu1 %2132  ;;  %v1902_v21 = vpop.permute.xlu0 %1901 }
 0x308   : > { %v2017_v24 = vsel %vm1997_vm3, %v1900_v53, %v1902_v21  ;;  %v2251_v1 = vsel %vm2234_vm9, %v8559_v54, %v2133_v45 }
 0x309   : > { %1907 = vrot.lane.b32.xlu1 %v10387_v50, %s6406_s11  ;;  %1741 = vrot.lane.b32.xlu0 %v8625_v19, %s6405_s10  ;;  %v3151_v12 = vsel %vm641_vm0, %v1814_v27, %v2017_v24  ;;  %v10390_v27 = vld [vmem:[#allocation32_spill] sm:$0xff] }
 0x30a   : > { %3822 = vmatprep.subr.bf16.mxu1 %v3151_v12 }
 0x30b   : > { %v1664_v33 = vpop.permute.xlu1 %1663  ;;  %3823 = vmatpush1.bf16.msra.mxu1 %v3147_v23  ;;  %v8638_v62 = vpop.permute.xlu0 %2134 }
 0x30c   : > { %v2252_v10 = vsel %vm2234_vm9, %v2133_v45, %v8638_v62  ;;  %v1780_v48 = vsel %vm1761_vm2, %v8389_v25, %v1664_v33 }
 0x30d   : > { %2140 = vrot.lane.b32.xlu1 %v10381_v9, %s6411_s16  ;;  %1909 = vrot.lane.b32.xlu0 %v10388_v6, %s6406_s11 }
 0x30e   : > { %3809 = vmatprep.subr.bf16.mxu0 %v2252_v10 }
 0x30f   : > { %3810 = vmatpush2.bf16.msra.mxu0 %v2251_v1  ;;  %v1964_v18 = vpop.permute.xlu1 %1963  ;;  %v8648_v22 = vpop.permute.xlu0 %1665 }
 0x310   : > { %v1781_v63 = vsel %vm1761_vm2, %v1664_v33, %v8648_v22  ;;  %v2047_v51 = vsel %vm1997_vm3, %v8583_v14, %v1964_v18  ;;  %v8681_v14 = vsel %vm641_vm0, %v10388_v6, %v8625_v19 }
 0x311   : > { %1671 = vrot.lane.b32.xlu1 %v10386_v28, %s6405_s10  ;;  %2142 = vrot.lane.b32.xlu0 %v10386_v28, %s6411_s16 }
 0x312   : > { %3824 = vmatprep.subr.bf16.mxu1 %v1781_v63 }
 0x313   : > { %3825 = vmatpush1.bf16.msra.mxu1 %v1780_v48  ;;  %v1496_v58 = vpop.permute.xlu1 %1495  ;;  %v8658_v54 = vpop.permute.xlu0 %1965 }
 0x314   : > { %v2048_v59 = vsel %vm1997_vm3, %v1964_v18, %v8658_v54 }
 0x315   : > { %1971 = vrot.lane.b32.xlu1 %v8409_v30, %s6406_s11  ;;  %1673 = vrot.lane.b32.xlu0 %v10389_v0, %s6405_s10  ;;  %v1577_v30 = vsel %vm1525_vm4, %v8411_v38, %v1496_v58 }
 0x316   : > { %3811 = vmatprep.subr.bf16.mxu0 %v2048_v59 }
 0x317   : > { %3812 = vmatpush2.bf16.msra.mxu0 %v2047_v51  ;;  %v1736_v25 = vpop.permute.xlu1 %1735  ;;  %v8668_v3 = vpop.permute.xlu0 %1497 }
 0x318   : > { %v1578_v34 = vsel %vm1525_vm4, %v1496_v58, %v8668_v3  ;;  %v1815_v45 = vsel %vm1761_vm2, %v8616_v43, %v1736_v25  ;;  %v10391_v43 = vld [vmem:[#allocation37_spill] sm:$0xff] }
 0x319   : > { %1503 = vrot.lane.b32.xlu1 %v8581_v4, %s6407_s12  ;;  %1973 = vrot.lane.b32.xlu0 %v8424_v41, %s6406_s11  ;;  %v8691_v41 = vld [vmem:[%s6481_s8 + $0xf4] sm:$0xff] }
 0x31a   : > { %3826 = vmatprep.subr.bf16.mxu1 %v1578_v34  ;;  %3814 = vmatmul.mubr.bf16.vlgmr.msra.gmra.mxu0 %v7329_v61  ;;  %v8702_v53 = vcombine.low %v8691_v41, %v8691_v41 }
 0x31b   : > { %3827 = vmatpush1.bf16.msra.mxu1 %v1577_v30  ;;  %v1904_v42 = vpop.permute.xlu1 %1903  ;;  %v8684_v11 = vpop.permute.xlu0 %1737  ;;  %6031 = vmatprep.mubr.msk.bf16.mxu0 %vm3350_vm1, %v7078_v44 }
 0x31c   : > { %v2018_v38 = vsel %vm1997_vm3, %v1902_v21, %v1904_v42  ;;  %v1816_v56 = vsel %vm1761_vm2, %v1736_v25, %v8684_v11 }
 0x31d   : > { %1743 = vrot.lane.b32.xlu1 %v8686_v37, %s6405_s10  ;;  %1505 = vrot.lane.b32.xlu0 %v8681_v14, %s6407_s12  ;;  %v3155_v24 = vsel %vm641_vm0, %v1815_v45, %v2018_v38  ;;  %v8770_v45 = vsel %vm641_vm0, %v10391_v43, %v8702_v53 }
 0x31f   : > { %v1260_v15 = vpop.permute.xlu1 %1259  ;;  %v8698_v26 = vpop.permute.xlu0 %1905 }
 0x320   : > { %v2019_v52 = vsel %vm1997_vm3, %v1904_v42, %v8698_v26  ;;  %v1341_v63 = vsel %vm1289_vm5, %v8441_v36, %v1260_v15  ;;  %v10392_v36 = vld [vmem:[#allocation30_spill] sm:$0xff]  ;;  %v10393_v42 = vld [vmem:[#allocation35_spill] sm:$0xff] }
 0x321   : > { %1911 = vrot.lane.b32.xlu1 %v10390_v27, %s6406_s11  ;;  %1745 = vrot.lane.b32.xlu0 %v8702_v53, %s6405_s10  ;;  %v3159_v21 = vsel %vm641_vm0, %v1816_v56, %v2019_v52 }
 0x322   : > { %3863 = vmatprep.subr.bf16.mxu0 %v3159_v21 }
 0x323   : > { %v1428_v13 = vpop.permute.xlu1 %1427  ;;  %3864 = vmatpush1.bf16.msra.mxu0 %v3155_v24  ;;  %v8716_v12 = vpop.permute.xlu0 %1261 }
 0x324   : > { %v1544_v23 = vsel %vm1525_vm4, %v8450_v2, %v1428_v13  ;;  %v1342_v1 = vsel %vm1289_vm5, %v1260_v15, %v8716_v12  ;;  %v8755_v15 = vsel %vm641_vm0, %v10390_v27, %v8686_v37 }
 0x325   : > { %1267 = vrot.lane.b32.xlu1 %v8532_v49, %s6408_s13  ;;  %1913 = vrot.lane.b32.xlu0 %v10391_v43, %s6406_s11  ;;  %v3015_v2 = vsel %vm641_vm0, %v1341_v63, %v1544_v23  ;;  %v10395_v23 = vld [vmem:[#allocation66_spill] sm:$0xff] }
 0x327   : > { %v1668_v33 = vpop.permute.xlu1 %1667  ;;  %v1430_v10 = vpop.permute.xlu0 %1429 }
 0x328   : > { %v1545_v18 = vsel %vm1525_vm4, %v1428_v13, %v1430_v10  ;;  %v10394_v13 = vld [vmem:[#allocation69_spill] sm:$0xff] }
 0x329   : > { %1435 = vrot.lane.b32.xlu1 %v10387_v50, %s6407_s12  ;;  %1269 = vrot.lane.b32.xlu0 %v8625_v19, %s6408_s13  ;;  %v3019_v48 = vsel %vm641_vm0, %v1342_v1, %v1545_v18  ;;  %v1782_v50 = vsel %vm1761_vm2, %v8648_v22, %v1668_v33  ;;  %v1072_v18 = vsel %vm1053_vm6, %v10384_v57, %v10395_v23 }
 0x32a   : > { %3828 = vmatprep.subr.bf16.mxu1 %v3019_v48 }
 0x32b   : > { %v1192_v58 = vpop.permute.xlu1 %1191  ;;  %3829 = vmatpush1.bf16.msra.mxu1 %v3015_v2  ;;  %v8735_v59 = vpop.permute.xlu0 %1669 }
 0x32c   : > { %v1783_v51 = vsel %vm1761_vm2, %v1668_v33, %v8735_v59  ;;  %v1308_v38 = vsel %vm1289_vm5, %v8465_v7, %v1192_v58  ;;  %v1073_v33 = vsel %vm1053_vm6, %v10395_v23, %v10394_v13 }
 0x32d   : > { %1675 = vrot.lane.b32.xlu1 %v10392_v36, %s6405_s10  ;;  %1437 = vrot.lane.b32.xlu0 %v10388_v6, %s6407_s12  ;;  %v2887_v48 = vsel %vm641_vm0, %v8186_v16, %v1073_v33 }
 0x32e   : > { %3865 = vmatprep.subr.bf16.mxu0 %v1783_v51 }
 0x32f   : > { %3866 = vmatpush1.bf16.msra.mxu0 %v1782_v50  ;;  %v1500_v25 = vpop.permute.xlu1 %1499  ;;  %v1194_v34 = vpop.permute.xlu0 %1193 }
 0x330   : > { %v1309_v30 = vsel %vm1289_vm5, %v1192_v58, %v1194_v34  ;;  %v1579_v7 = vsel %vm1525_vm4, %v8668_v3, %v1500_v25 }
 0x331   : > { %1199 = vrot.lane.b32.xlu1 %v10386_v28, %s6408_s13  ;;  %1677 = vrot.lane.b32.xlu0 %v10393_v42, %s6405_s10 }
 0x332   : > { %3830 = vmatprep.subr.bf16.mxu1 %v1309_v30 }
 0x333   : > { %3831 = vmatpush1.bf16.msra.mxu1 %v1308_v38  ;;  %v1024_v22 = vpop.permute.xlu1 %1023  ;;  %v8757_v56 = vpop.permute.xlu0 %1501 }
 0x334   : > { %v1580_v52 = vsel %vm1525_vm4, %v1500_v25, %v8757_v56  ;;  %v1105_v3 = vsel %vm1053_vm6, %v8475_v47, %v1024_v22  ;;  %v2883_v47 = vsel %vm641_vm0, %v8007_v31, %v1072_v18 }
 0x335   : > { %1507 = vrot.lane.b32.xlu1 %v8755_v15, %s6407_s12  ;;  %1201 = vrot.lane.b32.xlu0 %v10389_v0, %s6408_s13 }
 0x336   : > { %3867 = vmatprep.subr.bf16.mxu0 %v1580_v52 }
 0x337   : > { %3868 = vmatpush1.bf16.msra.mxu0 %v1579_v7  ;;  %v1264_v21 = vpop.permute.xlu1 %1263  ;;  %v1026_v24 = vpop.permute.xlu0 %1025  ;;  %v10396_v7 = vld [vmem:[#allocation71_spill] sm:$0xff] }
 0x338   : > { %v1106_v1 = vsel %vm1053_vm6, %v1024_v22, %v1026_v24  ;;  %v1343_v25 = vsel %vm1289_vm5, %v8716_v12, %v1264_v21 }
 0x339   : > { %1031 = vrot.lane.b32.xlu1 %v8581_v4, %s6404_s9  ;;  %1509 = vrot.lane.b32.xlu0 %v8770_v45, %s6407_s12 }
 0x33a   : > { %3832 = vmatprep.subr.bf16.mxu1 %v1106_v1 }
 0x33b   : > { %3833 = vmatpush1.bf16.msra.mxu1 %v1105_v3  ;;  %v1432_v63 = vpop.permute.xlu1 %1431  ;;  %v8787_v2 = vpop.permute.xlu0 %1265 }
 0x33c   : > { %3834 = vmatprep.subr.bf16.mxu1 %v2887_v48  ;;  %v1546_v58 = vsel %vm1525_vm4, %v1430_v10, %v1432_v63  ;;  %v1344_v16 = vsel %vm1289_vm5, %v1264_v21, %v8787_v2  ;;  %v10397_v21 = vld [vmem:[#allocation68_spill] sm:$0xff] }
 0x33d   : > { %1271 = vrot.lane.b32.xlu1 %v8686_v37, %s6408_s13  ;;  %1033 = vrot.lane.b32.xlu0 %v8681_v14, %s6404_s9  ;;  %v3023_v10 = vsel %vm641_vm0, %v1343_v25, %v1546_v58  ;;  %v1074_v33 = vsel %vm1053_vm6, %v10394_v13, %v10397_v21 }
 0x33f   : > { %3835 = vmatpush1.bf16.msra.mxu1 %v2883_v47  ;;  %v1196_v57 = vpop.permute.xlu1 %1195  ;;  %v8796_v51 = vpop.permute.xlu0 %1433 }
 0x340   : > { %v1547_v50 = vsel %vm1525_vm4, %v1432_v63, %v8796_v51  ;;  %3836 = vmatprep.subr.bf16.mxu1 %v10374_v32  ;;  %v1310_v12 = vsel %vm1289_vm5, %v1194_v34, %v1196_v57  ;;  %v8841_v47 = vpop.f32.mrf.mxu0 }
 0x341   : > { %1439 = vrot.lane.b32.xlu1 %v10390_v27, %s6407_s12  ;;  %1273 = vrot.lane.b32.xlu0 %v8702_v53, %s6408_s13  ;;  %v3027_v31 = vsel %vm641_vm0, %v1344_v16, %v1547_v50 }
 0x342   : > { %3869 = vmatprep.subr.bf16.mxu0 %v3027_v31  ;;  %v8851_v13 = vpop.f32.mrf.mxu0 }
 0x343   : > { %v1028_v30 = vpop.permute.xlu1 %1027  ;;  %3870 = vmatpush1.bf16.msra.mxu0 %v3023_v10  ;;  %v8811_v38 = vpop.permute.xlu0 %1197  ;;  %3837 = vmatpush1.bf16.msra.mxu1 %v10368_v55  ;;  %v1075_v55 = vsel %vm1053_vm6, %v10397_v21, %v10396_v7  ;;  %v8882_v21 = vcombine.high %v8691_v41, %v8691_v41 }
 0x344   : > { %v1311_v32 = vsel %vm1289_vm5, %v1196_v57, %v8811_v38  ;;  %v1107_v34 = vsel %vm1053_vm6, %v1026_v24, %v1028_v30  ;;  %v2895_v63 = vsel %vm641_vm0, %v8340_v35, %v1075_v55  ;;  %v2891_v24 = vsel %vm641_vm0, %v8279_v60, %v1074_v33  ;;  %v3491_v16 = vpop.f32.mrf.mxu0 }
 0x345   : > { %1203 = vrot.lane.b32.xlu1 %v10392_v36, %s6408_s13  ;;  %1441 = vrot.lane.b32.xlu0 %v10391_v43, %s6407_s12 }
 0x346   : > { %3871 = vmatprep.subr.bf16.mxu0 %v1311_v32  ;;  %v3492_v50 = vpop.f32.mrf.mxu0 }
 0x347   : > { %v2680_v22 = vpop.permute.xlu1 %2679  ;;  %3872 = vmatpush1.bf16.msra.mxu0 %v1310_v12  ;;  %v8821_v52 = vpop.permute.xlu0 %1029  ;;  %v10399_v50 = vld [vmem:[#allocation36_spill] sm:$0xff] }
 0x348   : > { %v1108_v23 = vsel %vm1053_vm6, %v1028_v30, %v8821_v52  ;;  %v2761_v1 = vsel %vm2709_vm7, %v8520_v46, %v2680_v22 }
 0x349   : > { %1035 = vrot.lane.b32.xlu1 %v8755_v15, %s6404_s9  ;;  %1205 = vrot.lane.b32.xlu0 %v10393_v42, %s6408_s13  ;;  %v3409_v46 = vsel %vm641_vm0, %v2761_v1, 0 }
 0x34a   : > { %3873 = vmatprep.subr.bf16.mxu0 %v1108_v23 }
 0x34b   : > { %v2612_v3 = vpop.permute.xlu1 %2611  ;;  %3874 = vmatpush1.bf16.msra.mxu0 %v1107_v34  ;;  %v2682_v18 = vpop.permute.xlu0 %2681 }
 0x34c   : > { %3875 = vmatprep.subr.bf16.mxu0 %v2895_v63  ;;  %v2762_v48 = vsel %vm2709_vm7, %v2680_v22, %v2682_v18  ;;  %v2728_v60 = vsel %vm2709_vm7, %v8550_v5, %v2612_v3 }
 0x34d   : > { %2687 = vrot.lane.b32.xlu1 %v8625_v19, %s6409_s14  ;;  %1037 = vrot.lane.b32.xlu0 %v8770_v45, %s6404_s9 }
 0x34e   : > { %6028 = vmatprep.subr.msk.bf16.mxu1 %vm641_vm0, %v2762_v48 }
 0x34f   : > { %3843 = vmatpush2.bf16.msra.mxu1 %v3409_v46  ;;  %v2444_v35 = vpop.permute.xlu1 %2443  ;;  %3876 = vmatpush1.bf16.msra.mxu0 %v2891_v24  ;;  %v2614_v58 = vpop.permute.xlu0 %2613 }
 0x350   : > { %v2729_v57 = vsel %vm2709_vm7, %v2612_v3, %v2614_v58  ;;  %3877 = vmatprep.subr.bf16.mxu0 %v10380_v17  ;;  %v2525_v17 = vsel %vm2473_vm8, %v8569_v29, %v2444_v35 }
 0x351   : > { %2619 = vrot.lane.b32.xlu1 %v10389_v0, %s6409_s14  ;;  %2689 = vrot.lane.b32.xlu0 %v8686_v37, %s6409_s14 }
 0x352   : > { %3844 = vmatprep.subr.bf16.mxu1 %v2729_v57 }
 0x353   : > { %3845 = vmatpush2.bf16.msra.mxu1 %v2728_v60  ;;  %v2684_v25 = vpop.permute.xlu1 %2683  ;;  %v2446_v31 = vpop.permute.xlu0 %2445  ;;  %3878 = vmatpush1.bf16.msra.mxu0 %v10377_v40 }
 0x354   : > { %v2526_v10 = vsel %vm2473_vm8, %v2444_v35, %v2446_v31  ;;  %v2763_v5 = vsel %vm2709_vm7, %v2682_v18, %v2684_v25  ;;  %v10398_v35 = vld [vmem:[#allocation34_spill] sm:$0xff] }
 0x355   : > { %2451 = vrot.lane.b32.xlu1 %v8681_v14, %s6410_s15  ;;  %2621 = vrot.lane.b32.xlu0 %v10392_v36, %s6409_s14  ;;  %v3415_v12 = vsel %vm641_vm0, %v2763_v5, 0 }
 0x356   : > { %3846 = vmatprep.subr.bf16.mxu1 %v2526_v10 }
 0x357   : > { %3847 = vmatpush2.bf16.msra.mxu1 %v2525_v17  ;;  %v2205_v30 = vpop.permute.xlu1 %2204  ;;  %v8870_v32 = vpop.permute.xlu0 %2685 }
 0x358   : > { %v2764_v40 = vsel %vm2709_vm7, %v2684_v25, %v8870_v32  ;;  %v2286_v3 = vsel %vm2234_vm9, %v8593_v39, %v2205_v30 }
 0x359   : > { %2691 = vrot.lane.b32.xlu1 %v8702_v53, %s6409_s14  ;;  %2453 = vrot.lane.b32.xlu0 %v8755_v15, %s6410_s15 }
 0x35a   : > { %6030 = vmatprep.subr.msk.bf16.mxu0 %vm641_vm0, %v2764_v40 }
 0x35b   : > { %3884 = vmatpush2.bf16.msra.mxu0 %v3415_v12  ;;  %v2376_v29 = vpop.permute.xlu1 %2375  ;;  %v2207_v22 = vpop.permute.xlu0 %2206 }
 0x35c   : > { %v2492_v55 = vsel %vm2473_vm8, %v8601_v8, %v2376_v29  ;;  %v2287_v33 = vsel %vm2234_vm9, %v2205_v30, %v2207_v22 }
 0x35d   : > { %2212 = vrot.lane.b32.xlu1 %v8625_v19, %s6411_s16  ;;  %2693 = vrot.lane.b32.xlu0 %v8882_v21, %s6409_s14  ;;  %v3279_v8 = vsel %vm641_vm0, %v2286_v3, %v2492_v55  ;;  %v373_v3 = vld [vmem:[%s6481_s8 + $0xfc] sm:$0xff] }
 0x35f   : > { %v2616_v23 = vpop.permute.xlu1 %2615  ;;  %v2378_v34 = vpop.permute.xlu0 %2377 }
 0x360   : > { %v2493_v1 = vsel %vm2473_vm8, %v2376_v29, %v2378_v34  ;;  %v2730_v39 = vsel %vm2709_vm7, %v2614_v58, %v2616_v23 }
 0x361   : > { %2383 = vrot.lane.b32.xlu1 %v10388_v6, %s6410_s15  ;;  %2214 = vrot.lane.b32.xlu0 %v8686_v37, %s6411_s16  ;;  %v3283_v41 = vsel %vm641_vm0, %v2287_v33, %v2493_v1 }
 0x362   : > { %3848 = vmatprep.subr.bf16.mxu1 %v3283_v41 }
 0x363   : > { %v2137_v18 = vpop.permute.xlu1 %2136  ;;  %3849 = vmatpush2.bf16.msra.mxu1 %v3279_v8  ;;  %v8900_v63 = vpop.permute.xlu0 %2617 }
 0x364   : > { %v2731_v48 = vsel %vm2709_vm7, %v2616_v23, %v8900_v63  ;;  %v8965_v23 = vpop.f32.mrf.mxu1 }
 0x365   : > { %2623 = vrot.lane.b32.xlu1 %v10393_v42, %s6409_s14  ;;  %2385 = vrot.lane.b32.xlu0 %v10390_v27, %s6410_s15  ;;  %v2253_v27 = vsel %vm2234_vm9, %v8638_v62, %v2137_v18  ;;  %v8931_v62 = vsel %vm641_vm0, %v10399_v50, %v8882_v21 }
 0x366   : > { %3885 = vmatprep.subr.bf16.mxu0 %v2731_v48  ;;  %v8971_v41 = vpop.f32.mrf.mxu1  ;;  %v8979_v48 = vcombine.low %v373_v3, %v373_v3 }
 0x367   : > { %3886 = vmatpush2.bf16.msra.mxu0 %v2730_v39  ;;  %v2448_v6 = vpop.permute.xlu1 %2447  ;;  %v8909_v46 = vpop.permute.xlu0 %2138 }
 0x368   : > { %v2254_v24 = vsel %vm2234_vm9, %v2137_v18, %v8909_v46  ;;  %v2527_v60 = vsel %vm2473_vm8, %v2446_v31, %v2448_v6 }
 0x369   : > { %2144 = vrot.lane.b32.xlu1 %v10389_v0, %s6411_s16  ;;  %2625 = vrot.lane.b32.xlu0 %v10398_v35, %s6409_s14 }
 0x36a   : > { %3850 = vmatprep.subr.bf16.mxu1 %v2254_v24 }
 0x36b   : > { %3851 = vmatpush2.bf16.msra.mxu1 %v2253_v27  ;;  %v1968_v57 = vpop.permute.xlu1 %1967  ;;  %v8919_v58 = vpop.permute.xlu0 %2449 }
 0x36c   : > { %v2528_v16 = vsel %vm2473_vm8, %v2448_v6, %v8919_v58  ;;  %v2049_v31 = vsel %vm1997_vm3, %v8658_v54, %v1968_v57 }
 0x36d   : > { %2455 = vrot.lane.b32.xlu1 %v8770_v45, %s6410_s15  ;;  %2146 = vrot.lane.b32.xlu0 %v10392_v36, %s6411_s16 }
 0x36e   : > { %3887 = vmatprep.subr.bf16.mxu0 %v2528_v16 }
 0x36f   : > { %3888 = vmatpush2.bf16.msra.mxu0 %v2527_v60  ;;  %v2209_v25 = vpop.permute.xlu1 %2208  ;;  %v8933_v10 = vpop.permute.xlu0 %1969 }
 0x370   : > { %v2050_v17 = vsel %vm1997_vm3, %v1968_v57, %v8933_v10  ;;  %v2288_v55 = vsel %vm2234_vm9, %v2207_v22, %v2209_v25 }
 0x371   : > { %1975 = vrot.lane.b32.xlu1 %v8581_v4, %s6406_s11  ;;  %2457 = vrot.lane.b32.xlu0 %v8931_v62, %s6410_s15 }
 0x372   : > { %3852 = vmatprep.subr.bf16.mxu1 %v2050_v17  ;;  %v8996_v17 = vpop.f32.mrf.mxu0 }
 0x373   : > { %3853 = vmatpush2.bf16.msra.mxu1 %v2049_v31  ;;  %v2380_v5 = vpop.permute.xlu1 %2379  ;;  %v8943_v30 = vpop.permute.xlu0 %2210 }
 0x374   : > { %v2494_v4 = vsel %vm2473_vm8, %v2378_v34, %v2380_v5  ;;  %v2289_v54 = vsel %vm2234_vm9, %v2209_v25, %v8943_v30 }
 0x375   : > { %2216 = vrot.lane.b32.xlu1 %v8702_v53, %s6411_s16  ;;  %1977 = vrot.lane.b32.xlu0 %v8681_v14, %s6406_s11  ;;  %v3287_v34 = vsel %vm641_vm0, %v2288_v55, %v2494_v4 }
 0x376   : > { %3855 = vmatmul.mubr.bf16.vlgmr.msra.gmra.mxu1 %v7329_v61 }
 0x377   : > { %v1740_v40 = vpop.permute.xlu1 %1739  ;;  %v8951_v12 = vpop.permute.xlu0 %2381  ;;  %6033 = vmatprep.mubr.msk.bf16.mxu1 %vm3350_vm1, %v7078_v44 }
 0x378   : > { %v2495_v29 = vsel %vm2473_vm8, %v2380_v5, %v8951_v12  ;;  %v1817_v27 = vsel %vm1761_vm2, %v8684_v11, %v1740_v40  ;;  %v10400_v11 = vld [vmem:[#allocation41_spill] sm:$0xff]  ;;  %v9004_v5 = vpop.f32.mrf.mxu0 }
 0x379   : > { %2387 = vrot.lane.b32.xlu1 %v10391_v43, %s6410_s15  ;;  %2218 = vrot.lane.b32.xlu0 %v8882_v21, %s6411_s16  ;;  %v3291_v14 = vsel %vm641_vm0, %v2289_v54, %v2495_v29  ;;  %v3532_v43 = vpop.f32.mrf.mxu1 }
 0x37a   : > { %3889 = vmatprep.subr.bf16.mxu0 %v3291_v14  ;;  %v3573_v29 = vpop.f32.mrf.mxu0  ;;  %v10401_v43 = vld [vmem:[#allocation39_spill] sm:$0xff] }
 0x37b   : > { %v1908_v33 = vpop.permute.xlu1 %1907  ;;  %3890 = vmatpush2.bf16.msra.mxu0 %v3287_v34  ;;  %v8968_v1 = vpop.permute.xlu0 %1741 }
 0x37c   : > { %v2020_v22 = vsel %vm1997_vm3, %v8698_v26, %v1908_v33  ;;  %v1818_v39 = vsel %vm1761_vm2, %v1740_v40, %v8968_v1  ;;  %v3533_v24 = vpop.f32.mrf.mxu1  ;;  %v3574_v55 = vpop.f32.mrf.mxu0 }
 0x37d   : > { %1747 = vrot.lane.b32.xlu1 %v8882_v21, %s6405_s10  ;;  %2389 = vrot.lane.b32.xlu0 %v10399_v50, %s6410_s15  ;;  %v3163_v57 = vsel %vm641_vm0, %v1817_v27, %v2020_v22  ;;  %v9044_v27 = vcombine.high %v373_v3, %v373_v3 }
 0x37f   : > { %v2141_v8 = vpop.permute.xlu1 %2140  ;;  %v1910_v18 = vpop.permute.xlu0 %1909 }
 0x380   : > { %v2021_v6 = vsel %vm1997_vm3, %v1908_v33, %v1910_v18  ;;  %v2255_v31 = vsel %vm2234_vm9, %v8909_v46, %v2141_v8 }
 0x381   : > { %1915 = vrot.lane.b32.xlu1 %v10399_v50, %s6406_s11  ;;  %1749 = vrot.lane.b32.xlu0 %v8979_v48, %s6405_s10  ;;  %v3167_v26 = vsel %vm641_vm0, %v1818_v39, %v2021_v6 }
 0x382   : > { %3904 = vmatprep.subr.bf16.mxu1 %v3167_v26 }
 0x383   : > { %v1672_v16 = vpop.permute.xlu1 %1671  ;;  %3905 = vmatpush1.bf16.msra.mxu1 %v3163_v57  ;;  %v8992_v60 = vpop.permute.xlu0 %2142 }
 0x384   : > { %v2256_v25 = vsel %vm2234_vm9, %v2141_v8, %v8992_v60  ;;  %v1784_v46 = vsel %vm1761_vm2, %v8735_v59, %v1672_v16 }
 0x385   : > { %2148 = vrot.lane.b32.xlu1 %v10393_v42, %s6411_s16  ;;  %1917 = vrot.lane.b32.xlu0 %v10400_v11, %s6406_s11 }
 0x386   : > { %3891 = vmatprep.subr.bf16.mxu0 %v2256_v25 }
 0x387   : > { %3892 = vmatpush2.bf16.msra.mxu0 %v2255_v31  ;;  %v1972_v4 = vpop.permute.xlu1 %1971  ;;  %v9006_v40 = vpop.permute.xlu0 %1673 }
 0x388   : > { %v1785_v54 = vsel %vm1761_vm2, %v1672_v16, %v9006_v40  ;;  %v2051_v22 = vsel %vm1997_vm3, %v8933_v10, %v1972_v4  ;;  %v9039_v10 = vsel %vm641_vm0, %v10400_v11, %v8979_v48 }
 0x389   : > { %1679 = vrot.lane.b32.xlu1 %v10398_v35, %s6405_s10  ;;  %2150 = vrot.lane.b32.xlu0 %v10398_v35, %s6411_s16 }
 0x38a   : > { %3906 = vmatprep.subr.bf16.mxu1 %v1785_v54 }
 0x38b   : > { %3907 = vmatpush1.bf16.msra.mxu1 %v1784_v46  ;;  %v1504_v14 = vpop.permute.xlu1 %1503  ;;  %v9016_v34 = vpop.permute.xlu0 %1973 }
 0x38c   : > { %v2052_v33 = vsel %vm1997_vm3, %v1972_v4, %v9016_v34  ;;  %v10402_v4 = vld [vmem:[#allocation40_spill] sm:$0xff] }
 0x38d   : > { %1979 = vrot.lane.b32.xlu1 %v8755_v15, %s6406_s11  ;;  %1681 = vrot.lane.b32.xlu0 %v10401_v43, %s6405_s10  ;;  %v1581_v15 = vsel %vm1525_vm4, %v8757_v56, %v1504_v14 }
 0x38e   : > { %3893 = vmatprep.subr.bf16.mxu0 %v2052_v33 }
 0x38f   : > { %3894 = vmatpush2.bf16.msra.mxu0 %v2051_v22  ;;  %v1744_v59 = vpop.permute.xlu1 %1743  ;;  %v9026_v8 = vpop.permute.xlu0 %1505 }
 0x390   : > { %v1582_v39 = vsel %vm1525_vm4, %v1504_v14, %v9026_v8  ;;  %v1819_v31 = vsel %vm1761_vm2, %v8968_v1, %v1744_v59  ;;  %v10403_v1 = vld [vmem:[#allocation45_spill] sm:$0xff] }
 0x391   : > { %1511 = vrot.lane.b32.xlu1 %v8931_v62, %s6407_s12  ;;  %1981 = vrot.lane.b32.xlu0 %v8770_v45, %s6406_s11  ;;  %v9049_v45 = vld [vmem:[%s6481_s8 + $0x104] sm:$0xff] }
 0x392   : > { %3908 = vmatprep.subr.bf16.mxu1 %v1582_v39  ;;  %3896 = vmatmul.mubr.bf16.vlgmr.msra.gmra.mxu0 %v7329_v61  ;;  %v9060_v3 = vcombine.low %v9049_v45, %v9049_v45 }
 0x393   : > { %3909 = vmatpush1.bf16.msra.mxu1 %v1581_v15  ;;  %v1912_v6 = vpop.permute.xlu1 %1911  ;;  %v9042_v24 = vpop.permute.xlu0 %1745  ;;  %6035 = vmatprep.mubr.msk.bf16.mxu0 %vm3350_vm1, %v7078_v44 }
 0x394   : > { %v2022_v56 = vsel %vm1997_vm3, %v1910_v18, %v1912_v6  ;;  %v1820_v16 = vsel %vm1761_vm2, %v1744_v59, %v9042_v24 }
 0x395   : > { %1751 = vrot.lane.b32.xlu1 %v9044_v27, %s6405_s10  ;;  %1513 = vrot.lane.b32.xlu0 %v9039_v10, %s6407_s12  ;;  %v3171_v54 = vsel %vm641_vm0, %v1819_v31, %v2022_v56 }
 0x397   : > { %v1268_v26 = vpop.permute.xlu1 %1267  ;;  %v9056_v57 = vpop.permute.xlu0 %1913 }
 0x398   : > { %v2023_v25 = vsel %vm1997_vm3, %v1912_v6, %v9056_v57  ;;  %v1345_v39 = vsel %vm1289_vm5, %v8787_v2, %v1268_v26  ;;  %v10404_v2 = vld [vmem:[#allocation38_spill] sm:$0xff] }
 0x399   : > { %1919 = vrot.lane.b32.xlu1 %v10402_v4, %s6406_s11  ;;  %1753 = vrot.lane.b32.xlu0 %v9060_v3, %s6405_s10  ;;  %v3175_v18 = vsel %vm641_vm0, %v1820_v16, %v2023_v25 }
 0x39a   : > { %3945 = vmatprep.subr.bf16.mxu0 %v3175_v18  ;;  %v10405_v18 = vld [vmem:[#allocation43_spill] sm:$0xff] }
 0x39b   : > { %v1436_v29 = vpop.permute.xlu1 %1435  ;;  %3946 = vmatpush1.bf16.msra.mxu0 %v3171_v54  ;;  %v9074_v46 = vpop.permute.xlu0 %1269 }
 0x39c   : > { %v1548_v55 = vsel %vm1525_vm4, %v8796_v51, %v1436_v29  ;;  %v1346_v22 = vsel %vm1289_vm5, %v1268_v26, %v9074_v46 }
 0x39d   : > { %1275 = vrot.lane.b32.xlu1 %v8882_v21, %s6408_s13  ;;  %1921 = vrot.lane.b32.xlu0 %v10403_v1, %s6406_s11  ;;  %v3031_v51 = vsel %vm641_vm0, %v1345_v39, %v1548_v55 }
 0x39f   : > { %v1676_v14 = vpop.permute.xlu1 %1675  ;;  %v1438_v33 = vpop.permute.xlu0 %1437 }
 0x3a0   : > { %v1549_v59 = vsel %vm1525_vm4, %v1436_v29, %v1438_v33  ;;  %v9113_v29 = vsel %vm641_vm0, %v10402_v4, %v9044_v27 }
 0x3a1   : > { %1443 = vrot.lane.b32.xlu1 %v10399_v50, %s6407_s12  ;;  %1277 = vrot.lane.b32.xlu0 %v8979_v48, %s6408_s13  ;;  %v3035_v15 = vsel %vm641_vm0, %v1346_v22, %v1549_v59  ;;  %v1786_v50 = vsel %vm1761_vm2, %v9006_v40, %v1676_v14  ;;  %v9128_v22 = vsel %vm641_vm0, %v10403_v1, %v9060_v3 }
 0x3a2   : > { %3910 = vmatprep.subr.bf16.mxu1 %v3035_v15  ;;  %v10406_v15 = vld [vmem:[#allocation73_spill] sm:$0xff] }
 0x3a3   : > { %v1200_v6 = vpop.permute.xlu1 %1199  ;;  %3911 = vmatpush1.bf16.msra.mxu1 %v3031_v51  ;;  %v9093_v56 = vpop.permute.xlu0 %1677  ;;  %v10407_v51 = vld [vmem:[#allocation70_spill] sm:$0xff] }
 0x3a4   : > { %v1787_v16 = vsel %vm1761_vm2, %v1676_v14, %v9093_v56  ;;  %v1312_v54 = vsel %vm1289_vm5, %v8811_v38, %v1200_v6 }
 0x3a5   : > { %1683 = vrot.lane.b32.xlu1 %v10404_v2, %s6405_s10  ;;  %1445 = vrot.lane.b32.xlu0 %v10400_v11, %s6407_s12 }
 0x3a6   : > { %3947 = vmatprep.subr.bf16.mxu0 %v1787_v16 }
 0x3a7   : > { %3948 = vmatpush1.bf16.msra.mxu0 %v1786_v50  ;;  %v1508_v26 = vpop.permute.xlu1 %1507  ;;  %v1202_v25 = vpop.permute.xlu0 %1201 }
 0x3a8   : > { %v1313_v31 = vsel %vm1289_vm5, %v1200_v6, %v1202_v25  ;;  %v1583_v38 = vsel %vm1525_vm4, %v9026_v8, %v1508_v26  ;;  %v1077_v6 = vsel %vm1053_vm6, %v10407_v51, %v10406_v15  ;;  %v9138_v8 = vpop.f32.mrf.mxu1 }
 0x3a9   : > { %1207 = vrot.lane.b32.xlu1 %v10398_v35, %s6408_s13  ;;  %1685 = vrot.lane.b32.xlu0 %v10405_v18, %s6405_s10 }
 0x3aa   : > { %3912 = vmatprep.subr.bf16.mxu1 %v1313_v31 }
 0x3ab   : > { %3913 = vmatpush1.bf16.msra.mxu1 %v1312_v54  ;;  %v1032_v40 = vpop.permute.xlu1 %1031  ;;  %v9115_v55 = vpop.permute.xlu0 %1509  ;;  %v2903_v54 = vsel %vm641_vm0, %v8532_v49, %v1077_v6 }
 0x3ac   : > { %v1584_v14 = vsel %vm1525_vm4, %v1508_v26, %v9115_v55  ;;  %v1109_v50 = vsel %vm1053_vm6, %v8821_v52, %v1032_v40  ;;  %v1076_v26 = vsel %vm1053_vm6, %v10396_v7, %v10407_v51 }
 0x3ad   : > { %1515 = vrot.lane.b32.xlu1 %v9113_v29, %s6407_s12  ;;  %1209 = vrot.lane.b32.xlu0 %v10401_v43, %s6408_s13  ;;  %v2899_v52 = vsel %vm641_vm0, %v8356_v20, %v1076_v26 }
 0x3ae   : > { %3949 = vmatprep.subr.bf16.mxu0 %v1584_v14 }
 0x3af   : > { %3950 = vmatpush1.bf16.msra.mxu0 %v1583_v38  ;;  %v1272_v59 = vpop.permute.xlu1 %1271  ;;  %v1034_v39 = vpop.permute.xlu0 %1033 }
 0x3b0   : > { %v1110_v16 = vsel %vm1053_vm6, %v1032_v40, %v1034_v39  ;;  %v9149_v38 = vpop.f32.mrf.mxu1 }
 0x3b1   : > { %1039 = vrot.lane.b32.xlu1 %v8931_v62, %s6404_s9  ;;  %1517 = vrot.lane.b32.xlu0 %v9128_v22, %s6407_s12 }
 0x3b2   : > { %3914 = vmatprep.subr.bf16.mxu1 %v1110_v16  ;;  %v3614_v7 = vpop.f32.mrf.mxu1 }
 0x3b3   : > { %3915 = vmatpush1.bf16.msra.mxu1 %v1109_v50  ;;  %v1440_v31 = vpop.permute.xlu1 %1439  ;;  %v9147_v14 = vpop.permute.xlu0 %1273 }
 0x3b4   : > { %3916 = vmatprep.subr.bf16.mxu1 %v2903_v54  ;;  %v1550_v40 = vsel %vm1525_vm4, %v1438_v33, %v1440_v31  ;;  %v1348_v6 = vsel %vm1289_vm5, %v1272_v59, %v9147_v14  ;;  %v3615_v50 = vpop.f32.mrf.mxu1  ;;  %v1347_v54 = vsel %vm1289_vm5, %v9074_v46, %v1272_v59  ;;  %v9178_v46 = vpop.f32.mrf.mxu0 }
 0x3b5   : > { %1279 = vrot.lane.b32.xlu1 %v9044_v27, %s6408_s13  ;;  %1041 = vrot.lane.b32.xlu0 %v9039_v10, %s6404_s9  ;;  %v3039_v33 = vsel %vm641_vm0, %v1347_v54, %v1550_v40  ;;  %10408 = vst [vmem:[#allocation50_spill] sm:$0xff] %v9178_v46 }
 0x3b7   : > { %3917 = vmatpush1.bf16.msra.mxu1 %v2899_v52  ;;  %v1204_v51 = vpop.permute.xlu1 %1203  ;;  %v9158_v49 = vpop.permute.xlu0 %1441 }
 0x3b8   : > { %v1551_v16 = vsel %vm1525_vm4, %v1440_v31, %v9158_v49  ;;  %3918 = vmatprep.subr.bf16.mxu1 %v10386_v28  ;;  %v1314_v59 = vsel %vm1289_vm5, %v1202_v25, %v1204_v51  ;;  %v9185_v52 = vpop.f32.mrf.mxu0 }
 0x3b9   : > { %1447 = vrot.lane.b32.xlu1 %v10402_v4, %s6407_s12  ;;  %1281 = vrot.lane.b32.xlu0 %v9060_v3, %s6408_s13  ;;  %v3043_v20 = vsel %vm641_vm0, %v1348_v6, %v1551_v16  ;;  %v10410_v6 = vld [vmem:[#allocation72_spill] sm:$0xff] }
 0x3ba   : > { %3951 = vmatprep.subr.bf16.mxu0 %v3043_v20  ;;  %v3655_v54 = vpop.f32.mrf.mxu0  ;;  %v1078_v20 = vsel %vm1053_vm6, %v10406_v15, %v10410_v6 }
 0x3bb   : > { %v1036_v26 = vpop.permute.xlu1 %1035  ;;  %3952 = vmatpush1.bf16.msra.mxu0 %v3039_v33  ;;  %v9173_v31 = vpop.permute.xlu0 %1205  ;;  %3919 = vmatpush1.bf16.msra.mxu1 %v10381_v9  ;;  %v10409_v9 = vld [vmem:[#allocation75_spill] sm:$0xff] }
 0x3bc   : > { %v1315_v28 = vsel %vm1289_vm5, %v1204_v51, %v9173_v31  ;;  %v1079_v16 = vsel %vm1053_vm6, %v10410_v6, %v10409_v9  ;;  %v1111_v25 = vsel %vm1053_vm6, %v1034_v39, %v1036_v26  ;;  %v3656_v51 = vpop.f32.mrf.mxu0 }
 0x3bd   : > { %1211 = vrot.lane.b32.xlu1 %v10404_v2, %s6408_s13  ;;  %1449 = vrot.lane.b32.xlu0 %v10403_v1, %s6407_s12  ;;  %v2911_v54 = vsel %vm641_vm0, %v8686_v37, %v1079_v16 }
 0x3be   : > { %3953 = vmatprep.subr.bf16.mxu0 %v1315_v28 }
 0x3bf   : > { %v2688_v7 = vpop.permute.xlu1 %2687  ;;  %3954 = vmatpush1.bf16.msra.mxu0 %v1314_v59  ;;  %v9187_v40 = vpop.permute.xlu0 %1037 }
 0x3c0   : > { %v1112_v50 = vsel %vm1053_vm6, %v1036_v26, %v9187_v40  ;;  %v2765_v33 = vsel %vm2709_vm7, %v8870_v32, %v2688_v7  ;;  %v2907_v32 = vsel %vm641_vm0, %v8625_v19, %v1078_v20  ;;  %v9246_v20 = vcombine.high %v9049_v45, %v9049_v45 }
 0x3c1   : > { %1043 = vrot.lane.b32.xlu1 %v9113_v29, %s6404_s9  ;;  %1213 = vrot.lane.b32.xlu0 %v10405_v18, %s6408_s13  ;;  %v3421_v39 = vsel %vm641_vm0, %v2765_v33, 0 }
 0x3c2   : > { %3955 = vmatprep.subr.bf16.mxu0 %v1112_v50 }
 0x3c3   : > { %v2620_v28 = vpop.permute.xlu1 %2619  ;;  %3956 = vmatpush1.bf16.msra.mxu0 %v1111_v25  ;;  %v2690_v59 = vpop.permute.xlu0 %2689 }
 0x3c4   : > { %3957 = vmatprep.subr.bf16.mxu0 %v2911_v54  ;;  %v2766_v46 = vsel %vm2709_vm7, %v2688_v7, %v2690_v59 }
 0x3c5   : > { %2695 = vrot.lane.b32.xlu1 %v8979_v48, %s6409_s14  ;;  %1045 = vrot.lane.b32.xlu0 %v9128_v22, %s6404_s9 }
 0x3c6   : > { %6032 = vmatprep.subr.msk.bf16.mxu1 %vm641_vm0, %v2766_v46  ;;  %v2732_v46 = vsel %vm2709_vm7, %v8900_v63, %v2620_v28 }
 0x3c7   : > { %3925 = vmatpush2.bf16.msra.mxu1 %v3421_v39  ;;  %v2452_v15 = vpop.permute.xlu1 %2451  ;;  %3958 = vmatpush1.bf16.msra.mxu0 %v2907_v32  ;;  %v2622_v37 = vpop.permute.xlu0 %2621 }
 0x3c8   : > { %v2733_v26 = vsel %vm2709_vm7, %v2620_v28, %v2622_v37  ;;  %3959 = vmatprep.subr.bf16.mxu0 %v10392_v36  ;;  %v2529_v36 = vsel %vm2473_vm8, %v8919_v58, %v2452_v15 }
 0x3c9   : > { %2627 = vrot.lane.b32.xlu1 %v10401_v43, %s6409_s14  ;;  %2697 = vrot.lane.b32.xlu0 %v9044_v27, %s6409_s14 }
 0x3ca   : > { %3926 = vmatprep.subr.bf16.mxu1 %v2733_v26 }
 0x3cb   : > { %3927 = vmatpush2.bf16.msra.mxu1 %v2732_v46  ;;  %v2692_v19 = vpop.permute.xlu1 %2691  ;;  %v2454_v7 = vpop.permute.xlu0 %2453  ;;  %3960 = vmatpush1.bf16.msra.mxu0 %v10389_v0 }
 0x3cc   : > { %v2530_v6 = vsel %vm2473_vm8, %v2452_v15, %v2454_v7  ;;  %v2767_v16 = vsel %vm2709_vm7, %v2690_v59, %v2692_v19  ;;  %v10247_v15 = vmov 0  }
 0x3cd   : > { %2459 = vrot.lane.b32.xlu1 %v9039_v10, %s6410_s15  ;;  %2629 = vrot.lane.b32.xlu0 %v10404_v2, %s6409_s14  ;;  %v3427_v25 = vsel %vm641_vm0, %v2767_v16, 0  ;;  %v10411_v16 = vld [vmem:[#allocation42_spill] sm:$0xff] }
 0x3ce   : > { %3928 = vmatprep.subr.bf16.mxu1 %v2530_v6  ;;  %6139 = vset.pattern.permute.xlu0 %v10247_v15 }
 0x3cf   : > { %3929 = vmatpush2.bf16.msra.mxu1 %v2529_v36  ;;  %v2213_v63 = vpop.permute.xlu1 %2212  ;;  %v9232_v50 = vpop.permute.xlu0 %2693  ;;  %6140 = vset.pattern.permute.xlu1 %v10247_v15  ;;  %v10421_v15 = vld [vmem:[#allocation74_spill] sm:$0xff] }
 0x3d0   : > { %v2768_v0 = vsel %vm2709_vm7, %v2692_v19, %v9232_v50  ;;  %v2290_v45 = vsel %vm2234_vm9, %v8943_v30, %v2213_v63 }
 0x3d1   : > { %2699 = vrot.lane.b32.xlu1 %v9060_v3, %s6409_s14  ;;  %2461 = vrot.lane.b32.xlu0 %v9113_v29, %s6410_s15 }
 0x3d2   : > { %6034 = vmatprep.subr.msk.bf16.mxu0 %vm641_vm0, %v2768_v0 }
 0x3d3   : > { %3966 = vmatpush2.bf16.msra.mxu0 %v3427_v25  ;;  %v2384_v58 = vpop.permute.xlu1 %2383  ;;  %v9242_v51 = vpop.permute.xlu0 %2214 }
 0x3d4   : > { %v2496_v33 = vsel %vm2473_vm8, %v8951_v12, %v2384_v58  ;;  %v2291_v54 = vsel %vm2234_vm9, %v2213_v63, %v9242_v51 }
 0x3d5   : > { %2220 = vrot.lane.b32.xlu1 %v8979_v48, %s6411_s16  ;;  %2701 = vrot.lane.b32.xlu0 %v9246_v20, %s6409_s14  ;;  %v3295_v12 = vsel %vm641_vm0, %v2290_v45, %v2496_v33 }
 0x3d7   : > { %v2624_v28 = vpop.permute.xlu1 %2623  ;;  %v2386_v59 = vpop.permute.xlu0 %2385 }
 0x3d8   : > { %v2497_v39 = vsel %vm2473_vm8, %v2384_v58, %v2386_v59  ;;  %v10412_v58 = vld [vmem:[#allocation44_spill] sm:$0xff] }
 0x3d9   : > { %2391 = vrot.lane.b32.xlu1 %v10400_v11, %s6410_s15  ;;  %2222 = vrot.lane.b32.xlu0 %v9044_v27, %s6411_s16  ;;  %v3299_v32 = vsel %vm641_vm0, %v2291_v54, %v2497_v39  ;;  %v2734_v11 = vsel %vm2709_vm7, %v2622_v37, %v2624_v28  ;;  %v9304_v39 = vpop.f32.mrf.mxu1 }
 0x3da   : > { %3930 = vmatprep.subr.bf16.mxu1 %v3299_v32  ;;  %10413 = vst [vmem:[#allocation3_spill] sm:$0xff] %v9304_v39 }
 0x3db   : > { %v2145_v26 = vpop.permute.xlu1 %2144  ;;  %3931 = vmatpush2.bf16.msra.mxu1 %v3295_v12  ;;  %v9266_v46 = vpop.permute.xlu0 %2625 }
 0x3dc   : > { %v2735_v30 = vsel %vm2709_vm7, %v2624_v28, %v9266_v46  ;;  %v9314_v12 = vpop.f32.mrf.mxu1 }
 0x3dd   : > { %2631 = vrot.lane.b32.xlu1 %v10405_v18, %s6409_s14  ;;  %2393 = vrot.lane.b32.xlu0 %v10402_v4, %s6410_s15  ;;  %v2257_v4 = vsel %vm2234_vm9, %v8992_v60, %v2145_v26  ;;  %v9298_v60 = vsel %vm641_vm0, %v10412_v58, %v9246_v20 }
 0x3de   : > { %3967 = vmatprep.subr.bf16.mxu0 %v2735_v30 }
 0x3df   : > { %3968 = vmatpush2.bf16.msra.mxu0 %v2734_v11  ;;  %v2456_v19 = vpop.permute.xlu1 %2455  ;;  %v9276_v6 = vpop.permute.xlu0 %2146 }
 0x3e0   : > { %v2258_v36 = vsel %vm2234_vm9, %v2145_v26, %v9276_v6  ;;  %v2531_v25 = vsel %vm2473_vm8, %v2454_v7, %v2456_v19 }
 0x3e1   : > { %2152 = vrot.lane.b32.xlu1 %v10401_v43, %s6411_s16  ;;  %2633 = vrot.lane.b32.xlu0 %v10411_v16, %s6409_s14 }
 0x3e2   : > { %3932 = vmatprep.subr.bf16.mxu1 %v2258_v36 }
 0x3e3   : > { %3933 = vmatpush2.bf16.msra.mxu1 %v2257_v4  ;;  %v1976_v63 = vpop.permute.xlu1 %1975  ;;  %v9286_v37 = vpop.permute.xlu0 %2457 }
 0x3e4   : > { %v2532_v0 = vsel %vm2473_vm8, %v2456_v19, %v9286_v37  ;;  %v2053_v7 = vsel %vm1997_vm3, %v9016_v34, %v1976_v63 }
 0x3e5   : > { %2463 = vrot.lane.b32.xlu1 %v9128_v22, %s6410_s15  ;;  %2154 = vrot.lane.b32.xlu0 %v10404_v2, %s6411_s16 }
 0x3e6   : > { %3969 = vmatprep.subr.bf16.mxu0 %v2532_v0 }
 0x3e7   : > { %3970 = vmatpush2.bf16.msra.mxu0 %v2531_v25  ;;  %v2217_v33 = vpop.permute.xlu1 %2216  ;;  %v9300_v28 = vpop.permute.xlu0 %1977  ;;  %v375_v25 = vld [vmem:[%s6481_s8 + $0x10c] sm:$0xff] }
 0x3e8   : > { %v2054_v54 = vsel %vm1997_vm3, %v1976_v63, %v9300_v28 }
 0x3e9   : > { %1983 = vrot.lane.b32.xlu1 %v8931_v62, %s6406_s11  ;;  %2465 = vrot.lane.b32.xlu0 %v9298_v60, %s6410_s15  ;;  %v3696_v62 = vpop.f32.mrf.mxu1 }
 0x3ea   : > { %3934 = vmatprep.subr.bf16.mxu1 %v2054_v54  ;;  %v9341_v54 = vpop.f32.mrf.mxu0 }
 0x3eb   : > { %3935 = vmatpush2.bf16.msra.mxu1 %v2053_v7  ;;  %v2388_v45 = vpop.permute.xlu1 %2387  ;;  %v9312_v32 = vpop.permute.xlu0 %2218  ;;  %10414 = vst [vmem:[#allocation2_spill] sm:$0xff] %v9341_v54 }
 0x3ec   : > { %v2498_v26 = vsel %vm2473_vm8, %v2386_v59, %v2388_v45  ;;  %v2293_v11 = vsel %vm2234_vm9, %v2217_v33, %v9312_v32  ;;  %v3697_v36 = vpop.f32.mrf.mxu1 }
 0x3ed   : > { %2224 = vrot.lane.b32.xlu1 %v9060_v3, %s6411_s16  ;;  %1985 = vrot.lane.b32.xlu0 %v9039_v10, %s6406_s11  ;;  %v2292_v10 = vsel %vm2234_vm9, %v9242_v51, %v2217_v33 }
 0x3ee   : > { %3937 = vmatmul.mubr.bf16.vlgmr.msra.gmra.mxu1 %v7329_v61  ;;  %v3303_v4 = vsel %vm641_vm0, %v2292_v10, %v2498_v26 }
 0x3ef   : > { %v1748_v30 = vpop.permute.xlu1 %1747  ;;  %v9322_v34 = vpop.permute.xlu0 %2389  ;;  %6037 = vmatprep.mubr.msk.bf16.mxu1 %vm3350_vm1, %v7078_v44 }
 0x3f0   : > { %v2499_v19 = vsel %vm2473_vm8, %v2388_v45, %v9322_v34  ;;  %v9351_v45 = vcombine.low %v375_v25, %v375_v25 }
 0x3f1   : > { %2395 = vrot.lane.b32.xlu1 %v10403_v1, %s6410_s15  ;;  %2226 = vrot.lane.b32.xlu0 %v9246_v20, %s6411_s16  ;;  %v3307_v59 = vsel %vm641_vm0, %v2293_v11, %v2499_v19  ;;  %v9347_v1 = vpop.f32.mrf.mxu0  ;;  %v1821_v19 = vsel %vm1761_vm2, %v9042_v24, %v1748_v30  ;;  %v10416_v24 = vld [vmem:[#allocation49_spill] sm:$0xff] }
 0x3f2   : > { %3971 = vmatprep.subr.bf16.mxu0 %v3307_v59  ;;  %10415 = vst [vmem:[#allocation84_spill] sm:$0xff] %v9347_v1 }
 0x3f3   : > { %v1916_v63 = vpop.permute.xlu1 %1915  ;;  %3972 = vmatpush2.bf16.msra.mxu0 %v3303_v4  ;;  %v9338_v0 = vpop.permute.xlu0 %1749 }
 0x3f4   : > { %v2024_v51 = vsel %vm1997_vm3, %v9056_v57, %v1916_v63  ;;  %v1822_v62 = vsel %vm1761_vm2, %v1748_v30, %v9338_v0  ;;  %v3737_v11 = vpop.f32.mrf.mxu0 }
 0x3f5   : > { %1755 = vrot.lane.b32.xlu1 %v9246_v20, %s6405_s10  ;;  %2397 = vrot.lane.b32.xlu0 %v10412_v58, %s6410_s15  ;;  %v3179_v36 = vsel %vm641_vm0, %v1821_v19, %v2024_v51 }
 0x3f6   : > { %v3738_v10 = vpop.f32.mrf.mxu0 }
 0x3f7   : > { %v2149_v33 = vpop.permute.xlu1 %2148  ;;  %v1918_v7 = vpop.permute.xlu0 %1917 }
 0x3f8   : > { %v2025_v26 = vsel %vm1997_vm3, %v1916_v63, %v1918_v7  ;;  %v2259_v30 = vsel %vm2234_vm9, %v9276_v6, %v2149_v33 }
 0x3f9   : > { %1923 = vrot.lane.b32.xlu1 %v10412_v58, %s6406_s11  ;;  %1757 = vrot.lane.b32.xlu0 %v9351_v45, %s6405_s10  ;;  %v3183_v57 = vsel %vm641_vm0, %v1822_v62, %v2025_v26 }
 0x3fa   : > { %3986 = vmatprep.subr.bf16.mxu1 %v3183_v57  ;;  %v10417_v57 = vld [vmem:[#allocation47_spill] sm:$0xff] }
 0x3fb   : > { %v1680_v59 = vpop.permute.xlu1 %1679  ;;  %3987 = vmatpush1.bf16.msra.mxu1 %v3179_v36  ;;  %v9364_v4 = vpop.permute.xlu0 %2150 }
 0x3fc   : > { %v2260_v63 = vsel %vm2234_vm9, %v2149_v33, %v9364_v4  ;;  %v1788_v11 = vsel %vm1761_vm2, %v9093_v56, %v1680_v59 }
 0x3fd   : > { %2156 = vrot.lane.b32.xlu1 %v10405_v18, %s6411_s16  ;;  %1925 = vrot.lane.b32.xlu0 %v10416_v24, %s6406_s11 }
 0x3fe   : > { %3973 = vmatprep.subr.bf16.mxu0 %v2260_v63 }
 0x3ff   : > { %3974 = vmatpush2.bf16.msra.mxu0 %v2259_v30  ;;  %v1980_v51 = vpop.permute.xlu1 %1979  ;;  %v9374_v62 = vpop.permute.xlu0 %1681 }
 0x400   : > { %v1789_v26 = vsel %vm1761_vm2, %v1680_v59, %v9374_v62  ;;  %v2055_v36 = vsel %vm1997_vm3, %v9300_v28, %v1980_v51  ;;  %v9409_v28 = vsel %vm641_vm0, %v10416_v24, %v9351_v45 }
 0x401   : > { %1687 = vrot.lane.b32.xlu1 %v10411_v16, %s6405_s10  ;;  %2158 = vrot.lane.b32.xlu0 %v10411_v16, %s6411_s16 }
 0x402   : > { %3988 = vmatprep.subr.bf16.mxu1 %v1789_v26 }
 0x403   : > { %3989 = vmatpush1.bf16.msra.mxu1 %v1788_v11  ;;  %v1512_v19 = vpop.permute.xlu1 %1511  ;;  %v9384_v6 = vpop.permute.xlu0 %1981 }
 0x404   : > { %v2056_v33 = vsel %vm1997_vm3, %v1980_v51, %v9384_v6  ;;  %v1585_v63 = vsel %vm1525_vm4, %v9115_v55, %v1512_v19 }
 0x405   : > { %1987 = vrot.lane.b32.xlu1 %v9113_v29, %s6406_s11  ;;  %1689 = vrot.lane.b32.xlu0 %v10417_v57, %s6405_s10  ;;  %v9402_v29 = vcombine.high %v375_v25, %v375_v25 }
 0x406   : > { %3975 = vmatprep.subr.bf16.mxu0 %v2056_v33  ;;  %v10418_v33 = vld [vmem:[#allocation48_spill] sm:$0xff] }
 0x407   : > { %3976 = vmatpush2.bf16.msra.mxu0 %v2055_v36  ;;  %v1752_v10 = vpop.permute.xlu1 %1751  ;;  %v9394_v56 = vpop.permute.xlu0 %1513 }
 0x408   : > { %v1586_v59 = vsel %vm1525_vm4, %v1512_v19, %v9394_v56  ;;  %v1823_v19 = vsel %vm1761_vm2, %v9338_v0, %v1752_v10 }
 0x409   : > { %1519 = vrot.lane.b32.xlu1 %v9298_v60, %s6407_s12  ;;  %1989 = vrot.lane.b32.xlu0 %v9128_v22, %s6406_s11 }
 0x40a   : > { %3990 = vmatprep.subr.bf16.mxu1 %v1586_v59  ;;  %3978 = vmatmul.mubr.bf16.vlgmr.msra.gmra.mxu0 %v7329_v61 }
 0x40b   : > { %3991 = vmatpush1.bf16.msra.mxu1 %v1585_v63  ;;  %v1920_v30 = vpop.permute.xlu1 %1919  ;;  %v9412_v51 = vpop.permute.xlu0 %1753  ;;  %6039 = vmatprep.mubr.msk.bf16.mxu0 %vm3350_vm1, %v7078_v44 }
 0x40c   : > { %v2026_v55 = vsel %vm1997_vm3, %v1918_v7, %v1920_v30  ;;  %v1824_v26 = vsel %vm1761_vm2, %v1752_v10, %v9412_v51 }
 0x40d   : > { %1759 = vrot.lane.b32.xlu1 %v9402_v29, %s6405_s10  ;;  %1521 = vrot.lane.b32.xlu0 %v9409_v28, %s6407_s12  ;;  %v3187_v36 = vsel %vm641_vm0, %v1823_v19, %v2026_v55  ;;  %v10419_v19 = vld [vmem:[#allocation46_spill] sm:$0xff] }
 0x40f   : > { %v1276_v22 = vpop.permute.xlu1 %1275  ;;  %v9421_v25 = vpop.permute.xlu0 %1921 }
 0x410   : > { %v2027_v11 = vsel %vm1997_vm3, %v1920_v30, %v9421_v25 }
 0x411   : > { %1283 = vrot.lane.b32.xlu1 %v9246_v20, %s6408_s13  ;;  %1927 = vrot.lane.b32.xlu0 %v10418_v33, %s6406_s11  ;;  %v3191_v7 = vsel %vm641_vm0, %v1824_v26, %v2027_v11  ;;  %v1349_v11 = vsel %vm1289_vm5, %v9147_v14, %v1276_v22 }
 0x412   : > { %4027 = vmatprep.subr.bf16.mxu0 %v3191_v7 }
 0x413   : > { %v1444_v59 = vpop.permute.xlu1 %1443  ;;  %4028 = vmatpush1.bf16.msra.mxu0 %v3187_v36  ;;  %v9435_v63 = vpop.permute.xlu0 %1277 }
 0x414   : > { %v1552_v0 = vsel %vm1525_vm4, %v9158_v49, %v1444_v59  ;;  %v1350_v26 = vsel %vm1289_vm5, %v1276_v22, %v9435_v63  ;;  %v9467_v22 = vsel %vm641_vm0, %v10418_v33, %v9402_v29 }
 0x415   : > { %1451 = vrot.lane.b32.xlu1 %v10412_v58, %s6407_s12  ;;  %1285 = vrot.lane.b32.xlu0 %v9351_v45, %s6408_s13  ;;  %v3047_v49 = vsel %vm641_vm0, %v1349_v11, %v1552_v0  ;;  %v9474_v11 = vpop.f32.mrf.mxu1 }
 0x417   : > { %v1684_v10 = vpop.permute.xlu1 %1683  ;;  %v1446_v30 = vpop.permute.xlu0 %1445 }
 0x418   : > { %v1553_v55 = vsel %vm1525_vm4, %v1444_v59, %v1446_v30  ;;  %v1790_v14 = vsel %vm1761_vm2, %v9374_v62, %v1684_v10 }
 0x419   : > { %1691 = vrot.lane.b32.xlu1 %v10419_v19, %s6405_s10  ;;  %1453 = vrot.lane.b32.xlu0 %v10416_v24, %s6407_s12  ;;  %v3051_v58 = vsel %vm641_vm0, %v1350_v26, %v1553_v55 }
 0x41a   : > { %3992 = vmatprep.subr.bf16.mxu1 %v3051_v58 }
 0x41b   : > { %v1208_v7 = vpop.permute.xlu1 %1207  ;;  %3993 = vmatpush1.bf16.msra.mxu1 %v3047_v49  ;;  %v9454_v36 = vpop.permute.xlu0 %1685 }
 0x41c   : > { %v1791_v59 = vsel %vm1761_vm2, %v1684_v10, %v9454_v36  ;;  %v1316_v62 = vsel %vm1289_vm5, %v9173_v31, %v1208_v7 }
 0x41d   : > { %1217 = vrot.lane.b32.xlu1 %v10417_v57, %s6408_s13  ;;  %1215 = vrot.lane.b32.xlu0 %v10411_v16, %s6408_s13 }
 0x41e   : > { %4029 = vmatprep.subr.bf16.mxu0 %v1791_v59  ;;  %v9482_v59 = vpop.f32.mrf.mxu1 }
 0x41f   : > { %4030 = vmatpush1.bf16.msra.mxu0 %v1790_v14  ;;  %v1516_v0 = vpop.permute.xlu1 %1515  ;;  %v1210_v26 = vpop.permute.xlu0 %1209 }
 0x420   : > { %v1317_v55 = vsel %vm1289_vm5, %v1208_v7, %v1210_v26  ;;  %v1587_v14 = vsel %vm1525_vm4, %v9394_v56, %v1516_v0  ;;  %v3778_v31 = vpop.f32.mrf.mxu1 }
 0x421   : > { %1047 = vrot.lane.b32.xlu1 %v9298_v60, %s6404_s9  ;;  %1523 = vrot.lane.b32.xlu0 %v9467_v22, %s6407_s12 }
 0x422   : > { %3994 = vmatprep.subr.bf16.mxu1 %v1317_v55  ;;  %v3779_v39 = vpop.f32.mrf.mxu1 }
 0x423   : > { %3995 = vmatpush1.bf16.msra.mxu1 %v1316_v62  ;;  %v1040_v10 = vpop.permute.xlu1 %1039  ;;  %v9478_v58 = vpop.permute.xlu0 %1517  ;;  %v10420_v62 = vld [vmem:[#allocation77_spill] sm:$0xff] }
 0x424   : > { %v1588_v49 = vsel %vm1525_vm4, %v1516_v0, %v9478_v58  ;;  %v1081_v54 = vsel %vm1053_vm6, %v10421_v15, %v10420_v62  ;;  %v1113_v56 = vsel %vm1053_vm6, %v9187_v40, %v1040_v10  ;;  %v1080_v0 = vsel %vm1053_vm6, %v10409_v9, %v10421_v15  ;;  %v9511_v40 = vpop.f32.mrf.mxu0 }
 0x425   : > { %1287 = vrot.lane.b32.xlu1 %v9402_v29, %s6408_s13  ;;  %1049 = vrot.lane.b32.xlu0 %v9409_v28, %s6404_s9  ;;  %10422 = vst [vmem:[#allocation82_spill] sm:$0xff] %v9511_v40  ;;  %v6247_v40 = vld [vmem:[%s6481_s8 + $0x88] ss:$0 sps:$4 sm:$0xff]  }
 0x426   : > { %4031 = vmatprep.subr.bf16.mxu0 %v1588_v49  ;;  %v9523_v31 = vpop.f32.mrf.mxu0 }
 0x427   : > { %4032 = vmatpush1.bf16.msra.mxu0 %v1587_v14  ;;  %v1280_v7 = vpop.permute.xlu1 %1279  ;;  %v1042_v55 = vpop.permute.xlu0 %1041  ;;  %v2919_v14 = vsel %vm641_vm0, %v8882_v21, %v1081_v54  ;;  %10423 = vst [vmem:[#allocation55_spill] sm:$0xff] %v9523_v31 }
 0x428   : > { %v1114_v1 = vsel %vm1053_vm6, %v1040_v10, %v1042_v55 }
 0x429   : > { %1219 = vrot.lane.b32.xlu1 %v10419_v19, %s6408_s13  ;;  %1455 = vrot.lane.b32.xlu0 %v10418_v33, %s6407_s12 }
 0x42a   : > { %3996 = vmatprep.subr.bf16.mxu1 %v1114_v1  ;;  %v2915_v1 = vsel %vm641_vm0, %v8702_v53, %v1080_v0  ;;  %v1351_v53 = vsel %vm1289_vm5, %v9435_v63, %v1280_v7  ;;  %v3819_v0 = vpop.f32.mrf.mxu0 }
 0x42b   : > { %3997 = vmatpush1.bf16.msra.mxu1 %v1113_v56  ;;  %v1448_v49 = vpop.permute.xlu1 %1447  ;;  %v9505_v39 = vpop.permute.xlu0 %1281 }
 0x42c   : > { %3998 = vmatprep.subr.bf16.mxu1 %v2919_v14  ;;  %v1554_v9 = vsel %vm1525_vm4, %v1446_v30, %v1448_v49  ;;  %v1352_v21 = vsel %vm1289_vm5, %v1280_v7, %v9505_v39  ;;  %v3820_v7 = vpop.f32.mrf.mxu0  ;;  %v9543_v14 = vld [vmem:[%s6481_s8 + $0x114] ss:$0 sps:$4 sm:$0xff]  }
 0x42d   : > { %2703 = vrot.lane.b32.xlu1 %v9351_v45, %s6409_s14  ;;  %1051 = vrot.lane.b32.xlu0 %v9467_v22, %s6404_s9  ;;  %v3055_v56 = vsel %vm641_vm0, %v1351_v53, %v1554_v9 }
 0x42f   : > { %3999 = vmatpush1.bf16.msra.mxu1 %v2915_v1  ;;  %v1212_v15 = vpop.permute.xlu1 %1211  ;;  %v9516_v10 = vpop.permute.xlu0 %1449 }
 0x430   : > { %v1555_v54 = vsel %vm1525_vm4, %v1448_v49, %v9516_v10  ;;  %4000 = vmatprep.subr.bf16.mxu1 %v10398_v35  ;;  %v1318_v1 = vsel %vm1289_vm5, %v1210_v26, %v1212_v15 }
 0x431   : > { %2635 = vrot.lane.b32.xlu1 %v10417_v57, %s6409_s14  ;;  %2705 = vrot.lane.b32.xlu0 %v9402_v29, %s6409_s14  ;;  %v3059_v30 = vsel %vm641_vm0, %v1352_v21, %v1555_v54  ;;  %v10424_v21 = vld [vmem:[#allocation79_spill] sm:$0xff]  ;;  %v10425_v54 = vld [vmem:[#allocation76_spill] sm:$0xff] }
 0x432   : > { %4033 = vmatprep.subr.bf16.mxu0 %v3059_v30  ;;  %v1083_v53 = vsel %vm1053_vm6, %v10425_v54, %v10424_v21 }
 0x433   : > { %v1044_v49 = vpop.permute.xlu1 %1043  ;;  %4034 = vmatpush1.bf16.msra.mxu0 %v3055_v56  ;;  %v9533_v35 = vpop.permute.xlu0 %1213  ;;  %4001 = vmatpush1.bf16.msra.mxu1 %v10393_v42  ;;  %v2927_v7 = vsel %vm641_vm0, %v9044_v27, %v1083_v53 }
 0x434   : > { %v1319_v63 = vsel %vm1289_vm5, %v1212_v15, %v9533_v35  ;;  %v1115_v26 = vsel %vm1053_vm6, %v1042_v55, %v1044_v49  ;;  %v1082_v15 = vsel %vm1053_vm6, %v10420_v62, %v10425_v54 }
 0x435   : > { %2467 = vrot.lane.b32.xlu1 %v9409_v28, %s6410_s15  ;;  %2637 = vrot.lane.b32.xlu0 %v10419_v19, %s6409_s14 }
 0x436   : > { %4035 = vmatprep.subr.bf16.mxu0 %v1319_v63 }
 0x437   : > { %v2696_v9 = vpop.permute.xlu1 %2695  ;;  %4036 = vmatpush1.bf16.msra.mxu0 %v1318_v1  ;;  %v9546_v42 = vpop.permute.xlu0 %1045  ;;  %v6246_v1 = vld [vmem:[%s6476_s29 + $0x88] ss:$0 sps:$4 sm:$0xff]   ;;  %s6102_s29 = smul.u32 132, %s10441_s21 }
 0x438   : > { %v1116_v30 = vsel %vm1053_vm6, %v1044_v49, %v9546_v42  ;;  %v2769_v56 = vsel %vm2709_vm7, %v9232_v50, %v2696_v9  ;;  %v2923_v50 = vsel %vm641_vm0, %v8979_v48, %v1082_v15  ;;  %v779_v49 = vsel %vm641_vm0, %v6246_v1, %v6247_v40 }
 0x439   : > { %2707 = vrot.lane.b32.xlu1 %v9543_v14, %s6409_s14  ;;  %2469 = vrot.lane.b32.xlu0 %v9467_v22, %s6410_s15  ;;  %v3433_v55 = vsel %vm641_vm0, %v2769_v56, 0  ;;  %v2334_v48 = vrot.slane %v779_v49, 4  ;;  %s10000_s7 = scalar_lea.vmem %s10112_s6, %s6102_s29 }
 0x43a   : > { %4037 = vmatprep.subr.bf16.mxu0 %v1116_v30 }
 0x43b   : > { %v2628_v0 = vpop.permute.xlu1 %2627  ;;  %4038 = vmatpush1.bf16.msra.mxu0 %v1115_v26  ;;  %v2698_v63 = vpop.permute.xlu0 %2697 }
 0x43c   : > { %v2770_v31 = vsel %vm2709_vm7, %v2696_v9, %v2698_v63  ;;  %4039 = vmatprep.subr.bf16.mxu0 %v2927_v7 }
 0x43d   : > { %2230 = vrot.lane.b32.xlu1 %v9402_v29, %s6411_s16  ;;  %2228 = vrot.lane.b32.xlu0 %v9351_v45, %s6411_s16  ;;  %v2736_v29 = vsel %vm2709_vm7, %v9266_v46, %v2628_v0  ;;  %v2336_v46 = vsel %vm641_vm0, %v2334_v48, %v9543_v14 }
 0x43e   : > { %6036 = vmatprep.subr.msk.bf16.mxu1 %vm641_vm0, %v2770_v31 }
 0x43f   : > { %4007 = vmatpush2.bf16.msra.mxu1 %v3433_v55  ;;  %v2460_v27 = vpop.permute.xlu1 %2459  ;;  %4040 = vmatpush1.bf16.msra.mxu0 %v2923_v50  ;;  %v2630_v62 = vpop.permute.xlu0 %2629 }
 0x440   : > { %v2737_v9 = vsel %vm2709_vm7, %v2628_v0, %v2630_v62  ;;  %4041 = vmatprep.subr.bf16.mxu0 %v10404_v2  ;;  %v2533_v2 = vsel %vm2473_vm8, %v9286_v37, %v2460_v27 }
 0x441   : > { %2401 = vrot.lane.b32.xlu1 %v10418_v33, %s6410_s15  ;;  %2399 = vrot.lane.b32.xlu0 %v10416_v24, %s6410_s15 }
 0x442   : > { %4008 = vmatprep.subr.bf16.mxu1 %v2737_v9 }
 0x443   : > { %4009 = vmatpush2.bf16.msra.mxu1 %v2736_v29  ;;  %v2700_v31 = vpop.permute.xlu1 %2699  ;;  %v2462_v54 = vpop.permute.xlu0 %2461  ;;  %4042 = vmatpush1.bf16.msra.mxu0 %v10401_v43 }
 0x444   : > { %v2534_v40 = vsel %vm2473_vm8, %v2460_v27, %v2462_v54  ;;  %v2771_v24 = vsel %vm2709_vm7, %v2698_v63, %v2700_v31  ;;  %v9631_v29 = vpop.f32.mrf.mxu1 }
 0x445   : > { %2160 = vrot.lane.b32.xlu1 %v10417_v57, %s6411_s16  ;;  %2639 = vrot.lane.b32.xlu0 %v779_v49, %s6409_s14  ;;  %v3439_v37 = vsel %vm641_vm0, %v2771_v24, 0 }
 0x446   : > { %4010 = vmatprep.subr.bf16.mxu1 %v2534_v40 }
 0x447   : > { %4011 = vmatpush2.bf16.msra.mxu1 %v2533_v2  ;;  %v2221_v33 = vpop.permute.xlu1 %2220  ;;  %v9595_v53 = vpop.permute.xlu0 %2701 }
 0x448   : > { %v2772_v43 = vsel %vm2709_vm7, %v2700_v31, %v9595_v53  ;;  %v2294_v7 = vsel %vm2234_vm9, %v9312_v32, %v2221_v33  ;;  %v9639_v31 = vpop.f32.mrf.mxu1 }
 0x449   : > { %2471 = vrot.lane.b32.xlu1 %v2336_v46, %s6410_s15  ;;  %2162 = vrot.lane.b32.xlu0 %v10419_v19, %s6411_s16 }
 0x44a   : > { %6038 = vmatprep.subr.msk.bf16.mxu0 %vm641_vm0, %v2772_v43  ;;  %v3860_v2 = vpop.f32.mrf.mxu1 }
 0x44b   : > { %4048 = vmatpush2.bf16.msra.mxu0 %v3439_v37  ;;  %v2392_v30 = vpop.permute.xlu1 %2391  ;;  %v2223_v26 = vpop.permute.xlu0 %2222 }
 0x44c   : > { %v2500_v15 = vsel %vm2473_vm8, %v9322_v34, %v2392_v30  ;;  %v2295_v19 = vsel %vm2234_vm9, %v2221_v33, %v2223_v26  ;;  %v3861_v33 = vpop.f32.mrf.mxu1 }
 0x44d   : > { %1993 = vrot.lane.b32.xlu1 %v9409_v28, %s6406_s11  ;;  %1991 = vrot.lane.b32.xlu0 %v9298_v60, %s6406_s11  ;;  %v3311_v60 = vsel %vm641_vm0, %v2294_v7, %v2500_v15 }
 0x44f   : > { %v2632_v56 = vpop.permute.xlu1 %2631  ;;  %v2394_v0 = vpop.permute.xlu0 %2393 }
 0x450   : > { %v2501_v63 = vsel %vm2473_vm8, %v2392_v30, %v2394_v0  ;;  %v2738_v32 = vsel %vm2709_vm7, %v2630_v62, %v2632_v56 }
 0x451   : > { %2403 = vrot.lane.b32.xlu1 %v2334_v48, %s6410_s15  ;;  %2232 = vrot.lane.b32.xlu0 %v9543_v14, %s6411_s16  ;;  %v3315_v28 = vsel %vm641_vm0, %v2295_v19, %v2501_v63  ;;  %v3338_v14 = vld [vmem:[%s10109_s3] sm:$0xff] }
 0x452   : > { %4012 = vmatprep.subr.bf16.mxu1 %v3315_v28  ;;  %v9645_v37 = vpop.f32.mrf.mxu0 }
 0x453   : > { %v2153_v34 = vpop.permute.xlu1 %2152  ;;  %4013 = vmatpush2.bf16.msra.mxu1 %v3311_v60  ;;  %v9619_v1 = vpop.permute.xlu0 %2633 }
 0x454   : > { %v2739_v55 = vsel %vm2709_vm7, %v2632_v56, %v9619_v1  ;;  %v2261_v48 = vsel %vm2234_vm9, %v9364_v4, %v2153_v34  ;;  %v9649_v56 = vpop.f32.mrf.mxu0 }
 0x455   : > { %1995 = vrot.lane.b32.xlu1 %v9467_v22, %s6406_s11  ;;  %2164 = vrot.lane.b32.xlu0 %v779_v49, %s6411_s16 }
 0x456   : > { %4049 = vmatprep.subr.bf16.mxu0 %v2739_v55 }
 0x457   : > { %4050 = vmatpush2.bf16.msra.mxu0 %v2738_v32  ;;  %v2464_v50 = vpop.permute.xlu1 %2463  ;;  %v2155_v27 = vpop.permute.xlu0 %2154 }
 0x458   : > { %v2262_v9 = vsel %vm2234_vm9, %v2153_v34, %v2155_v27  ;;  %v2535_v40 = vsel %vm2473_vm8, %v2462_v54, %v2464_v50  ;;  %v3901_v54 = vpop.f32.mrf.mxu0 }
 0x459   : > { %3341 = vperm.xlu0 %6139, %v3338_v14   ;;  %4014 = vmatprep.subr.bf16.mxu1 %v2262_v9 }
 0x45a   : > { %4015 = vmatpush2.bf16.msra.mxu1 %v2261_v48  ;;  %v3902_v60 = vpop.f32.mrf.mxu0 }
 0x45b   : > { %v1984_v22 = vpop.permute.xlu1 %1983  ;;  %v9635_v62 = vpop.permute.xlu0 %2465 }
 0x45c   : > { %v2536_v49 = vsel %vm2473_vm8, %v2464_v50, %v9635_v62  ;;  %v2057_v43 = vsel %vm1997_vm3, %v9384_v6, %v1984_v22 }
 0x45d   : > { %4051 = vmatprep.subr.bf16.mxu0 %v2536_v49 }
 0x45e   : > { %4052 = vmatpush2.bf16.msra.mxu0 %v2535_v40 }
 0x45f   : > { %v2225_v46 = vpop.permute.xlu1 %2224  ;;  %v1986_v24 = vpop.permute.xlu0 %1985 }
 0x460   : > { %v2058_v4 = vsel %vm1997_vm3, %v1984_v22, %v1986_v24  ;;  %v2296_v34 = vsel %vm2234_vm9, %v2223_v26, %v2225_v46 }
 0x461   : > { %4016 = vmatprep.subr.bf16.mxu1 %v2058_v4 }
 0x462   : > { %4017 = vmatpush2.bf16.msra.mxu1 %v2057_v43 }
 0x463   : > { %v2396_v30 = vpop.permute.xlu1 %2395  ;;  %v9647_v15 = vpop.permute.xlu0 %2226 }
 0x464   : > { %v2502_v19 = vsel %vm2473_vm8, %v2394_v0, %v2396_v30  ;;  %v2297_v6 = vsel %vm2234_vm9, %v2225_v46, %v9647_v15 }
 0x465   : > { %4019 = vmatmul.mubr.bf16.vlgmr.msra.gmra.mxu1 %v7329_v61  ;;  %v3319_v32 = vsel %vm641_vm0, %v2296_v34, %v2502_v19  ;;  %v10426_v34 = vmov 0  }
 0x466   : > { %6041 = vmatprep.mubr.msk.bf16.mxu1 %vm3350_vm1, %v7078_v44 }
 0x467   : > { %v1756_v63 = vpop.permute.xlu1 %1755  ;;  %v9655_v7 = vpop.permute.xlu0 %2397 }
 0x468   : > { %v2503_v28 = vsel %vm2473_vm8, %v2396_v30, %v9655_v7  ;;  %v1825_v26 = vsel %vm1761_vm2, %v9412_v51, %v1756_v63 }
 0x469   : > { %v3323_v55 = vsel %vm641_vm0, %v2297_v6, %v2503_v28 }
 0x46a   : > { %4053 = vmatprep.subr.bf16.mxu0 %v3323_v55 }
 0x46b   : > { %v1924_v14 = vpop.permute.xlu1 %1923  ;;  %4054 = vmatpush2.bf16.msra.mxu0 %v3319_v32  ;;  %v1758_v0 = vpop.permute.xlu0 %1757 }
 0x46c   : > { %v2028_v50 = vsel %vm1997_vm3, %v9421_v25, %v1924_v14  ;;  %v1826_v22 = vsel %vm1761_vm2, %v1756_v63, %v1758_v0 }
 0x46d   : > { %v3195_v2 = vsel %vm641_vm0, %v1825_v26, %v2028_v50 }
 0x46f   : > { %v2157_v9 = vpop.permute.xlu1 %2156  ;;  %v1926_v48 = vpop.permute.xlu0 %1925 }
 0x470   : > { %v2029_v49 = vsel %vm1997_vm3, %v1924_v14, %v1926_v48  ;;  %v2263_v33 = vsel %vm2234_vm9, %v2155_v27, %v2157_v9 }
 0x471   : > { %v3199_v40 = vsel %vm641_vm0, %v1826_v22, %v2029_v49 }
 0x472   : > { %4068 = vmatprep.subr.bf16.mxu1 %v3199_v40 }
 0x473   : > { %v1688_v46 = vpop.permute.xlu1 %1687  ;;  %4069 = vmatpush1.bf16.msra.mxu1 %v3195_v2  ;;  %v9672_v4 = vpop.permute.xlu0 %2158 }
 0x474   : > { %v2264_v25 = vsel %vm2234_vm9, %v2157_v9, %v9672_v4  ;;  %v1792_v54 = vsel %vm1761_vm2, %v9454_v36, %v1688_v46 }
 0x475   : > { %4055 = vmatprep.subr.bf16.mxu0 %v2264_v25 }
 0x476   : > { %4056 = vmatpush2.bf16.msra.mxu0 %v2263_v33 }
 0x477   : > { %v1988_v43 = vpop.permute.xlu1 %1987  ;;  %v1690_v30 = vpop.permute.xlu0 %1689 }
 0x478   : > { %v1793_v51 = vsel %vm1761_vm2, %v1688_v46, %v1690_v30  ;;  %v2059_v28 = vsel %vm1997_vm3, %v1986_v24, %v1988_v43 }
 0x479   : > { %4070 = vmatprep.subr.bf16.mxu1 %v1793_v51 }
 0x47a   : > { %4071 = vmatpush1.bf16.msra.mxu1 %v1792_v54 }
 0x47b   : > { %v1520_v19 = vpop.permute.xlu1 %1519  ;;  %v9680_v63 = vpop.permute.xlu0 %1989 }
 0x47c   : > { %v2060_v6 = vsel %vm1997_vm3, %v1988_v43, %v9680_v63  ;;  %v1589_v36 = vsel %vm1525_vm4, %v9478_v58, %v1520_v19 }
 0x47d   : > { %4057 = vmatprep.subr.bf16.mxu0 %v2060_v6  ;;  %v10428_v6 = vld [vmem:[#allocation78_spill] sm:$0xff] }
 0x47e   : > { %4058 = vmatpush2.bf16.msra.mxu0 %v2059_v28 }
 0x47f   : > { %v1760_v27 = vpop.permute.xlu1 %1759  ;;  %v1522_v60 = vpop.permute.xlu0 %1521  ;;  %4109 = vmatprep.subr.bf16.mxu0 %v10426_v34 }
 0x480   : > { %v1590_v55 = vsel %vm1525_vm4, %v1520_v19, %v1522_v60  ;;  %v1827_v14 = vsel %vm1761_vm2, %v1758_v0, %v1760_v27  ;;  %v10427_v19 = vld [vmem:[#allocation81_spill] sm:$0xff] }
 0x481   : > { %4060 = vmatmul.mubr.bf16.vlgmr.msra.gmra.mxu0 %v7329_v61  ;;  %4072 = vmatprep.subr.bf16.mxu1 %v1590_v55  ;;  %v1085_v28 = vsel %vm1053_vm6, %v10428_v6, %v10427_v19 }
 0x482   : > { %4073 = vmatpush1.bf16.msra.mxu1 %v1589_v36  ;;  %6042 = vmatprep.mubr.msk.bf16.mxu0 %vm3350_vm1, %v7078_v44 }
 0x483   : > { %v1284_v32 = vpop.permute.xlu1 %1283  ;;  %v1928_v24 = vpop.permute.xlu0 %1927 }
 0x484   : > { %v2030_v50 = vsel %vm1997_vm3, %v1926_v48, %v1928_v24  ;;  %v1353_v48 = vsel %vm1289_vm5, %v9505_v39, %v1284_v32 }
 0x485   : > { %v3203_v9 = vsel %vm641_vm0, %v1827_v14, %v2030_v50 }
 0x486   : > { %4110 = vmatpush1.bf16.msra.mxu0 %v3203_v9 }
 0x487   : > { %v1452_v22 = vpop.permute.xlu1 %1451  ;;  %v1286_v49 = vpop.permute.xlu0 %1285  ;;  %4111 = vmatprep.subr.bf16.mxu0 %v10426_v34 }
 0x488   : > { %v1556_v58 = vsel %vm1525_vm4, %v9516_v10, %v1452_v22  ;;  %v1354_v44 = vsel %vm1289_vm5, %v1284_v32, %v1286_v49 }
 0x489   : > { %v3063_v25 = vsel %vm641_vm0, %v1353_v48, %v1556_v58 }
 0x48b   : > { %v1692_v26 = vpop.permute.xlu1 %1691  ;;  %v1454_v40 = vpop.permute.xlu0 %1453 }
 0x48c   : > { %v1794_v2 = vsel %vm1761_vm2, %v1690_v30, %v1692_v26  ;;  %v1557_v0 = vsel %vm1525_vm4, %v1452_v22, %v1454_v40 }
 0x48d   : > { %4112 = vmatpush1.bf16.msra.mxu0 %v1794_v2  ;;  %v3067_v46 = vsel %vm641_vm0, %v1354_v44, %v1557_v0  ;;  %v10429_v2 = vld [vmem:[#allocation80_spill] sm:$0xff] }
 0x48e   : > { %4074 = vmatprep.subr.bf16.mxu1 %v3067_v46  ;;  %4113 = vmatprep.subr.bf16.mxu0 %v10426_v34  ;;  %v1086_v0 = vsel %vm1053_vm6, %v10427_v19, %v10429_v2 }
 0x48f   : > { %v1218_v10 = vpop.permute.xlu1 %1217  ;;  %4075 = vmatpush1.bf16.msra.mxu1 %v3063_v25  ;;  %v1216_v33 = vpop.permute.xlu0 %1215  ;;  %v2939_v25 = vsel %vm641_vm0, %v9351_v45, %v1086_v0 }
 0x490   : > { %v1321_v43 = vsel %vm1289_vm5, %v1216_v33, %v1218_v10  ;;  %v1320_v30 = vsel %vm1289_vm5, %v9533_v35, %v1216_v33  ;;  %v1084_v35 = vsel %vm1053_vm6, %v10424_v21, %v10428_v6 }
 0x491   : > { %4076 = vmatprep.subr.bf16.mxu1 %v1321_v43  ;;  %v2931_v22 = vsel %vm641_vm0, %v9060_v3, %v1084_v35 }
 0x493   : > { %v1048_v51 = vpop.permute.xlu1 %1047  ;;  %4077 = vmatpush1.bf16.msra.mxu1 %v1320_v30  ;;  %v1524_v39 = vpop.permute.xlu0 %1523 }
 0x494   : > { %v1591_v54 = vsel %vm1525_vm4, %v1522_v60, %v1524_v39  ;;  %v1117_v32 = vsel %vm1053_vm6, %v9546_v42, %v1048_v51  ;;  %v2935_v60 = vsel %vm641_vm0, %v9246_v20, %v1085_v28 }
 0x495   : > { %4114 = vmatpush1.bf16.msra.mxu0 %v1591_v54 }
 0x496   : > { %4115 = vmatprep.subr.bf16.mxu0 %v10426_v34 }
 0x497   : > { %v1288_v27 = vpop.permute.xlu1 %1287  ;;  %v1050_v55 = vpop.permute.xlu0 %1049 }
 0x498   : > { %v1118_v36 = vsel %vm1053_vm6, %v1048_v51, %v1050_v55  ;;  %v1355_v50 = vsel %vm1289_vm5, %v1286_v49, %v1288_v27 }
 0x499   : > { %4078 = vmatprep.subr.bf16.mxu1 %v1118_v36 }
 0x49a   : > { %4079 = vmatpush1.bf16.msra.mxu1 %v1117_v32 }
 0x49b   : > { %v1220_v24 = vpop.permute.xlu1 %1219  ;;  %4080 = vmatprep.subr.bf16.mxu1 %v2935_v60  ;;  %v1456_v14 = vpop.permute.xlu0 %1455 }
 0x49c   : > { %v1558_v9 = vsel %vm1525_vm4, %v1454_v40, %v1456_v14  ;;  %v1322_v20 = vsel %vm1289_vm5, %v1218_v10, %v1220_v24 }
 0x49d   : > { %v3071_v42 = vsel %vm641_vm0, %v1355_v50, %v1558_v9 }
 0x49e   : > { %4081 = vmatpush1.bf16.msra.mxu1 %v2931_v22  ;;  %4116 = vmatpush1.bf16.msra.mxu0 %v3071_v42 }
 0x49f   : > { %v2704_v58 = vpop.permute.xlu1 %2703  ;;  %v1052_v21 = vpop.permute.xlu0 %1051  ;;  %4082 = vmatprep.subr.bf16.mxu1 %v10411_v16  ;;  %4117 = vmatprep.subr.bf16.mxu0 %v10426_v34 }
 0x4a0   : > { %v2773_v49 = vsel %vm2709_vm7, %v9595_v53, %v2704_v58  ;;  %v1119_v16 = vsel %vm1053_vm6, %v1050_v55, %v1052_v21 }
 0x4a1   : > { %v3445_v44 = vsel %vm641_vm0, %v2773_v49, 0 }
 0x4a2   : > { %4083 = vmatpush1.bf16.msra.mxu1 %v10405_v18  ;;  %4118 = vmatpush1.bf16.msra.mxu0 %v1322_v20 }
 0x4a3   : > { %v2636_v26 = vpop.permute.xlu1 %2635  ;;  %v2706_v3 = vpop.permute.xlu0 %2705  ;;  %4119 = vmatprep.subr.bf16.mxu0 %v10426_v34 }
 0x4a4   : > { %v2774_v40 = vsel %vm2709_vm7, %v2704_v58, %v2706_v3  ;;  %v2740_v46 = vsel %vm2709_vm7, %v9619_v1, %v2636_v26 }
 0x4a5   : > { %6040 = vmatprep.subr.msk.bf16.mxu1 %vm641_vm0, %v2774_v40 }
 0x4a6   : > { %4089 = vmatpush2.bf16.msra.mxu1 %v3445_v44  ;;  %4120 = vmatpush1.bf16.msra.mxu0 %v1119_v16 }
 0x4a7   : > { %v2468_v18 = vpop.permute.xlu1 %2467  ;;  %v2638_v53 = vpop.permute.xlu0 %2637  ;;  %4121 = vmatprep.subr.bf16.mxu0 %v10426_v34 }
 0x4a8   : > { %v2741_v48 = vsel %vm2709_vm7, %v2636_v26, %v2638_v53  ;;  %v2537_v30 = vsel %vm2473_vm8, %v9635_v62, %v2468_v18 }
 0x4a9   : > { %4090 = vmatprep.subr.bf16.mxu1 %v2741_v48 }
 0x4aa   : > { %4091 = vmatpush2.bf16.msra.mxu1 %v2740_v46  ;;  %4122 = vmatpush1.bf16.msra.mxu0 %v2939_v25 }
 0x4ab   : > { %v2708_v10 = vpop.permute.xlu1 %2707  ;;  %v2470_v33 = vpop.permute.xlu0 %2469  ;;  %4123 = vmatprep.subr.bf16.mxu0 %v10426_v34 }
 0x4ac   : > { %v2538_v43 = vsel %vm2473_vm8, %v2468_v18, %v2470_v33  ;;  %v2775_v51 = vsel %vm2709_vm7, %v2706_v3, %v2708_v10 }
 0x4ad   : > { %4092 = vmatprep.subr.bf16.mxu1 %v2538_v43  ;;  %v3451_v19 = vsel %vm641_vm0, %v2775_v51, 0 }
 0x4ae   : > { %4093 = vmatpush2.bf16.msra.mxu1 %v2537_v30  ;;  %4124 = vmatpush1.bf16.msra.mxu0 %v10417_v57  ;;  %v9753_v1 = vpop.f32.mrf.mxu1 }
 0x4af   : > { %v2231_v45 = vpop.permute.xlu1 %2230  ;;  %v2229_v39 = vpop.permute.xlu0 %2228  ;;  %4129 = vmatprep.subr.bf16.mxu0 %v10426_v34 }
 0x4b0   : > { %v9756_v54 = vpop.f32.mrf.mxu1  ;;  %v2298_v27 = vsel %vm2234_vm9, %v9647_v15, %v2229_v39  ;;  %v2299_v57 = vsel %vm2234_vm9, %v2229_v39, %v2231_v45 }
 0x4b2   : > { %4130 = vmatpush2.bf16.msra.mxu0 %v3451_v19  ;;  %v3942_v6 = vpop.f32.mrf.mxu1 }
 0x4b3   : > { %v2402_v28 = vpop.permute.xlu1 %2401  ;;  %v2400_v62 = vpop.permute.xlu0 %2399  ;;  %4131 = vmatprep.subr.bf16.mxu0 %v10426_v34 }
 0x4b4   : > { %v2504_v55 = vsel %vm2473_vm8, %v9655_v7, %v2400_v62  ;;  %v2505_v36 = vsel %vm2473_vm8, %v2400_v62, %v2402_v28  ;;  %v3943_v32 = vpop.f32.mrf.mxu1 }
 0x4b5   : > { %v3331_v35 = vsel %vm641_vm0, %v2299_v57, %v2505_v36  ;;  %v3327_v60 = vsel %vm641_vm0, %v2298_v27, %v2504_v55 }
 0x4b6   : > { %4094 = vmatprep.subr.bf16.mxu1 %v3331_v35 }
 0x4b7   : > { %v2161_v24 = vpop.permute.xlu1 %2160  ;;  %4095 = vmatpush2.bf16.msra.mxu1 %v3327_v60  ;;  %v2640_v14 = vpop.permute.xlu0 %2639 }
 0x4b8   : > { %v2742_v50 = vsel %vm2709_vm7, %v2638_v53, %v2640_v14  ;;  %v2265_v42 = vsel %vm2234_vm9, %v9672_v4, %v2161_v24  ;;  %v9822_v14 = vld [vmem:[%s10110_s4] sm:$0x1] }
 0x4b9   : > { %4132 = vmatpush2.bf16.msra.mxu0 %v2742_v50 }
 0x4ba   : > { %4133 = vmatprep.subr.bf16.mxu0 %v10426_v34 }
 0x4bb   : > { %v2472_v15 = vpop.permute.xlu1 %2471  ;;  %v2163_v9 = vpop.permute.xlu0 %2162 }
 0x4bc   : > { %v2539_v7 = vsel %vm2473_vm8, %v2470_v33, %v2472_v15  ;;  %v2266_v22 = vsel %vm2234_vm9, %v2161_v24, %v2163_v9 }
 0x4bd   : > { %4096 = vmatprep.subr.bf16.mxu1 %v2266_v22  ;;  %4134 = vmatpush2.bf16.msra.mxu0 %v2539_v7 }
 0x4be   : > { %4097 = vmatpush2.bf16.msra.mxu1 %v2265_v42  ;;  %4135 = vmatprep.subr.bf16.mxu0 %v10426_v34 }
 0x4bf   : > { %v1994_v58 = vpop.permute.xlu1 %1993  ;;  %v1992_v21 = vpop.permute.xlu0 %1991 }
 0x4c0   : > { %v2061_v20 = vsel %vm1997_vm3, %v9680_v63, %v1992_v21  ;;  %v2062_v49 = vsel %vm1997_vm3, %v1992_v21, %v1994_v58 }
 0x4c1   : > { %4098 = vmatprep.subr.bf16.mxu1 %v2062_v49 }
 0x4c2   : > { %4099 = vmatpush2.bf16.msra.mxu1 %v2061_v20 }
 0x4c3   : > { %v2404_v26 = vpop.permute.xlu1 %2403  ;;  %v2233_v3 = vpop.permute.xlu0 %2232 }
 0x4c4   : > { %v2506_v40 = vsel %vm2473_vm8, %v2402_v28, %v2404_v26  ;;  %v2300_v4 = vsel %vm2234_vm9, %v2231_v45, %v2233_v3 }
 0x4c5   : > { %4101 = vmatmul.mubr.bf16.vlgmr.msra.gmra.mxu1 %v7329_v61  ;;  %v3335_v44 = vsel %vm641_vm0, %v2300_v4, %v2506_v40 }
 0x4c6   : > { %4136 = vmatpush2.bf16.msra.mxu0 %v3335_v44  ;;  %4357 = vmatprep.mubr.bf16.mxu1 %v10426_v34  ;;  %v10430_v44 = vld [vmem:[#allocation50_spill] sm:$0xff] }
 0x4c7   : > { %v2165_v16 = vpop.permute.xlu0 %2164  ;;  %4137 = vmatprep.subr.bf16.mxu0 %v10426_v34  ;;  %v1996_v2 = vpop.permute.xlu1 %1995 }
 0x4c8   : > { %v2267_v63 = vsel %vm2234_vm9, %v2163_v9, %v2165_v16  ;;  %v2063_v53 = vsel %vm1997_vm3, %v1994_v58, %v1996_v2 }
 0x4ca   : > { %4138 = vmatpush2.bf16.msra.mxu0 %v2267_v63  ;;  %v9785_v0 = vpop.f32.mrf.mxu0 }
 0x4cb   : > { %4139 = vmatprep.subr.bf16.mxu0 %v10426_v34 }
 0x4cc   : > { %v9788_v18 = vpop.f32.mrf.mxu0 }
 0x4ce   : > { %4140 = vmatpush2.bf16.msra.mxu0 %v2063_v53  ;;  %v3983_v48 = vpop.f32.mrf.mxu0 }
 0x4d0   : > { %v3984_v46 = vpop.f32.mrf.mxu0 }
 0x4d1   : > { %4142 = vmatmul.mubr.bf16.vlgmr.msra.gmra.mxu0 %v7329_v61 }
 0x4d2   : > { %4644 = vmatprep.mubr.bf16.mxu0 %v10426_v34 }
 0x4d4   : > { %v9793_v25 = vpop.permute.xlu0 %3341 }
 0x4d5   : > { %v3857_v10 = vadd.f32 %v9631_v29, %v9793_v25  ;;  %v3490_v33 = vadd.f32 %v8851_v13, %v9793_v25  ;;  %v3777_v43 = vadd.f32 %v9482_v59, %v9793_v25  ;;  %v3859_v30 = vadd.f32 %v9639_v31, %v9793_v25 }
 0x4d6   : > { %v3488_v51 = vadd.f32 %v8841_v47, %v9793_v25  ;;  %v3775_v61 = vadd.f32 %v9474_v11, %v9793_v25  ;;  %v3531_v45 = vadd.f32 %v8971_v41, %v9793_v25  ;;  %v3529_v29 = vadd.f32 %v8965_v23, %v9793_v25 }
 0x4d7   : > { %v4167_v39 = vmax.f32 %v3857_v10, 0.0  ;;  %v4150_v13 = vmax.f32 %v3490_v33, 0.0  ;;  %v4164_v19 = vmax.f32 %v3777_v43, 0.0  ;;  %v4168_v6 = vmax.f32 %v3859_v30, 0.0  ;;  %v10431_v43 = vld [vmem:[#allocation3_spill] sm:$0xff] }
 0x4d8   : > { %v4149_v59 = vmax.f32 %v3488_v51, 0.0  ;;  %v4163_v28 = vmax.f32 %v3775_v61, 0.0  ;;  %v4152_v62 = vmax.f32 %v3531_v45, 0.0  ;;  %v4151_v31 = vmax.f32 %v3529_v29, 0.0  ;;  %v10432_v45 = vld [vmem:[#allocation84_spill] sm:$0xff] }
 0x4d9   : > { %v4183_v27 = vpack.c.bf16 %v4150_v13, %v4150_v13  ;;  %v4197_v57 = vpack.c.bf16 %v4164_v19, %v4164_v19  ;;  %v4201_v47 = vpack.c.bf16 %v4168_v6, %v4168_v6  ;;  %v4200_v11 = vpack.c.bf16 %v4167_v39, %v4167_v39  ;;  %v10433_v19 = vld [vmem:[#allocation2_spill] sm:$0xff] }
 0x4da   : > { %v4182_v55 = vpack.c.bf16 %v4149_v59, %v4149_v59  ;;  %v4196_v36 = vpack.c.bf16 %v4163_v28, %v4163_v28  ;;  %v4185_v41 = vpack.c.bf16 %v4152_v62, %v4152_v62  ;;  %v3572_v23 = vadd.f32 %v9004_v5, %v9793_v25 }
 0x4db   : > { %6043 = vmatprep.subr.msk.bf16.mxu1 %vm641_vm0, %v4183_v27  ;;  %6057 = vmatprep.subr.msk.bf16.mxu0 %vm641_vm0, %v4197_v57  ;;  %v4184_v60 = vpack.c.bf16 %v4151_v31, %v4151_v31  ;;  %v3570_v24 = vadd.f32 %v8996_v17, %v9793_v25  ;;  %v4281_v5 = vsel %vm641_vm0, %v4200_v11, 0  ;;  %v3613_v7 = vadd.f32 %v9149_v38, %v9793_v25  ;;  %v10434_v31 = vld [vmem:[#allocation55_spill] sm:$0xff] }
 0x4dc   : > { %v4227_v32 = vsel %vm641_vm0, %v4182_v55, 0  ;;  %v4269_v35 = vsel %vm641_vm0, %v4196_v36, 0  ;;  %v4154_v50 = vmax.f32 %v3572_v23, 0.0  ;;  %v3611_v22 = vadd.f32 %v9138_v8, %v9793_v25  ;;  %v10435_v55 = vld [vmem:[#allocation82_spill] sm:$0xff] }
 0x4dd   : > { %4340 = vmatpush1.bf16.msra.mxu1 %v4227_v32  ;;  %4627 = vmatpush1.bf16.msra.mxu0 %v4269_v35  ;;  %v4233_v17 = vsel %vm641_vm0, %v4184_v60, 0  ;;  %v4153_v9 = vmax.f32 %v3570_v24, 0.0  ;;  %v4156_v58 = vmax.f32 %v3613_v7, 0.0  ;;  %v3939_v21 = vadd.f32 %v9753_v1, %v9793_v25 }
 0x4de   : > { %6045 = vmatprep.subr.msk.bf16.mxu1 %vm641_vm0, %v4185_v41  ;;  %6061 = vmatprep.subr.msk.bf16.mxu0 %vm641_vm0, %v4201_v47  ;;  %v4187_v15 = vpack.c.bf16 %v4154_v50, %v4154_v50  ;;  %v3941_v38 = vadd.f32 %v9756_v54, %v9793_v25  ;;  %v4155_v20 = vmax.f32 %v3611_v22, 0.0  ;;  %v3654_v49 = vadd.f32 %v9185_v52, %v9793_v25 }
 0x4df   : > { %v4186_v42 = vpack.c.bf16 %v4153_v9, %v4153_v9  ;;  %v4189_v8 = vpack.c.bf16 %v4156_v58, %v4156_v58  ;;  %v4171_v3 = vmax.f32 %v3939_v21, 0.0  ;;  %v3652_v16 = vadd.f32 %v10430_v44, %v9793_v25 }
 0x4e0   : > { %6044 = vmatmul.mubr.msk.bf16.vlgmr.msra.gmra.mxu1 %vm4222_vm10, %v9822_v14  ;;  %6058 = vmatmul.mubr.msk.bf16.vlgmr.msra.gmra.mxu0 %vm4222_vm10, %v9822_v14  ;;  %v4172_v40 = vmax.f32 %v3941_v38, 0.0  ;;  %v4188_v52 = vpack.c.bf16 %v4155_v20, %v4155_v20  ;;  %v4158_v4 = vmax.f32 %v3654_v49, 0.0  ;;  %v3695_v46 = vadd.f32 %v9314_v12, %v9793_v25 }
 0x4e1   : > { %4381 = vmatpush1.bf16.msra.mxu1 %v4233_v17  ;;  %4398 = vmatprep.mubr.bf16.mxu1 %v10426_v34  ;;  %v4239_v26 = vsel %vm641_vm0, %v4186_v42, 0  ;;  %v4204_v1 = vpack.c.bf16 %v4171_v3, %v4171_v3  ;;  %v4157_v48 = vmax.f32 %v3652_v16, 0.0  ;;  %v3693_v30 = vadd.f32 %v10431_v43, %v9793_v25 }
 0x4e2   : > { %6047 = vmatprep.subr.msk.bf16.mxu1 %vm641_vm0, %v4187_v15  ;;  %4709 = vmatpush1.bf16.msra.mxu0 %v4281_v5  ;;  %v4205_v54 = vpack.c.bf16 %v4172_v40, %v4172_v40  ;;  %v4245_v2 = vsel %vm641_vm0, %v4188_v52, 0  ;;  %v4191_v53 = vpack.c.bf16 %v4158_v4, %v4158_v4  ;;  %v4160_v33 = vmax.f32 %v3695_v46, 0.0 }
 0x4e3   : > { %4726 = vmatprep.mubr.bf16.mxu0 %v10426_v34  ;;  %v4293_v63 = vsel %vm641_vm0, %v4204_v1, 0  ;;  %v4190_v10 = vpack.c.bf16 %v4157_v48, %v4157_v48  ;;  %v4159_v61 = vmax.f32 %v3693_v30, 0.0  ;;  %v3736_v29 = vadd.f32 %v10432_v45, %v9793_v25 }
 0x4e4   : > { %6065 = vmatprep.subr.msk.bf16.mxu0 %vm641_vm0, %v4205_v54  ;;  %v4193_v51 = vpack.c.bf16 %v4160_v33, %v4160_v33  ;;  %v3734_v6 = vadd.f32 %v10433_v19, %v9793_v25  ;;  %v3818_v27 = vadd.f32 %v10434_v31, %v9793_v25  ;;  %v3816_v36 = vadd.f32 %v10435_v55, %v9793_v25 }
 0x4e5   : > { %v4251_v12 = vsel %vm641_vm0, %v4190_v10, 0  ;;  %v4192_v39 = vpack.c.bf16 %v4159_v61, %v4159_v61  ;;  %v4162_v13 = vmax.f32 %v3736_v29, 0.0  ;;  %v3900_v11 = vadd.f32 %v9649_v56, %v9793_v25  ;;  %v4216_v56 = vld [vmem:[%s10111_s5] sm:$0x3] }
 0x4e6   : > { %v4161_v62 = vmax.f32 %v3734_v6, 0.0  ;;  %v4166_v47 = vmax.f32 %v3818_v27, 0.0  ;;  %v4165_v32 = vmax.f32 %v3816_v36, 0.0  ;;  %v3898_v35 = vadd.f32 %v9645_v37, %v9793_v25  ;;  %4219 = vperm.xlu1 %6140, %v4216_v56  }
 0x4e7   : > { %v4257_v59 = vsel %vm641_vm0, %v4192_v39, 0  ;;  %v4195_v28 = vpack.c.bf16 %v4162_v13, %v4162_v13  ;;  %v4170_v60 = vmax.f32 %v3900_v11, 0.0  ;;  %v3982_v50 = vadd.f32 %v9788_v18, %v9793_v25 }
 0x4e8   : > { %6046 = vmatmul.mubr.msk.bf16.vlgmr.msra.gmra.mxu1 %vm4222_vm10, %v9822_v14  ;;  %6062 = vmatmul.mubr.msk.bf16.vlgmr.msra.gmra.mxu0 %vm4222_vm10, %v9822_v14  ;;  %v4194_v57 = vpack.c.bf16 %v4161_v62, %v4161_v62  ;;  %v4199_v23 = vpack.c.bf16 %v4166_v47, %v4166_v47  ;;  %v4198_v24 = vpack.c.bf16 %v4165_v32, %v4165_v32  ;;  %v4169_v5 = vmax.f32 %v3898_v35, 0.0 }
 0x4e9   : > { %4422 = vmatpush1.bf16.msra.mxu1 %v4239_v26  ;;  %4439 = vmatprep.mubr.bf16.mxu1 %v10426_v34  ;;  %v4203_v17 = vpack.c.bf16 %v4170_v60, %v4170_v60  ;;  %v3980_v37 = vadd.f32 %v9785_v0, %v9793_v25  ;;  %v4174_v9 = vmax.f32 %v3982_v50, 0.0  ;;  %v6413_v30 = vmov 0.0  }
 0x4ea   : > { %6049 = vmatprep.subr.msk.bf16.mxu1 %vm641_vm0, %v4189_v8  ;;  %4808 = vmatprep.mubr.bf16.mxu0 %v10426_v34  ;;  %v4263_v41 = vsel %vm641_vm0, %v4194_v57, 0  ;;  %v4275_v15 = vsel %vm641_vm0, %v4198_v24, 0  ;;  %v4202_v7 = vpack.c.bf16 %v4169_v5, %v4169_v5 }
 0x4eb   : > { %4791 = vmatpush1.bf16.msra.mxu0 %v4293_v63  ;;  %v4173_v22 = vmax.f32 %v3980_v37, 0.0  ;;  %v4207_v42 = vpack.c.bf16 %v4174_v9, %v4174_v9 }
 0x4ec   : > { %v4287_v18 = vsel %vm641_vm0, %v4202_v7, 0 }
 0x4ed   : > { %v4206_v58 = vpack.c.bf16 %v4173_v22, %v4173_v22 }
 0x4ef   : > { %v4299_v21 = vsel %vm641_vm0, %v4206_v58, 0 }
 0x4f0   : > { %6048 = vmatmul.mubr.msk.bf16.vlgmr.msra.gmra.mxu1 %vm4222_vm10, %v9822_v14  ;;  %6066 = vmatmul.mubr.msk.bf16.vlgmr.msra.gmra.mxu0 %vm4222_vm10, %v9822_v14 }
 0x4f1   : > { %4463 = vmatpush1.bf16.msra.mxu1 %v4245_v2  ;;  %4480 = vmatprep.mubr.bf16.mxu1 %v10426_v34 }
 0x4f2   : > { %6051 = vmatprep.subr.msk.bf16.mxu1 %vm641_vm0, %v4191_v53  ;;  %4890 = vmatprep.mubr.bf16.mxu0 %v10426_v34 }
 0x4f8   : > { %6050 = vmatmul.mubr.msk.bf16.vlgmr.msra.gmra.mxu1 %vm4222_vm10, %v9822_v14 }
 0x4f9   : > { %4504 = vmatpush1.bf16.msra.mxu1 %v4251_v12  ;;  %4521 = vmatprep.mubr.bf16.mxu1 %v10426_v34 }
 0x4fa   : > { %6053 = vmatprep.subr.msk.bf16.mxu1 %vm641_vm0, %v4193_v51 }
 0x500   : > { %6052 = vmatmul.mubr.msk.bf16.vlgmr.msra.gmra.mxu1 %vm4222_vm10, %v9822_v14 }
 0x501   : > { %4545 = vmatpush1.bf16.msra.mxu1 %v4257_v59  ;;  %4562 = vmatprep.mubr.bf16.mxu1 %v10426_v34 }
 0x502   : > { %6055 = vmatprep.subr.msk.bf16.mxu1 %vm641_vm0, %v4195_v28 }
 0x508   : > { %6054 = vmatmul.mubr.msk.bf16.vlgmr.msra.gmra.mxu1 %vm4222_vm10, %v9822_v14 }
 0x509   : > { %4586 = vmatpush1.bf16.msra.mxu1 %v4263_v41  ;;  %4603 = vmatprep.mubr.bf16.mxu1 %v10426_v34 }
 0x50a   : > { %6059 = vmatprep.subr.msk.bf16.mxu1 %vm641_vm0, %v4199_v23 }
 0x510   : > { %6056 = vmatmul.mubr.msk.bf16.vlgmr.msra.gmra.mxu1 %vm4222_vm10, %v9822_v14 }
 0x511   : > { %4668 = vmatpush1.bf16.msra.mxu1 %v4275_v15  ;;  %4685 = vmatprep.mubr.bf16.mxu1 %v10426_v34 }
 0x512   : > { %6063 = vmatprep.subr.msk.bf16.mxu1 %vm641_vm0, %v4203_v17 }
 0x518   : > { %6060 = vmatmul.mubr.msk.bf16.vlgmr.msra.gmra.mxu1 %vm4222_vm10, %v9822_v14 }
 0x519   : > { %4750 = vmatpush1.bf16.msra.mxu1 %v4287_v18  ;;  %4767 = vmatprep.mubr.bf16.mxu1 %v10426_v34 }
 0x51a   : > { %6067 = vmatprep.subr.msk.bf16.mxu1 %vm641_vm0, %v4207_v42 }
 0x520   : > { %6064 = vmatmul.mubr.msk.bf16.vlgmr.msra.gmra.mxu1 %vm4222_vm10, %v9822_v14 }
 0x521   : > { %4832 = vmatpush1.bf16.msra.mxu1 %v4299_v21  ;;  %4849 = vmatprep.mubr.bf16.mxu1 %v10426_v34 }
 0x525   : > { %v4020_v0 = vpop.f32.mrf.mxu1 }
 0x526   : > { %v4021_v38 = vadd.f32 %v4020_v0, %v9793_v25 }
 0x527   : > { %v4022_v20 = vpop.f32.mrf.mxu1 }
 0x528   : > { %v4175_v49 = vmax.f32 %v4021_v38, 0.0  ;;  %v4023_v26 = vadd.f32 %v4022_v20, %v9793_v25  ;;  %6068 = vmatmul.mubr.msk.bf16.vlgmr.msra.gmra.mxu1 %vm4222_vm10, %v9822_v14 }
 0x529   : > { %v4024_v8 = vpop.f32.mrf.mxu1  ;;  %4931 = vmatprep.mubr.bf16.mxu1 %v10426_v34 }
 0x52a   : > { %v4208_v3 = vpack.c.bf16 %v4175_v49, %v4175_v49  ;;  %v4176_v40 = vmax.f32 %v4023_v26, 0.0 }
 0x52b   : > { %v4025_v1 = vpop.f32.mrf.mxu1 }
 0x52c   : > { %v4209_v54 = vpack.c.bf16 %v4176_v40, %v4176_v40  ;;  %v4305_v52 = vsel %vm641_vm0, %v4208_v3, 0 }
 0x52e   : > { %6069 = vmatprep.subr.msk.bf16.mxu0 %vm641_vm0, %v4209_v54 }
 0x52f   : > { %4873 = vmatpush1.bf16.msra.mxu0 %v4305_v52 }
 0x532   : > { %6070 = vmatmul.mubr.msk.bf16.vlgmr.msra.gmra.mxu0 %vm4222_vm10, %v9822_v14 }
 0x533   : > { %4972 = vmatprep.mubr.bf16.mxu0 %v10426_v34 }
 0x541   : > { %v4061_v4 = vpop.f32.mrf.mxu0 }
 0x542   : > { %v4062_v44 = vadd.f32 %v4061_v4, %v9793_v25 }
 0x543   : > { %v4063_v16 = vpop.f32.mrf.mxu0 }
 0x544   : > { %v4177_v63 = vmax.f32 %v4062_v44, 0.0  ;;  %v4064_v2 = vadd.f32 %v4063_v16, %v9793_v25 }
 0x545   : > { %v4065_v53 = vpop.f32.mrf.mxu0 }
 0x546   : > { %v4210_v48 = vpack.c.bf16 %v4177_v63, %v4177_v63  ;;  %v4178_v46 = vmax.f32 %v4064_v2, 0.0 }
 0x547   : > { %v4066_v10 = vpop.f32.mrf.mxu0 }
 0x548   : > { %v4211_v33 = vpack.c.bf16 %v4178_v46, %v4178_v46  ;;  %v4311_v43 = vsel %vm641_vm0, %v4210_v48, 0 }
 0x54a   : > { %6071 = vmatprep.subr.msk.bf16.mxu1 %vm641_vm0, %v4211_v33 }
 0x54b   : > { %4914 = vmatpush1.bf16.msra.mxu1 %v4311_v43 }
 0x54c   : > { %6094 = vmatprep.subr.bf16.mxu1 %v6413_v30 }
 0x54e   : > { %6072 = vmatmul.mubr.msk.bf16.vlgmr.msra.gmra.mxu1 %vm4222_vm10, %v9822_v14 }
 0x54f   : > { %6096 = vmatprep.mubr.msk.bf16.mxu1 %vm6414_vm11, %v6413_v30 }
 0x561   : > { %v9943_v11 = vpop.permute.xlu1 %4219 }
 0x585   : > { %v4102_v34 = vpop.f32.mrf.mxu1 }
 0x586   : > { %v4103_v12 = vadd.f32 %v4102_v34, %v9793_v25 }
 0x587   : > { %v4104_v51 = vpop.f32.mrf.mxu1 }
 0x588   : > { %v4179_v61 = vmax.f32 %v4103_v12, 0.0  ;;  %v4105_v45 = vadd.f32 %v4104_v51, %v9793_v25 }
 0x589   : > { %v4106_v29 = vpop.f32.mrf.mxu1 }
 0x58a   : > { %v4212_v39 = vpack.c.bf16 %v4179_v61, %v4179_v61  ;;  %v4180_v13 = vmax.f32 %v4105_v45, 0.0 }
 0x58b   : > { %v4107_v19 = vpop.f32.mrf.mxu1 }
 0x58c   : > { %v4213_v6 = vpack.c.bf16 %v4180_v13, %v4180_v13  ;;  %v4317_v59 = vsel %vm641_vm0, %v4212_v39, 0 }
 0x58e   : > { %6073 = vmatprep.subr.msk.bf16.mxu0 %vm641_vm0, %v4213_v6 }
 0x58f   : > { %4955 = vmatpush1.bf16.msra.mxu0 %v4317_v59 }
 0x591   : > { %v4143_v28 = vpop.f32.mrf.mxu0 }
 0x592   : > { %v4144_v62 = vadd.f32 %v4143_v28, %v9793_v25  ;;  %6074 = vmatmul.mubr.msk.bf16.vlgmr.msra.gmra.mxu0 %vm4222_vm10, %v9822_v14 }
 0x593   : > { %v4145_v31 = vpop.f32.mrf.mxu0 }
 0x594   : > { %v4181_v27 = vmax.f32 %v4144_v62, 0.0 }
 0x595   : > { %v4146_v57 = vpop.f32.mrf.mxu0 }
 0x596   : > { %v4214_v47 = vpack.c.bf16 %v4181_v27, %v4181_v27 }
 0x597   : > { %v4147_v55 = vpop.f32.mrf.mxu0 }
 0x598   : > { %v4323_v36 = vsel %vm641_vm0, %v4214_v47, 0 }
 0x599   : > { %6095 = vmatpush3.bf16.msra.mxu1 %v4323_v36 }
 0x59c   : > { %6097 = vmatmul.mubr.msk.bf16.vlgmr.msra.gmra.mxu1 %vm4222_vm10, %v9822_v14 }
 0x5a0   : > { %v4359_v41 = vpop.f32.mrf.mxu1  ;;  %v4646_v23 = vpop.f32.mrf.mxu0 }
 0x5a1   : > { %v4360_v25 = vadd.f32 %v4359_v41, %v9943_v11  ;;  %v4647_v8 = vadd.f32 %v4646_v23, %v9943_v11 }
 0x5a2   : > { %v4361_v32 = vpop.f32.mrf.mxu1  ;;  %v4648_v35 = vpop.f32.mrf.mxu0 }
 0x5a3   : > { %v4362_v60 = vadd.f32 %v4361_v32, %v9943_v11  ;;  %v5021_v24 = vsub.f32 0.0, %v4360_v25  ;;  %v5035_v44 = vsub.f32 0.0, %v4647_v8  ;;  %v4649_v19 = vadd.f32 %v4648_v35, %v9943_v11 }
 0x5a4   : > { %v4363_v56 = vpop.f32.mrf.mxu1  ;;  %v4650_v50 = vpop.f32.mrf.mxu0 }
 0x5a5   : > { %v5022_v5 = vsub.f32 0.0, %v4362_v60  ;;  %v5054_v17 = vmul.f32 1.442695, %v5021_v24  ;;  %v5082_v30 = vmul.f32 1.442695, %v5035_v44  ;;  %v5036_v36 = vsub.f32 0.0, %v4649_v19 }
 0x5a6   : > { %v4364_v15 = vpop.f32.mrf.mxu1  ;;  %v4651_v37 = vpop.f32.mrf.mxu0 }
 0x5a7   : > { %v5056_v9 = vmul.f32 1.442695, %v5022_v5  ;;  %6248 = vpow2.f32 %v5054_v17  ;;  %v5084_v56 = vmul.f32 1.442695, %v5036_v36 }
 0x5a8   : > { %v4400_v7 = vpop.f32.mrf.mxu1  ;;  %v4728_v14 = vpop.f32.mrf.mxu0 }
 0x5a9   : > { %v4401_v22 = vadd.f32 %v4400_v7, %v9943_v11  ;;  %6250 = vpow2.f32 %v5056_v9  ;;  %v4729_v32 = vadd.f32 %v4728_v14, %v9943_v11 }
 0x5aa   : > { %v4402_v42 = vpop.f32.mrf.mxu1  ;;  %v4730_v18 = vpop.f32.mrf.mxu0 }
 0x5ab   : > { %v4403_v58 = vadd.f32 %v4402_v42, %v9943_v11  ;;  %v5023_v21 = vsub.f32 0.0, %v4401_v22  ;;  %v4731_v60 = vadd.f32 %v4730_v18, %v9943_v11  ;;  %v5039_v37 = vsub.f32 0.0, %v4729_v32 }
 0x5ac   : > { %v4404_v0 = vpop.f32.mrf.mxu1  ;;  %v4732_v38 = vpop.f32.mrf.mxu0 }
 0x5ad   : > { %v5024_v20 = vsub.f32 0.0, %v4403_v58  ;;  %v5058_v49 = vmul.f32 1.442695, %v5023_v21  ;;  %v5040_v42 = vsub.f32 0.0, %v4731_v60 }
 0x5ae   : > { %v4405_v26 = vpop.f32.mrf.mxu1  ;;  %v4733_v3 = vpop.f32.mrf.mxu0 }
 0x5af   : > { %6252 = vpow2.f32 %v5058_v49  ;;  %v5060_v40 = vmul.f32 1.442695, %v5024_v20  ;;  %v5090_v49 = vmul.f32 1.442695, %v5039_v37  ;;  %v5292_v26 = vlaneseq }
 0x5b0   : > { %v4441_v1 = vpop.f32.mrf.mxu1  ;;  %v9950_v54 = vpop.f32.mrf.mxu0  ;;  %v5092_v3 = vmul.f32 1.442695, %v5040_v42 }
 0x5b1   : > { %v4442_v52 = vadd.f32 %v4441_v1, %v9943_v11  ;;  %6254 = vpow2.f32 %v5060_v40  ;;  %v4811_v38 = vadd.f32 %v9950_v54, %v9943_v11  ;;  %v6415_v1 = vmov 1966171168  }
 0x5b2   : > { %v4443_v4 = vpop.f32.mrf.mxu1  ;;  %v9953_v16 = vpop.f32.mrf.mxu0  ;;  %vm5509_vm12 = vcmp.lt.s32.totalorder %v5292_v26, 128 }
 0x5b3   : > { %v4444_v63 = vadd.f32 %v4443_v4, %v9943_v11  ;;  %v5025_v2 = vsub.f32 0.0, %v4442_v52  ;;  %v5290_v52 = vunpack.c.l.s4 %v6415_v1 }
 0x5b4   : > { %v4445_v53 = vpop.f32.mrf.mxu1  ;;  %v4814_v48 = vpop.f32.mrf.mxu0 }
 0x5b5   : > { %v5026_v46 = vsub.f32 0.0, %v4444_v63  ;;  %v5062_v10 = vmul.f32 1.442695, %v5025_v2  ;;  %v6249_v33 = vpop.eup %6248  ;;  %v4813_v63 = vadd.f32 %v9953_v16, %v9943_v11  ;;  %v5043_v48 = vsub.f32 0.0, %v4811_v38 }
 0x5b6   : > { %v4446_v43 = vpop.f32.mrf.mxu1  ;;  %v4815_v34 = vpop.f32.mrf.mxu0  ;;  %v5120_v29 = vadd.f32 1.0, %v6249_v33 }
 0x5b7   : > { %v6251_v12 = vpop.eup %6250  ;;  %6256 = vpow2.f32 %v5062_v10  ;;  %v5064_v51 = vmul.f32 1.442695, %v5026_v46  ;;  %v5044_v16 = vsub.f32 0.0, %v4813_v63  ;;  %v5098_v19 = vmul.f32 1.442695, %v5043_v48 }
 0x5b8   : > { %v4482_v61 = vpop.f32.mrf.mxu1  ;;  %v5121_v13 = vadd.f32 1.0, %v6251_v12 }
 0x5b9   : > { %v4483_v45 = vadd.f32 %v4482_v61, %v9943_v11  ;;  %6258 = vpow2.f32 %v5064_v51  ;;  %v5291_v51 = vunpack.c.0.s8 %v5290_v52  ;;  %v5293_v61 = vshrl.u32 %v5292_v26, 7 }
 0x5ba   : > { %v4484_v39 = vpop.f32.mrf.mxu1  ;;  %6260 = vpow2.f32 %v5082_v30 }
 0x5bb   : > { %v4485_v6 = vadd.f32 %v4484_v39, %v9943_v11  ;;  %v5027_v59 = vsub.f32 0.0, %v4483_v45  ;;  %6262 = vrcp.f32 %v5120_v29  ;;  %v9974_v36 = vsub.s32 %v5291_v51, %v5293_v61 }
 0x5bc   : > { %v6253_v28 = vpop.eup %6252  ;;  %v4486_v62 = vpop.f32.mrf.mxu1  ;;  %6264 = vrcp.f32 %v5121_v13 }
 0x5bd   : > { %v5028_v31 = vsub.f32 0.0, %v4485_v6  ;;  %v5066_v27 = vmul.f32 1.442695, %v5027_v59  ;;  %v5122_v57 = vadd.f32 1.0, %v6253_v28 }
 0x5be   : > { %v6255_v47 = vpop.eup %6254  ;;  %v4487_v55 = vpop.f32.mrf.mxu1 }
 0x5bf   : > { %6266 = vpow2.f32 %v5066_v27  ;;  %v5068_v41 = vmul.f32 1.442695, %v5028_v31  ;;  %v5123_v23 = vadd.f32 1.0, %v6255_v47  ;;  %v5100_v47 = vmul.f32 1.442695, %v5044_v16 }
 0x5c0   : > { %6268 = vrcp.f32 %v5122_v57  ;;  %v4523_v25 = vpop.f32.mrf.mxu1 }
 0x5c1   : > { %6270 = vpow2.f32 %v5068_v41  ;;  %v4524_v35 = vadd.f32 %v4523_v25, %v9943_v11 }
 0x5c2   : > { %6272 = vrcp.f32 %v5123_v23  ;;  %v4525_v24 = vpop.f32.mrf.mxu1 }
 0x5c3   : > { %v5029_v50 = vsub.f32 0.0, %v4524_v35  ;;  %v4526_v5 = vadd.f32 %v4525_v24, %v9943_v11  ;;  %6274 = vpow2.f32 %v5084_v56 }
 0x5c4   : > { %v6257_v17 = vpop.eup %6256  ;;  %v4527_v15 = vpop.f32.mrf.mxu1 }
 0x5c5   : > { %v5124_v9 = vadd.f32 1.0, %v6257_v17  ;;  %v5070_v7 = vmul.f32 1.442695, %v5029_v50  ;;  %v5030_v22 = vsub.f32 0.0, %v4526_v5 }
 0x5c6   : > { %v6259_v58 = vpop.eup %6258  ;;  %v4528_v14 = vpop.f32.mrf.mxu1 }
 0x5c7   : > { %v6261_v21 = vpop.eup %6260  ;;  %v5125_v0 = vadd.f32 1.0, %v6259_v58  ;;  %6276 = vrcp.f32 %v5124_v9  ;;  %v5072_v18 = vmul.f32 1.442695, %v5030_v22 }
 0x5c8   : > { %6278 = vpow2.f32 %v5070_v7  ;;  %v4564_v20 = vpop.f32.mrf.mxu1  ;;  %v9966_v40 = vpop.eup %6262  ;;  %v5134_v44 = vadd.f32 1.0, %v6261_v21 }
 0x5c9   : > { %6280 = vrcp.f32 %v5125_v0  ;;  %v4565_v8 = vadd.f32 %v4564_v20, %v9943_v11  ;;  %v6265_v2 = vpop.eup %6264  ;;  %v5186_v6 = vmul.f32 9.5, %v9966_v40 }
 0x5ca   : > { %6282 = vpow2.f32 %v5072_v18  ;;  %v4566_v4 = vpop.f32.mrf.mxu1  ;;  %v5187_v59 = vmul.f32 9.5, %v6265_v2  ;;  %v5556_v24 = vcombine.low %v9966_v40, %v6265_v2 }
 0x5cb   : > { %v5031_v54 = vsub.f32 0.0, %v4565_v8  ;;  %v4567_v53 = vadd.f32 %v4566_v4, %v9943_v11  ;;  %6284 = vpow2.f32 %v5090_v49  ;;  %v5219_v32 = vadd.f32 0.5, %v5186_v6 }
 0x5cc   : > { %v6267_v46 = vpop.eup %6266  ;;  %v4568_v10 = vpop.f32.mrf.mxu1  ;;  %6286 = vpow2.f32 %v5092_v3  ;;  %v5220_v35 = vadd.f32 0.5, %v5187_v59  ;;  %v5566_v18 = vrot.slane %v5556_v24, %v9974_v36 }
 0x5cd   : > { %v6269_v33 = vpop.eup %6268  ;;  %v5126_v43 = vadd.f32 1.0, %v6267_v46  ;;  %v5074_v30 = vmul.f32 1.442695, %v5031_v54  ;;  %v5032_v34 = vsub.f32 0.0, %v4567_v53  ;;  %6288 = vrcp.f32 %v5134_v44 }
 0x5ce   : > { %v6271_v12 = vpop.eup %6270  ;;  %v4569_v45 = vpop.f32.mrf.mxu1  ;;  %v5188_v28 = vmul.f32 9.5, %v6269_v33  ;;  %v5285_v0 = vcombine.low %v5219_v32, %v5220_v35 }
 0x5cf   : > { %v6273_v29 = vpop.eup %6272  ;;  %v5127_v39 = vadd.f32 1.0, %v6271_v12  ;;  %6290 = vrcp.f32 %v5126_v43  ;;  %v5076_v13 = vmul.f32 1.442695, %v5032_v34 }
 0x5d0   : > { %6292 = vpow2.f32 %v5074_v30  ;;  %v4605_v62 = vpop.f32.mrf.mxu1  ;;  %v5189_v31 = vmul.f32 9.5, %v6273_v29  ;;  %v6275_v55 = vpop.eup %6274  ;;  %v5221_v60 = vadd.f32 0.5, %v5188_v28  ;;  %v5557_v17 = vcombine.low %v6269_v33, %v6273_v29 }
 0x5d1   : > { %6294 = vrcp.f32 %v5127_v39  ;;  %v4606_v27 = vadd.f32 %v4605_v62, %v9943_v11  ;;  %v5135_v21 = vadd.f32 1.0, %v6275_v55  ;;  %v5295_v10 = vrot.slane %v5285_v0, %v9974_v36 }
 0x5d2   : > { %6296 = vpow2.f32 %v5076_v13  ;;  %v4607_v57 = vpop.f32.mrf.mxu1  ;;  %v5222_v5 = vadd.f32 0.5, %v5189_v31  ;;  %v5573_v40 = vrot.slane %v5557_v17, %v9974_v36 }
 0x5d3   : > { %v5033_v41 = vsub.f32 0.0, %v4606_v27  ;;  %v4608_v23 = vadd.f32 %v4607_v57, %v9943_v11  ;;  %6298 = vpow2.f32 %v5098_v19 }
 0x5d4   : > { %v6277_v25 = vpop.eup %6276  ;;  %v4609_v56 = vpop.f32.mrf.mxu1  ;;  %6300 = vpow2.f32 %v5100_v47  ;;  %v5286_v3 = vcombine.low %v5221_v60, %v5222_v5  ;;  %v5588_v34 = vcombine.high %v5566_v18, %v5573_v40 }
 0x5d5   : > { %v6279_v50 = vpop.eup %6278  ;;  %v5078_v15 = vmul.f32 1.442695, %v5033_v41  ;;  %v5034_v37 = vsub.f32 0.0, %v4608_v23  ;;  %v5190_v7 = vmul.f32 9.5, %v6277_v25 }
 0x5d6   : > { %v6281_v9 = vpop.eup %6280  ;;  %v5128_v22 = vadd.f32 1.0, %v6279_v50  ;;  %v4610_v42 = vpop.f32.mrf.mxu1  ;;  %v5302_v16 = vrot.slane %v5286_v3, %v9974_v36  ;;  %v5596_v35 = vrot.slane %v5588_v34, %v9974_v36 }
 0x5d7   : > { %v6283_v58 = vpop.eup %6282  ;;  %v5191_v14 = vmul.f32 9.5, %v6281_v9  ;;  %6302 = vpow2.f32 %v5078_v15  ;;  %v5080_v20 = vmul.f32 1.442695, %v5034_v37  ;;  %v5223_v4 = vadd.f32 0.5, %v5190_v7 }
 0x5d8   : > { %v5129_v38 = vadd.f32 1.0, %v6283_v58  ;;  %v4687_v49 = vpop.f32.mrf.mxu1  ;;  %v6285_v8 = vpop.eup %6284  ;;  %6304 = vrcp.f32 %v5128_v22  ;;  %v5558_v63 = vcombine.low %v6277_v25, %v6281_v9  ;;  %v5317_v32 = vcombine.low %v5295_v10, %v5302_v16 }
 0x5d9   : > { %v4688_v1 = vadd.f32 %v4687_v49, %v9943_v11  ;;  %v6287_v52 = vpop.eup %6286  ;;  %v5224_v44 = vadd.f32 0.5, %v5191_v14  ;;  %v5138_v41 = vadd.f32 1.0, %v6285_v8 }
 0x5da   : > { %6306 = vrcp.f32 %v5129_v38  ;;  %v4689_v2 = vpop.f32.mrf.mxu1  ;;  %v9981_v54 = vpop.eup %6288  ;;  %v5580_v29 = vrot.slane %v5558_v63, %v9974_v36  ;;  %v5139_v14 = vadd.f32 1.0, %v6287_v52 }
 0x5db   : > { %6308 = vpow2.f32 %v5080_v20  ;;  %v5037_v53 = vsub.f32 0.0, %v4688_v1  ;;  %v4690_v48 = vadd.f32 %v4689_v2, %v9943_v11  ;;  %v5287_v45 = vcombine.low %v5223_v4, %v5224_v44 }
 0x5dc   : > { %v6291_v46 = vpop.eup %6290  ;;  %6310 = vrcp.f32 %v5135_v21  ;;  %v4691_v33 = vpop.f32.mrf.mxu1  ;;  %v5325_v20 = vrot.slane %v5317_v32, %v9974_v36 }
 0x5dd   : > { %v6293_v43 = vpop.eup %6292  ;;  %v5192_v30 = vmul.f32 9.5, %v6291_v46  ;;  %v5086_v12 = vmul.f32 1.442695, %v5037_v53  ;;  %v5038_v51 = vsub.f32 0.0, %v4690_v48  ;;  %v5309_v25 = vrot.slane %v5287_v45, %v9974_v36 }
 0x5de   : > { %v6295_v61 = vpop.eup %6294  ;;  %v5130_v39 = vadd.f32 1.0, %v6293_v43  ;;  %v4692_v13 = vpop.f32.mrf.mxu1 }
 0x5df   : > { %v6297_v19 = vpop.eup %6296  ;;  %v5193_v6 = vmul.f32 9.5, %v6295_v61  ;;  %v5225_v59 = vadd.f32 0.5, %v5192_v30  ;;  %v5559_v28 = vcombine.low %v6291_v46, %v6295_v61  ;;  %6312 = vpow2.f32 %v5086_v12 }
 0x5e0   : > { %v6299_v62 = vpop.eup %6298  ;;  %6314 = vrcp.f32 %v5130_v39  ;;  %v5131_v31 = vadd.f32 1.0, %v6297_v19  ;;  %v5088_v27 = vmul.f32 1.442695, %v5038_v51  ;;  %v4769_v57 = vpop.f32.mrf.mxu1  ;;  %v5200_v30 = vmul.f32 9.5, %v9981_v54 }
 0x5e1   : > { %v5226_v47 = vadd.f32 0.5, %v5193_v6  ;;  %v5587_v55 = vrot.slane %v5559_v28, %v9974_v36  ;;  %v4770_v23 = vadd.f32 %v4769_v57, %v9943_v11  ;;  %v6301_v24 = vpop.eup %6300  ;;  %v5142_v44 = vadd.f32 1.0, %v6299_v62 }
 0x5e2   : > { %6316 = vrcp.f32 %v5131_v31  ;;  %v4771_v60 = vpop.f32.mrf.mxu1  ;;  %v5143_v2 = vadd.f32 1.0, %v6301_v24 }
 0x5e3   : > { %v5288_v56 = vcombine.low %v5225_v59, %v5226_v47  ;;  %v5589_v50 = vcombine.high %v5580_v29, %v5587_v55  ;;  %6318 = vpow2.f32 %v5088_v27  ;;  %v5041_v5 = vsub.f32 0.0, %v4770_v23 }
 0x5e4   : > { %v6303_v17 = vpop.eup %6302  ;;  %v4772_v15 = vadd.f32 %v4771_v60, %v9943_v11  ;;  %v4773_v37 = vpop.f32.mrf.mxu1  ;;  %6320 = vrcp.f32 %v5138_v41  ;;  %v5233_v23 = vadd.f32 0.5, %v5200_v30 }
 0x5e5   : > { %v5316_v9 = vrot.slane %v5288_v56, %v9974_v36  ;;  %v5603_v7 = vrot.slane %v5589_v50, %v9974_v36  ;;  %v5132_v22 = vadd.f32 1.0, %v6303_v17  ;;  %v5094_v42 = vmul.f32 1.442695, %v5041_v5  ;;  %v9995_v58 = vpop.eup %6304 }
 0x5e6   : > { %v5042_v21 = vsub.f32 0.0, %v4772_v15  ;;  %v4774_v0 = vpop.f32.mrf.mxu1  ;;  %v5194_v63 = vmul.f32 9.5, %v9995_v58 }
 0x5e7   : > { %v10002_v18 = vpop.eup %6306  ;;  %v5318_v38 = vcombine.low %v5309_v25, %v5316_v9  ;;  %v5604_v49 = vcombine.low %v5596_v35, %v5603_v7  ;;  %6322 = vrcp.f32 %v5132_v22 }
 0x5e8   : > { %v6309_v8 = vpop.eup %6308  ;;  %6324 = vpow2.f32 %v5094_v42  ;;  %v4851_v3 = vpop.f32.mrf.mxu1  ;;  %v5096_v52 = vmul.f32 1.442695, %v5042_v21  ;;  %v5195_v10 = vmul.f32 9.5, %v10002_v18  ;;  %v5227_v29 = vadd.f32 0.5, %v5194_v63 }
 0x5e9   : > { %v10005_v40 = vpop.eup %6310  ;;  %v5332_v1 = vrot.slane %v5318_v38, %v9974_v36  ;;  %6085 = vst [vmem:[%s10000_s7 + $0x2] ss:$4 sm:$0xff] %v5604_v49  ;;  %v5133_v4 = vadd.f32 1.0, %v6309_v8  ;;  %6326 = vrcp.f32 %v5139_v14  ;;  %v4852_v53 = vadd.f32 %v4851_v3, %v9943_v11 }
 0x5ea   : > { %v4853_v48 = vpop.f32.mrf.mxu1  ;;  %v5201_v61 = vmul.f32 9.5, %v10005_v40  ;;  %v5228_v59 = vadd.f32 0.5, %v5195_v10  ;;  %v5605_v28 = vcombine.low %v9995_v58, %v10002_v18  ;;  %v5608_v25 = vcombine.low %v9981_v54, %v10005_v40 }
 0x5eb   : > { %v5333_v46 = vcombine.low %v5325_v20, %v5332_v1  ;;  %6328 = vrcp.f32 %v5133_v4  ;;  %v4854_v33 = vadd.f32 %v4853_v48, %v9943_v11  ;;  %v5045_v34 = vsub.f32 0.0, %v4852_v53 }
 0x5ec   : > { %v6313_v43 = vpop.eup %6312  ;;  %6330 = vpow2.f32 %v5096_v52  ;;  %v4855_v12 = vpop.f32.mrf.mxu1  ;;  %v5334_v60 = vcombine.low %v5227_v29, %v5228_v59  ;;  %v5234_v24 = vadd.f32 0.5, %v5201_v61  ;;  %v5615_v5 = vrot.slane %v5605_v28, %v9974_v36 }
 0x5ed   : > { %v6315_v51 = vpop.eup %6314  ;;  %5500 = vst [vmem:[%s10000_s7] ss:$4 sm:$0xff] %v5333_v46  ;;  %6080 = vst [vmem:[%s10000_s7 + $0x1] ss:$4 sm:$0xff] %v5333_v46  ;;  %v5136_v45 = vadd.f32 1.0, %v6313_v43  ;;  %6332 = vrcp.f32 %v5142_v44  ;;  %v5046_v16 = vsub.f32 0.0, %v4854_v33  ;;  %v5636_v42 = vrot.slane %v5608_v25, %v9974_v36 }
 0x5ee   : > { %v5196_v39 = vmul.f32 9.5, %v6315_v51  ;;  %6334 = vrcp.f32 %v5143_v2  ;;  %v5102_v13 = vmul.f32 1.442695, %v5045_v34  ;;  %v4856_v19 = vpop.f32.mrf.mxu1  ;;  %v5344_v0 = vrot.slane %v5334_v60, %v9974_v36 }
 0x5ef   : > { %v6317_v6 = vpop.eup %6316  ;;  %6336 = vrcp.f32 %v5136_v45  ;;  %v5104_v62 = vmul.f32 1.442695, %v5046_v16  ;;  %v5337_v18 = vcombine.low %v5233_v23, %v5234_v24 }
 0x5f0   : > { %v6319_v31 = vpop.eup %6318  ;;  %v5229_v27 = vadd.f32 0.5, %v5196_v39  ;;  %v5197_v57 = vmul.f32 9.5, %v6317_v6  ;;  %v5606_v47 = vcombine.low %v6315_v51, %v6317_v6  ;;  %6338 = vpow2.f32 %v5102_v13 }
 0x5f1   : > { %v5137_v55 = vadd.f32 1.0, %v6319_v31  ;;  %6340 = vpow2.f32 %v5104_v62  ;;  %v10021_v35 = vpop.eup %6320  ;;  %v5365_v45 = vrot.slane %v5337_v18, %v9974_v36 }
 0x5f2   : > { %v5230_v41 = vadd.f32 0.5, %v5197_v57  ;;  %v4892_v32 = vpop.f32.mrf.mxu0  ;;  %v5622_v15 = vrot.slane %v5606_v47, %v9974_v36  ;;  %v5204_v53 = vmul.f32 9.5, %v10021_v35 }
 0x5f3   : > { %6342 = vrcp.f32 %v5137_v55  ;;  %v4893_v56 = vadd.f32 %v4892_v32, %v9943_v11 }
 0x5f4   : > { %v6323_v50 = vpop.eup %6322  ;;  %v5335_v17 = vcombine.low %v5229_v27, %v5230_v41  ;;  %v4894_v37 = vpop.f32.mrf.mxu0  ;;  %v5637_v3 = vcombine.high %v5615_v5, %v5622_v15  ;;  %v5237_v13 = vadd.f32 0.5, %v5204_v53 }
 0x5f5   : > { %v6325_v9 = vpop.eup %6324  ;;  %v5198_v7 = vmul.f32 9.5, %v6323_v50  ;;  %v5047_v22 = vsub.f32 0.0, %v4893_v56  ;;  %v4895_v54 = vadd.f32 %v4894_v37, %v9943_v11 }
 0x5f6   : > { %v5140_v58 = vadd.f32 1.0, %v6325_v9  ;;  %v4896_v14 = vpop.f32.mrf.mxu0  ;;  %v6327_v21 = vpop.eup %6326  ;;  %v5351_v8 = vrot.slane %v5335_v17, %v9974_v36  ;;  %v5645_v51 = vrot.slane %v5637_v3, %v9974_v36 }
 0x5f7   : > { %v5106_v38 = vmul.f32 1.442695, %v5047_v22  ;;  %v5048_v20 = vsub.f32 0.0, %v4895_v54  ;;  %v5231_v40 = vadd.f32 0.5, %v5198_v7  ;;  %v5205_v43 = vmul.f32 9.5, %v6327_v21 }
 0x5f8   : > { %v6329_v49 = vpop.eup %6328  ;;  %6344 = vrcp.f32 %v5140_v58  ;;  %v4897_v1 = vpop.f32.mrf.mxu0  ;;  %v5366_v34 = vcombine.low %v5344_v0, %v5351_v8  ;;  %v5655_v19 = vcombine.low %v10021_v35, %v6327_v21 }
 0x5f9   : > { %v6331_v4 = vpop.eup %6330  ;;  %v5199_v44 = vmul.f32 9.5, %v6329_v49  ;;  %v5607_v52 = vcombine.low %v6323_v50, %v6329_v49  ;;  %6346 = vpow2.f32 %v5106_v38  ;;  %v5108_v63 = vmul.f32 1.442695, %v5048_v20 }
 0x5fa   : > { %v6333_v2 = vpop.eup %6332  ;;  %v5141_v48 = vadd.f32 1.0, %v6331_v4  ;;  %v5238_v62 = vadd.f32 0.5, %v5205_v43  ;;  %v5374_v57 = vrot.slane %v5366_v34, %v9974_v36  ;;  %v5671_v50 = vrot.slane %v5655_v19, %v9974_v36 }
 0x5fb   : > { %v6335_v46 = vpop.eup %6334  ;;  %v5232_v10 = vadd.f32 0.5, %v5199_v44  ;;  %v5629_v33 = vrot.slane %v5607_v52, %v9974_v36  ;;  %6348 = vpow2.f32 %v5108_v63  ;;  %v5208_v47 = vmul.f32 9.5, %v6333_v2 }
 0x5fc   : > { %v6337_v30 = vpop.eup %6336  ;;  %6350 = vrcp.f32 %v5141_v48  ;;  %v5209_v55 = vmul.f32 9.5, %v6335_v46  ;;  %v5384_v56 = vcombine.low %v5237_v13, %v5238_v62  ;;  %v5657_v5 = vcombine.low %v6333_v2, %v6335_v46 }
 0x5fd   : > { %v6339_v12 = vpop.eup %6338  ;;  %v5336_v61 = vcombine.low %v5231_v40, %v5232_v10  ;;  %v5638_v16 = vcombine.high %v5629_v33, %v5636_v42  ;;  %v5202_v39 = vmul.f32 9.5, %v6337_v30  ;;  %v5241_v9 = vadd.f32 0.5, %v5208_v47 }
 0x5fe   : > { %v6341_v29 = vpop.eup %6340  ;;  %v5144_v6 = vadd.f32 1.0, %v6339_v12  ;;  %v5242_v7 = vadd.f32 0.5, %v5209_v55  ;;  %v5400_v21 = vrot.slane %v5384_v56, %v9974_v36  ;;  %v5685_v0 = vrot.slane %v5657_v5, %v9974_v36 }
 0x5ff   : > { %v5358_v59 = vrot.slane %v5336_v61, %v9974_v36  ;;  %v5652_v28 = vrot.slane %v5638_v16, %v9974_v36  ;;  %v5145_v31 = vadd.f32 1.0, %v6341_v29  ;;  %v5235_v60 = vadd.f32 0.5, %v5202_v39 }
 0x600   : > { %v6343_v27 = vpop.eup %6342  ;;  %6352 = vrcp.f32 %v5144_v6  ;;  %v5386_v20 = vcombine.low %v5241_v9, %v5242_v7 }
 0x601   : > { %v5367_v41 = vcombine.low %v5358_v59, %v5365_v45  ;;  %v5653_v23 = vcombine.low %v5645_v51, %v5652_v28  ;;  %v5203_v25 = vmul.f32 9.5, %v6343_v27  ;;  %v5654_v32 = vcombine.low %v6337_v30, %v6343_v27 }
 0x602   : > { %6354 = vrcp.f32 %v5145_v31  ;;  %v5414_v2 = vrot.slane %v5386_v20, %v9974_v36 }
 0x603   : > { %v5381_v35 = vrot.slane %v5367_v41, %v9974_v36  ;;  %6086 = vst [vmem:[%s10000_s7 + $0x22] ss:$4 sm:$0xff] %v5653_v23  ;;  %v5236_v24 = vadd.f32 0.5, %v5203_v25  ;;  %v5664_v37 = vrot.slane %v5654_v32, %v9974_v36 }
 0x605   : > { %v6345_v17 = vpop.eup %6344  ;;  %v5382_v15 = vcombine.low %v5374_v57, %v5381_v35  ;;  %v5383_v54 = vcombine.low %v5235_v60, %v5236_v24  ;;  %v5686_v38 = vcombine.high %v5664_v37, %v5671_v50 }
 0x606   : > { %v6347_v22 = vpop.eup %6346  ;;  %v5206_v42 = vmul.f32 9.5, %v6345_v17 }
 0x607   : > { %6076 = vst [vmem:[%s10000_s7 + $0x20] ss:$4 sm:$0xff] %v5382_v15  ;;  %6081 = vst [vmem:[%s10000_s7 + $0x21] ss:$4 sm:$0xff] %v5382_v15  ;;  %v5146_v58 = vadd.f32 1.0, %v6347_v22  ;;  %v5393_v8 = vrot.slane %v5383_v54, %v9974_v36  ;;  %v5694_v63 = vrot.slane %v5686_v38, %v9974_v36 }
 0x608   : > { %v6349_v14 = vpop.eup %6348  ;;  %v5239_v3 = vadd.f32 0.5, %v5206_v42 }
 0x609   : > { %v6351_v18 = vpop.eup %6350  ;;  %6356 = vrcp.f32 %v5146_v58  ;;  %v5147_v49 = vadd.f32 1.0, %v6349_v14  ;;  %v5415_v53 = vcombine.low %v5393_v8, %v5400_v21 }
 0x60a   : > { %v5207_v40 = vmul.f32 9.5, %v6351_v18  ;;  %v5656_v1 = vcombine.low %v6345_v17, %v6351_v18 }
 0x60b   : > { %6358 = vrcp.f32 %v5147_v49  ;;  %v5423_v13 = vrot.slane %v5415_v53, %v9974_v36 }
 0x60c   : > { %v5240_v4 = vadd.f32 0.5, %v5207_v40  ;;  %v5678_v44 = vrot.slane %v5656_v1, %v9974_v36 }
 0x60d   : > { %v6353_v52 = vpop.eup %6352 }
 0x60e   : > { %v5385_v48 = vcombine.low %v5239_v3, %v5240_v4  ;;  %v5687_v46 = vcombine.high %v5678_v44, %v5685_v0  ;;  %v5210_v10 = vmul.f32 9.5, %v6353_v52  ;;  %v4933_v33 = vpop.f32.mrf.mxu1 }
 0x60f   : > { %v6355_v43 = vpop.eup %6354  ;;  %v4934_v30 = vadd.f32 %v4933_v33, %v9943_v11 }
 0x610   : > { %v5407_v34 = vrot.slane %v5385_v48, %v9974_v36  ;;  %v5701_v12 = vrot.slane %v5687_v46, %v9974_v36  ;;  %v5243_v51 = vadd.f32 0.5, %v5210_v10  ;;  %v5211_v61 = vmul.f32 9.5, %v6355_v43  ;;  %v4935_v45 = vpop.f32.mrf.mxu1 }
 0x611   : > { %v5703_v16 = vcombine.low %v6353_v52, %v6355_v43  ;;  %v5049_v29 = vsub.f32 0.0, %v4934_v30  ;;  %v4936_v39 = vadd.f32 %v4935_v45, %v9943_v11 }
 0x612   : > { %v5416_v19 = vcombine.low %v5407_v34, %v5414_v2  ;;  %v5702_v6 = vcombine.low %v5694_v63, %v5701_v12  ;;  %v5244_v59 = vadd.f32 0.5, %v5211_v61  ;;  %v4937_v28 = vpop.f32.mrf.mxu1 }
 0x613   : > { %v5110_v62 = vmul.f32 1.442695, %v5049_v29  ;;  %v5050_v31 = vsub.f32 0.0, %v4936_v39  ;;  %v10060_v35 = vrot.slane %v5703_v16, %v9974_v36 }
 0x614   : > { %v5430_v27 = vrot.slane %v5416_v19, %v9974_v36  ;;  %6087 = vst [vmem:[%s10000_s7 + $0x42] ss:$4 sm:$0xff] %v5702_v6  ;;  %v5432_v57 = vcombine.low %v5243_v51, %v5244_v59  ;;  %v4938_v47 = vpop.f32.mrf.mxu1 }
 0x615   : > { %6360 = vpow2.f32 %v5110_v62  ;;  %v5112_v55 = vmul.f32 1.442695, %v5050_v31 }
 0x616   : > { %v6357_v41 = vpop.eup %6356  ;;  %v5431_v23 = vcombine.low %v5423_v13, %v5430_v27  ;;  %v10064_v17 = vrot.slane %v5432_v57, %v9974_v36 }
 0x617   : > { %v5212_v25 = vmul.f32 9.5, %v6357_v41  ;;  %6362 = vpow2.f32 %v5112_v55 }
 0x618   : > { %v6359_v32 = vpop.eup %6358  ;;  %6077 = vst [vmem:[%s10000_s7 + $0x40] ss:$4 sm:$0xff] %v5431_v23  ;;  %6082 = vst [vmem:[%s10000_s7 + $0x41] ss:$4 sm:$0xff] %v5431_v23 }
 0x619   : > { %v5245_v60 = vadd.f32 0.5, %v5212_v25  ;;  %v5213_v24 = vmul.f32 9.5, %v6359_v32  ;;  %v5704_v56 = vcombine.low %v6357_v41, %v6359_v32 }
 0x61b   : > { %v5246_v50 = vadd.f32 0.5, %v5213_v24  ;;  %v5720_v5 = vrot.slane %v5704_v56, %v9974_v36 }
 0x61d   : > { %v5433_v15 = vcombine.low %v5245_v60, %v5246_v50  ;;  %v5735_v37 = vcombine.high %v10060_v35, %v5720_v5 }
 0x61f   : > { %v10068_v9 = vrot.slane %v5433_v15, %v9974_v36  ;;  %v5743_v41 = vrot.slane %v5735_v37, %v9974_v36 }
 0x621   : > { %v5464_v7 = vcombine.low %v10064_v17, %v10068_v9 }
 0x622   : > { %v6361_v22 = vpop.eup %6360 }
 0x623   : > { %v5148_v54 = vadd.f32 1.0, %v6361_v22  ;;  %v5472_v50 = vrot.slane %v5464_v7, %v9974_v36 }
 0x624   : > { %v6363_v42 = vpop.eup %6362 }
 0x625   : > { %6364 = vrcp.f32 %v5148_v54  ;;  %v5149_v58 = vadd.f32 1.0, %v6363_v42 }
 0x627   : > { %6366 = vrcp.f32 %v5149_v58 }
 0x632   : > { %v6365_v14 = vpop.eup %6364 }
 0x633   : > { %v5214_v21 = vmul.f32 9.5, %v6365_v14 }
 0x634   : > { %v6367_v0 = vpop.eup %6366 }
 0x635   : > { %v5247_v18 = vadd.f32 0.5, %v5214_v21  ;;  %v5215_v38 = vmul.f32 9.5, %v6367_v0  ;;  %v5705_v20 = vcombine.low %v6365_v14, %v6367_v0 }
 0x637   : > { %v5248_v49 = vadd.f32 0.5, %v5215_v38 }
 0x639   : > { %v5434_v8 = vcombine.low %v5247_v18, %v5248_v49 }
 0x63b   : > { %v5456_v57 = vrot.slane %v5434_v8, %v9974_v36 }
 0x652   : > { %v4974_v3 = vpop.f32.mrf.mxu0 }
 0x653   : > { %v4975_v40 = vadd.f32 %v4974_v3, %v9943_v11 }
 0x654   : > { %v4976_v1 = vpop.f32.mrf.mxu0 }
 0x655   : > { %v5051_v4 = vsub.f32 0.0, %v4975_v40  ;;  %v4977_v44 = vadd.f32 %v4976_v1, %v9943_v11 }
 0x656   : > { %v4978_v52 = vpop.f32.mrf.mxu0 }
 0x657   : > { %v5114_v63 = vmul.f32 1.442695, %v5051_v4  ;;  %v5052_v2 = vsub.f32 0.0, %v4977_v44 }
 0x658   : > { %v4979_v53 = vpop.f32.mrf.mxu0 }
 0x659   : > { %6368 = vpow2.f32 %v5114_v63  ;;  %v5116_v48 = vmul.f32 1.442695, %v5052_v2 }
 0x65b   : > { %6370 = vpow2.f32 %v5116_v48 }
 0x65c   : > { %v5015_v46 = vpop.f32.mrf.mxu1 }
 0x65d   : > { %v5016_v10 = vadd.f32 %v5015_v46, %v9943_v11  ;;  %v5727_v11 = vrot.slane %v5705_v20, %v9974_v36 }
 0x65e   : > { %v6098_v33 = vpop.f32.mrf.mxu1 }
 0x65f   : > { %v5053_v43 = vsub.f32 0.0, %v5016_v10 }
 0x660   : > { %v5018_v30 = vpop.f32.mrf.mxu1 }
 0x661   : > { %v5118_v34 = vmul.f32 1.442695, %v5053_v43 }
 0x662   : > { %v6099_v12 = vpop.f32.mrf.mxu1 }
 0x663   : > { %6372 = vpow2.f32 %v5118_v34 }
 0x666   : > { %v6369_v51 = vpop.eup %6368 }
 0x667   : > { %v5150_v61 = vadd.f32 1.0, %v6369_v51 }
 0x668   : > { %v6371_v45 = vpop.eup %6370 }
 0x669   : > { %6374 = vrcp.f32 %v5150_v61  ;;  %v5151_v16 = vadd.f32 1.0, %v6371_v45 }
 0x66b   : > { %6376 = vrcp.f32 %v5151_v16 }
 0x670   : > { %v6373_v29 = vpop.eup %6372 }
 0x671   : > { %v5152_v39 = vadd.f32 1.0, %v6373_v29 }
 0x673   : > { %6378 = vrcp.f32 %v5152_v39 }
 0x676   : > { %v6375_v13 = vpop.eup %6374 }
 0x677   : > { %v5216_v19 = vmul.f32 9.5, %v6375_v13 }
 0x678   : > { %v6377_v6 = vpop.eup %6376 }
 0x679   : > { %v5249_v59 = vadd.f32 0.5, %v5216_v19  ;;  %v5217_v28 = vmul.f32 9.5, %v6377_v6  ;;  %v5706_v62 = vcombine.low %v6375_v13, %v6377_v6 }
 0x67b   : > { %v5250_v31 = vadd.f32 0.5, %v5217_v28  ;;  %v5734_v27 = vrot.slane %v5706_v62, %v9974_v36 }
 0x67d   : > { %v5435_v47 = vcombine.low %v5249_v59, %v5250_v31  ;;  %v5736_v55 = vcombine.high %v5727_v11, %v5734_v27 }
 0x67f   : > { %v5463_v23 = vrot.slane %v5435_v47, %v9974_v36  ;;  %v5750_v25 = vrot.slane %v5736_v55, %v9974_v36 }
 0x680   : > { %v6379_v32 = vpop.eup %6378 }
 0x681   : > { %v5465_v60 = vcombine.low %v5456_v57, %v5463_v23  ;;  %v5751_v35 = vcombine.low %v5743_v41, %v5750_v25  ;;  %v5218_v24 = vmul.f32 9.5, %v6379_v32  ;;  %v5758_v56 = vrot.slane %v6379_v32, %v9974_v36 }
 0x683   : > { %v5479_v5 = vrot.slane %v5465_v60, %v9974_v36  ;;  %6088 = vst [vmem:[%s10000_s7 + $0x62] ss:$4 sm:$0xff] %v5751_v35  ;;  %v5251_v15 = vadd.f32 0.5, %v5218_v24  ;;  %v5759_v37 = vcombine.high %v5758_v56, %v5758_v56 }
 0x685   : > { %v5480_v22 = vcombine.low %v5472_v50, %v5479_v5  ;;  %v5487_v54 = vrot.slane %v5251_v15, %v9974_v36  ;;  %v5766_v42 = vrot.slane %v5759_v37, %v9974_v36 }
 0x687   : > { %6078 = vst [vmem:[%s10000_s7 + $0x60] ss:$4 sm:$0xff] %v5480_v22  ;;  %6083 = vst [vmem:[%s10000_s7 + $0x61] ss:$4 sm:$0xff] %v5480_v22  ;;  %v5494_v58 = vrot.slane %v5487_v54, %v9974_v36 }
 0x688   : > { %6089 = vst.msk [vmem:[%s10000_s7 + $0x82] ss:$4 sm:$0x1] %vm5509_vm12, %v5766_v42 }
 0x689   : > { %6079 = vst.msk [vmem:[%s10000_s7 + $0x80] ss:$4 sm:$0x1] %vm5509_vm12, %v5494_v58  ;;  %6084 = vst.msk [vmem:[%s10000_s7 + $0x81] ss:$4 sm:$0x1] %vm5509_vm12, %v5494_v58 }
 0x68a PF: > { %s16_s23 = sadd.s32 1, %s6402_s23   ;;  %s10436_s21 = smov %s6398_s22 }
 0x68b   : > { %p13_p5 = scmp.ge.s32.totalorder %s16_s23, 4   ;;  %s10437_s22 = smov %s10439_s24 }
 0x68d   :  { %15 = sbr.rel (!%p13_p5) target bundleno = 2 (0x2), region = 91 }

</bundles_post_ra>
